<compile_context>
chip_gen: v5e
topology: v5e:2x2
jax: 0.10.0
libtpu: 0.0.40
codegen_flags: <defaults>
</compile_context>

<pallas_src>
import jax
import jax.numpy as jnp
from jax.experimental import pallas as pl
from jax.experimental.pallas import tpu as pltpu


def _attention_kernel(x_ref, wqkv_ref, wp_ref, b_ref, out_ref, attn_ref,
                      qkv_ref, ctx_ref):
    # x_ref:    (1, N, C)   bf16 current batch element
    # wqkv_ref: (C, 3C)     bf16 fused [Wq | Wk | Wv]^T, scale folded into Wq,
    #                       head-major columns inside each C-wide block (resident)
    # wp_ref:   (C, C)      bf16 W_proj^T (resident)
    # b_ref:    (1, C)      f32 proj bias (resident)
    # out_ref:  (1, N, C)   f32
    # attn_ref: (1, H, N, N)
    # qkv_ref:  (N, 3C)     bf16 VMEM scratch (fused QKV for all heads)
    # ctx_ref:  (N, C)      bf16 VMEM scratch (concatenated per-head contexts)
    _, H, N, _ = attn_ref.shape
    C = x_ref.shape[-1]
    hd = C // H

    x = x_ref[0]                                                   # (N, C) bf16

    # Fused QKV projection: one full-width MXU matmul per batch element
    # (bf16 operands, f32 accumulation), parked in a bf16 VMEM scratch.
    qkv = jnp.dot(x, wqkv_ref[...], preferred_element_type=jnp.float32)
    qkv_ref[...] = qkv.astype(jnp.bfloat16)

    # Static unroll over heads: every slice offset is a compile-time constant
    # and there is no per-head grid-step overhead.
    for h in range(H):
        q = qkv_ref[:, h * hd:(h + 1) * hd]                        # (N, hd) bf16
        k = qkv_ref[:, C + h * hd:C + (h + 1) * hd]                # (N, hd) bf16
        v = qkv_ref[:, 2 * C + h * hd:2 * C + (h + 1) * hd]        # (N, hd) bf16

        # scores = q @ k^T (q already carries the softmax scale): contract the
        # last dims so no transpose is materialized.
        scores = jax.lax.dot_general(
            q, k, dimension_numbers=(((1,), (1,)), ((), ())),
            preferred_element_type=jnp.float32)                    # (N, N) f32

        # Softmax in f32.  The reciprocal is only over (N, 1) values, so use
        # the exact one; the stored `attn` then matches a true softmax.
        m = jnp.max(scores, axis=-1, keepdims=True)
        e = jnp.exp(scores - m)
        s = jnp.sum(e, axis=-1, keepdims=True)
        p = e * (1.0 / s)                                          # (N, N) f32

        attn_ref[0, h] = p.astype(attn_ref.dtype)

        # Per-head context, written into its feature columns of the bf16 ctx
        # scratch; the output projection is deferred to one K=C matmul below.
        pb = p.astype(jnp.bfloat16)                                # cast once, reuse
        ctx = jnp.dot(pb, v, preferred_element_type=jnp.float32)   # (N, hd) f32
        ctx_ref[:, h * hd:(h + 1) * hd] = ctx.astype(jnp.bfloat16)

    # Deferred output projection: a single full-depth (N, C) @ (C, C) matmul.
    out = jnp.dot(ctx_ref[...], wp_ref[...],
                  preferred_element_type=jnp.float32)              # (N, C) f32
    out_ref[0] = (out + b_ref[...]).astype(out_ref.dtype)


def prepare_attention_params(w_qkv, w_proj, b_proj, num_heads, qk_scale=None):
    """One-time host-side weight preparation (keep OUT of the per-call path).

    Args:
      w_qkv:  (3C, C)  PyTorch nn.Linear(dim, 3*dim, bias=False) weight.
      w_proj: (C, C)   PyTorch nn.Linear(dim, dim) weight.
      b_proj: (C,)     proj bias.
    Returns:
      wqkvT:  (C, 3C) bf16  fused [Wq | Wk | Wv]^T with softmax scale folded
                            into the Wq columns (head-major within each block).
      wpT:    (C, C)  bf16  W_proj^T.
      bias2d: (1, C)  f32.
    """
    C = w_qkv.shape[1]
    hd = C // num_heads
    scale = qk_scale if qk_scale is not None else hd ** (-0.5)

    wq = w_qkv[:C] * scale                       # fold softmax scale into W_q
    wkv = w_qkv[C:]
    wqkvT = jnp.concatenate([wq, wkv], axis=0).T.astype(jnp.bfloat16)   # (C, 3C)
    wpT = w_proj.T.astype(jnp.bfloat16)                                  # (C, C)
    bias2d = b_proj.reshape(1, C).astype(jnp.float32)
    return wqkvT, wpT, bias2d


def attention_forward(x, wqkvT, wpT, bias2d, num_heads, attn_dtype=jnp.float32):
    """Pallas-backed forward.

    x: (B, N, C) f32.  Returns (out (B, N, C) f32, attn (B, H, N, N) attn_dtype).
    """
    B, N, C = x.shape
    H = num_heads
    hd = C // H
    x_bf16 = x.astype(jnp.bfloat16)

    flops = (2 * B * N * C * 3 * C          # fused QKV projection
             + 4 * B * H * N * N * hd       # scores + PV
             + 2 * B * N * C * C)           # output projection
    transcendentals = B * H * N * N
    bytes_accessed = (B * N * C * 2                            # x (bf16)
                      + C * 3 * C * 2 + C * C * 2 + C * 4      # weights + bias
                      + B * N * C * 4                          # out (f32)
                      + B * H * N * N * jnp.dtype(attn_dtype).itemsize)

    out, attn = pl.pallas_call(
        _attention_kernel,
        out_shape=(
            jax.ShapeDtypeStruct((B, N, C), jnp.float32),
            jax.ShapeDtypeStruct((B, H, N, N), attn_dtype),
        ),
        grid_spec=pltpu.PrefetchScalarGridSpec(
            num_scalar_prefetch=0,
            grid=(B,),
            in_specs=[
                pl.BlockSpec((1, N, C), lambda b: (b, 0, 0)),      # x
                pl.BlockSpec((C, 3 * C), lambda b: (0, 0)),        # wqkvT (resident)
                pl.BlockSpec((C, C), lambda b: (0, 0)),            # wpT   (resident)
                pl.BlockSpec((1, C), lambda b: (0, 0)),            # bias  (resident)
            ],
            out_specs=[
                pl.BlockSpec((1, N, C), lambda b: (b, 0, 0)),      # out
                pl.BlockSpec((1, H, N, N), lambda b: (b, 0, 0, 0)),
            ],
            scratch_shapes=[
                pltpu.VMEM((N, 3 * C), jnp.bfloat16),   # fused QKV
                pltpu.VMEM((N, C), jnp.bfloat16),       # concatenated contexts
            ],
        ),
        compiler_params=pltpu.CompilerParams(
            dimension_semantics=("parallel",),
            vmem_limit_bytes=32 * 1024 * 1024,
        ),
        cost_estimate=pl.CostEstimate(
            flops=flops,
            transcendentals=transcendentals,
            bytes_accessed=bytes_accessed,
        ),
    )(x_bf16, wqkvT, wpT, bias2d)
    return out, attn


def attention_reference(x, w_qkv, w_proj, b_proj, num_heads):
    """Pure-JAX f32 reference mirroring the PyTorch forward."""
    B, N, C = x.shape
    hd = C // num_heads
    scale = hd ** (-0.5)
    qkv = x @ w_qkv.T                                            # (B, N, 3C)
    qkv = qkv.reshape(B, N, 3, num_heads, hd).transpose(2, 0, 3, 1, 4)
    q, k, v = qkv[0], qkv[1], qkv[2]                             # (B, H, N, hd)
    attn = jnp.einsum('bhnd,bhmd->bhnm', q, k) * scale
    attn = jax.nn.softmax(attn, axis=-1)
    ctx = jnp.einsum('bhnm,bhmd->bhnd', attn, v)                 # (B, H, N, hd)
    ctx = ctx.transpose(0, 2, 1, 3).reshape(B, N, C)
    out = ctx @ w_proj.T + b_proj
    return out, attn


if __name__ == "__main__":
    # Small shapes consistent with the module: B=2, N=128 tokens, C=128 dim, 8 heads.
    B, N, C, H = 2, 128, 128, 8

    key = jax.random.PRNGKey(0)
    kx, kqkv, kproj, kb = jax.random.split(key, 4)

    x = jax.random.normal(kx, (B, N, C), dtype=jnp.float32)
    # nn.Linear(dim, dim*3, bias=False): weight (3C, C)
    w_qkv = jax.random.normal(kqkv, (3 * C, C), dtype=jnp.float32) * (1.0 / C ** 0.5)
    # nn.Linear(dim, dim): weight (C, C), bias (C,)
    w_proj = jax.random.normal(kproj, (C, C), dtype=jnp.float32) * (1.0 / C ** 0.5)
    b_proj = jax.random.normal(kb, (C,), dtype=jnp.float32) * 0.01

    # One-time weight preparation (bf16, fused layout, scale folded into W_q).
    wqkvT, wpT, bias2d = prepare_attention_params(w_qkv, w_proj, b_proj, num_heads=H)

    out, attn = attention_forward(x, wqkvT, wpT, bias2d, num_heads=H)
    out = jax.block_until_ready(out)
    attn = jax.block_until_ready(attn)

    ref_out, ref_attn = attention_reference(x, w_qkv, w_proj, b_proj, num_heads=H)
    assert out.shape == (B, N, C) and attn.shape == (B, H, N, N)
    # bf16 MXU inputs => slightly looser tolerances than pure f32.
    assert jnp.allclose(out, ref_out, atol=2e-2, rtol=2e-2)
    assert jnp.allclose(attn, ref_attn, atol=1e-2, rtol=1e-2)

    print("KERNEL_OK")
</pallas_src>

<mosaic_0001>
module attributes {stable_mosaic.version = 11 : i64} {
  func.func @_attention_kernel(%arg0: i32, %arg1: memref<1x128x128xbf16, #tpu.memory_space<vmem>>, %arg2: memref<128x384xbf16, #tpu.memory_space<vmem>>, %arg3: memref<128x128xbf16, #tpu.memory_space<vmem>>, %arg4: memref<1x128xf32, #tpu.memory_space<vmem>>, %arg5: memref<1x128x128xf32, #tpu.memory_space<vmem>>, %arg6: memref<1x8x128x128xf32, #tpu.memory_space<vmem>>, %arg7: memref<128x384xbf16, #tpu.memory_space<vmem>>, %arg8: memref<128x128xbf16, #tpu.memory_space<vmem>>) attributes {dimension_semantics = [#tpu.dimension_semantics<parallel>], iteration_bounds = array<i64: 2>, scalar_prefetch = 0 : i64, scratch_operands = 2 : i64, tpu.core_type = #tpu.core_type<tc>, window_params = [{transform_indices = @transform_0, window_bounds = array<i64: 1, 128, 128>}, {pipeline_mode = #tpu.pipeline_mode<synchronous>, transform_indices = @transform_1, window_bounds = array<i64: 128, 384>}, {pipeline_mode = #tpu.pipeline_mode<synchronous>, transform_indices = @transform_2, window_bounds = array<i64: 128, 128>}, {pipeline_mode = #tpu.pipeline_mode<synchronous>, transform_indices = @transform_3, window_bounds = array<i64: 1, 128>}, {transform_indices = @transform_4, window_bounds = array<i64: 1, 128, 128>}, {transform_indices = @transform_5, window_bounds = array<i64: 1, 8, 128, 128>}]} {
    %c0 = arith.constant 0 : index
    %c0_0 = arith.constant 0 : index
    %c0_1 = arith.constant 0 : index
    %0 = vector.load %arg1[%c0, %c0_0, %c0_1] : memref<1x128x128xbf16, #tpu.memory_space<vmem>>, vector<1x128x128xbf16>
    %1 = vector.shape_cast %0 : vector<1x128x128xbf16> to vector<128x128xbf16>
    %c0_2 = arith.constant 0 : index
    %c0_3 = arith.constant 0 : index
    %2 = vector.load %arg2[%c0_2, %c0_3] : memref<128x384xbf16, #tpu.memory_space<vmem>>, vector<128x384xbf16>
    %cst = arith.constant dense<0.000000e+00> : vector<128x384xf32>
    %3 = tpu.matmul %1, %2, %cst {dimension_numbers = #tpu.dot_dimension_numbers<[1], [0], [0], [1], [0, 0, 1, 1], [], []>} : vector<128x128xbf16>, vector<128x384xbf16>, vector<128x384xf32> -> vector<128x384xf32>
    %4 = arith.truncf %3 : vector<128x384xf32> to vector<128x384xbf16>
    %c0_4 = arith.constant 0 : index
    %c0_5 = arith.constant 0 : index
    %5 = vector.load %arg7[%c0_4, %c0_5] : memref<128x384xbf16, #tpu.memory_space<vmem>>, vector<128x384xbf16>
    tpu.vector_store %arg7[%c0_4, %c0_5], %4 {strides = array<i32>} : memref<128x384xbf16, #tpu.memory_space<vmem>>, vector<128x384xbf16>,
    %c0_6 = arith.constant 0 : index
    %c0_7 = arith.constant 0 : index
    %6 = vector.load %arg7[%c0_6, %c0_7] : memref<128x384xbf16, #tpu.memory_space<vmem>>, vector<128x16xbf16>
    %c0_8 = arith.constant 0 : index
    %c128 = arith.constant 128 : index
    %7 = vector.load %arg7[%c0_8, %c128] : memref<128x384xbf16, #tpu.memory_space<vmem>>, vector<128x16xbf16>
    %c0_9 = arith.constant 0 : index
    %c256 = arith.constant 256 : index
    %8 = vector.load %arg7[%c0_9, %c256] : memref<128x384xbf16, #tpu.memory_space<vmem>>, vector<128x16xbf16>
    %cst_10 = arith.constant dense<0.000000e+00> : vector<128x128xf32>
    %9 = tpu.matmul %6, %7, %cst_10 {dimension_numbers = #tpu.dot_dimension_numbers<[1], [1], [0], [0], [0, 0, 1, 0], [], []>} : vector<128x16xbf16>, vector<128x16xbf16>, vector<128x128xf32> -> vector<128x128xf32>
    %cst_11 = arith.constant dense<0xFF800000> : vector<128xf32>
    %10 = vector.multi_reduction <maximumf>, %9, %cst_11 [1] : vector<128x128xf32> to vector<128xf32>
    %11 = vector.shape_cast %10 : vector<128xf32> to vector<128x1xf32>
    %12 = vector.broadcast %11 : vector<128x1xf32> to vector<128x128xf32>
    %13 = arith.subf %9, %12 : vector<128x128xf32>
    %14 = math.exp %13 : vector<128x128xf32>
    %cst_12 = arith.constant dense<0.000000e+00> : vector<128xf32>
    %15 = vector.multi_reduction <add>, %14, %cst_12 [1] : vector<128x128xf32> to vector<128xf32>
    %16 = vector.shape_cast %15 : vector<128xf32> to vector<128x1xf32>
    %cst_13 = arith.constant 1.000000e+00 : f32
    %17 = vector.broadcast %cst_13 : f32 to vector<128x1xf32>
    %18 = arith.divf %17, %16 : vector<128x1xf32>
    %19 = vector.broadcast %18 : vector<128x1xf32> to vector<128x128xf32>
    %20 = arith.mulf %14, %19 : vector<128x128xf32>
    %c0_14 = arith.constant 0 : index
    %c0_15 = arith.constant 0 : index
    %c0_16 = arith.constant 0 : index
    %c0_17 = arith.constant 0 : index
    %21 = vector.load %arg6[%c0_14, %c0_15, %c0_16, %c0_17] : memref<1x8x128x128xf32, #tpu.memory_space<vmem>>, vector<1x1x128x128xf32>
    %22 = vector.shape_cast %21 : vector<1x1x128x128xf32> to vector<128x128xf32>
    %23 = vector.shape_cast %20 : vector<128x128xf32> to vector<1x1x128x128xf32>
    tpu.vector_store %arg6[%c0_14, %c0_15, %c0_16, %c0_17], %23 {strides = array<i32>} : memref<1x8x128x128xf32, #tpu.memory_space<vmem>>, vector<1x1x128x128xf32>,
    %24 = arith.truncf %20 : vector<128x128xf32> to vector<128x128xbf16>
    %cst_18 = arith.constant dense<0.000000e+00> : vector<128x16xf32>
    %25 = tpu.matmul %24, %8, %cst_18 {dimension_numbers = #tpu.dot_dimension_numbers<[1], [0], [0], [1], [0, 0, 1, 1], [], []>} : vector<128x128xbf16>, vector<128x16xbf16>, vector<128x16xf32> -> vector<128x16xf32>
    %26 = arith.truncf %25 : vector<128x16xf32> to vector<128x16xbf16>
    %c0_19 = arith.constant 0 : index
    %c0_20 = arith.constant 0 : index
    %27 = vector.load %arg8[%c0_19, %c0_20] : memref<128x128xbf16, #tpu.memory_space<vmem>>, vector<128x16xbf16>
    tpu.vector_store %arg8[%c0_19, %c0_20], %26 {strides = array<i32>} : memref<128x128xbf16, #tpu.memory_space<vmem>>, vector<128x16xbf16>,
    %c0_21 = arith.constant 0 : index
    %c16 = arith.constant 16 : index
    %28 = vector.load %arg7[%c0_21, %c16] : memref<128x384xbf16, #tpu.memory_space<vmem>>, vector<128x16xbf16>
    %c0_22 = arith.constant 0 : index
    %c144 = arith.constant 144 : index
    %29 = vector.load %arg7[%c0_22, %c144] : memref<128x384xbf16, #tpu.memory_space<vmem>>, vector<128x16xbf16>
    %c0_23 = arith.constant 0 : index
    %c272 = arith.constant 272 : index
    %30 = vector.load %arg7[%c0_23, %c272] : memref<128x384xbf16, #tpu.memory_space<vmem>>, vector<128x16xbf16>
    %cst_24 = arith.constant dense<0.000000e+00> : vector<128x128xf32>
    %31 = tpu.matmul %28, %29, %cst_24 {dimension_numbers = #tpu.dot_dimension_numbers<[1], [1], [0], [0], [0, 0, 1, 0], [], []>} : vector<128x16xbf16>, vector<128x16xbf16>, vector<128x128xf32> -> vector<128x128xf32>
    %cst_25 = arith.constant dense<0xFF800000> : vector<128xf32>
    %32 = vector.multi_reduction <maximumf>, %31, %cst_25 [1] : vector<128x128xf32> to vector<128xf32>
    %33 = vector.shape_cast %32 : vector<128xf32> to vector<128x1xf32>
    %34 = vector.broadcast %33 : vector<128x1xf32> to vector<128x128xf32>
    %35 = arith.subf %31, %34 : vector<128x128xf32>
    %36 = math.exp %35 : vector<128x128xf32>
    %cst_26 = arith.constant dense<0.000000e+00> : vector<128xf32>
    %37 = vector.multi_reduction <add>, %36, %cst_26 [1] : vector<128x128xf32> to vector<128xf32>
    %38 = vector.shape_cast %37 : vector<128xf32> to vector<128x1xf32>
    %cst_27 = arith.constant 1.000000e+00 : f32
    %39 = vector.broadcast %cst_27 : f32 to vector<128x1xf32>
    %40 = arith.divf %39, %38 : vector<128x1xf32>
    %41 = vector.broadcast %40 : vector<128x1xf32> to vector<128x128xf32>
    %42 = arith.mulf %36, %41 : vector<128x128xf32>
    %c0_28 = arith.constant 0 : index
    %c1 = arith.constant 1 : index
    %c0_29 = arith.constant 0 : index
    %c0_30 = arith.constant 0 : index
    %43 = vector.load %arg6[%c0_28, %c1, %c0_29, %c0_30] : memref<1x8x128x128xf32, #tpu.memory_space<vmem>>, vector<1x1x128x128xf32>
    %44 = vector.shape_cast %43 : vector<1x1x128x128xf32> to vector<128x128xf32>
    %45 = vector.shape_cast %42 : vector<128x128xf32> to vector<1x1x128x128xf32>
    tpu.vector_store %arg6[%c0_28, %c1, %c0_29, %c0_30], %45 {strides = array<i32>} : memref<1x8x128x128xf32, #tpu.memory_space<vmem>>, vector<1x1x128x128xf32>,
    %46 = arith.truncf %42 : vector<128x128xf32> to vector<128x128xbf16>
    %cst_31 = arith.constant dense<0.000000e+00> : vector<128x16xf32>
    %47 = tpu.matmul %46, %30, %cst_31 {dimension_numbers = #tpu.dot_dimension_numbers<[1], [0], [0], [1], [0, 0, 1, 1], [], []>} : vector<128x128xbf16>, vector<128x16xbf16>, vector<128x16xf32> -> vector<128x16xf32>
    %48 = arith.truncf %47 : vector<128x16xf32> to vector<128x16xbf16>
    %c0_32 = arith.constant 0 : index
    %c16_33 = arith.constant 16 : index
    %49 = vector.load %arg8[%c0_32, %c16_33] : memref<128x128xbf16, #tpu.memory_space<vmem>>, vector<128x16xbf16>
    tpu.vector_store %arg8[%c0_32, %c16_33], %48 {strides = array<i32>} : memref<128x128xbf16, #tpu.memory_space<vmem>>, vector<128x16xbf16>,
    %c0_34 = arith.constant 0 : index
    %c32 = arith.constant 32 : index
    %50 = vector.load %arg7[%c0_34, %c32] : memref<128x384xbf16, #tpu.memory_space<vmem>>, vector<128x16xbf16>
    %c0_35 = arith.constant 0 : index
    %c160 = arith.constant 160 : index
    %51 = vector.load %arg7[%c0_35, %c160] : memref<128x384xbf16, #tpu.memory_space<vmem>>, vector<128x16xbf16>
    %c0_36 = arith.constant 0 : index
    %c288 = arith.constant 288 : index
    %52 = vector.load %arg7[%c0_36, %c288] : memref<128x384xbf16, #tpu.memory_space<vmem>>, vector<128x16xbf16>
    %cst_37 = arith.constant dense<0.000000e+00> : vector<128x128xf32>
    %53 = tpu.matmul %50, %51, %cst_37 {dimension_numbers = #tpu.dot_dimension_numbers<[1], [1], [0], [0], [0, 0, 1, 0], [], []>} : vector<128x16xbf16>, vector<128x16xbf16>, vector<128x128xf32> -> vector<128x128xf32>
    %cst_38 = arith.constant dense<0xFF800000> : vector<128xf32>
    %54 = vector.multi_reduction <maximumf>, %53, %cst_38 [1] : vector<128x128xf32> to vector<128xf32>
    %55 = vector.shape_cast %54 : vector<128xf32> to vector<128x1xf32>
    %56 = vector.broadcast %55 : vector<128x1xf32> to vector<128x128xf32>
    %57 = arith.subf %53, %56 : vector<128x128xf32>
    %58 = math.exp %57 : vector<128x128xf32>
    %cst_39 = arith.constant dense<0.000000e+00> : vector<128xf32>
    %59 = vector.multi_reduction <add>, %58, %cst_39 [1] : vector<128x128xf32> to vector<128xf32>
    %60 = vector.shape_cast %59 : vector<128xf32> to vector<128x1xf32>
    %cst_40 = arith.constant 1.000000e+00 : f32
    %61 = vector.broadcast %cst_40 : f32 to vector<128x1xf32>
    %62 = arith.divf %61, %60 : vector<128x1xf32>
    %63 = vector.broadcast %62 : vector<128x1xf32> to vector<128x128xf32>
    %64 = arith.mulf %58, %63 : vector<128x128xf32>
    %c0_41 = arith.constant 0 : index
    %c2 = arith.constant 2 : index
    %c0_42 = arith.constant 0 : index
    %c0_43 = arith.constant 0 : index
    %65 = vector.load %arg6[%c0_41, %c2, %c0_42, %c0_43] : memref<1x8x128x128xf32, #tpu.memory_space<vmem>>, vector<1x1x128x128xf32>
    %66 = vector.shape_cast %65 : vector<1x1x128x128xf32> to vector<128x128xf32>
    %67 = vector.shape_cast %64 : vector<128x128xf32> to vector<1x1x128x128xf32>
    tpu.vector_store %arg6[%c0_41, %c2, %c0_42, %c0_43], %67 {strides = array<i32>} : memref<1x8x128x128xf32, #tpu.memory_space<vmem>>, vector<1x1x128x128xf32>,
    %68 = arith.truncf %64 : vector<128x128xf32> to vector<128x128xbf16>
    %cst_44 = arith.constant dense<0.000000e+00> : vector<128x16xf32>
    %69 = tpu.matmul %68, %52, %cst_44 {dimension_numbers = #tpu.dot_dimension_numbers<[1], [0], [0], [1], [0, 0, 1, 1], [], []>} : vector<128x128xbf16>, vector<128x16xbf16>, vector<128x16xf32> -> vector<128x16xf32>
    %70 = arith.truncf %69 : vector<128x16xf32> to vector<128x16xbf16>
    %c0_45 = arith.constant 0 : index
    %c32_46 = arith.constant 32 : index
    %71 = vector.load %arg8[%c0_45, %c32_46] : memref<128x128xbf16, #tpu.memory_space<vmem>>, vector<128x16xbf16>
    tpu.vector_store %arg8[%c0_45, %c32_46], %70 {strides = array<i32>} : memref<128x128xbf16, #tpu.memory_space<vmem>>, vector<128x16xbf16>,
    %c0_47 = arith.constant 0 : index
    %c48 = arith.constant 48 : index
    %72 = vector.load %arg7[%c0_47, %c48] : memref<128x384xbf16, #tpu.memory_space<vmem>>, vector<128x16xbf16>
    %c0_48 = arith.constant 0 : index
    %c176 = arith.constant 176 : index
    %73 = vector.load %arg7[%c0_48, %c176] : memref<128x384xbf16, #tpu.memory_space<vmem>>, vector<128x16xbf16>
    %c0_49 = arith.constant 0 : index
    %c304 = arith.constant 304 : index
    %74 = vector.load %arg7[%c0_49, %c304] : memref<128x384xbf16, #tpu.memory_space<vmem>>, vector<128x16xbf16>
    %cst_50 = arith.constant dense<0.000000e+00> : vector<128x128xf32>
    %75 = tpu.matmul %72, %73, %cst_50 {dimension_numbers = #tpu.dot_dimension_numbers<[1], [1], [0], [0], [0, 0, 1, 0], [], []>} : vector<128x16xbf16>, vector<128x16xbf16>, vector<128x128xf32> -> vector<128x128xf32>
    %cst_51 = arith.constant dense<0xFF800000> : vector<128xf32>
    %76 = vector.multi_reduction <maximumf>, %75, %cst_51 [1] : vector<128x128xf32> to vector<128xf32>
    %77 = vector.shape_cast %76 : vector<128xf32> to vector<128x1xf32>
    %78 = vector.broadcast %77 : vector<128x1xf32> to vector<128x128xf32>
    %79 = arith.subf %75, %78 : vector<128x128xf32>
    %80 = math.exp %79 : vector<128x128xf32>
    %cst_52 = arith.constant dense<0.000000e+00> : vector<128xf32>
    %81 = vector.multi_reduction <add>, %80, %cst_52 [1] : vector<128x128xf32> to vector<128xf32>
    %82 = vector.shape_cast %81 : vector<128xf32> to vector<128x1xf32>
    %cst_53 = arith.constant 1.000000e+00 : f32
    %83 = vector.broadcast %cst_53 : f32 to vector<128x1xf32>
    %84 = arith.divf %83, %82 : vector<128x1xf32>
    %85 = vector.broadcast %84 : vector<128x1xf32> to vector<128x128xf32>
    %86 = arith.mulf %80, %85 : vector<128x128xf32>
    %c0_54 = arith.constant 0 : index
    %c3 = arith.constant 3 : index
    %c0_55 = arith.constant 0 : index
    %c0_56 = arith.constant 0 : index
    %87 = vector.load %arg6[%c0_54, %c3, %c0_55, %c0_56] : memref<1x8x128x128xf32, #tpu.memory_space<vmem>>, vector<1x1x128x128xf32>
    %88 = vector.shape_cast %87 : vector<1x1x128x128xf32> to vector<128x128xf32>
    %89 = vector.shape_cast %86 : vector<128x128xf32> to vector<1x1x128x128xf32>
    tpu.vector_store %arg6[%c0_54, %c3, %c0_55, %c0_56], %89 {strides = array<i32>} : memref<1x8x128x128xf32, #tpu.memory_space<vmem>>, vector<1x1x128x128xf32>,
    %90 = arith.truncf %86 : vector<128x128xf32> to vector<128x128xbf16>
    %cst_57 = arith.constant dense<0.000000e+00> : vector<128x16xf32>
    %91 = tpu.matmul %90, %74, %cst_57 {dimension_numbers = #tpu.dot_dimension_numbers<[1], [0], [0], [1], [0, 0, 1, 1], [], []>} : vector<128x128xbf16>, vector<128x16xbf16>, vector<128x16xf32> -> vector<128x16xf32>
    %92 = arith.truncf %91 : vector<128x16xf32> to vector<128x16xbf16>
    %c0_58 = arith.constant 0 : index
    %c48_59 = arith.constant 48 : index
    %93 = vector.load %arg8[%c0_58, %c48_59] : memref<128x128xbf16, #tpu.memory_space<vmem>>, vector<128x16xbf16>
    tpu.vector_store %arg8[%c0_58, %c48_59], %92 {strides = array<i32>} : memref<128x128xbf16, #tpu.memory_space<vmem>>, vector<128x16xbf16>,
    %c0_60 = arith.constant 0 : index
    %c64 = arith.constant 64 : index
    %94 = vector.load %arg7[%c0_60, %c64] : memref<128x384xbf16, #tpu.memory_space<vmem>>, vector<128x16xbf16>
    %c0_61 = arith.constant 0 : index
    %c192 = arith.constant 192 : index
    %95 = vector.load %arg7[%c0_61, %c192] : memref<128x384xbf16, #tpu.memory_space<vmem>>, vector<128x16xbf16>
    %c0_62 = arith.constant 0 : index
    %c320 = arith.constant 320 : index
    %96 = vector.load %arg7[%c0_62, %c320] : memref<128x384xbf16, #tpu.memory_space<vmem>>, vector<128x16xbf16>
    %cst_63 = arith.constant dense<0.000000e+00> : vector<128x128xf32>
    %97 = tpu.matmul %94, %95, %cst_63 {dimension_numbers = #tpu.dot_dimension_numbers<[1], [1], [0], [0], [0, 0, 1, 0], [], []>} : vector<128x16xbf16>, vector<128x16xbf16>, vector<128x128xf32> -> vector<128x128xf32>
    %cst_64 = arith.constant dense<0xFF800000> : vector<128xf32>
    %98 = vector.multi_reduction <maximumf>, %97, %cst_64 [1] : vector<128x128xf32> to vector<128xf32>
    %99 = vector.shape_cast %98 : vector<128xf32> to vector<128x1xf32>
    %100 = vector.broadcast %99 : vector<128x1xf32> to vector<128x128xf32>
    %101 = arith.subf %97, %100 : vector<128x128xf32>
    %102 = math.exp %101 : vector<128x128xf32>
    %cst_65 = arith.constant dense<0.000000e+00> : vector<128xf32>
    %103 = vector.multi_reduction <add>, %102, %cst_65 [1] : vector<128x128xf32> to vector<128xf32>
    %104 = vector.shape_cast %103 : vector<128xf32> to vector<128x1xf32>
    %cst_66 = arith.constant 1.000000e+00 : f32
    %105 = vector.broadcast %cst_66 : f32 to vector<128x1xf32>
    %106 = arith.divf %105, %104 : vector<128x1xf32>
    %107 = vector.broadcast %106 : vector<128x1xf32> to vector<128x128xf32>
    %108 = arith.mulf %102, %107 : vector<128x128xf32>
    %c0_67 = arith.constant 0 : index
    %c4 = arith.constant 4 : index
    %c0_68 = arith.constant 0 : index
    %c0_69 = arith.constant 0 : index
    %109 = vector.load %arg6[%c0_67, %c4, %c0_68, %c0_69] : memref<1x8x128x128xf32, #tpu.memory_space<vmem>>, vector<1x1x128x128xf32>
    %110 = vector.shape_cast %109 : vector<1x1x128x128xf32> to vector<128x128xf32>
    %111 = vector.shape_cast %108 : vector<128x128xf32> to vector<1x1x128x128xf32>
    tpu.vector_store %arg6[%c0_67, %c4, %c0_68, %c0_69], %111 {strides = array<i32>} : memref<1x8x128x128xf32, #tpu.memory_space<vmem>>, vector<1x1x128x128xf32>,
    %112 = arith.truncf %108 : vector<128x128xf32> to vector<128x128xbf16>
    %cst_70 = arith.constant dense<0.000000e+00> : vector<128x16xf32>
    %113 = tpu.matmul %112, %96, %cst_70 {dimension_numbers = #tpu.dot_dimension_numbers<[1], [0], [0], [1], [0, 0, 1, 1], [], []>} : vector<128x128xbf16>, vector<128x16xbf16>, vector<128x16xf32> -> vector<128x16xf32>
    %114 = arith.truncf %113 : vector<128x16xf32> to vector<128x16xbf16>
    %c0_71 = arith.constant 0 : index
    %c64_72 = arith.constant 64 : index
    %115 = vector.load %arg8[%c0_71, %c64_72] : memref<128x128xbf16, #tpu.memory_space<vmem>>, vector<128x16xbf16>
    tpu.vector_store %arg8[%c0_71, %c64_72], %114 {strides = array<i32>} : memref<128x128xbf16, #tpu.memory_space<vmem>>, vector<128x16xbf16>,
    %c0_73 = arith.constant 0 : index
    %c80 = arith.constant 80 : index
    %116 = vector.load %arg7[%c0_73, %c80] : memref<128x384xbf16, #tpu.memory_space<vmem>>, vector<128x16xbf16>
    %c0_74 = arith.constant 0 : index
    %c208 = arith.constant 208 : index
    %117 = vector.load %arg7[%c0_74, %c208] : memref<128x384xbf16, #tpu.memory_space<vmem>>, vector<128x16xbf16>
    %c0_75 = arith.constant 0 : index
    %c336 = arith.constant 336 : index
    %118 = vector.load %arg7[%c0_75, %c336] : memref<128x384xbf16, #tpu.memory_space<vmem>>, vector<128x16xbf16>
    %cst_76 = arith.constant dense<0.000000e+00> : vector<128x128xf32>
    %119 = tpu.matmul %116, %117, %cst_76 {dimension_numbers = #tpu.dot_dimension_numbers<[1], [1], [0], [0], [0, 0, 1, 0], [], []>} : vector<128x16xbf16>, vector<128x16xbf16>, vector<128x128xf32> -> vector<128x128xf32>
    %cst_77 = arith.constant dense<0xFF800000> : vector<128xf32>
    %120 = vector.multi_reduction <maximumf>, %119, %cst_77 [1] : vector<128x128xf32> to vector<128xf32>
    %121 = vector.shape_cast %120 : vector<128xf32> to vector<128x1xf32>
    %122 = vector.broadcast %121 : vector<128x1xf32> to vector<128x128xf32>
    %123 = arith.subf %119, %122 : vector<128x128xf32>
    %124 = math.exp %123 : vector<128x128xf32>
    %cst_78 = arith.constant dense<0.000000e+00> : vector<128xf32>
    %125 = vector.multi_reduction <add>, %124, %cst_78 [1] : vector<128x128xf32> to vector<128xf32>
    %126 = vector.shape_cast %125 : vector<128xf32> to vector<128x1xf32>
    %cst_79 = arith.constant 1.000000e+00 : f32
    %127 = vector.broadcast %cst_79 : f32 to vector<128x1xf32>
    %128 = arith.divf %127, %126 : vector<128x1xf32>
    %129 = vector.broadcast %128 : vector<128x1xf32> to vector<128x128xf32>
    %130 = arith.mulf %124, %129 : vector<128x128xf32>
    %c0_80 = arith.constant 0 : index
    %c5 = arith.constant 5 : index
    %c0_81 = arith.constant 0 : index
    %c0_82 = arith.constant 0 : index
    %131 = vector.load %arg6[%c0_80, %c5, %c0_81, %c0_82] : memref<1x8x128x128xf32, #tpu.memory_space<vmem>>, vector<1x1x128x128xf32>
    %132 = vector.shape_cast %131 : vector<1x1x128x128xf32> to vector<128x128xf32>
    %133 = vector.shape_cast %130 : vector<128x128xf32> to vector<1x1x128x128xf32>
    tpu.vector_store %arg6[%c0_80, %c5, %c0_81, %c0_82], %133 {strides = array<i32>} : memref<1x8x128x128xf32, #tpu.memory_space<vmem>>, vector<1x1x128x128xf32>,
    %134 = arith.truncf %130 : vector<128x128xf32> to vector<128x128xbf16>
    %cst_83 = arith.constant dense<0.000000e+00> : vector<128x16xf32>
    %135 = tpu.matmul %134, %118, %cst_83 {dimension_numbers = #tpu.dot_dimension_numbers<[1], [0], [0], [1], [0, 0, 1, 1], [], []>} : vector<128x128xbf16>, vector<128x16xbf16>, vector<128x16xf32> -> vector<128x16xf32>
    %136 = arith.truncf %135 : vector<128x16xf32> to vector<128x16xbf16>
    %c0_84 = arith.constant 0 : index
    %c80_85 = arith.constant 80 : index
    %137 = vector.load %arg8[%c0_84, %c80_85] : memref<128x128xbf16, #tpu.memory_space<vmem>>, vector<128x16xbf16>
    tpu.vector_store %arg8[%c0_84, %c80_85], %136 {strides = array<i32>} : memref<128x128xbf16, #tpu.memory_space<vmem>>, vector<128x16xbf16>,
    %c0_86 = arith.constant 0 : index
    %c96 = arith.constant 96 : index
    %138 = vector.load %arg7[%c0_86, %c96] : memref<128x384xbf16, #tpu.memory_space<vmem>>, vector<128x16xbf16>
    %c0_87 = arith.constant 0 : index
    %c224 = arith.constant 224 : index
    %139 = vector.load %arg7[%c0_87, %c224] : memref<128x384xbf16, #tpu.memory_space<vmem>>, vector<128x16xbf16>
    %c0_88 = arith.constant 0 : index
    %c352 = arith.constant 352 : index
    %140 = vector.load %arg7[%c0_88, %c352] : memref<128x384xbf16, #tpu.memory_space<vmem>>, vector<128x16xbf16>
    %cst_89 = arith.constant dense<0.000000e+00> : vector<128x128xf32>
    %141 = tpu.matmul %138, %139, %cst_89 {dimension_numbers = #tpu.dot_dimension_numbers<[1], [1], [0], [0], [0, 0, 1, 0], [], []>} : vector<128x16xbf16>, vector<128x16xbf16>, vector<128x128xf32> -> vector<128x128xf32>
    %cst_90 = arith.constant dense<0xFF800000> : vector<128xf32>
    %142 = vector.multi_reduction <maximumf>, %141, %cst_90 [1] : vector<128x128xf32> to vector<128xf32>
    %143 = vector.shape_cast %142 : vector<128xf32> to vector<128x1xf32>
    %144 = vector.broadcast %143 : vector<128x1xf32> to vector<128x128xf32>
    %145 = arith.subf %141, %144 : vector<128x128xf32>
    %146 = math.exp %145 : vector<128x128xf32>
    %cst_91 = arith.constant dense<0.000000e+00> : vector<128xf32>
    %147 = vector.multi_reduction <add>, %146, %cst_91 [1] : vector<128x128xf32> to vector<128xf32>
    %148 = vector.shape_cast %147 : vector<128xf32> to vector<128x1xf32>
    %cst_92 = arith.constant 1.000000e+00 : f32
    %149 = vector.broadcast %cst_92 : f32 to vector<128x1xf32>
    %150 = arith.divf %149, %148 : vector<128x1xf32>
    %151 = vector.broadcast %150 : vector<128x1xf32> to vector<128x128xf32>
    %152 = arith.mulf %146, %151 : vector<128x128xf32>
    %c0_93 = arith.constant 0 : index
    %c6 = arith.constant 6 : index
    %c0_94 = arith.constant 0 : index
    %c0_95 = arith.constant 0 : index
    %153 = vector.load %arg6[%c0_93, %c6, %c0_94, %c0_95] : memref<1x8x128x128xf32, #tpu.memory_space<vmem>>, vector<1x1x128x128xf32>
    %154 = vector.shape_cast %153 : vector<1x1x128x128xf32> to vector<128x128xf32>
    %155 = vector.shape_cast %152 : vector<128x128xf32> to vector<1x1x128x128xf32>
    tpu.vector_store %arg6[%c0_93, %c6, %c0_94, %c0_95], %155 {strides = array<i32>} : memref<1x8x128x128xf32, #tpu.memory_space<vmem>>, vector<1x1x128x128xf32>,
    %156 = arith.truncf %152 : vector<128x128xf32> to vector<128x128xbf16>
    %cst_96 = arith.constant dense<0.000000e+00> : vector<128x16xf32>
    %157 = tpu.matmul %156, %140, %cst_96 {dimension_numbers = #tpu.dot_dimension_numbers<[1], [0], [0], [1], [0, 0, 1, 1], [], []>} : vector<128x128xbf16>, vector<128x16xbf16>, vector<128x16xf32> -> vector<128x16xf32>
    %158 = arith.truncf %157 : vector<128x16xf32> to vector<128x16xbf16>
    %c0_97 = arith.constant 0 : index
    %c96_98 = arith.constant 96 : index
    %159 = vector.load %arg8[%c0_97, %c96_98] : memref<128x128xbf16, #tpu.memory_space<vmem>>, vector<128x16xbf16>
    tpu.vector_store %arg8[%c0_97, %c96_98], %158 {strides = array<i32>} : memref<128x128xbf16, #tpu.memory_space<vmem>>, vector<128x16xbf16>,
    %c0_99 = arith.constant 0 : index
    %c112 = arith.constant 112 : index
    %160 = vector.load %arg7[%c0_99, %c112] : memref<128x384xbf16, #tpu.memory_space<vmem>>, vector<128x16xbf16>
    %c0_100 = arith.constant 0 : index
    %c240 = arith.constant 240 : index
    %161 = vector.load %arg7[%c0_100, %c240] : memref<128x384xbf16, #tpu.memory_space<vmem>>, vector<128x16xbf16>
    %c0_101 = arith.constant 0 : index
    %c368 = arith.constant 368 : index
    %162 = vector.load %arg7[%c0_101, %c368] : memref<128x384xbf16, #tpu.memory_space<vmem>>, vector<128x16xbf16>
    %cst_102 = arith.constant dense<0.000000e+00> : vector<128x128xf32>
    %163 = tpu.matmul %160, %161, %cst_102 {dimension_numbers = #tpu.dot_dimension_numbers<[1], [1], [0], [0], [0, 0, 1, 0], [], []>} : vector<128x16xbf16>, vector<128x16xbf16>, vector<128x128xf32> -> vector<128x128xf32>
    %cst_103 = arith.constant dense<0xFF800000> : vector<128xf32>
    %164 = vector.multi_reduction <maximumf>, %163, %cst_103 [1] : vector<128x128xf32> to vector<128xf32>
    %165 = vector.shape_cast %164 : vector<128xf32> to vector<128x1xf32>
    %166 = vector.broadcast %165 : vector<128x1xf32> to vector<128x128xf32>
    %167 = arith.subf %163, %166 : vector<128x128xf32>
    %168 = math.exp %167 : vector<128x128xf32>
    %cst_104 = arith.constant dense<0.000000e+00> : vector<128xf32>
    %169 = vector.multi_reduction <add>, %168, %cst_104 [1] : vector<128x128xf32> to vector<128xf32>
    %170 = vector.shape_cast %169 : vector<128xf32> to vector<128x1xf32>
    %cst_105 = arith.constant 1.000000e+00 : f32
    %171 = vector.broadcast %cst_105 : f32 to vector<128x1xf32>
    %172 = arith.divf %171, %170 : vector<128x1xf32>
    %173 = vector.broadcast %172 : vector<128x1xf32> to vector<128x128xf32>
    %174 = arith.mulf %168, %173 : vector<128x128xf32>
    %c0_106 = arith.constant 0 : index
    %c7 = arith.constant 7 : index
    %c0_107 = arith.constant 0 : index
    %c0_108 = arith.constant 0 : index
    %175 = vector.load %arg6[%c0_106, %c7, %c0_107, %c0_108] : memref<1x8x128x128xf32, #tpu.memory_space<vmem>>, vector<1x1x128x128xf32>
    %176 = vector.shape_cast %175 : vector<1x1x128x128xf32> to vector<128x128xf32>
    %177 = vector.shape_cast %174 : vector<128x128xf32> to vector<1x1x128x128xf32>
    tpu.vector_store %arg6[%c0_106, %c7, %c0_107, %c0_108], %177 {strides = array<i32>} : memref<1x8x128x128xf32, #tpu.memory_space<vmem>>, vector<1x1x128x128xf32>,
    %178 = arith.truncf %174 : vector<128x128xf32> to vector<128x128xbf16>
    %cst_109 = arith.constant dense<0.000000e+00> : vector<128x16xf32>
    %179 = tpu.matmul %178, %162, %cst_109 {dimension_numbers = #tpu.dot_dimension_numbers<[1], [0], [0], [1], [0, 0, 1, 1], [], []>} : vector<128x128xbf16>, vector<128x16xbf16>, vector<128x16xf32> -> vector<128x16xf32>
    %180 = arith.truncf %179 : vector<128x16xf32> to vector<128x16xbf16>
    %c0_110 = arith.constant 0 : index
    %c112_111 = arith.constant 112 : index
    %181 = vector.load %arg8[%c0_110, %c112_111] : memref<128x128xbf16, #tpu.memory_space<vmem>>, vector<128x16xbf16>
    tpu.vector_store %arg8[%c0_110, %c112_111], %180 {strides = array<i32>} : memref<128x128xbf16, #tpu.memory_space<vmem>>, vector<128x16xbf16>,
    %c0_112 = arith.constant 0 : index
    %c0_113 = arith.constant 0 : index
    %182 = vector.load %arg8[%c0_112, %c0_113] : memref<128x128xbf16, #tpu.memory_space<vmem>>, vector<128x128xbf16>
    %c0_114 = arith.constant 0 : index
    %c0_115 = arith.constant 0 : index
    %183 = vector.load %arg3[%c0_114, %c0_115] : memref<128x128xbf16, #tpu.memory_space<vmem>>, vector<128x128xbf16>
    %cst_116 = arith.constant dense<0.000000e+00> : vector<128x128xf32>
    %184 = tpu.matmul %182, %183, %cst_116 {dimension_numbers = #tpu.dot_dimension_numbers<[1], [0], [0], [1], [0, 0, 1, 1], [], []>} : vector<128x128xbf16>, vector<128x128xbf16>, vector<128x128xf32> -> vector<128x128xf32>
    %c0_117 = arith.constant 0 : index
    %c0_118 = arith.constant 0 : index
    %185 = vector.load %arg4[%c0_117, %c0_118] : memref<1x128xf32, #tpu.memory_space<vmem>>, vector<1x128xf32>
    %186 = vector.broadcast %185 : vector<1x128xf32> to vector<128x128xf32>
    %187 = arith.addf %184, %186 : vector<128x128xf32>
    %c0_119 = arith.constant 0 : index
    %c0_120 = arith.constant 0 : index
    %c0_121 = arith.constant 0 : index
    %188 = vector.load %arg5[%c0_119, %c0_120, %c0_121] : memref<1x128x128xf32, #tpu.memory_space<vmem>>, vector<1x128x128xf32>
    %189 = vector.shape_cast %188 : vector<1x128x128xf32> to vector<128x128xf32>
    %190 = vector.shape_cast %187 : vector<128x128xf32> to vector<1x128x128xf32>
    tpu.vector_store %arg5[%c0_119, %c0_120, %c0_121], %190 {strides = array<i32>} : memref<1x128x128xf32, #tpu.memory_space<vmem>>, vector<1x128x128xf32>,
    return
  }
  func.func @transform_0(%arg0: i32) -> (i32, i32, i32) {
    %c0_i32 = arith.constant 0 : i32
    %c0_i32_0 = arith.constant 0 : i32
    %c0_i32_1 = arith.constant 0 : i32
    return %arg0, %c0_i32, %c0_i32_0 : i32, i32, i32
  }
  func.func @transform_1(%arg0: i32) -> (i32, i32) {
    %c0_i32 = arith.constant 0 : i32
    %c0_i32_0 = arith.constant 0 : i32
    %c0_i32_1 = arith.constant 0 : i32
    return %c0_i32, %c0_i32_0 : i32, i32
  }
  func.func @transform_2(%arg0: i32) -> (i32, i32) {
    %c0_i32 = arith.constant 0 : i32
    %c0_i32_0 = arith.constant 0 : i32
    %c0_i32_1 = arith.constant 0 : i32
    return %c0_i32, %c0_i32_0 : i32, i32
  }
  func.func @transform_3(%arg0: i32) -> (i32, i32) {
    %c0_i32 = arith.constant 0 : i32
    %c0_i32_0 = arith.constant 0 : i32
    %c0_i32_1 = arith.constant 0 : i32
    return %c0_i32, %c0_i32_0 : i32, i32
  }
  func.func @transform_4(%arg0: i32) -> (i32, i32, i32) {
    %c0_i32 = arith.constant 0 : i32
    %c0_i32_0 = arith.constant 0 : i32
    %c0_i32_1 = arith.constant 0 : i32
    return %arg0, %c0_i32, %c0_i32_0 : i32, i32, i32
  }
  func.func @transform_5(%arg0: i32) -> (i32, i32, i32, i32) {
    %c0_i32 = arith.constant 0 : i32
    %c0_i32_0 = arith.constant 0 : i32
    %c0_i32_1 = arith.constant 0 : i32
    %c0_i32_2 = arith.constant 0 : i32
    return %arg0, %c0_i32, %c0_i32_0, %c0_i32_1 : i32, i32, i32, i32
  }
}

</mosaic_0001>

<bundles_post_ra>
// kernel: tpu_custom_call.1
= control target key start
LH: loop header
LB: loop body
LE: loop exit
PB: predicated region body
PF: predicated region fallthrough
CT: control target
= control target key end

     0   :  { %11 = vsyncpa [#allocation5], 0  ;;  %s13912_s0 = inlined_call_operand.hbm [shape: bf16[2,128,128], index: 0, kind: input, shape index: {}]   ;;  %s13913_s1 = inlined_call_operand.hbm [shape: bf16[128,384], index: 1, kind: input, shape index: {}]   ;;  %s13914_s2 = inlined_call_operand.hbm [shape: bf16[128,128], index: 2, kind: input, shape index: {}]   ;;  %s13915_s3 = inlined_call_operand.vmem [shape: f32[1,128], index: 3, kind: input, shape index: {}]   ;;  %s13916_s4 = inlined_call_operand.hbm [shape: f32[2,128,128], index: 4, kind: output, shape index: {0}]   ;;  %s13917_s5 = inlined_call_operand.hbm [shape: f32[2,8,128,128], index: 5, kind: output, shape index: {1}]  }
   0x1   :  { %13 = vsyncpa [#allocation5 + $0x1], 0 }
   0x2   :  { %14 = vsyncpa [#allocation8], 0 }
   0x3   :  { %15 = vsyncpa [#allocation6], 0 }
   0x4   :  { %17 = vsyncpa [#allocation6 + $0x1], 0 }
   0x5   :  { %18 = vsyncpa [#allocation12], 0 }
   0x6   :  { %20 = vsyncpa [#allocation12 + $0x1], 0  ;;  %s10098_s18 = smov 0   ;;  %s10100_s19 = smov 0  }
   0x7   :  { %s10102_s20 = smov 0   ;;  %s10104_s21 = smov 0  }
   0x8 LB: > { %s10119_s22 = sadd.s32 4294967295, %s10051_s21   ;;  %s7852_s23 = sadd.s32 4294967294, %s10051_s21   ;;  %s10051_s21 = sphi %s10104_s21, %s14147_s21   ;;  %s10047_s20 = sphi %s10102_s20, %s14146_s20   ;;  %s10043_s19 = sphi %s10100_s19, %s14145_s19   ;;  %s10039_s18 = sphi %s10098_s18, %s14144_s18  }
   0x9   : > { %p46_p0 = scmp.ne.s32.totalorder %s10043_s19, %s10039_s18  ;;  %p47_p1 = scmp.eq.s32.totalorder %s10119_s22, 0 }
   0xa   : > { %p133_p2 = scmp.eq.s32.totalorder %s10119_s22, 1  ;;  %p139_p3 = scmp.eq.s32.totalorder %s7852_s23, 1 }
   0xb   : > { %p10128_p4 = por %p47_p1, %p46_p0  ;;  %p7853_p5 = scmp.ge.s32.totalorder %s10051_s21, 1 }
   0xc   : > { %p10133_p6 = por %p139_p3, %p46_p0  ;;  %p172_p7 = scmp.lt.s32.totalorder %s10051_s21, 3 }
   0xd   : > { %s183_s28 = sshll.u32 %s13913_s1, 4  ;;  %s10053_s30 = smov [#allocation7]   ;;  %s184_s28 = int_to_ptr.hbm [resolvable:$true] %s183_s28 }
   0xe   : > { %p10141_p8 = pnand %p7853_p5, %p172_p7  ;;  %s185_s6 = sshll.u32 %s10053_s30, 4  ;;  %s186_s6 = int_to_ptr.vmem [resolvable:$true] %s185_s6 }
   0xf   : > { %s197_s9 = sshll.u32 %s13914_s2, 4  ;;  %s10054_s10 = smov 192   ;;  %s198_s9 = int_to_ptr.hbm [resolvable:$true] %s197_s9 }
  0x10   : > { %p9275_p9 = pneg %p10141_p8  ;;  %s10055_s11 = smov 12  }
  0x11   : > { %s10056_s12 = smov [#allocation9]   ;;  %s13918_s14 = smov 64  }
  0x12   : > { %p9276_p10 = pnand %p9275_p9, %p47_p1  ;;  %s199_s13 = sshll.u32 %s10056_s12, 4  ;;  %s200_s13 = int_to_ptr.vmem [resolvable:$true] %s199_s13 }
  0x13   : > { %s10058_s15 = smov 4   ;;  %s10157_s16 = sadd.s32 1, %s10051_s21  }
  0x14   : > { %9278 = dma.hbm_to_vmem [thread:$0]  (!%p9276_p10), %s184_s28, 3072, %s186_s6, [#allocation8], %s10054_s10, %s10054_s10, %s10055_s11  }
  0x15   : > { %9281 = dma.hbm_to_vmem [thread:$0]  (!%p9276_p10), %s198_s9, 1024, %s200_s13, [#allocation8], %s13918_s14, %s13918_s14, %s10058_s15  }
  0x16   : > { %s30_s17 = ssub.s32 %s10051_s21, %s10157_s16  ;;  %s33_s23 = sadd.s32 1, %s10047_s20 }
  0x17   : > { %p31_p12 = scmp.eq.s32.totalorder %s30_s17, 0  ;;  %p40_p13 = scmp.ne.s32.totalorder %s10047_s20, %s10043_s19 }
  0x18   : > { %p41_p0 = scmp.eq.s32.totalorder %s10051_s21, 0  ;;  %p9295_p7 = scmp.lt.s32.totalorder %s10051_s21, 2 }
  0x19   : > { %s10166_s26 = scalar_select %p31_p12, %s10047_s20, %s33_s23  }
  0x1a   : > { %p42_p3 = por %p41_p0, %p40_p13  ;;  %p10170_p5 = por %p133_p2, %p40_p13 }
  0x1b   : > { %s216_s28 = sand.u32 1, %s10047_s20   ;;  %s9010_s6 = sshll.u32 %s10051_s21, 6 }
  0x1c   : > { %s7857_s30 = sshll.u32 %s216_s28, 6  ;;  %s225_s9 = scalar_lea.hbm %s13912_s0, %s9010_s6 }
  0x1d   : > { %s220_s10 = scalar_lea.vmem [#allocation4], %s7857_s30  ;;  %s226_s12 = sshll.u32 %s225_s9, 4  ;;  %s227_s12 = int_to_ptr.hbm [resolvable:$true] %s226_s12 }
  0x1e   : > { %s228_s11 = sshll.u32 %s220_s10, 4  ;;  %p10180_p9 = pnand %p9295_p7, %p42_p3  ;;  %s229_s11 = int_to_ptr.vmem [resolvable:$true] %s228_s11 }
  0x1f   : > { %s217_s17 = scalar_lea.sflag [#allocation5], %s216_s28  ;;  %s9919_s23 = sshra.s32 %s227_s12, 4  ;;  %s9920_s23 = int_to_ptr.hbm [resolvable:$true] %s9919_s23 }
  0x20   : > { %s9921_s14 = scalar_lea.hbm %s9920_s23, 64  ;;  %p9923_p10 = pneg %p10180_p9 }
  0x21   : > { %p9922_p2 = scmp.ne.s32.totalorder %s9920_s23, %s9921_s14  ;;  %s9926_s7 = scalar_lea.hbm %s13912_s0, 128 }
  0x22   : > { %p9927_p0 = scmp.lt.s32.totalorder %s9920_s23, %s13912_s0  ;;  %p9928_p3 = scmp.lt.s32.totalorder %s9926_s7, %s9921_s14 }
  0x23   : > { %p9924_p12 = pnand %p9923_p10, %p9922_p2 }
  0x24   : > { %p9929_p7 = por %p9928_p3, %p9927_p0 }
  0x25   : > { %p9925_p13 = pneg %p9924_p12 }
  0x27   : > { %p9930_p11 = pnand %p9929_p7, %p9925_p13 }
  0x29   : > { %9933 = shalt.err (!%p9930_p11)
}
  0x2a   : > { %s13948_s28 = smov 64   ;;  %240 = sbr.rel (%p10141_p8) target bundleno = 2825 (0xb09), region = 36 }
  0x2b   : > { %9285 = dma.hbm_to_vmem [thread:$0]  (!%p10180_p9), %s227_s12, 1024, %s229_s11, %s217_s17, %s13948_s28, %s13948_s28, %s10058_s15  }
  0x2f   : > { %s10200_s10 = sand.u32 1, %s10043_s19  }
  0x30   : > { %s7861_s23 = sshll.u32 %s10200_s10, 6  ;;  %s243_s14 = scalar_lea.sflag [#allocation5], %s10200_s10 }
  0x31   : > { %s10204_s6 = scalar_lea.vmem [#allocation4], %s7861_s23 }
  0x32   : > { %10022 = dma.done.wait (%p10128_p4), %s243_s14, 1024  }
  0x33   : > { %10024 = vsyncadd (%p10128_p4), %s243_s14, 4294966272 }
  0x34   : > { %10026 = dma.done.wait (%p47_p1), [#allocation8], 4096  }
  0x35   : > { %10028 = vsyncadd (%p47_p1), [#allocation8], 4294963200  ;;  %v7984_v0 = vld [vmem:[#allocation7 + $0xa8] sm:$0xf]  ;;  %v9041_v1 = vld [vmem:[#allocation7 + $0xb0] sm:$0xf0] }
  0x36   : > { %v9040_v2 = vld [vmem:[#allocation7 + $0xac] sm:$0xf]  ;;  %v7985_v3 = vor.u32 %v9041_v1, %v7984_v0  ;;  %v7986_v4 = vld [vmem:[#allocation7 + $0xb4] sm:$0xf0]  ;;  %v7992_v5 = vld [vmem:[#allocation7 + $0xb0] sm:$0xf] }
  0x37   : > { %v9042_v6 = vld [vmem:[#allocation7 + $0xb8] sm:$0xf0]  ;;  %v7989_v7 = vor.u32 %v9040_v2, %v7986_v4  ;;  %v7972_v9 = vld [vmem:[#allocation7 + $0x90] sm:$0xf]  ;;  %v9037_v11 = vld [vmem:[#allocation7 + $0x94] sm:$0xf] }
  0x38   : > { %v7993_v8 = vor.u32 %v9042_v6, %v7992_v5  ;;  %v9038_v10 = vld [vmem:[#allocation7 + $0x98] sm:$0xf0]  ;;  %513 = vmatpush.bf16.msra.mxu0 %v7985_v3  ;;  %v7974_v13 = vld [vmem:[#allocation7 + $0x9c] sm:$0xf0]  ;;  %v7980_v14 = vld [vmem:[#allocation7 + $0x98] sm:$0xf] }
  0x39   : > { %v7973_v12 = vor.u32 %v9038_v10, %v7972_v9  ;;  %v9039_v15 = vld [vmem:[#allocation7 + $0xa0] sm:$0xf0]  ;;  %562 = vmatpush.bf16.msra.mxu1 %v7989_v7  ;;  %v7977_v16 = vor.u32 %v9037_v11, %v7974_v13  ;;  %v7960_v18 = vld [vmem:[#allocation7 + $0x78] sm:$0xf]  ;;  %v9034_v20 = vld [vmem:[#allocation7 + $0x7c] sm:$0xf] }
  0x3a   : > { %611 = vmatpush.bf16.msra.mxu2 %v7993_v8  ;;  %v7981_v17 = vor.u32 %v9039_v15, %v7980_v14  ;;  %v9035_v19 = vld [vmem:[#allocation7 + $0x80] sm:$0xf0]  ;;  %v7962_v21 = vld [vmem:[#allocation7 + $0x84] sm:$0xf0]  ;;  %v7968_v22 = vld [vmem:[#allocation7 + $0x80] sm:$0xf] }
  0x3b   : > { %v9036_v23 = vld [vmem:[#allocation7 + $0x88] sm:$0xf0]  ;;  %v7961_v24 = vor.u32 %v9035_v19, %v7960_v18  ;;  %v7965_v25 = vor.u32 %v9034_v20, %v7962_v21  ;;  %v7948_v27 = vld [vmem:[#allocation7 + $0x60] sm:$0xf]  ;;  %v9031_v29 = vld [vmem:[#allocation7 + $0x64] sm:$0xf] }
  0x3c   : > { %514 = vmatpush.bf16.msra.mxu0 %v7973_v12  ;;  %v7969_v26 = vor.u32 %v9036_v23, %v7968_v22  ;;  %v9032_v28 = vld [vmem:[#allocation7 + $0x68] sm:$0xf0]  ;;  %v7950_v30 = vld [vmem:[#allocation7 + $0x6c] sm:$0xf0]  ;;  %v7956_v31 = vld [vmem:[#allocation7 + $0x68] sm:$0xf] }
  0x3d   : > { %563 = vmatpush.bf16.msra.mxu1 %v7977_v16  ;;  %v9033_v32 = vld [vmem:[#allocation7 + $0x70] sm:$0xf0]  ;;  %v7949_v33 = vor.u32 %v9032_v28, %v7948_v27  ;;  %v7953_v34 = vor.u32 %v9031_v29, %v7950_v30  ;;  %v7936_v36 = vld [vmem:[#allocation7 + $0x48] sm:$0xf]  ;;  %v9028_v38 = vld [vmem:[#allocation7 + $0x4c] sm:$0xf] }
  0x3e   : > { %612 = vmatpush.bf16.msra.mxu2 %v7981_v17  ;;  %v7957_v35 = vor.u32 %v9033_v32, %v7956_v31  ;;  %v9029_v37 = vld [vmem:[#allocation7 + $0x50] sm:$0xf0]  ;;  %v7938_v39 = vld [vmem:[#allocation7 + $0x54] sm:$0xf0]  ;;  %v7944_v40 = vld [vmem:[#allocation7 + $0x50] sm:$0xf] }
  0x3f   : > { %v9030_v41 = vld [vmem:[#allocation7 + $0x58] sm:$0xf0]  ;;  %v7937_v42 = vor.u32 %v9029_v37, %v7936_v36  ;;  %v7924_v43 = vld [vmem:[#allocation7 + $0x30] sm:$0xf]  ;;  %v7941_v44 = vor.u32 %v9028_v38, %v7938_v39  ;;  %v9025_v47 = vld [vmem:[#allocation7 + $0x34] sm:$0xf] }
  0x40   : > { %515 = vmatpush.bf16.msra.mxu0 %v7961_v24  ;;  %v7945_v45 = vor.u32 %v9030_v41, %v7944_v40  ;;  %v9026_v46 = vld [vmem:[#allocation7 + $0x38] sm:$0xf0]  ;;  %v7926_v48 = vld [vmem:[#allocation7 + $0x3c] sm:$0xf0]  ;;  %v7932_v49 = vld [vmem:[#allocation7 + $0x38] sm:$0xf] }
  0x41   : > { %564 = vmatpush.bf16.msra.mxu1 %v7965_v25  ;;  %v9027_v50 = vld [vmem:[#allocation7 + $0x40] sm:$0xf0]  ;;  %v7925_v51 = vor.u32 %v9026_v46, %v7924_v43  ;;  %v7929_v52 = vor.u32 %v9025_v47, %v7926_v48  ;;  %v7912_v54 = vld [vmem:[#allocation7 + $0x18] sm:$0xf]  ;;  %v9022_v56 = vld [vmem:[#allocation7 + $0x1c] sm:$0xf] }
  0x42   : > { %613 = vmatpush.bf16.msra.mxu2 %v7969_v26  ;;  %v7933_v53 = vor.u32 %v9027_v50, %v7932_v49  ;;  %v9023_v55 = vld [vmem:[#allocation7 + $0x20] sm:$0xf0]  ;;  %v7914_v57 = vld [vmem:[#allocation7 + $0x24] sm:$0xf0]  ;;  %v7920_v58 = vld [vmem:[#allocation7 + $0x20] sm:$0xf] }
  0x43   : > { %v9024_v59 = vld [vmem:[#allocation7 + $0x28] sm:$0xf0]  ;;  %v7913_v60 = vor.u32 %v9023_v55, %v7912_v54  ;;  %v7917_v61 = vor.u32 %v9022_v56, %v7914_v57  ;;  %v7900_v63 = vld [vmem:[#allocation7] sm:$0xf]  ;;  %v9019_v1 = vld [vmem:[#allocation7 + $0x4] sm:$0xf] }
  0x44   : > { %516 = vmatpush.bf16.msra.mxu0 %v7949_v33  ;;  %v7921_v62 = vor.u32 %v9024_v59, %v7920_v58  ;;  %v9020_v0 = vld [vmem:[#allocation7 + $0x8] sm:$0xf0]  ;;  %v7902_v2 = vld [vmem:[#allocation7 + $0xc] sm:$0xf0]  ;;  %v7908_v3 = vld [vmem:[#allocation7 + $0x8] sm:$0xf] }
  0x45   : > { %565 = vmatpush.bf16.msra.mxu1 %v7953_v34  ;;  %v9021_v4 = vld [vmem:[#allocation7 + $0x10] sm:$0xf0]  ;;  %v7901_v5 = vor.u32 %v9020_v0, %v7900_v63  ;;  %v7905_v6 = vor.u32 %v9019_v1, %v7902_v2  ;;  %v9011_v8 = vld [vmem:[%s10204_s6] sm:$0xff]  ;;  %v9012_v9 = vld [vmem:[%s10204_s6 + $0x8] sm:$0xff]  ;;  %s10059_s24 = smov 64   ;;  %s10060_s29 = smov 96  }
  0x46   : > { %614 = vmatpush.bf16.msra.mxu2 %v7957_v35  ;;  %v7909_v7 = vor.u32 %v9021_v4, %v7908_v3  ;;  %v9013_v10 = vld [vmem:[%s10204_s6 + $0x10] sm:$0xff]  ;;  %v9014_v11 = vld [vmem:[%s10204_s6 + $0x18] sm:$0xff]  ;;  %v9015_v12 = vld [vmem:[%s10204_s6 + $0x20] sm:$0xff]  ;;  %s10061_s15 = smov 112   ;;  %s10062_s11 = smov 80   ;;  %vm852_vm0 = vcmask 130048  }
  0x47   : > { %v9016_v13 = vld [vmem:[%s10204_s6 + $0x28] sm:$0xff]  ;;  %v9017_v14 = vld [vmem:[%s10204_s6 + $0x30] sm:$0xff]  ;;  %v9018_v15 = vld [vmem:[%s10204_s6 + $0x38] sm:$0xff]  ;;  %s10063_s12 = smov 48   ;;  %s10064_s13 = smov 32  }
  0x48   : > { %517 = vmatpush.bf16.msra.mxu0 %v7937_v42  ;;  %s10065_s17 = smov 16   ;;  %s7865_s30 = sshll.u32 %s10200_s10, 10 }
  0x49   : > { %566 = vmatpush.bf16.msra.mxu1 %v7941_v44  ;;  %s10960_s7 = scalar_lea.vmem [#allocation11], %s7865_s30  ;;  %s7864_s8 = sshll.u32 %s10200_s10, 7 }
  0x4a   : > { %615 = vmatpush.bf16.msra.mxu2 %v7945_v45  ;;  %s13801_s23 = scalar_lea.vmem [#allocation10], %s7864_s8  ;;  %s9252_s14 = sshll.u32 %s10119_s22, 10 }
  0x4b   : > { %s7724_s6 = sshll.u32 %s10960_s7, 4  ;;  %s9969_s9 = scalar_lea.hbm %s13917_s5, 2048  ;;  %s7725_s6 = int_to_ptr.vmem [resolvable:$true] %s7724_s6 }
  0x4c   : > { %518 = vmatpush.bf16.msra.mxu0 %v7925_v51 }
  0x4d   : > { %567 = vmatpush.bf16.msra.mxu1 %v7929_v52 }
  0x4e   : > { %616 = vmatpush.bf16.msra.mxu2 %v7933_v53 }
  0x50   : > { %519 = vmatpush.bf16.msra.mxu0 %v7913_v60 }
  0x51   : > { %568 = vmatpush.bf16.msra.mxu1 %v7917_v61 }
  0x52   : > { %617 = vmatpush.bf16.msra.mxu2 %v7921_v62 }
  0x54   : > { %520 = vmatpush.bf16.msra.mxu0 %v7901_v5 }
  0x55   : > { %569 = vmatpush.bf16.msra.mxu1 %v7905_v6 }
  0x56   : > { %618 = vmatpush.bf16.msra.mxu2 %v7909_v7 }
  0x57   : > { %521 = vmatmul.bf16.vlgmr.msra.gmra.mxu0 %v9011_v8 }
  0x58   : > { %570 = vmatmul.bf16.vlgmr.msra.gmra.mxu1 %v9011_v8 }
  0x59   : > { %619 = vmatmul.bf16.vlgmr.msra.gmra.mxu2 %v9011_v8 }
  0x67   : > { %526 = vmatmul.bf16.gmra.mxu0 %v9012_v9 }
  0x68   : > { %575 = vmatmul.bf16.gmra.mxu1 %v9012_v9 }
  0x69   : > { %624 = vmatmul.bf16.gmra.mxu2 %v9012_v9 }
  0x77   : > { %531 = vmatmul.bf16.gmra.mxu0 %v9013_v10 }
  0x78   : > { %580 = vmatmul.bf16.gmra.mxu1 %v9013_v10 }
  0x79   : > { %629 = vmatmul.bf16.gmra.mxu2 %v9013_v10 }
  0x87   : > { %536 = vmatmul.bf16.gmra.mxu0 %v9014_v11 }
  0x88   : > { %585 = vmatmul.bf16.gmra.mxu1 %v9014_v11 }
  0x89   : > { %634 = vmatmul.bf16.gmra.mxu2 %v9014_v11 }
  0x97   : > { %541 = vmatmul.bf16.gmra.mxu0 %v9015_v12 }
  0x98   : > { %590 = vmatmul.bf16.gmra.mxu1 %v9015_v12 }
  0x99   : > { %639 = vmatmul.bf16.gmra.mxu2 %v9015_v12 }
  0xa7   : > { %546 = vmatmul.bf16.gmra.mxu0 %v9016_v13 }
  0xa8   : > { %595 = vmatmul.bf16.gmra.mxu1 %v9016_v13 }
  0xa9   : > { %644 = vmatmul.bf16.gmra.mxu2 %v9016_v13 }
  0xb7   : > { %551 = vmatmul.bf16.gmra.mxu0 %v9017_v14 }
  0xb8   : > { %600 = vmatmul.bf16.gmra.mxu1 %v9017_v14 }
  0xb9   : > { %649 = vmatmul.bf16.gmra.mxu2 %v9017_v14 }
  0xc7   : > { %556 = vmatmul.bf16.gmra.mxu0 %v9018_v15 }
  0xc8   : > { %605 = vmatmul.bf16.gmra.mxu1 %v9018_v15 }
  0xc9   : > { %654 = vmatmul.bf16.gmra.mxu2 %v9018_v15 }
  0xd4   : > { %v522_v16 = vpop.f32.mrf.mxu0 }
  0xd5   : > { %v571_v17 = vpop.f32.mrf.mxu1 }
  0xd6   : > { %v660_v18 = vpack.c.bf16 %v571_v17, %v522_v16 }
  0xd8   : > { %692 = vst [vmem:[#allocation2] sm:$0xff] %v660_v18 }
  0xdc   : > { %v620_v19 = vpop.f32.mrf.mxu2  ;;  %v524_v21 = vpop.f32.mrf.mxu0 }
  0xdd   : > { %v661_v20 = vpack.c.bf16 %v620_v19, %v620_v19  ;;  %v573_v22 = vpop.f32.mrf.mxu1 }
  0xde   : > { %v662_v23 = vpack.c.bf16 %v573_v22, %v524_v21 }
  0xdf   : > { %693 = vst [vmem:[#allocation2 + $0x8] sm:$0xf] %v661_v20  ;;  %v8460_v28 = vld [vmem:[#allocation2] sm:$0xf]  ;;  %v8372_v47 = vld [vmem:[#allocation2 + $0x4] sm:$0xf] }
  0xe0   : > { %694 = vst [vmem:[#allocation2 + $0xc] sm:$0xff] %v662_v23  ;;  %v8220_v30 = vld [vmem:[#allocation2] sm:$0xf]  ;;  %v8132_v50 = vld [vmem:[#allocation2 + $0x4] sm:$0xf] }
  0xe1   : > { %v8100_v31 = vld [vmem:[#allocation2] sm:$0xf]  ;;  %v8252_v63 = vld [vmem:[#allocation2 + $0x4] sm:$0xf] }
  0xe2   : > { %v8340_v12 = vld [vmem:[#allocation2] sm:$0xf] }
  0xe4   : > { %v622_v24 = vpop.f32.mrf.mxu2  ;;  %v527_v26 = vpop.f32.mrf.mxu0 }
  0xe5   : > { %v663_v25 = vpack.c.bf16 %v622_v24, %v622_v24  ;;  %v576_v27 = vpop.f32.mrf.mxu1 }
  0xe6   : > { %v664_v29 = vpack.c.bf16 %v576_v27, %v527_v26  ;;  %v8188_v42 = vld [vmem:[#allocation2 + $0x8] sm:$0xf] }
  0xe7   : > { %695 = vst [vmem:[#allocation2 + $0x14] sm:$0xf] %v663_v25  ;;  %v9139_v32 = vld [vmem:[#allocation2 + $0x8] sm:$0xf0]  ;;  %v9123_v44 = vld [vmem:[#allocation2 + $0xc] sm:$0xf0] }
  0xe8   : > { %v9091_v33 = vld [vmem:[#allocation2 + $0x8] sm:$0xf0]  ;;  %696 = vst [vmem:[#allocation2 + $0x18] sm:$0xff] %v664_v29  ;;  %v8461_v35 = vor.u32 %v9139_v32, %v8460_v28  ;;  %v9075_v46 = vld [vmem:[#allocation2 + $0xc] sm:$0xf0]  ;;  %v8373_v49 = vor.u32 %v9123_v44, %v8372_v47 }
  0xe9   : > { %v9067_v34 = vld [vmem:[#allocation2 + $0x8] sm:$0xf0]  ;;  %v8221_v36 = vor.u32 %v9091_v33, %v8220_v30  ;;  %v8133_v51 = vor.u32 %v9075_v46, %v8132_v50  ;;  %v8308_v56 = vld [vmem:[#allocation2 + $0x8] sm:$0xf]  ;;  %v9099_v59 = vld [vmem:[#allocation2 + $0xc] sm:$0xf0] }
  0xea   : > { %v8101_v37 = vor.u32 %v9067_v34, %v8100_v31  ;;  %4140 = vrot.lane.b32.xlu1 %v8461_v35, %s10059_s24  ;;  %v8253_v1 = vor.u32 %v9099_v59, %v8252_v63  ;;  %v9115_v9 = vld [vmem:[#allocation2 + $0x8] sm:$0xf0]  ;;  %v8428_v23 = vld [vmem:[#allocation2 + $0x8] sm:$0xf] }
  0xeb   : > { %2420 = vrot.lane.b32.xlu0 %v8221_v36, %s10060_s29  ;;  %v8341_v15 = vor.u32 %v9115_v9, %v8340_v12 }
  0xec   : > { %1560 = vrot.lane.b32.xlu2 %v8101_v37, %s10061_s15  ;;  %v625_v38 = vpop.f32.mrf.mxu2  ;;  %v529_v40 = vpop.f32.mrf.mxu0 }
  0xed   : > { %v665_v39 = vpack.c.bf16 %v625_v38, %v625_v38  ;;  %v578_v41 = vpop.f32.mrf.mxu1 }
  0xee   : > { %v9083_v43 = vld [vmem:[#allocation2 + $0x10] sm:$0xf0]  ;;  %v666_v45 = vpack.c.bf16 %v578_v41, %v529_v40 }
  0xef   : > { %697 = vst [vmem:[#allocation2 + $0x20] sm:$0xf] %v665_v39  ;;  %v8189_v48 = vor.u32 %v9083_v43, %v8188_v42  ;;  %v9107_v57 = vld [vmem:[#allocation2 + $0x10] sm:$0xf0]  ;;  %v8136_v60 = vld [vmem:[#allocation2 + $0x1c] sm:$0xf] }
  0xf0   : > { %698 = vst [vmem:[#allocation2 + $0x24] sm:$0xff] %v666_v45  ;;  %v8309_v62 = vor.u32 %v9107_v57, %v8308_v56  ;;  %v8224_v10 = vld [vmem:[#allocation2 + $0x18] sm:$0xf]  ;;  %v9131_v24 = vld [vmem:[#allocation2 + $0x10] sm:$0xf0] }
  0xf1   : > { %v8104_v11 = vld [vmem:[#allocation2 + $0x18] sm:$0xf]  ;;  %v8256_v26 = vld [vmem:[#allocation2 + $0x1c] sm:$0xf]  ;;  %v8429_v29 = vor.u32 %v9131_v24, %v8428_v23 }
  0xf2   : > { %2162 = vrot.lane.b32.xlu1 %v8189_v48, %s10061_s15  ;;  %v8344_v25 = vld [vmem:[#allocation2 + $0x18] sm:$0xf]  ;;  %v8376_v40 = vld [vmem:[#allocation2 + $0x1c] sm:$0xf] }
  0xf3   : > { %3336 = vrot.lane.b32.xlu0 %v8373_v49, %s10062_s11  ;;  %v8464_v39 = vld [vmem:[#allocation2 + $0x18] sm:$0xf] }
  0xf4   : > { %1616 = vrot.lane.b32.xlu2 %v8133_v51, %s10061_s15  ;;  %v627_v52 = vpop.f32.mrf.mxu2  ;;  %v532_v54 = vpop.f32.mrf.mxu0 }
  0xf5   : > { %v667_v53 = vpack.c.bf16 %v627_v52, %v627_v52  ;;  %v581_v55 = vpop.f32.mrf.mxu1 }
  0xf6   : > { %v668_v58 = vpack.c.bf16 %v581_v55, %v532_v54  ;;  %v8192_v35 = vld [vmem:[#allocation2 + $0x20] sm:$0xf] }
  0xf7   : > { %699 = vst [vmem:[#allocation2 + $0x2c] sm:$0xf] %v667_v53  ;;  %v9076_v61 = vld [vmem:[#allocation2 + $0x24] sm:$0xf0]  ;;  %v9092_v6 = vld [vmem:[#allocation2 + $0x20] sm:$0xf0] }
  0xf8   : > { %700 = vst [vmem:[#allocation2 + $0x30] sm:$0xff] %v668_v58  ;;  %v8137_v0 = vor.u32 %v9076_v61, %v8136_v60  ;;  %v9068_v7 = vld [vmem:[#allocation2 + $0x20] sm:$0xf0]  ;;  %v8225_v13 = vor.u32 %v9092_v6, %v8224_v10  ;;  %v9100_v21 = vld [vmem:[#allocation2 + $0x24] sm:$0xf0] }
  0xf9   : > { %v8105_v14 = vor.u32 %v9068_v7, %v8104_v11  ;;  %v9116_v20 = vld [vmem:[#allocation2 + $0x20] sm:$0xf0]  ;;  %v8257_v28 = vor.u32 %v9100_v21, %v8256_v26  ;;  %v9124_v38 = vld [vmem:[#allocation2 + $0x24] sm:$0xf0]  ;;  %v8312_v47 = vld [vmem:[#allocation2 + $0x20] sm:$0xf] }
  0xfa   : > { %1618 = vrot.lane.b32.xlu1 %v8137_v0, %s10061_s15  ;;  %v8345_v27 = vor.u32 %v9116_v20, %v8344_v25  ;;  %v9140_v34 = vld [vmem:[#allocation2 + $0x20] sm:$0xf0]  ;;  %v8377_v43 = vor.u32 %v9124_v38, %v8376_v40  ;;  %v8432_v61 = vld [vmem:[#allocation2 + $0x20] sm:$0xf] }
  0xfb   : > { %3022 = vrot.lane.b32.xlu0 %v8309_v62, %s10060_s29  ;;  %v8465_v41 = vor.u32 %v9140_v34, %v8464_v39 }
  0xfc   : > { %2476 = vrot.lane.b32.xlu2 %v8253_v1, %s10060_s29  ;;  %v630_v2 = vpop.f32.mrf.mxu2  ;;  %v534_v4 = vpop.f32.mrf.mxu0 }
  0xfd   : > { %v669_v3 = vpack.c.bf16 %v630_v2, %v630_v2  ;;  %v583_v5 = vpop.f32.mrf.mxu1 }
  0xfe   : > { %v670_v8 = vpack.c.bf16 %v583_v5, %v534_v4  ;;  %v9084_v36 = vld [vmem:[#allocation2 + $0x28] sm:$0xf0] }
  0xff   : > { %701 = vst [vmem:[#allocation2 + $0x38] sm:$0xf] %v669_v3  ;;  %v8193_v42 = vor.u32 %v9084_v36, %v8192_v35  ;;  %v9108_v49 = vld [vmem:[#allocation2 + $0x28] sm:$0xf0]  ;;  %v8140_v50 = vld [vmem:[#allocation2 + $0x34] sm:$0xf] }
 0x100   : > { %702 = vst [vmem:[#allocation2 + $0x3c] sm:$0xff] %v670_v8  ;;  %v8228_v53 = vld [vmem:[#allocation2 + $0x30] sm:$0xf]  ;;  %v8313_v55 = vor.u32 %v9108_v49, %v8312_v47  ;;  %v9132_v1 = vld [vmem:[#allocation2 + $0x28] sm:$0xf0] }
 0x101   : > { %v8348_v2 = vld [vmem:[#allocation2 + $0x30] sm:$0xf]  ;;  %v8433_v6 = vor.u32 %v9132_v1, %v8432_v61  ;;  %v8260_v25 = vld [vmem:[#allocation2 + $0x34] sm:$0xf] }
 0x102   : > { %2422 = vrot.lane.b32.xlu1 %v8225_v13, %s10060_s29  ;;  %v8468_v13 = vld [vmem:[#allocation2 + $0x30] sm:$0xf]  ;;  %v8380_v39 = vld [vmem:[#allocation2 + $0x34] sm:$0xf] }
 0x103   : > { %1562 = vrot.lane.b32.xlu0 %v8105_v14, %s10061_s15 }
 0x104   : > { %3280 = vrot.lane.b32.xlu2 %v8341_v15, %s10062_s11  ;;  %v632_v16 = vpop.f32.mrf.mxu2  ;;  %v537_v18 = vpop.f32.mrf.mxu0 }
 0x105   : > { %v671_v17 = vpack.c.bf16 %v632_v16, %v632_v16  ;;  %v586_v19 = vpop.f32.mrf.mxu1  ;;  %v8108_v16 = vld [vmem:[#allocation2 + $0x30] sm:$0xf] }
 0x106   : > { %v672_v22 = vpack.c.bf16 %v586_v19, %v537_v18  ;;  %v8196_v62 = vld [vmem:[#allocation2 + $0x38] sm:$0xf] }
 0x107   : > { %703 = vst [vmem:[#allocation2 + $0x44] sm:$0xf] %v671_v17  ;;  %v9077_v51 = vld [vmem:[#allocation2 + $0x3c] sm:$0xf0]  ;;  %v9093_v54 = vld [vmem:[#allocation2 + $0x38] sm:$0xf0] }
 0x108   : > { %704 = vst [vmem:[#allocation2 + $0x48] sm:$0xff] %v672_v22  ;;  %v8141_v56 = vor.u32 %v9077_v51, %v8140_v50  ;;  %v8229_v57 = vor.u32 %v9093_v54, %v8228_v53  ;;  %v9117_v3 = vld [vmem:[#allocation2 + $0x38] sm:$0xf0]  ;;  %v8316_v11 = vld [vmem:[#allocation2 + $0x38] sm:$0xf] }
 0x109   : > { %v8349_v7 = vor.u32 %v9117_v3, %v8348_v2  ;;  %v9141_v15 = vld [vmem:[#allocation2 + $0x38] sm:$0xf0]  ;;  %v8500_v53 = vld [vmem:[#allocation2 + $0x34] sm:$0xf] }
 0x10a   : > { %3282 = vrot.lane.b32.xlu1 %v8345_v27, %s10062_s11  ;;  %v9069_v17 = vld [vmem:[#allocation2 + $0x38] sm:$0xf0]  ;;  %v8469_v20 = vor.u32 %v9141_v15, %v8468_v13 }
 0x10b   : > { %2478 = vrot.lane.b32.xlu0 %v8257_v28, %s10060_s29  ;;  %v8109_v21 = vor.u32 %v9069_v17, %v8108_v16 }
 0x10c   : > { %3882 = vrot.lane.b32.xlu2 %v8429_v29, %s10062_s11  ;;  %v635_v30 = vpop.f32.mrf.mxu2  ;;  %v539_v32 = vpop.f32.mrf.mxu0  ;;  %v8436_v29 = vld [vmem:[#allocation2 + $0x38] sm:$0xf] }
 0x10d   : > { %v673_v31 = vpack.c.bf16 %v635_v30, %v635_v30  ;;  %v588_v33 = vpop.f32.mrf.mxu1 }
 0x10e   : > { %v674_v37 = vpack.c.bf16 %v588_v33, %v539_v32  ;;  %v9085_v63 = vld [vmem:[#allocation2 + $0x40] sm:$0xf0] }
 0x10f   : > { %705 = vst [vmem:[#allocation2 + $0x50] sm:$0xf] %v673_v31  ;;  %v8197_v5 = vor.u32 %v9085_v63, %v8196_v62  ;;  %v9109_v12 = vld [vmem:[#allocation2 + $0x40] sm:$0xf0]  ;;  %v8112_v26 = vld [vmem:[#allocation2 + $0x48] sm:$0xf] }
 0x110   : > { %706 = vst [vmem:[#allocation2 + $0x54] sm:$0xff] %v674_v37  ;;  %v8317_v19 = vor.u32 %v9109_v12, %v8316_v11  ;;  %v9133_v30 = vld [vmem:[#allocation2 + $0x40] sm:$0xf0]  ;;  %v9101_v31 = vld [vmem:[#allocation2 + $0x3c] sm:$0xf0] }
 0x111   : > { %v8437_v34 = vor.u32 %v9133_v30, %v8436_v29  ;;  %v8261_v35 = vor.u32 %v9101_v31, %v8260_v25  ;;  %v8504_v3 = vld [vmem:[#allocation2 + $0x4c] sm:$0xf] }
 0x112   : > { %4142 = vrot.lane.b32.xlu1 %v8465_v41, %s10059_s24  ;;  %v9125_v41 = vld [vmem:[#allocation2 + $0x3c] sm:$0xf0]  ;;  %v8624_v25 = vld [vmem:[#allocation2 + $0x4c] sm:$0xf] }
 0x113   : > { %2164 = vrot.lane.b32.xlu0 %v8193_v42, %s10061_s15  ;;  %v8232_v42 = vld [vmem:[#allocation2 + $0x48] sm:$0xf]  ;;  %v8381_v47 = vor.u32 %v9125_v41, %v8380_v39 }
 0x114   : > { %3338 = vrot.lane.b32.xlu2 %v8377_v43, %s10062_s11  ;;  %v637_v44 = vpop.f32.mrf.mxu2  ;;  %v542_v46 = vpop.f32.mrf.mxu0 }
 0x115   : > { %v675_v45 = vpack.c.bf16 %v637_v44, %v637_v44  ;;  %v591_v48 = vpop.f32.mrf.mxu1 }
 0x116   : > { %v676_v52 = vpack.c.bf16 %v591_v48, %v542_v46 }
 0x117   : > { %707 = vst [vmem:[#allocation2 + $0x5c] sm:$0xf] %v675_v45  ;;  %v9070_v27 = vld [vmem:[#allocation2 + $0x50] sm:$0xf0]  ;;  %v8144_v45 = vld [vmem:[#allocation2 + $0x4c] sm:$0xf] }
 0x118   : > { %708 = vst [vmem:[#allocation2 + $0x60] sm:$0xff] %v676_v52  ;;  %v8113_v33 = vor.u32 %v9070_v27, %v8112_v26  ;;  %v9094_v43 = vld [vmem:[#allocation2 + $0x50] sm:$0xf0]  ;;  %v9078_v46 = vld [vmem:[#allocation2 + $0x54] sm:$0xf0] }
 0x119   : > { %v8233_v48 = vor.u32 %v9094_v43, %v8232_v42  ;;  %v8145_v49 = vor.u32 %v9078_v46, %v8144_v45  ;;  %v9118_v11 = vld [vmem:[#allocation2 + $0x50] sm:$0xf0]  ;;  %v9174_v26 = vld [vmem:[#allocation2 + $0x54] sm:$0xf0] }
 0x11a   : > { %3024 = vrot.lane.b32.xlu1 %v8313_v55, %s10060_s29  ;;  %v9149_v55 = vld [vmem:[#allocation2 + $0x3c] sm:$0xf0]  ;;  %v8625_v29 = vor.u32 %v9174_v26, %v8624_v25 }
 0x11b   : > { %1620 = vrot.lane.b32.xlu0 %v8141_v56, %s10061_s15  ;;  %v8384_v56 = vld [vmem:[#allocation2 + $0x4c] sm:$0xf]  ;;  %v8501_v61 = vor.u32 %v9149_v55, %v8500_v53 }
 0x11c   : > { %2424 = vrot.lane.b32.xlu2 %v8229_v57, %s10060_s29  ;;  %v640_v58 = vpop.f32.mrf.mxu2  ;;  %v544_v60 = vpop.f32.mrf.mxu0  ;;  %v9126_v57 = vld [vmem:[#allocation2 + $0x54] sm:$0xf0] }
 0x11d   : > { %v677_v59 = vpack.c.bf16 %v640_v58, %v640_v58  ;;  %v593_v0 = vpop.f32.mrf.mxu1  ;;  %v8385_v62 = vor.u32 %v9126_v57, %v8384_v56 }
 0x11e   : > { %v678_v4 = vpack.c.bf16 %v593_v0, %v544_v60  ;;  %v9102_v60 = vld [vmem:[#allocation2 + $0x54] sm:$0xf0]  ;;  %v9134_v39 = vld [vmem:[#allocation2 + $0x58] sm:$0xf0] }
 0x11f   : > { %709 = vst [vmem:[#allocation2 + $0x68] sm:$0xf] %v677_v59  ;;  %v8264_v59 = vld [vmem:[#allocation2 + $0x4c] sm:$0xf]  ;;  %v8116_v53 = vld [vmem:[#allocation2 + $0x60] sm:$0xf] }
 0x120   : > { %710 = vst [vmem:[#allocation2 + $0x6c] sm:$0xff] %v678_v4  ;;  %v8265_v63 = vor.u32 %v9102_v60, %v8264_v59 }
 0x122   : > { %3884 = vrot.lane.b32.xlu1 %v8433_v6, %s10062_s11  ;;  %v9150_v6 = vld [vmem:[#allocation2 + $0x54] sm:$0xf0] }
 0x123   : > { %3284 = vrot.lane.b32.xlu0 %v8349_v7, %s10062_s11  ;;  %v8472_v7 = vld [vmem:[#allocation2 + $0x48] sm:$0xf]  ;;  %v8505_v12 = vor.u32 %v9150_v6, %v8504_v3 }
 0x124   : > { %2166 = vrot.lane.b32.xlu2 %v8197_v5, %s10061_s15  ;;  %v642_v8 = vpop.f32.mrf.mxu2  ;;  %v547_v10 = vpop.f32.mrf.mxu0 }
 0x125   : > { %v679_v9 = vpack.c.bf16 %v642_v8, %v642_v8  ;;  %v596_v14 = vpop.f32.mrf.mxu1  ;;  %v9142_v8 = vld [vmem:[#allocation2 + $0x50] sm:$0xf0] }
 0x126   : > { %v680_v18 = vpack.c.bf16 %v596_v14, %v547_v10  ;;  %v8352_v10 = vld [vmem:[#allocation2 + $0x48] sm:$0xf]  ;;  %v8473_v13 = vor.u32 %v9142_v8, %v8472_v7 }
 0x127   : > { %711 = vst [vmem:[#allocation2 + $0x74] sm:$0xf] %v679_v9  ;;  %v8353_v14 = vor.u32 %v9118_v11, %v8352_v10 }
 0x128   : > { %712 = vst [vmem:[#allocation2 + $0x78] sm:$0xff] %v680_v18  ;;  %v8200_v18 = vld [vmem:[#allocation2 + $0x50] sm:$0xf] }
 0x12a   : > { %1564 = vrot.lane.b32.xlu1 %v8109_v21, %s10061_s15  ;;  %v9086_v21 = vld [vmem:[#allocation2 + $0x58] sm:$0xf0] }
 0x12b   : > { %4144 = vrot.lane.b32.xlu0 %v8469_v20, %s10059_s24  ;;  %v8201_v27 = vor.u32 %v9086_v21, %v8200_v18  ;;  %v8628_v18 = vld [vmem:[#allocation2 + $0x64] sm:$0xf]  ;;  %v8084_v21 = vld [vmem:[#allocation2 + $0x68] sm:$0xf] }
 0x12c   : > { %3026 = vrot.lane.b32.xlu2 %v8317_v19, %s10060_s29  ;;  %v645_v22 = vpop.f32.mrf.mxu2  ;;  %v549_v24 = vpop.f32.mrf.mxu0 }
 0x12d   : > { %v681_v23 = vpack.c.bf16 %v645_v22, %v645_v22  ;;  %v598_v28 = vpop.f32.mrf.mxu1  ;;  %v8148_v22 = vld [vmem:[#allocation2 + $0x64] sm:$0xf] }
 0x12e   : > { %v682_v32 = vpack.c.bf16 %v598_v28, %v549_v24 }
 0x12f   : > { %713 = vst [vmem:[#allocation2 + $0x80] sm:$0xf] %v681_v23  ;;  %v9079_v23 = vld [vmem:[#allocation2 + $0x6c] sm:$0xf0]  ;;  %v8048_v7 = vld [vmem:[#allocation2 + $0x7c] sm:$0xf] }
 0x130   : > { %714 = vst [vmem:[#allocation2 + $0x84] sm:$0xff] %v682_v32  ;;  %v8149_v28 = vor.u32 %v9079_v23, %v8148_v22  ;;  %v8320_v32 = vld [vmem:[#allocation2 + $0x50] sm:$0xf]  ;;  %v9063_v22 = vld [vmem:[#allocation2 + $0x70] sm:$0xf0] }
 0x132   : > { %2480 = vrot.lane.b32.xlu1 %v8261_v35, %s10060_s29  ;;  %v8236_v35 = vld [vmem:[#allocation2 + $0x60] sm:$0xf] }
 0x133   : > { %3886 = vrot.lane.b32.xlu0 %v8437_v34, %s10062_s11 }
 0x134   : > { %1566 = vrot.lane.b32.xlu2 %v8113_v33, %s10061_s15  ;;  %v647_v36 = vpop.f32.mrf.mxu2  ;;  %v552_v38 = vpop.f32.mrf.mxu0  ;;  %v9110_v33 = vld [vmem:[#allocation2 + $0x58] sm:$0xf0] }
 0x135   : > { %v683_v37 = vpack.c.bf16 %v647_v36, %v647_v36  ;;  %v601_v40 = vpop.f32.mrf.mxu1  ;;  %v9095_v36 = vld [vmem:[#allocation2 + $0x68] sm:$0xf0]  ;;  %v8321_v41 = vor.u32 %v9110_v33, %v8320_v32 }
 0x136   : > { %v684_v44 = vpack.c.bf16 %v601_v40, %v552_v38  ;;  %v8440_v38 = vld [vmem:[#allocation2 + $0x50] sm:$0xf]  ;;  %v8237_v42 = vor.u32 %v9095_v36, %v8236_v35  ;;  %v8088_v3 = vld [vmem:[#allocation2 + $0x80] sm:$0xf]  ;;  %v8204_v35 = vld [vmem:[#allocation2 + $0x68] sm:$0xf] }
 0x137   : > { %715 = vst [vmem:[#allocation2 + $0x8c] sm:$0xf] %v683_v37  ;;  %v9056_v8 = vld [vmem:[#allocation2 + $0x84] sm:$0xf0]  ;;  %v8120_v36 = vld [vmem:[#allocation2 + $0x78] sm:$0xf] }
 0x138   : > { %716 = vst [vmem:[#allocation2 + $0x90] sm:$0xff] %v684_v44  ;;  %v8441_v44 = vor.u32 %v9134_v39, %v8440_v38  ;;  %v9087_v38 = vld [vmem:[#allocation2 + $0x70] sm:$0xf0]  ;;  %v8444_v39 = vld [vmem:[#allocation2 + $0x68] sm:$0xf] }
 0x13a   : > { %3340 = vrot.lane.b32.xlu1 %v8381_v47, %s10062_s11 }
 0x13b   : > { %2426 = vrot.lane.b32.xlu0 %v8233_v48, %s10060_s29 }
 0x13c   : > { %1622 = vrot.lane.b32.xlu2 %v8145_v49, %s10061_s15  ;;  %v650_v50 = vpop.f32.mrf.mxu2  ;;  %v554_v52 = vpop.f32.mrf.mxu0  ;;  %v8356_v49 = vld [vmem:[#allocation2 + $0x60] sm:$0xf] }
 0x13d   : > { %v685_v51 = vpack.c.bf16 %v650_v50, %v650_v50  ;;  %v603_v54 = vpop.f32.mrf.mxu1 }
 0x13e   : > { %v686_v58 = vpack.c.bf16 %v603_v54, %v554_v52  ;;  %v9119_v52 = vld [vmem:[#allocation2 + $0x68] sm:$0xf0] }
 0x13f   : > { %717 = vst [vmem:[#allocation2 + $0x98] sm:$0xf] %v685_v51  ;;  %v8052_v45 = vld [vmem:[#allocation2 + $0x94] sm:$0xf]  ;;  %v9071_v54 = vld [vmem:[#allocation2 + $0x68] sm:$0xf0] }
 0x140   : > { %718 = vst [vmem:[#allocation2 + $0x9c] sm:$0xff] %v686_v58  ;;  %v9064_v6 = vld [vmem:[#allocation2 + $0x88] sm:$0xf0] }
 0x141   : > { %v8089_v11 = vor.u32 %v9064_v6, %v8088_v3  ;;  %v9059_v6 = vld [vmem:[#allocation2 + $0x10] sm:$0xf0] }
 0x142   : > { %4200 = vrot.lane.b32.xlu1 %v8501_v61, %s10059_s24  ;;  %v8388_v61 = vld [vmem:[#allocation2 + $0x64] sm:$0xf] }
 0x143   : > { %3342 = vrot.lane.b32.xlu0 %v8385_v62, %s10062_s11  ;;  %v9127_v62 = vld [vmem:[#allocation2 + $0x6c] sm:$0xf0] }
 0x144   : > { %2482 = vrot.lane.b32.xlu2 %v8265_v63, %s10060_s29  ;;  %v652_v0 = vpop.f32.mrf.mxu2  ;;  %v557_v2 = vpop.f32.mrf.mxu0  ;;  %v8357_v63 = vor.u32 %v9119_v52, %v8356_v49 }
 0x145   : > { %v687_v1 = vpack.c.bf16 %v652_v0, %v652_v0  ;;  %v606_v5 = vpop.f32.mrf.mxu1  ;;  %v8117_v0 = vor.u32 %v9071_v54, %v8116_v53  ;;  %v8072_v53 = vld [vmem:[#allocation2 + $0x20] sm:$0xf]  ;;  %v9060_v54 = vld [vmem:[#allocation2 + $0x28] sm:$0xf0] }
 0x146   : > { %v10258_v4 = vpop.permute.xlu2 %1560  ;;  %v688_v9 = vpack.c.bf16 %v606_v5, %v557_v2  ;;  %v8092_v58 = vld [vmem:[#allocation2 + $0x98] sm:$0xf]  ;;  %v8389_v5 = vor.u32 %v9127_v62, %v8388_v61  ;;  %v9111_v61 = vld [vmem:[#allocation2 + $0x70] sm:$0xf0]  ;;  %v8152_v62 = vld [vmem:[#allocation2 + $0x7c] sm:$0xf] }
 0x147   : > { %719 = vst [vmem:[#allocation2 + $0xa4] sm:$0xf] %v687_v1  ;;  %v9057_v46 = vld [vmem:[#allocation2 + $0x9c] sm:$0xf0] }
 0x148   : > { %720 = vst [vmem:[#allocation2 + $0xa8] sm:$0xff] %v688_v9  ;;  %v8053_v55 = vor.u32 %v9057_v46, %v8052_v45  ;;  %v8076_v45 = vld [vmem:[#allocation2 + $0x38] sm:$0xf]  ;;  %v9061_v46 = vld [vmem:[#allocation2 + $0x40] sm:$0xf0] }
 0x149   : > { %v8077_v52 = vor.u32 %v9061_v46, %v8076_v45  ;;  %v8632_v45 = vld [vmem:[#allocation2 + $0x7c] sm:$0xf]  ;;  %v9176_v46 = vld [vmem:[#allocation2 + $0x84] sm:$0xf0] }
 0x14a   : > { %4202 = vrot.lane.b32.xlu1 %v8505_v12, %s10059_s24  ;;  %v896_v1 = vsel %vm852_vm0, %v8053_v55, 0  ;;  %v8508_v12 = vld [vmem:[#allocation2 + $0x64] sm:$0xf]  ;;  %v8040_v55 = vld [vmem:[#allocation2 + $0x4c] sm:$0xf] }
 0x14b   : > { %4146 = vrot.lane.b32.xlu0 %v8473_v13, %s10059_s24  ;;  %v8049_v13 = vor.u32 %v9056_v8, %v8048_v7 }
 0x14c   : > { %3286 = vrot.lane.b32.xlu2 %v8353_v14, %s10062_s11  ;;  %v655_v15 = vpop.f32.mrf.mxu2  ;;  %v559_v17 = vpop.f32.mrf.mxu0 }
 0x14d   : > { %v689_v16 = vpack.c.bf16 %v655_v15, %v655_v15  ;;  %v608_v20 = vpop.f32.mrf.mxu1  ;;  %v9151_v15 = vld [vmem:[#allocation2 + $0x6c] sm:$0xf0]  ;;  %v893_v25 = vsel %vm852_vm0, %v8049_v13, 0 }
 0x14e   : > { %v10263_v19 = vpop.permute.xlu2 %1616  ;;  %v690_v24 = vpack.c.bf16 %v608_v20, %v559_v17  ;;  %v9065_v59 = vld [vmem:[#allocation2 + $0xa0] sm:$0xf0]  ;;  %v9103_v17 = vld [vmem:[#allocation2 + $0x6c] sm:$0xf0]  ;;  %v8509_v23 = vor.u32 %v9151_v15, %v8508_v12 }
 0x14f   : > { %721 = vst [vmem:[#allocation2 + $0xb0] sm:$0xf] %v689_v16  ;;  %v8056_v37 = vld [vmem:[#allocation2 + $0xac] sm:$0xf]  ;;  %v8093_v2 = vor.u32 %v9065_v59, %v8092_v58  ;;  %v8268_v16 = vld [vmem:[#allocation2 + $0x64] sm:$0xf] }
 0x150   : > { %722 = vst [vmem:[#allocation2 + $0xb4] sm:$0xff] %v690_v24  ;;  %v9175_v20 = vld [vmem:[#allocation2 + $0x6c] sm:$0xf0]  ;;  %v8269_v24 = vor.u32 %v9103_v17, %v8268_v16  ;;  %v8036_v16 = vld [vmem:[#allocation2 + $0x34] sm:$0xf] }
 0x151   : > { %v8629_v26 = vor.u32 %v9175_v20, %v8628_v18  ;;  %v9053_v17 = vld [vmem:[#allocation2 + $0x3c] sm:$0xf0] }
 0x152   : > { %1624 = vrot.lane.b32.xlu1 %v8149_v28, %s10061_s15  ;;  %v8080_v28 = vld [vmem:[#allocation2 + $0x50] sm:$0xf] }
 0x153   : > { %2168 = vrot.lane.b32.xlu0 %v8201_v27, %s10061_s15  ;;  %v8085_v27 = vor.u32 %v9063_v22, %v8084_v21  ;;  %v8272_v21 = vld [vmem:[#allocation2 + $0x7c] sm:$0xf]  ;;  %v9104_v22 = vld [vmem:[#allocation2 + $0x84] sm:$0xf0] }
 0x154   : > { %5062 = vrot.lane.b32.xlu2 %v8625_v29, %s10063_s12  ;;  %v657_v30 = vpop.f32.mrf.mxu2  ;;  %v9062_v29 = vld [vmem:[#allocation2 + $0x58] sm:$0xf0] }
 0x155   : > { %v691_v31 = vpack.c.bf16 %v657_v30, %v657_v30  ;;  %v8044_v30 = vld [vmem:[#allocation2 + $0x64] sm:$0xf] }
 0x156   : > { %v10268_v34 = vpop.permute.xlu2 %2476  ;;  %v8096_v48 = vld [vmem:[#allocation2 + $0xb0] sm:$0xf] }
 0x157   : > { %723 = vst [vmem:[#allocation2 + $0xbc] sm:$0xf] %v691_v31  ;;  %v9058_v40 = vld [vmem:[#allocation2 + $0xb4] sm:$0xf0]  ;;  %v9055_v31 = vld [vmem:[#allocation2 + $0x6c] sm:$0xf0] }
 0x158   : > { %v8057_v43 = vor.u32 %v9058_v40, %v8056_v37  ;;  %v9072_v37 = vld [vmem:[#allocation2 + $0x80] sm:$0xf0]  ;;  %v9135_v40 = vld [vmem:[#allocation2 + $0x70] sm:$0xf0] }
 0x15a   : > { %2428 = vrot.lane.b32.xlu1 %v8237_v42, %s10060_s29  ;;  %v899_v47 = vsel %vm852_vm0, %v8057_v43, 0  ;;  %v8045_v42 = vor.u32 %v9055_v31, %v8044_v30 }
 0x15b   : > { %3028 = vrot.lane.b32.xlu0 %v8321_v41, %s10060_s29  ;;  %901 = vmatpush.bf16.xpose.msra.mxu3 %v899_v47  ;;  %v8081_v41 = vor.u32 %v9062_v29, %v8080_v28  ;;  %v8205_v47 = vor.u32 %v9087_v38, %v8204_v35  ;;  %v8273_v28 = vor.u32 %v9104_v22, %v8272_v21  ;;  %v8124_v21 = vld [vmem:[#allocation2 + $0x90] sm:$0xf]  ;;  %v9073_v22 = vld [vmem:[#allocation2 + $0x98] sm:$0xf0] }
 0x15c   : > { %3888 = vrot.lane.b32.xlu2 %v8441_v44, %s10062_s11  ;;  %v10274_v50 = vpop.permute.xlu1 %4140  ;;  %v8121_v44 = vor.u32 %v9072_v37, %v8120_v36  ;;  %v890_v49 = vsel %vm852_vm0, %v8045_v42, 0  ;;  %v8032_v36 = vld [vmem:[#allocation2 + $0x1c] sm:$0xf]  ;;  %v9052_v37 = vld [vmem:[#allocation2 + $0x24] sm:$0xf0] }
 0x15d   : > { %13949 = vst [vmem:[#allocation17_spill] sm:$0xff] %v10274_v50  ;;  %v10276_v51 = vpop.permute.xlu0 %2420  ;;  %v9088_v42 = vld [vmem:[#allocation2 + $0x88] sm:$0xf0]  ;;  %v9166_v50 = vld [vmem:[#allocation2 + $0x50] sm:$0xf0] }
 0x15e   : > { %v10278_v56 = vpop.permute.xlu2 %3280  ;;  %v9066_v57 = vld [vmem:[#allocation2 + $0xb8] sm:$0xf0] }
 0x15f   : > { %13950 = vst [vmem:[#allocation18_spill] sm:$0xff] %v10278_v56  ;;  %v8097_v60 = vor.u32 %v9066_v57, %v8096_v48  ;;  %v8445_v48 = vor.u32 %v9135_v40, %v8444_v39  ;;  %v9054_v57 = vld [vmem:[#allocation2 + $0x54] sm:$0xf0]  ;;  %v8392_v40 = vld [vmem:[#allocation2 + $0x7c] sm:$0xf] }
 0x160   : > { %v8041_v3 = vor.u32 %v9054_v57, %v8040_v55 }
 0x161   : > { %1390 = vmatpush.bf16.msrb.mxu0 %v8097_v60  ;;  %v8324_v60 = vld [vmem:[#allocation2 + $0x68] sm:$0xf] }
 0x162   : > { %3288 = vrot.lane.b32.xlu1 %v8357_v63, %s10062_s11  ;;  %v9080_v63 = vld [vmem:[#allocation2 + $0x84] sm:$0xf0]  ;;  %v8325_v7 = vor.u32 %v9111_v61, %v8324_v60  ;;  %v887_v13 = vsel %vm852_vm0, %v8041_v3, 0  ;;  %v8448_v60 = vld [vmem:[#allocation2 + $0x80] sm:$0xf] }
 0x163   : > { %1568 = vrot.lane.b32.xlu0 %v8117_v0, %s10061_s15  ;;  %902 = vmatpush.bf16.xpose.msra.mxu3 %v896_v1  ;;  %v8073_v0 = vor.u32 %v9060_v54, %v8072_v53  ;;  %v8240_v1 = vld [vmem:[#allocation2 + $0x78] sm:$0xf]  ;;  %v8153_v8 = vor.u32 %v9080_v63, %v8152_v62  ;;  %v9051_v54 = vld [vmem:[#allocation2 + $0xc] sm:$0xf0]  ;;  %v8028_v61 = vld [vmem:[#allocation2 + $0x4] sm:$0xf] }
 0x164   : > { %3344 = vrot.lane.b32.xlu2 %v8389_v5, %s10062_s11  ;;  %v10284_v9 = vpop.permute.xlu1 %2162  ;;  %v8068_v5 = vld [vmem:[#allocation2 + $0x8] sm:$0xf]  ;;  %v9136_v63 = vld [vmem:[#allocation2 + $0x88] sm:$0xf0]  ;;  %v9081_v3 = vld [vmem:[#allocation2 + $0x9c] sm:$0xf0] }
 0x165   : > { %1391 = vmatpush.bf16.msrb.mxu0 %v8093_v2  ;;  %v10286_v10 = vpop.permute.xlu0 %3336  ;;  %v9096_v2 = vld [vmem:[#allocation2 + $0x80] sm:$0xf0]  ;;  %v8069_v15 = vor.u32 %v9059_v6, %v8068_v5  ;;  %v8029_v5 = vor.u32 %v9051_v54, %v8028_v61  ;;  %v8449_v6 = vor.u32 %v9136_v63, %v8448_v60  ;;  %v8636_v60 = vld [vmem:[#allocation2 + $0x94] sm:$0xf]  ;;  %v9177_v61 = vld [vmem:[#allocation2 + $0x9c] sm:$0xf0] }
 0x166   : > { %v10288_v14 = vpop.permute.xlu2 %3882  ;;  %v8241_v12 = vor.u32 %v9096_v2, %v8240_v1  ;;  %v9112_v1 = vld [vmem:[#allocation2 + $0x88] sm:$0xf0]  ;;  %v8156_v2 = vld [vmem:[#allocation2 + $0x94] sm:$0xf]  ;;  %v8248_v63 = vld [vmem:[#allocation2 + $0xa8] sm:$0xf] }
 0x169   : > { %1392 = vmatpush.bf16.msrb.mxu0 %v8089_v11 }
 0x16a   : > { %4204 = vrot.lane.b32.xlu1 %v8509_v23, %s10059_s24  ;;  %v8360_v23 = vld [vmem:[#allocation2 + $0x78] sm:$0xf] }
 0x16b   : > { %2484 = vrot.lane.b32.xlu0 %v8269_v24, %s10060_s29  ;;  %903 = vmatpush.bf16.xpose.msra.mxu3 %v893_v25  ;;  %v9120_v24 = vld [vmem:[#allocation2 + $0x80] sm:$0xf0]  ;;  %v8512_v25 = vld [vmem:[#allocation2 + $0x7c] sm:$0xf] }
 0x16c   : > { %5064 = vrot.lane.b32.xlu2 %v8629_v26, %s10063_s12  ;;  %v10296_v33 = vpop.permute.xlu1 %1618  ;;  %v9152_v26 = vld [vmem:[#allocation2 + $0x84] sm:$0xf0]  ;;  %v8361_v29 = vor.u32 %v9120_v24, %v8360_v23  ;;  %v8276_v23 = vld [vmem:[#allocation2 + $0x94] sm:$0xf]  ;;  %v9105_v24 = vld [vmem:[#allocation2 + $0x9c] sm:$0xf0] }
 0x16d   : > { %1393 = vmatpush.bf16.msrb.mxu0 %v8085_v27  ;;  %v10294_v32 = vpop.permute.xlu0 %3022  ;;  %v8037_v27 = vor.u32 %v9053_v17, %v8036_v16  ;;  %v8513_v30 = vor.u32 %v9152_v26, %v8512_v25  ;;  %v8244_v16 = vld [vmem:[#allocation2 + $0x90] sm:$0xf]  ;;  %v9097_v17 = vld [vmem:[#allocation2 + $0x98] sm:$0xf0]  ;;  %v9043_v25 = vld [vmem:[#allocation2 + $0x8] sm:$0xf0] }
 0x16e   : > { %v10298_v43 = vpop.permute.xlu2 %3338 }
 0x16f   : > { %v884_v31 = vsel %vm852_vm0, %v8037_v27, 0  ;;  %v8245_v27 = vor.u32 %v9097_v17, %v8244_v16 }
 0x171   : > { %1394 = vmatpush.bf16.msrb.mxu0 %v8081_v41  ;;  %v8208_v41 = vld [vmem:[#allocation2 + $0x80] sm:$0xf] }
 0x172   : > { %2170 = vrot.lane.b32.xlu1 %v8205_v47, %s10061_s15  ;;  %v8033_v47 = vor.u32 %v9052_v37, %v8032_v36 }
 0x173   : > { %3890 = vrot.lane.b32.xlu0 %v8445_v48, %s10062_s11  ;;  %904 = vmatpush.bf16.xpose.msra.mxu3 %v890_v49  ;;  %v8209_v48 = vor.u32 %v9088_v42, %v8208_v41  ;;  %v9129_v41 = vld [vmem:[#allocation2 + $0x9c] sm:$0xf0]  ;;  %v8160_v42 = vld [vmem:[#allocation2 + $0xac] sm:$0xf] }
 0x174   : > { %1570 = vrot.lane.b32.xlu2 %v8121_v44, %s10061_s15  ;;  %v10304_v58 = vpop.permute.xlu1 %2422  ;;  %v9128_v44 = vld [vmem:[#allocation2 + $0x84] sm:$0xf0]  ;;  %v881_v53 = vsel %vm852_vm0, %v8033_v47, 0 }
 0x175   : > { %1395 = vmatpush.bf16.msrb.mxu0 %v8077_v52  ;;  %v10306_v59 = vpop.permute.xlu0 %1562  ;;  %v8393_v49 = vor.u32 %v9128_v44, %v8392_v40  ;;  %v8633_v52 = vor.u32 %v9176_v46, %v8632_v45  ;;  %v8396_v40 = vld [vmem:[#allocation2 + $0x94] sm:$0xf]  ;;  %v9082_v44 = vld [vmem:[#allocation2 + $0xb4] sm:$0xf0]  ;;  %v8364_v45 = vld [vmem:[#allocation2 + $0x90] sm:$0xf] }
 0x176   : > { %v10308_v11 = vpop.permute.xlu2 %2424  ;;  %v9121_v46 = vld [vmem:[#allocation2 + $0x98] sm:$0xf0]  ;;  %v8397_v47 = vor.u32 %v9129_v41, %v8396_v40 }
 0x177   : > { %13951 = vst [vmem:[#allocation19_spill] sm:$0xff] %v10308_v11  ;;  %v8604_v11 = vld [vmem:[#allocation2 + $0x90] sm:$0xf] }
 0x179   : > { %1396 = vmatpush.bf16.msrb.mxu0 %v8073_v0  ;;  %v8328_v0 = vld [vmem:[#allocation2 + $0x80] sm:$0xf] }
 0x17a   : > { %3030 = vrot.lane.b32.xlu1 %v8325_v7, %s10060_s29  ;;  %v8329_v7 = vor.u32 %v9112_v1, %v8328_v0  ;;  %v9098_v0 = vld [vmem:[#allocation2 + $0xb0] sm:$0xf0] }
 0x17b   : > { %1626 = vrot.lane.b32.xlu0 %v8153_v8, %s10061_s15  ;;  %905 = vmatpush.bf16.xpose.msra.mxu3 %v887_v13  ;;  %v8157_v8 = vor.u32 %v9081_v3, %v8156_v2  ;;  %v8516_v1 = vld [vmem:[#allocation2 + $0x94] sm:$0xf]  ;;  %v9153_v2 = vld [vmem:[#allocation2 + $0x9c] sm:$0xf0]  ;;  %v9044_v3 = vld [vmem:[#allocation2 + $0x20] sm:$0xf0] }
 0x17c   : > { %2430 = vrot.lane.b32.xlu2 %v8241_v12, %s10060_s29  ;;  %v10314_v18 = vpop.permute.xlu1 %3282  ;;  %v878_v12 = vsel %vm852_vm0, %v8029_v5, 0  ;;  %v8637_v5 = vor.u32 %v9177_v61, %v8636_v60  ;;  %v9045_v60 = vld [vmem:[#allocation2 + $0x38] sm:$0xf0] }
 0x17d   : > { %1397 = vmatpush.bf16.msrb.mxu0 %v8069_v15  ;;  %13952 = vst [vmem:[#allocation20_spill] sm:$0xff] %v10314_v18  ;;  %v10316_v20 = vpop.permute.xlu0 %2478  ;;  %v8616_v61 = vld [vmem:[#allocation2 + $0x1c] sm:$0xf]  ;;  %v9202_v18 = vld [vmem:[#allocation2 + $0xb4] sm:$0xf0] }
 0x17e   : > { %v10321_v35 = vpop.permute.xlu2 %2166 }
 0x182   : > { %2486 = vrot.lane.b32.xlu1 %v8273_v28, %s10060_s29  ;;  %v8125_v28 = vor.u32 %v9073_v22, %v8124_v21  ;;  %v8368_v22 = vld [vmem:[#allocation2 + $0xa8] sm:$0xf] }
 0x183   : > { %3290 = vrot.lane.b32.xlu0 %v8361_v29, %s10062_s11  ;;  %906 = vmatpush.bf16.xpose.msra.mxu3 %v884_v31  ;;  %v7996_v29 = vld [vmem:[#allocation2] sm:$0xf] }
 0x184   : > { %4206 = vrot.lane.b32.xlu2 %v8513_v30, %s10059_s24  ;;  %v10324_v38 = vpop.permute.xlu1 %4142  ;;  %v8277_v30 = vor.u32 %v9105_v24, %v8276_v23  ;;  %v7997_v31 = vor.u32 %v9043_v25, %v7996_v29  ;;  %v8212_v23 = vld [vmem:[#allocation2 + $0x98] sm:$0xf]  ;;  %v9089_v24 = vld [vmem:[#allocation2 + $0xa0] sm:$0xf0]  ;;  %v9122_v25 = vld [vmem:[#allocation2 + $0xb0] sm:$0xf0] }
 0x185   : > { %13953 = vst [vmem:[#allocation21_spill] sm:$0xff] %v10324_v38  ;;  %v10326_v39 = vpop.permute.xlu0 %2164  ;;  %v8213_v29 = vor.u32 %v9089_v24, %v8212_v23  ;;  %v9130_v23 = vld [vmem:[#allocation2 + $0xb4] sm:$0xf0]  ;;  %v9146_v38 = vld [vmem:[#allocation2 + $0xb0] sm:$0xf0] }
 0x186   : > { %v10336_v62 = vpop.permute.xlu2 %3026 }
 0x18a   : > { %3346 = vrot.lane.b32.xlu1 %v8393_v49, %s10062_s11 }
 0x18b   : > { %5066 = vrot.lane.b32.xlu0 %v8633_v52, %s10063_s12  ;;  %907 = vmatpush.bf16.xpose.msra.mxu3 %v881_v53  ;;  %v8365_v52 = vor.u32 %v9121_v46, %v8364_v45  ;;  %v8128_v45 = vld [vmem:[#allocation2 + $0xa8] sm:$0xf]  ;;  %v9074_v46 = vld [vmem:[#allocation2 + $0xb0] sm:$0xf0] }
 0x18c   : > { %2172 = vrot.lane.b32.xlu2 %v8209_v48, %s10061_s15  ;;  %v10332_v55 = vpop.permute.xlu1 %3024  ;;  %v8161_v48 = vor.u32 %v9082_v44, %v8160_v42  ;;  %v9172_v42 = vld [vmem:[#allocation2 + $0x24] sm:$0xf0] }
 0x18d   : > { %v10334_v57 = vpop.permute.xlu0 %1620 }
 0x18e   : > { %v10346_v26 = vpop.permute.xlu2 %1566 }
 0x192   : > { %3892 = vrot.lane.b32.xlu1 %v8449_v6, %s10062_s11  ;;  %v8249_v6 = vor.u32 %v9098_v0, %v8248_v63  ;;  %v8617_v63 = vor.u32 %v9172_v42, %v8616_v61  ;;  %v8129_v0 = vor.u32 %v9074_v46, %v8128_v45  ;;  %v9148_v45 = vld [vmem:[#allocation2 + $0x24] sm:$0xf0]  ;;  %v8496_v61 = vld [vmem:[#allocation2 + $0x1c] sm:$0xf] }
 0x193   : > { %3032 = vrot.lane.b32.xlu0 %v8329_v7, %s10060_s29  ;;  %908 = vmatpush.bf16.xpose.msra.mxu3 %v878_v12  ;;  %v8000_v7 = vld [vmem:[#allocation2 + $0x18] sm:$0xf]  ;;  %v8008_v46 = vld [vmem:[#allocation2 + $0x48] sm:$0xf] }
 0x194   : > { %1628 = vrot.lane.b32.xlu2 %v8157_v8, %s10061_s15  ;;  %v10342_v13 = vpop.permute.xlu1 %3884  ;;  %v8517_v8 = vor.u32 %v9153_v2, %v8516_v1  ;;  %v8001_v12 = vor.u32 %v9044_v3, %v8000_v7  ;;  %v8216_v3 = vld [vmem:[#allocation2 + $0xb0] sm:$0xf] }
 0x195   : > { %v10344_v15 = vpop.permute.xlu0 %3284 }
 0x196   : > { %13954 = vst [vmem:[#allocation22_spill] sm:$0xff] %v10344_v15  ;;  %v10356_v49 = vpop.permute.xlu2 %1622  ;;  %v8760_v15 = vld [vmem:[#allocation2 + $0xac] sm:$0xf] }
 0x19a   : > { %1572 = vrot.lane.b32.xlu1 %v8125_v28, %s10061_s15  ;;  %8058 = vmatmul.msk.bf16.vlgmr.msra.gmra.mxu3 %vm852_vm0, %v7997_v31  ;;  %v9113_v28 = vld [vmem:[#allocation2 + $0xa0] sm:$0xf0] }
 0x19b   : > { %2432 = vrot.lane.b32.xlu0 %v8245_v27, %s10060_s29  ;;  %v8332_v27 = vld [vmem:[#allocation2 + $0x98] sm:$0xf] }
 0x19c   : > { %2488 = vrot.lane.b32.xlu2 %v8277_v30, %s10060_s29  ;;  %v10354_v37 = vpop.permute.xlu1 %1564  ;;  %v8369_v30 = vor.u32 %v9122_v25, %v8368_v22  ;;  %v8333_v31 = vor.u32 %v9113_v28, %v8332_v27  ;;  %v8400_v22 = vld [vmem:[#allocation2 + $0xac] sm:$0xf] }
 0x19d   : > { %v10352_v36 = vpop.permute.xlu0 %4144  ;;  %v8401_v28 = vor.u32 %v9130_v23, %v8400_v22  ;;  %v8620_v22 = vld [vmem:[#allocation2 + $0x34] sm:$0xf]  ;;  %v9173_v23 = vld [vmem:[#allocation2 + $0x3c] sm:$0xf0] }
 0x19e   : > { %13955 = vst [vmem:[#allocation23_spill] sm:$0xff] %v10352_v36  ;;  %v10367_v16 = vpop.permute.xlu2 %2482  ;;  %v8016_v36 = vld [vmem:[#allocation2 + $0x78] sm:$0xf] }
 0x1a2   : > { %1630 = vrot.lane.b32.xlu1 %v8161_v48, %s10061_s15  ;;  %v8452_v48 = vld [vmem:[#allocation2 + $0x98] sm:$0xf] }
 0x1a3   : > { %3348 = vrot.lane.b32.xlu0 %v8397_v47, %s10062_s11  ;;  %v8004_v47 = vld [vmem:[#allocation2 + $0x30] sm:$0xf] }
 0x1a4   : > { %3292 = vrot.lane.b32.xlu2 %v8365_v52, %s10062_s11  ;;  %v10363_v54 = vpop.permute.xlu1 %2480  ;;  %v9137_v52 = vld [vmem:[#allocation2 + $0xa0] sm:$0xf0]  ;;  %v8005_v2 = vor.u32 %v9045_v60, %v8004_v47  ;;  %v8520_v47 = vld [vmem:[#allocation2 + $0xac] sm:$0xf]  ;;  %v9046_v60 = vld [vmem:[#allocation2 + $0x50] sm:$0xf0] }
 0x1a5   : > { %v10361_v53 = vpop.permute.xlu0 %3886  ;;  %v8453_v1 = vor.u32 %v9137_v52, %v8452_v48  ;;  %v9154_v48 = vld [vmem:[#allocation2 + $0xb4] sm:$0xf0] }
 0x1a6   : > { %v10382_v44 = vpop.permute.xlu2 %3286 }
 0x1a7   : > { %13958 = vst [vmem:[#allocation26_spill] sm:$0xff] %v10382_v44  ;;  %v8592_v44 = vld [vmem:[#allocation2 + $0x48] sm:$0xf] }
 0x1aa   : > { %2434 = vrot.lane.b32.xlu1 %v8249_v6, %s10060_s29  ;;  %8059 = vmatmul.msk.bf16.gmra.mxu3 %vm852_vm0, %v8001_v12  ;;  %v9106_v12 = vld [vmem:[#allocation2 + $0xb4] sm:$0xf0] }
 0x1ab   : > { %5068 = vrot.lane.b32.xlu0 %v8637_v5, %s10063_s12  ;;  %v9090_v5 = vld [vmem:[#allocation2 + $0xb8] sm:$0xf0] }
 0x1ac   : > { %4208 = vrot.lane.b32.xlu2 %v8517_v8, %s10059_s24  ;;  %v10371_v17 = vpop.permute.xlu1 %3340  ;;  %v8280_v8 = vld [vmem:[#allocation2 + $0xac] sm:$0xf]  ;;  %v8217_v24 = vor.u32 %v9090_v5, %v8216_v3 }
 0x1ad   : > { %v10373_v21 = vpop.permute.xlu0 %2426  ;;  %v8281_v27 = vor.u32 %v9106_v12, %v8280_v8  ;;  %v9171_v8 = vld [vmem:[#allocation2 + $0xc] sm:$0xf0] }
 0x1ae   : > { %13956 = vst [vmem:[#allocation24_spill] sm:$0xff] %v10373_v21  ;;  %v10392_v25 = vpop.permute.xlu2 %5062  ;;  %v9147_v12 = vld [vmem:[#allocation2 + $0xc] sm:$0xf0]  ;;  %v9168_v21 = vld [vmem:[#allocation2 + $0x80] sm:$0xf0] }
 0x1af   : > { %13960 = vst [vmem:[#allocation28_spill] sm:$0xff] %v10392_v25  ;;  %v8600_v25 = vld [vmem:[#allocation2 + $0x78] sm:$0xf] }
 0x1b2   : > { %3294 = vrot.lane.b32.xlu1 %v8369_v30, %s10062_s11  ;;  %v9114_v30 = vld [vmem:[#allocation2 + $0xb8] sm:$0xf0] }
 0x1b3   : > { %2174 = vrot.lane.b32.xlu0 %v8213_v29, %s10061_s15  ;;  %v8336_v29 = vld [vmem:[#allocation2 + $0xb0] sm:$0xf] }
 0x1b4   : > { %3034 = vrot.lane.b32.xlu2 %v8333_v31, %s10060_s29  ;;  %v10378_v40 = vpop.permute.xlu1 %4200  ;;  %v8337_v52 = vor.u32 %v9114_v30, %v8336_v29  ;;  %v8621_v30 = vor.u32 %v9173_v23, %v8620_v22 }
 0x1b5   : > { %13957 = vst [vmem:[#allocation25_spill] sm:$0xff] %v10378_v40  ;;  %v10380_v41 = vpop.permute.xlu0 %3342  ;;  %v9199_v40 = vld [vmem:[#allocation2 + $0x6c] sm:$0xf0] }
 0x1ba   : > { %5058 = vrot.lane.b32.xlu1 %v8617_v63, %s10063_s12  ;;  %8060 = vmatmul.msk.bf16.gmra.mxu3 %vm852_vm0, %v8005_v2  ;;  %v8497_v63 = vor.u32 %v9148_v45, %v8496_v61  ;;  %v8009_v2 = vor.u32 %v9046_v60, %v8008_v46  ;;  %v9145_v60 = vld [vmem:[#allocation2 + $0x98] sm:$0xf0]  ;;  %v8640_v61 = vld [vmem:[#allocation2 + $0xac] sm:$0xf] }
 0x1bb   : > { %1574 = vrot.lane.b32.xlu0 %v8129_v0, %s10061_s15  ;;  %v10401_v0 = vpop.permute.xlu2 %3888 }
 0x1bc   : > { %3894 = vrot.lane.b32.xlu2 %v8453_v1, %s10062_s11  ;;  %v10388_v6 = vpop.permute.xlu1 %4202  ;;  %v8521_v1 = vor.u32 %v9154_v48, %v8520_v47  ;;  %v8476_v48 = vld [vmem:[#allocation2 + $0x60] sm:$0xf] }
 0x1bd   : > { %v10390_v7 = vpop.permute.xlu0 %4146 }
 0x1be   : > { %13959 = vst [vmem:[#allocation27_spill] sm:$0xff] %v10390_v7 }
 0x1c2   : > { %2176 = vrot.lane.b32.xlu1 %v8217_v24, %s10061_s15  ;;  %v8612_v24 = vld [vmem:[#allocation2 + $0x4] sm:$0xf] }
 0x1c3   : > { %2490 = vrot.lane.b32.xlu0 %v8281_v27, %s10060_s29  ;;  %v8492_v27 = vld [vmem:[#allocation2 + $0x4] sm:$0xf]  ;;  %v10413_v45 = vpop.permute.xlu2 %3344 }
 0x1c4   : > { %3350 = vrot.lane.b32.xlu2 %v8401_v28, %s10062_s11  ;;  %v10399_v42 = vpop.permute.xlu1 %1624  ;;  %v8613_v28 = vor.u32 %v9171_v8, %v8612_v24  ;;  %v8493_v29 = vor.u32 %v9147_v12, %v8492_v27  ;;  %v9047_v8 = vld [vmem:[#allocation2 + $0x68] sm:$0xf0]  ;;  %v8456_v27 = vld [vmem:[#allocation2 + $0xb0] sm:$0xf] }
 0x1c5   : > { %v10397_v31 = vpop.permute.xlu0 %2168 }
 0x1ca   : > { %3036 = vrot.lane.b32.xlu1 %v8337_v52, %s10060_s29  ;;  %8061 = vmatmul.msk.bf16.gmra.mxu3 %vm852_vm0, %v8009_v2  ;;  %v8484_v52 = vld [vmem:[#allocation2 + $0x90] sm:$0xf]  ;;  %v8012_v2 = vld [vmem:[#allocation2 + $0x60] sm:$0xf] }
 0x1cb   : > { %4198 = vrot.lane.b32.xlu0 %v8497_v63, %s10059_s24  ;;  %v9178_v63 = vld [vmem:[#allocation2 + $0xb4] sm:$0xf0]  ;;  %v8485_v12 = vor.u32 %v9145_v60, %v8484_v52  ;;  %v8013_v24 = vor.u32 %v9047_v8, %v8012_v2  ;;  %v10428_v7 = vpop.permute.xlu2 %5064  ;;  %v9164_v52 = vld [vmem:[#allocation2 + $0x20] sm:$0xf0] }
 0x1cc   : > { %4210 = vrot.lane.b32.xlu2 %v8521_v1, %s10059_s24  ;;  %v10409_v5 = vpop.permute.xlu1 %2428  ;;  %v9143_v1 = vld [vmem:[#allocation2 + $0x68] sm:$0xf0]  ;;  %v8641_v22 = vor.u32 %v9178_v63, %v8640_v61  ;;  %13963 = vst [vmem:[#allocation31_spill] sm:$0xff] %v10428_v7  ;;  %v8480_v60 = vld [vmem:[#allocation2 + $0x78] sm:$0xf] }
 0x1cd   : > { %v10407_v3 = vpop.permute.xlu0 %3028  ;;  %13961 = vst [vmem:[#allocation29_spill] sm:$0xff] %v10409_v5  ;;  %v8477_v23 = vor.u32 %v9143_v1, %v8476_v48  ;;  %v9144_v48 = vld [vmem:[#allocation2 + $0x80] sm:$0xf0]  ;;  %v8584_v63 = vld [vmem:[#allocation2 + $0x18] sm:$0xf] }
 0x1ce   : > { %v8585_v1 = vor.u32 %v9164_v52, %v8584_v63  ;;  %v8481_v2 = vor.u32 %v9144_v48, %v8480_v60  ;;  %v8580_v52 = vld [vmem:[#allocation2] sm:$0xf]  ;;  %v8868_v5 = vld [vmem:[#allocation2 + $0x64] sm:$0xf]  ;;  %v9195_v7 = vld [vmem:[#allocation2 + $0xc] sm:$0xf0] }
 0x1d2   : > { %5056 = vrot.lane.b32.xlu1 %v8613_v28, %s10063_s12  ;;  %v9138_v28 = vld [vmem:[#allocation2 + $0xb8] sm:$0xf0] }
 0x1d3   : > { %4196 = vrot.lane.b32.xlu0 %v8493_v29, %s10059_s24  ;;  %v8457_v61 = vor.u32 %v9138_v28, %v8456_v27  ;;  %v9048_v27 = vld [vmem:[#allocation2 + $0x80] sm:$0xf0]  ;;  %v10437_v28 = vpop.permute.xlu2 %1570 }
 0x1d4   : > { %5060 = vrot.lane.b32.xlu2 %v8621_v30, %s10063_s12  ;;  %v10416_v46 = vpop.permute.xlu1 %3288  ;;  %13964 = vst [vmem:[#allocation32_spill] sm:$0xff] %v10437_v28  ;;  %v9223_v28 = vld [vmem:[#allocation2 + $0x6c] sm:$0xf0] }
 0x1d5   : > { %13962 = vst [vmem:[#allocation30_spill] sm:$0xff] %v10416_v46  ;;  %v10418_v47 = vpop.permute.xlu0 %1568  ;;  %v8488_v46 = vld [vmem:[#allocation2 + $0xa8] sm:$0xf] }
 0x1d6   : > { %v8489_v63 = vor.u32 %v9146_v38, %v8488_v46  ;;  %v8593_v38 = vor.u32 %v9166_v50, %v8592_v44  ;;  %v9226_v50 = vld [vmem:[#allocation2 + $0xb4] sm:$0xf0]  ;;  %v9049_v44 = vld [vmem:[#allocation2 + $0x98] sm:$0xf0] }
 0x1da   : > { %4152 = vrot.lane.b32.xlu1 %v8485_v12, %s10059_s24  ;;  %8062 = vmatmul.msk.bf16.gmra.mxu3 %vm852_vm0, %v8013_v24  ;;  %v9165_v24 = vld [vmem:[#allocation2 + $0x38] sm:$0xf0] }
 0x1db   : > { %5070 = vrot.lane.b32.xlu0 %v8641_v22, %s10063_s12  ;;  %v9163_v22 = vld [vmem:[#allocation2 + $0x8] sm:$0xf0]  ;;  %v10447_v46 = vpop.permute.xlu2 %2430 }
 0x1dc   : > { %4148 = vrot.lane.b32.xlu2 %v8477_v23, %s10059_s24  ;;  %v10424_v29 = vpop.permute.xlu1 %4204  ;;  %v8588_v23 = vld [vmem:[#allocation2 + $0x30] sm:$0xf]  ;;  %v8581_v48 = vor.u32 %v9163_v22, %v8580_v52  ;;  %v9167_v22 = vld [vmem:[#allocation2 + $0x68] sm:$0xf0]  ;;  %13965 = vst [vmem:[#allocation33_spill] sm:$0xff] %v10447_v46 }
 0x1dd   : > { %v10426_v30 = vpop.permute.xlu0 %2484  ;;  %v8589_v60 = vor.u32 %v9165_v24, %v8588_v23  ;;  %v8596_v23 = vld [vmem:[#allocation2 + $0x60] sm:$0xf]  ;;  %v8864_v46 = vld [vmem:[#allocation2 + $0x4c] sm:$0xf] }
 0x1de   : > { %v8597_v24 = vor.u32 %v9167_v22, %v8596_v23 }
 0x1e2   : > { %5002 = vrot.lane.b32.xlu1 %v8585_v1, %s10063_s12 }
 0x1e3   : > { %3896 = vrot.lane.b32.xlu0 %v8457_v61, %s10062_s11  ;;  %v8017_v61 = vor.u32 %v9048_v27, %v8016_v36  ;;  %v8761_v36 = vor.u32 %v9202_v18, %v8760_v15  ;;  %v9200_v18 = vld [vmem:[#allocation2 + $0x84] sm:$0xf0]  ;;  %v8020_v15 = vld [vmem:[#allocation2 + $0x90] sm:$0xf] }
 0x1e4   : > { %4150 = vrot.lane.b32.xlu2 %v8481_v2, %s10059_s24  ;;  %v10433_v8 = vpop.permute.xlu1 %2170  ;;  %v8021_v56 = vor.u32 %v9049_v44, %v8020_v15 }
 0x1e5   : > { %v10435_v12 = vpop.permute.xlu0 %3890 }
 0x1ea   : > { %5004 = vrot.lane.b32.xlu1 %v8589_v60, %s10063_s12  ;;  %8063 = vmatmul.msk.bf16.gmra.mxu3 %vm852_vm0, %v8017_v61  ;;  %v8752_v60 = vld [vmem:[#allocation2 + $0x7c] sm:$0xf]  ;;  %v8880_v61 = vld [vmem:[#allocation2 + $0xac] sm:$0xf] }
 0x1eb   : > { %5000 = vrot.lane.b32.xlu0 %v8581_v48, %s10063_s12  ;;  %v8876_v48 = vld [vmem:[#allocation2 + $0x94] sm:$0xf]  ;;  %v8881_v22 = vor.u32 %v9226_v50, %v8880_v61  ;;  %v8872_v61 = vld [vmem:[#allocation2 + $0x7c] sm:$0xf]  ;;  %v9224_v50 = vld [vmem:[#allocation2 + $0x84] sm:$0xf0] }
 0x1ec   : > { %4154 = vrot.lane.b32.xlu2 %v8489_v63, %s10059_s24  ;;  %v10443_v1 = vpop.permute.xlu1 %3030  ;;  %v9225_v63 = vld [vmem:[#allocation2 + $0x9c] sm:$0xf0]  ;;  %v8873_v44 = vor.u32 %v9224_v50, %v8872_v61  ;;  %v8601_v61 = vor.u32 %v9168_v21, %v8600_v25  ;;  %v8869_v50 = vor.u32 %v9223_v28, %v8868_v5  ;;  %v8732_v25 = vld [vmem:[#allocation2 + $0x4] sm:$0xf] }
 0x1ed   : > { %v10445_v2 = vpop.permute.xlu0 %1626  ;;  %v8877_v23 = vor.u32 %v9225_v63, %v8876_v48  ;;  %v9222_v48 = vld [vmem:[#allocation2 + $0x54] sm:$0xf0]  ;;  %v8756_v63 = vld [vmem:[#allocation2 + $0x94] sm:$0xf]  ;;  %v8733_v5 = vor.u32 %v9195_v7, %v8732_v25  ;;  %v8820_v7 = vld [vmem:[#allocation2] sm:$0xf] }
 0x1f2   : > { %5006 = vrot.lane.b32.xlu1 %v8593_v38, %s10063_s12  ;;  %v8753_v38 = vor.u32 %v9200_v18, %v8752_v60  ;;  %v9201_v60 = vld [vmem:[#allocation2 + $0x9c] sm:$0xf0]  ;;  %v8865_v18 = vor.u32 %v9222_v48, %v8864_v46  ;;  %v8024_v46 = vld [vmem:[#allocation2 + $0xa8] sm:$0xf]  ;;  %v9050_v48 = vld [vmem:[#allocation2 + $0xb0] sm:$0xf0] }
 0x1f3   : > { %5930 = vrot.lane.b32.xlu0 %v8761_v36, %s10064_s13  ;;  %v10458_v36 = vpop.permute.xlu2 %4206  ;;  %v8757_v15 = vor.u32 %v9201_v60, %v8756_v63  ;;  %v8736_v63 = vld [vmem:[#allocation2 + $0x1c] sm:$0xf] }
 0x1f4   : > { %5008 = vrot.lane.b32.xlu2 %v8597_v24, %s10063_s12  ;;  %v10452_v27 = vpop.permute.xlu1 %2486 }
 0x1f5   : > { %v10454_v52 = vpop.permute.xlu0 %3290 }
 0x1f6   : > { %13966 = vst [vmem:[#allocation34_spill] sm:$0xff] %v10454_v52 }
 0x1fa   : > { %6788 = vrot.lane.b32.xlu1 %v8877_v23, %s10065_s17  ;;  %8064 = vmatmul.msk.bf16.gmra.mxu3 %vm852_vm0, %v8021_v56 }
 0x1fb   : > { %6790 = vrot.lane.b32.xlu0 %v8881_v22, %s10065_s17  ;;  %v9196_v22 = vld [vmem:[#allocation2 + $0x24] sm:$0xf0] }
 0x1fc   : > { %5926 = vrot.lane.b32.xlu2 %v8753_v38, %s10064_s13  ;;  %v10462_v24 = vpop.permute.xlu1 %3346  ;;  %v10473_v38 = vpop.permute.xlu2 %2172  ;;  %v8737_v60 = vor.u32 %v9196_v22, %v8736_v63  ;;  %v9169_v22 = vld [vmem:[#allocation2 + $0x98] sm:$0xf0] }
 0x1fd   : > { %v10464_v52 = vpop.permute.xlu0 %5066 }
 0x1fe   : > { %13967 = vst [vmem:[#allocation35_spill] sm:$0xff] %v10464_v52  ;;  %v8748_v52 = vld [vmem:[#allocation2 + $0x64] sm:$0xf] }
 0x1ff   : > { %v8749_v28 = vor.u32 %v9199_v40, %v8748_v52 }
 0x202   : > { %6782 = vrot.lane.b32.xlu1 %v8865_v18, %s10065_s17  ;;  %v8025_v18 = vor.u32 %v9050_v48, %v8024_v46  ;;  %v8605_v46 = vor.u32 %v9169_v22, %v8604_v11 }
 0x203   : > { %5928 = vrot.lane.b32.xlu0 %v8757_v15, %s10064_s13 }
 0x204   : > { %6786 = vrot.lane.b32.xlu2 %v8873_v44, %s10065_s17  ;;  %v10469_v56 = vpop.permute.xlu1 %3892  ;;  %v1629_v21 = vpop.permute.xlu2 %1628 }
 0x205   : > { %v10471_v23 = vpop.permute.xlu0 %3032 }
 0x20a   : > { %5918 = vrot.lane.b32.xlu1 %v8737_v60, %s10064_s13  ;;  %8065 = vmatmul.msk.bf16.gmra.mxu3 %vm852_vm0, %v8025_v18  ;;  %v9211_v60 = vld [vmem:[#allocation2 + $0x8] sm:$0xf0]  ;;  %v9198_v18 = vld [vmem:[#allocation2 + $0x54] sm:$0xf0] }
 0x20b   : > { %5010 = vrot.lane.b32.xlu0 %v8601_v61, %s10063_s12  ;;  %v8821_v40 = vor.u32 %v9211_v60, %v8820_v7  ;;  %v9220_v60 = vld [vmem:[#allocation2 + $0x24] sm:$0xf0] }
 0x20c   : > { %6784 = vrot.lane.b32.xlu2 %v8869_v50, %s10065_s17  ;;  %v10481_v44 = vpop.permute.xlu1 %1572  ;;  %v8744_v50 = vld [vmem:[#allocation2 + $0x4c] sm:$0xf]  ;;  %v2489_v52 = vpop.permute.xlu2 %2488 }
 0x20d   : > { %v10479_v15 = vpop.permute.xlu0 %2432  ;;  %13969 = vst [vmem:[#allocation37_spill] sm:$0xff] %v10481_v44  ;;  %v9221_v44 = vld [vmem:[#allocation2 + $0x3c] sm:$0xf0]  ;;  %v8745_v11 = vor.u32 %v9198_v18, %v8744_v50  ;;  %v8856_v50 = vld [vmem:[#allocation2 + $0x1c] sm:$0xf] }
 0x20e   : > { %13968 = vst [vmem:[#allocation36_spill] sm:$0xff] %v10479_v15  ;;  %v8860_v15 = vld [vmem:[#allocation2 + $0x34] sm:$0xf] }
 0x20f   : > { %v8861_v22 = vor.u32 %v9221_v44, %v8860_v15  ;;  %v8857_v44 = vor.u32 %v9220_v60, %v8856_v50 }
 0x212   : > { %5916 = vrot.lane.b32.xlu1 %v8733_v5, %s10064_s13 }
 0x213   : > { %5924 = vrot.lane.b32.xlu0 %v8749_v28, %s10064_s13  ;;  %v1675_v28 = vsel %vm852_vm0, %v1629_v21, 0  ;;  %v1672_v21 = vsel %vm852_vm0, %v10445_v2, 0  ;;  %v1669_v2 = vsel %vm852_vm0, %v10399_v42, 0 }
 0x214   : > { %5012 = vrot.lane.b32.xlu2 %v8605_v46, %s10063_s12  ;;  %v1631_v63 = vpop.permute.xlu1 %1630  ;;  %v8740_v46 = vld [vmem:[#allocation2 + $0x34] sm:$0xf]  ;;  %v10500_v18 = vpop.permute.xlu2 %3292 }
 0x215   : > { %v10486_v48 = vpop.permute.xlu0 %3348  ;;  %v1678_v61 = vsel %vm852_vm0, %v1631_v63, 0  ;;  %v9197_v63 = vld [vmem:[#allocation2 + $0x3c] sm:$0xf0]  ;;  %13971 = vst [vmem:[#allocation39_spill] sm:$0xff] %v10500_v18 }
 0x216   : > { %1680 = vmatpush.bf16.xpose.msrb.mxu1 %v1678_v61  ;;  %v8741_v15 = vor.u32 %v9197_v63, %v8740_v46  ;;  %v8700_v46 = vld [vmem:[#allocation2] sm:$0xf] }
 0x21a   : > { %6720 = vrot.lane.b32.xlu1 %v8821_v40, %s10065_s17 }
 0x21b   : > { %5922 = vrot.lane.b32.xlu0 %v8745_v11, %s10064_s13  ;;  %v8608_v11 = vld [vmem:[#allocation2 + $0xa8] sm:$0xf] }
 0x21c   : > { %6780 = vrot.lane.b32.xlu2 %v8861_v22, %s10065_s17  ;;  %v10494_v5 = vpop.permute.xlu1 %2434  ;;  %v9170_v22 = vld [vmem:[#allocation2 + $0xb0] sm:$0xf0] }
 0x21d   : > { %v10492_v25 = vpop.permute.xlu0 %5068  ;;  %13970 = vst [vmem:[#allocation38_spill] sm:$0xff] %v10494_v5  ;;  %v10497_v61 = vpop.f32.mrf.mxu3  ;;  %v8609_v63 = vor.u32 %v9170_v22, %v8608_v11 }
 0x21e   : > { %1681 = vmatpush.bf16.xpose.msrb.mxu1 %v1675_v28  ;;  %v9187_v28 = vld [vmem:[#allocation2 + $0x8] sm:$0xf0] }
 0x21f   : > { %v8701_v60 = vor.u32 %v9187_v28, %v8700_v46  ;;  %v1666_v46 = vsel %vm852_vm0, %v10356_v49, 0 }
 0x223   : > { %5920 = vrot.lane.b32.xlu0 %v8741_v15, %s10064_s13 }
 0x224   : > { %6778 = vrot.lane.b32.xlu2 %v8857_v44, %s10065_s17  ;;  %v10503_v40 = vpop.permute.xlu1 %3294  ;;  %v10515_v44 = vpop.permute.xlu2 %4208 }
 0x225   : > { %v2175_v7 = vpop.permute.xlu0 %2174  ;;  %13972 = vst [vmem:[#allocation40_spill] sm:$0xff] %v10503_v40  ;;  %v10507_v5 = vpop.f32.mrf.mxu3  ;;  %v9219_v40 = vld [vmem:[#allocation2 + $0xc] sm:$0xf0] }
 0x226   : > { %1682 = vmatpush.bf16.xpose.msrb.mxu1 %v1672_v21  ;;  %v8852_v21 = vld [vmem:[#allocation2 + $0x4] sm:$0xf] }
 0x227   : > { %v8853_v11 = vor.u32 %v9219_v40, %v8852_v21  ;;  %v1663_v40 = vsel %vm852_vm0, %v10334_v57, 0  ;;  %v2535_v21 = vsel %vm852_vm0, %v2489_v52, 0  ;;  %v1660_v57 = vsel %vm852_vm0, %v10296_v33, 0 }
 0x228   : > { %v1657_v33 = vsel %vm852_vm0, %v10263_v19, 0  ;;  %v2526_v19 = vsel %vm852_vm0, %v10367_v16, 0  ;;  %v3389_v16 = vsel %vm852_vm0, %v10413_v45, 0 }
 0x22b   : > { %5014 = vrot.lane.b32.xlu0 %v8609_v63, %s10063_s12 }
 0x22c   : > { %5860 = vrot.lane.b32.xlu2 %v8701_v60, %s10064_s13  ;;  %v10511_v50 = vpop.permute.xlu1 %5058  ;;  %v3035_v42 = vpop.permute.xlu2 %3034 }
 0x22d   : > { %v10513_v15 = vpop.permute.xlu0 %1574  ;;  %v10519_v18 = vpop.f32.mrf.mxu3 }
 0x22e   : > { %13973 = vst [vmem:[#allocation41_spill] sm:$0xff] %v10513_v15  ;;  %1683 = vmatpush.bf16.xpose.msrb.mxu1 %v1669_v2 }
 0x233   : > { %6776 = vrot.lane.b32.xlu0 %v8853_v11, %s10065_s17 }
 0x234   : > { %v2177_v22 = vpop.permute.xlu1 %2176  ;;  %v3895_v11 = vpop.permute.xlu2 %3894 }
 0x235   : > { %v2491_v28 = vpop.permute.xlu0 %2490  ;;  %2186 = vmatpush.bf16.msrb.mxu2 %v2177_v22  ;;  %v10525_v60 = vpop.f32.mrf.mxu3  ;;  %v5115_v22 = vsel %vm852_vm0, %v10492_v25, 0 }
 0x236   : > { %v2538_v63 = vsel %vm852_vm0, %v2491_v28, 0  ;;  %1684 = vmatpush.bf16.xpose.msrb.mxu1 %v1666_v46  ;;  %v13974_v46 = vld [vmem:[#allocation19_spill] sm:$0xff] }
 0x237   : > { %2540 = vmatpush.bf16.xpose.msrb.mxu3 %v2538_v63 }
 0x239   : > { %2187 = vmatpush.bf16.msrb.mxu2 %v2175_v7 }
 0x23c   : > { %v3037_v15 = vpop.permute.xlu1 %3036 }
 0x23d   : > { %v10527_v2 = vpop.permute.xlu0 %4198  ;;  %2188 = vmatpush.bf16.msrb.mxu2 %v10473_v38  ;;  %3046 = vmatpush.bf16.msra.mxu0 %v3037_v15  ;;  %v10533_v49 = vpop.f32.mrf.mxu3  ;;  %v2532_v38 = vsel %vm852_vm0, %v10452_v27, 0 }
 0x23e   : > { %1685 = vmatpush.bf16.xpose.msrb.mxu1 %v1663_v40  ;;  %v13976_v40 = vld [vmem:[#allocation35_spill] sm:$0xff] }
 0x23f   : > { %2541 = vmatpush.bf16.xpose.msrb.mxu3 %v2535_v21  ;;  %v5112_v25 = vsel %vm852_vm0, %v13976_v40, 0  ;;  %v13985_v40 = vld [vmem:[#allocation36_spill] sm:$0xff] }
 0x241   : > { %2189 = vmatpush.bf16.msrb.mxu2 %v10433_v8  ;;  %3047 = vmatpush.bf16.msra.mxu0 %v3035_v42  ;;  %v3351_v8 = vpop.permute.xlu2 %3350  ;;  %v13975_v42 = vld [vmem:[#allocation25_spill] sm:$0xff] }
 0x242   : > { %v3398_v27 = vsel %vm852_vm0, %v3351_v8, 0 }
 0x244   : > { %954 = vmax.xlane.f32.xlu1 %v10519_v18 }
 0x245   : > { %v10536_v7 = vpop.permute.xlu0 %4196  ;;  %2190 = vmatpush.bf16.msrb.mxu2 %v10397_v31  ;;  %3048 = vmatpush.bf16.msra.mxu0 %v10471_v23  ;;  %v10545_v52 = vpop.f32.mrf.mxu3  ;;  %v2529_v31 = vsel %vm852_vm0, %v10426_v30, 0 }
 0x246   : > { %1686 = vmatpush.bf16.xpose.msrb.mxu1 %v1660_v57  ;;  %v4240_v57 = vsel %vm852_vm0, %v10527_v2, 0 }
 0x247   : > { %2542 = vmatpush.bf16.xpose.msrb.mxu3 %v2532_v38 }
 0x249   : > { %2191 = vmatpush.bf16.msrb.mxu2 %v10321_v35  ;;  %3049 = vmatpush.bf16.msra.mxu0 %v10443_v1  ;;  %v4211_v30 = vpop.permute.xlu2 %4210  ;;  %v10626_v1 = vpop.permute.xlu1 %5056 }
 0x24a   : > { %v4258_v45 = vsel %vm852_vm0, %v4211_v30, 0 }
 0x24c   : > { %956 = vmax.xlane.f32.xlu1 %v10525_v60 }
 0x24d   : > { %v10549_v15 = vpop.permute.xlu0 %5070  ;;  %2192 = vmatpush.bf16.msrb.mxu2 %v10326_v39  ;;  %3050 = vmatpush.bf16.msra.mxu0 %v10407_v3  ;;  %v10559_v35 = vpop.f32.mrf.mxu3 }
 0x24e   : > { %1687 = vmatpush.bf16.xpose.msrb.mxu1 %v1657_v33  ;;  %v5118_v23 = vsel %vm852_vm0, %v10549_v15, 0  ;;  %v13978_v15 = vld [vmem:[#allocation32_spill] sm:$0xff] }
 0x24f   : > { %2543 = vmatpush.bf16.xpose.msrb.mxu3 %v2529_v31  ;;  %v13979_v33 = vld [vmem:[#allocation24_spill] sm:$0xff] }
 0x251   : > { %2193 = vmatpush.bf16.msrb.mxu2 %v10284_v9  ;;  %3051 = vmatpush.bf16.msra.mxu0 %v10336_v62  ;;  %v3395_v9 = vsel %vm852_vm0, %v10486_v48, 0  ;;  %v3392_v62 = vsel %vm852_vm0, %v10462_v24, 0  ;;  %v5061_v24 = vpop.permute.xlu2 %5060 }
 0x255   : > { %958 = vmax.xlane.f32.xlu2 %v10533_v49  ;;  %v3897_v39 = vpop.permute.xlu0 %3896  ;;  %8162 = vmatmul.msk.bf16.vlgmr.msrb.gmra.mxu1 %vm852_vm0, %v10258_v4  ;;  %v10569_v3 = vpop.f32.mrf.mxu3  ;;  %v2523_v4 = vsel %vm852_vm0, %v10363_v54, 0 }
 0x256   : > { %3400 = vmatpush.bf16.xpose.msra.mxu1 %v3398_v27  ;;  %3052 = vmatpush.bf16.msra.mxu0 %v10332_v55  ;;  %v4237_v27 = vsel %vm852_vm0, %v10536_v7, 0 }
 0x257   : > { %3906 = vmatpush.bf16.msra.mxu2 %v3897_v39  ;;  %2544 = vmatpush.bf16.xpose.msrb.mxu3 %v2526_v19  ;;  %v13980_v39 = vld [vmem:[#allocation28_spill] sm:$0xff] }
 0x258   : > { %964 = vmax.xlane.f32.xlu1 %v10569_v3  ;;  %v5106_v2 = vsel %vm852_vm0, %v13980_v39, 0 }
 0x25a   : > { %3053 = vmatpush.bf16.msra.mxu0 %v10294_v32  ;;  %v2520_v32 = vsel %vm852_vm0, %v10316_v20, 0 }
 0x25b   : > { %3907 = vmatpush.bf16.msra.mxu2 %v3895_v11 }
 0x25d   : > { %960 = vmax.xlane.f32.xlu2 %v10545_v52  ;;  %950 = vmax.xlane.f32.xlu0 %v10497_v61  ;;  %v10579_v55 = vpop.f32.mrf.mxu3 }
 0x25e   : > { %3401 = vmatpush.bf16.xpose.msra.mxu1 %v3395_v9 }
 0x25f   : > { %3908 = vmatpush.bf16.msra.mxu2 %v10469_v56  ;;  %2545 = vmatpush.bf16.xpose.msrb.mxu3 %v2523_v4 }
 0x263   : > { %3909 = vmatpush.bf16.msra.mxu2 %v10435_v12  ;;  %v10598_v12 = vpop.permute.xlu0 %5000 }
 0x265   : > { %966 = vmax.xlane.f32.xlu2 %v10579_v55  ;;  %952 = vmax.xlane.f32.xlu0 %v10507_v5  ;;  %v10591_v54 = vpop.f32.mrf.mxu3 }
 0x266   : > { %3402 = vmatpush.bf16.xpose.msra.mxu1 %v3392_v62  ;;  %v5103_v62 = vsel %vm852_vm0, %v5061_v24, 0 }
 0x267   : > { %8163 = vmatmul.msk.bf16.gmra.mxu1 %vm852_vm0, %v10306_v59  ;;  %3910 = vmatpush.bf16.msra.mxu2 %v10401_v0  ;;  %v2517_v59 = vsel %vm852_vm0, %v10268_v34, 0  ;;  %v3386_v0 = vsel %vm852_vm0, %v10380_v41, 0 }
 0x268   : > { %2546 = vmatpush.bf16.xpose.msrb.mxu3 %v2520_v32 }
 0x26b   : > { %3911 = vmatpush.bf16.msra.mxu2 %v10361_v53  ;;  %v5931_v53 = vpop.permute.xlu0 %5930 }
 0x26c   : > { %v5978_v19 = vsel %vm852_vm0, %v5931_v53, 0 }
 0x26d   : > { %962 = vmax.xlane.f32.xlu0 %v10559_v35  ;;  %v10602_v20 = vpop.f32.mrf.mxu3 }
 0x26e   : > { %3403 = vmatpush.bf16.xpose.msra.mxu1 %v3389_v16  ;;  %970 = vmax.xlane.f32.xlu1 %v10602_v20 }
 0x26f   : > { %3912 = vmatpush.bf16.msra.mxu2 %v10342_v13  ;;  %v3383_v13 = vsel %vm852_vm0, %v10371_v17, 0 }
 0x270   : > { %2547 = vmatpush.bf16.xpose.msrb.mxu3 %v2517_v59  ;;  %v13981_v59 = vld [vmem:[#allocation37_spill] sm:$0xff] }
 0x273   : > { %3913 = vmatpush.bf16.msra.mxu2 %v10288_v14  ;;  %v4255_v14 = vsel %vm852_vm0, %v10515_v44, 0  ;;  %v10631_v17 = vpop.permute.xlu0 %6790 }
 0x275   : > { %968 = vmax.xlane.f32.xlu0 %v10591_v54  ;;  %v10615_v34 = vpop.f32.mrf.mxu3 }
 0x276   : > { %3404 = vmatpush.bf16.xpose.msra.mxu1 %v3386_v0  ;;  %972 = vmax.xlane.f32.xlu2 %v10615_v34  ;;  %v13982_v0 = vld [vmem:[#allocation29_spill] sm:$0xff] }
 0x277   : > { %8164 = vmatmul.msk.bf16.gmra.mxu1 %vm852_vm0, %v10354_v37  ;;  %8282 = vmatmul.msk.bf16.vlgmr.msrb.gmra.mxu3 %vm852_vm0, %v10276_v51  ;;  %v3380_v37 = vsel %vm852_vm0, %v10298_v43, 0  ;;  %v4252_v51 = vsel %vm852_vm0, %v10458_v36, 0  ;;  %v3377_v43 = vsel %vm852_vm0, %v10286_v10, 0  ;;  %v4249_v36 = vsel %vm852_vm0, %v10424_v29, 0 }
 0x278   : > { %4260 = vmatpush.bf16.xpose.msra.mxu3 %v4258_v45  ;;  %v4246_v10 = vsel %vm852_vm0, %v10388_v6, 0  ;;  %v4243_v6 = vsel %vm852_vm0, %v13975_v42, 0  ;;  %v5100_v45 = vsel %vm852_vm0, %v10511_v50, 0  ;;  %v13984_v50 = vld [vmem:[#allocation33_spill] sm:$0xff] }
 0x27b   : > { %v5929_v48 = vpop.permute.xlu0 %5928 }
 0x27c   : > { %v5975_v32 = vsel %vm852_vm0, %v5929_v48, 0 }
 0x27d   : > { %v10622_v41 = vpop.f32.mrf.mxu3 }
 0x27e   : > { %3405 = vmatpush.bf16.xpose.msra.mxu1 %v3383_v13  ;;  %974 = vmax.xlane.f32.xlu0 %v10622_v41 }
 0x280   : > { %4261 = vmatpush.bf16.xpose.msra.mxu3 %v4255_v14 }
 0x283   : > { %v10659_v28 = vpop.permute.xlu0 %5010 }
 0x285   : > { %v10637_v56 = vpop.f32.mrf.mxu3 }
 0x286   : > { %3406 = vmatpush.bf16.xpose.msra.mxu1 %v3380_v37  ;;  %976 = vmax.xlane.f32.xlu1 %v10637_v56  ;;  %v5097_v37 = vsel %vm852_vm0, %v10626_v1, 0 }
 0x287   : > { %8165 = vmatmul.msk.bf16.gmra.mxu1 %vm852_vm0, %v10346_v26  ;;  %8283 = vmatmul.msk.bf16.gmra.mxu3 %vm852_vm0, %v10304_v58  ;;  %v10646_v26 = vpop.permute.xlu1 %4152  ;;  %v10648_v58 = vpop.permute.xlu2 %4148 }
 0x288   : > { %4262 = vmatpush.bf16.xpose.msra.mxu3 %v4252_v51 }
 0x28b   : > { %v5925_v11 = vpop.permute.xlu0 %5924 }
 0x28c   : > { %v5969_v51 = vsel %vm852_vm0, %v5925_v11, 0 }
 0x28d   : > { %v10650_v44 = vpop.f32.mrf.mxu3 }
 0x28e   : > { %3407 = vmatpush.bf16.xpose.msra.mxu1 %v3377_v43  ;;  %978 = vmax.xlane.f32.xlu2 %v10650_v44 }
 0x28f   : > { %v10657_v29 = vpop.permute.xlu1 %5002  ;;  %v10665_v63 = vpop.permute.xlu2 %4150 }
 0x290   : > { %4263 = vmatpush.bf16.xpose.msra.mxu3 %v4249_v36 }
 0x293   : > { %v5923_v9 = vpop.permute.xlu0 %5922 }
 0x294   : > { %v5966_v48 = vsel %vm852_vm0, %v5923_v9, 0 }
 0x296   : > { %5120 = vmatpush.bf16.xpose.msrb.mxu1 %v5118_v23  ;;  %v13983_v23 = vld [vmem:[#allocation41_spill] sm:$0xff] }
 0x297   : > { %8166 = vmatmul.msk.bf16.gmra.mxu1 %vm852_vm0, %v10418_v47  ;;  %8284 = vmatmul.msk.bf16.gmra.mxu3 %vm852_vm0, %v13974_v46  ;;  %v10671_v21 = vpop.permute.xlu1 %5004  ;;  %v13977_v47 = vld [vmem:[#allocation31_spill] sm:$0xff]  ;;  %v10677_v8 = vpop.permute.xlu2 %4154 }
 0x298   : > { %4264 = vmatpush.bf16.xpose.msra.mxu3 %v4246_v10  ;;  %v5109_v38 = vsel %vm852_vm0, %v13977_v47, 0 }
 0x29b   : > { %v5921_v30 = vpop.permute.xlu0 %5920 }
 0x29c   : > { %v5963_v46 = vsel %vm852_vm0, %v5921_v30, 0 }
 0x29e   : > { %5121 = vmatpush.bf16.xpose.msrb.mxu1 %v5115_v22 }
 0x29f   : > { %v10683_v31 = vpop.permute.xlu1 %5006  ;;  %v10690_v4 = vpop.permute.xlu2 %5008 }
 0x2a0   : > { %4265 = vmatpush.bf16.xpose.msra.mxu3 %v4243_v6  ;;  %v6838_v6 = vsel %vm852_vm0, %v10631_v17, 0 }
 0x2a3   : > { %v10703_v14 = vpop.permute.xlu0 %5014 }
 0x2a6   : > { %5122 = vmatpush.bf16.xpose.msrb.mxu1 %v5112_v25  ;;  %v13986_v25 = vld [vmem:[#allocation18_spill] sm:$0xff] }
 0x2a7   : > { %8167 = vmatmul.msk.bf16.gmra.mxu1 %vm852_vm0, %v13978_v15  ;;  %8285 = vmatmul.msk.bf16.gmra.mxu3 %vm852_vm0, %v13979_v33  ;;  %v6789_v16 = vpop.permute.xlu1 %6788  ;;  %v5927_v7 = vpop.permute.xlu2 %5926 }
 0x2a8   : > { %4266 = vmatpush.bf16.xpose.msra.mxu3 %v4240_v57  ;;  %v5972_v13 = vsel %vm852_vm0, %v5927_v7, 0  ;;  %v10731_v33 = vpop.f32.mrf.mxu3 }
 0x2ab   : > { %v10712_v36 = vpop.permute.xlu0 %6776 }
 0x2ae   : > { %5123 = vmatpush.bf16.xpose.msrb.mxu1 %v5109_v38 }
 0x2af   : > { %v10701_v53 = vpop.permute.xlu1 %6782  ;;  %v6787_v24 = vpop.permute.xlu2 %6786 }
 0x2b0   : > { %4267 = vmatpush.bf16.xpose.msra.mxu3 %v4237_v27 }
 0x2b6   : > { %5124 = vmatpush.bf16.xpose.msrb.mxu1 %v5106_v2  ;;  %v6835_v2 = vsel %vm852_vm0, %v6789_v16, 0  ;;  %v13989_v16 = vld [vmem:[#allocation20_spill] sm:$0xff] }
 0x2b7   : > { %8168 = vmatmul.msk.bf16.gmra.mxu1 %vm852_vm0, %v13981_v59  ;;  %8286 = vmatmul.msk.bf16.gmra.mxu3 %vm852_vm0, %v13982_v0  ;;  %v5919_v43 = vpop.permute.xlu1 %5918  ;;  %v6785_v10 = vpop.permute.xlu2 %6784  ;;  %v6832_v59 = vsel %vm852_vm0, %v6787_v24, 0  ;;  %v13990_v24 = vld [vmem:[#allocation22_spill] sm:$0xff] }
 0x2b8   : > { %5980 = vmatpush.bf16.xpose.msrb.mxu3 %v5978_v19  ;;  %v5960_v38 = vsel %vm852_vm0, %v5919_v43, 0 }
 0x2be   : > { %5125 = vmatpush.bf16.xpose.msrb.mxu1 %v5103_v62 }
 0x2bf   : > { %v5917_v22 = vpop.permute.xlu1 %5916  ;;  %v10725_v57 = vpop.permute.xlu2 %5012 }
 0x2c0   : > { %5981 = vmatpush.bf16.xpose.msrb.mxu3 %v5975_v32  ;;  %v5957_v19 = vsel %vm852_vm0, %v5917_v22, 0 }
 0x2c6   : > { %5126 = vmatpush.bf16.xpose.msrb.mxu1 %v5100_v45 }
 0x2c7   : > { %8169 = vmatmul.msk.bf16.gmra.mxu1 %vm852_vm0, %v13983_v23  ;;  %8287 = vmatmul.msk.bf16.gmra.mxu3 %vm852_vm0, %v13984_v50  ;;  %v10729_v15 = vpop.permute.xlu1 %6720  ;;  %v6781_v62 = vpop.permute.xlu2 %6780  ;;  %v13991_v23 = vld [vmem:[#allocation17_spill] sm:$0xff]  ;;  %v6826_v50 = vsel %vm852_vm0, %v10701_v53, 0 }
 0x2c8   : > { %5982 = vmatpush.bf16.xpose.msrb.mxu3 %v5972_v13  ;;  %13987 = vst [vmem:[#allocation19_spill] sm:$0xff] %v10729_v15 }
 0x2ce   : > { %5127 = vmatpush.bf16.xpose.msrb.mxu1 %v5097_v37  ;;  %v6829_v37 = vsel %vm852_vm0, %v6785_v10, 0 }
 0x2cf   : > { %v955_v9 = vpop.xlane.xlu1 %954 }
 0x2d0   : > { %5983 = vmatpush.bf16.xpose.msrb.mxu3 %v5969_v51  ;;  %v951_v1 = vpop.xlane.xlu0 %950  ;;  %v984_v7 = vsub.f32 %v10519_v18, %v955_v9  ;;  %v6779_v18 = vpop.permute.xlu2 %6778 }
 0x2d1   : > { %v982_v39 = vsub.f32 %v10497_v61, %v951_v1  ;;  %v13988_v61 = vld [vmem:[#allocation38_spill] sm:$0xff] }
 0x2d2   : > { %v10716_v42 = vpop.f32.mrf.mxu1  ;;  %v1002_v0 = vmul.f32 1.442695, %v984_v7 }
 0x2d3   : > { %1729 = vmax.xlane.f32.xlu0 %v10716_v42 }
 0x2d7   : > { %8288 = vmatmul.msk.bf16.gmra.mxu3 %vm852_vm0, %v13985_v40  ;;  %8402 = vmatmul.msk.bf16.vlgmr.msra.gmra.mxu1 %vm852_vm0, %v13986_v25  ;;  %v957_v10 = vpop.xlane.xlu1 %956 }
 0x2d8   : > { %5984 = vmatpush.bf16.xpose.msrb.mxu3 %v5966_v48  ;;  %6840 = vmatpush.bf16.xpose.msra.mxu1 %v6838_v6  ;;  %v953_v11 = vpop.xlane.xlu0 %952  ;;  %v10770_v48 = vpop.permute.xlu2 %5860  ;;  %v985_v1 = vsub.f32 %v10525_v60, %v957_v10  ;;  %v6823_v6 = vsel %vm852_vm0, %v6781_v62, 0  ;;  %v13993_v60 = vld [vmem:[#allocation21_spill] sm:$0xff]  ;;  %v6817_v62 = vsel %vm852_vm0, %v10712_v36, 0  ;;  %v13995_v36 = vld [vmem:[#allocation23_spill] sm:$0xff] }
 0x2d9   : > { %v983_v47 = vsub.f32 %v10507_v5, %v953_v11  ;;  %v998_v5 = vmul.f32 1.442695, %v982_v39 }
 0x2da   : > { %v10733_v27 = vpop.f32.mrf.mxu1  ;;  %v1004_v40 = vmul.f32 1.442695, %v985_v1 }
 0x2db   : > { %v1000_v17 = vmul.f32 1.442695, %v983_v47  ;;  %1731 = vmax.xlane.f32.xlu2 %v10733_v27  ;;  %980 = vmax.xlane.f32.xlu0 %v10731_v33 }
 0x2dd   : > { %9347 = vpow2.f32 %v1000_v17  ;;  %v6820_v17 = vsel %vm852_vm0, %v6779_v18, 0 }
 0x2de   : > { %9349 = vpow2.f32 %v998_v5 }
 0x2df   : > { %9351 = vpow2.f32 %v1002_v0 }
 0x2e0   : > { %5985 = vmatpush.bf16.xpose.msrb.mxu3 %v5963_v46  ;;  %6841 = vmatpush.bf16.xpose.msra.mxu1 %v6835_v2  ;;  %v959_v25 = vpop.xlane.xlu2 %958  ;;  %9353 = vpow2.f32 %v1004_v40 }
 0x2e1   : > { %v986_v53 = vsub.f32 %v10533_v49, %v959_v25 }
 0x2e3   : > { %v10742_v30 = vpop.eup %9347  ;;  %v1006_v39 = vmul.f32 1.442695, %v986_v53 }
 0x2e4   : > { %v10740_v32 = vpop.f32.mrf.mxu1  ;;  %1032 = vadd.xlane.f32.xlu2 %v10742_v30  ;;  %v10752_v45 = vpop.eup %9349 }
 0x2e5   : > { %1733 = vmax.xlane.f32.xlu1 %v10740_v32  ;;  %v10759_v51 = vpop.eup %9351  ;;  %9355 = vpow2.f32 %v1006_v39 }
 0x2e6   : > { %v10791_v2 = vpop.eup %9353 }
 0x2e7   : > { %8289 = vmatmul.msk.bf16.gmra.mxu3 %vm852_vm0, %v13988_v61  ;;  %8403 = vmatmul.msk.bf16.gmra.mxu1 %vm852_vm0, %v13989_v16  ;;  %v963_v61 = vpop.xlane.xlu0 %962 }
 0x2e8   : > { %5986 = vmatpush.bf16.xpose.msrb.mxu3 %v5960_v38  ;;  %6842 = vmatpush.bf16.xpose.msra.mxu1 %v6832_v59  ;;  %v13992_v38 = vld [vmem:[#allocation26_spill] sm:$0xff]  ;;  %v961_v5 = vpop.xlane.xlu2 %960  ;;  %v988_v0 = vsub.f32 %v10559_v35, %v963_v61 }
 0x2e9   : > { %v987_v9 = vsub.f32 %v10545_v52, %v961_v5  ;;  %v13994_v52 = vld [vmem:[#allocation30_spill] sm:$0xff] }
 0x2eb   : > { %v1008_v7 = vmul.f32 1.442695, %v987_v9  ;;  %v10803_v16 = vpop.eup %9355 }
 0x2ec   : > { %v10754_v13 = vpop.f32.mrf.mxu1 }
 0x2ed   : > { %1030 = vadd.xlane.f32.xlu1 %v10752_v45  ;;  %1735 = vmax.xlane.f32.xlu0 %v10754_v13  ;;  %9357 = vpow2.f32 %v1008_v7 }
 0x2ef   : > { %v969_v39 = vpop.xlane.xlu0 %968 }
 0x2f0   : > { %5987 = vmatpush.bf16.xpose.msrb.mxu3 %v5957_v19  ;;  %6843 = vmatpush.bf16.xpose.msra.mxu1 %v6829_v37  ;;  %v1010_v37 = vmul.f32 1.442695, %v988_v0  ;;  %v967_v40 = vpop.xlane.xlu2 %966 }
 0x2f2   : > { %9359 = vpow2.f32 %v1010_v37  ;;  %v13998_v37 = vld [vmem:[#allocation39_spill] sm:$0xff] }
 0x2f4   : > { %v10761_v43 = vpop.f32.mrf.mxu1 }
 0x2f5   : > { %1034 = vadd.xlane.f32.xlu0 %v10759_v51 }
 0x2f7   : > { %8404 = vmatmul.msk.bf16.gmra.mxu1 %vm852_vm0, %v13990_v24  ;;  %8522 = vmatmul.msk.bf16.vlgmr.msra.gmra.mxu3 %vm852_vm0, %v13991_v23  ;;  %v965_v24 = vpop.xlane.xlu1 %964 }
 0x2f8   : > { %6844 = vmatpush.bf16.xpose.msra.mxu1 %v6826_v50  ;;  %v10819_v50 = vpop.eup %9357  ;;  %v989_v35 = vsub.f32 %v10569_v3, %v965_v24  ;;  %v990_v3 = vsub.f32 %v10579_v55, %v967_v40 }
 0x2fa   : > { %v10772_v22 = vpop.f32.mrf.mxu3  ;;  %v1012_v1 = vmul.f32 1.442695, %v989_v35 }
 0x2fb   : > { %2589 = vmax.xlane.f32.xlu1 %v10772_v22 }
 0x2fc   : > { %v10776_v46 = vpop.f32.mrf.mxu1  ;;  %9361 = vpow2.f32 %v1012_v1  ;;  %v973_v1 = vpop.xlane.xlu2 %972 }
 0x2ff   : > { %v971_v61 = vpop.xlane.xlu1 %970 }
 0x300   : > { %6845 = vmatpush.bf16.xpose.msra.mxu1 %v6823_v6  ;;  %v10827_v6 = vpop.eup %9359 }
 0x302   : > { %v10779_v11 = vpop.f32.mrf.mxu3  ;;  %v10841_v5 = vpop.eup %9361 }
 0x303   : > { %1739 = vmax.xlane.f32.xlu1 %v10776_v46  ;;  %2591 = vmax.xlane.f32.xlu2 %v10779_v11 }
 0x304   : > { %v10784_v47 = vpop.f32.mrf.mxu1 }
 0x307   : > { %8405 = vmatmul.msk.bf16.gmra.mxu1 %vm852_vm0, %v13992_v38  ;;  %8523 = vmatmul.msk.bf16.gmra.mxu3 %vm852_vm0, %v13993_v60  ;;  %v13996_v38 = vld [vmem:[#allocation34_spill] sm:$0xff]  ;;  %v13997_v60 = vld [vmem:[#allocation27_spill] sm:$0xff] }
 0x308   : > { %6846 = vmatpush.bf16.xpose.msra.mxu1 %v6820_v17  ;;  %v1014_v17 = vmul.f32 1.442695, %v990_v3  ;;  %v993_v3 = vsub.f32 %v10615_v34, %v973_v1 }
 0x30a   : > { %v10793_v19 = vpop.f32.mrf.mxu3  ;;  %9363 = vpow2.f32 %v1014_v17 }
 0x30b   : > { %1036 = vadd.xlane.f32.xlu1 %v10791_v2  ;;  %1737 = vmax.xlane.f32.xlu2 %v10761_v43 }
 0x30c   : > { %2593 = vmax.xlane.f32.xlu0 %v10793_v19  ;;  %v10798_v49 = vpop.f32.mrf.mxu1 }
 0x310   : > { %6847 = vmatpush.bf16.xpose.msra.mxu1 %v6817_v62  ;;  %v991_v62 = vsub.f32 %v10591_v54, %v969_v39 }
 0x312   : > { %v10805_v59 = vpop.f32.mrf.mxu3  ;;  %v1016_v7 = vmul.f32 1.442695, %v991_v62 }
 0x313   : > { %1038 = vadd.xlane.f32.xlu2 %v10803_v16  ;;  %2595 = vmax.xlane.f32.xlu1 %v10805_v59 }
 0x314   : > { %1741 = vmax.xlane.f32.xlu0 %v10784_v47  ;;  %v10811_v18 = vpop.f32.mrf.mxu1  ;;  %9365 = vpow2.f32 %v1016_v7  ;;  %v14001_v7 = vld [vmem:[#allocation40_spill] sm:$0xff] }
 0x317   : > { %8406 = vmatmul.msk.bf16.gmra.mxu1 %vm852_vm0, %v13994_v52  ;;  %8524 = vmatmul.msk.bf16.gmra.mxu3 %vm852_vm0, %v13995_v36  ;;  %v10853_v52 = vpop.eup %9363  ;;  %v992_v36 = vsub.f32 %v10602_v20, %v971_v61  ;;  %v979_v61 = vpop.xlane.xlu2 %978 }
 0x319   : > { %v1018_v24 = vmul.f32 1.442695, %v992_v36  ;;  %v977_v36 = vpop.xlane.xlu1 %976 }
 0x31a   : > { %v10817_v23 = vpop.f32.mrf.mxu3  ;;  %v10865_v35 = vpop.eup %9365 }
 0x31b   : > { %1745 = vmax.xlane.f32.xlu1 %v10811_v18  ;;  %2597 = vmax.xlane.f32.xlu2 %v10817_v23  ;;  %9367 = vpow2.f32 %v1018_v24 }
 0x31c   : > { %1040 = vadd.xlane.f32.xlu0 %v10819_v50  ;;  %v10825_v10 = vpop.f32.mrf.mxu1 }
 0x322   : > { %v10829_v25 = vpop.f32.mrf.mxu3 }
 0x323   : > { %1042 = vadd.xlane.f32.xlu1 %v10827_v6  ;;  %1743 = vmax.xlane.f32.xlu2 %v10798_v49 }
 0x324   : > { %2599 = vmax.xlane.f32.xlu0 %v10829_v25  ;;  %v10834_v53 = vpop.f32.mrf.mxu1 }
 0x327   : > { %8407 = vmatmul.msk.bf16.gmra.mxu1 %vm852_vm0, %v13996_v38  ;;  %8525 = vmatmul.msk.bf16.gmra.mxu3 %vm852_vm0, %v13997_v60  ;;  %v1020_v38 = vmul.f32 1.442695, %v993_v3  ;;  %v975_v60 = vpop.xlane.xlu0 %974 }
 0x328   : > { %v994_v39 = vsub.f32 %v10622_v41, %v975_v60  ;;  %v995_v41 = vsub.f32 %v10637_v56, %v977_v36  ;;  %v996_v56 = vsub.f32 %v10650_v44, %v979_v61 }
 0x329   : > { %9369 = vpow2.f32 %v1020_v38 }
 0x32a   : > { %v10843_v9 = vpop.f32.mrf.mxu3  ;;  %v1022_v34 = vmul.f32 1.442695, %v994_v39 }
 0x32b   : > { %1044 = vadd.xlane.f32.xlu2 %v10841_v5  ;;  %2601 = vmax.xlane.f32.xlu1 %v10843_v9 }
 0x32c   : > { %1747 = vmax.xlane.f32.xlu0 %v10825_v10  ;;  %v10849_v55 = vpop.f32.mrf.mxu1  ;;  %9371 = vpow2.f32 %v1022_v34 }
 0x332   : > { %v10851_v0 = vpop.f32.mrf.mxu3 }
 0x333   : > { %1751 = vmax.xlane.f32.xlu1 %v10849_v55  ;;  %2603 = vmax.xlane.f32.xlu2 %v10851_v0 }
 0x334   : > { %1046 = vadd.xlane.f32.xlu0 %v10853_v52  ;;  %v10859_v54 = vpop.f32.mrf.mxu1 }
 0x337   : > { %8408 = vmatmul.msk.bf16.gmra.mxu1 %vm852_vm0, %v13998_v37  ;;  %8526 = vmatmul.msk.bf16.gmra.mxu3 %vm852_vm0, %v10648_v58  ;;  %v10875_v58 = vpop.eup %9367 }
 0x338   : > { %v10891_v24 = vpop.eup %9369 }
 0x339   : > { %14002 = vst [vmem:[#allocation31_spill] sm:$0xff] %v10891_v24  ;;  %v10899_v60 = vpop.eup %9371 }
 0x33a   : > { %v10867_v40 = vpop.f32.mrf.mxu3  ;;  %14004 = vst [vmem:[#allocation24_spill] sm:$0xff] %v10899_v60 }
 0x33b   : > { %1048 = vadd.xlane.f32.xlu1 %v10865_v35  ;;  %1749 = vmax.xlane.f32.xlu2 %v10834_v53 }
 0x33c   : > { %2605 = vmax.xlane.f32.xlu0 %v10867_v40  ;;  %v10872_v20 = vpop.f32.mrf.mxu1 }
 0x33d   : > { %13999 = vst [vmem:[#allocation25_spill] sm:$0xff] %v10872_v20 }
 0x342   : > { %v10877_v17 = vpop.f32.mrf.mxu3 }
 0x343   : > { %1050 = vadd.xlane.f32.xlu2 %v10875_v58  ;;  %2607 = vmax.xlane.f32.xlu1 %v10877_v17 }
 0x344   : > { %1753 = vmax.xlane.f32.xlu0 %v10859_v54  ;;  %v10883_v62 = vpop.f32.mrf.mxu1 }
 0x345   : > { %14000 = vst [vmem:[#allocation35_spill] sm:$0xff] %v10883_v62 }
 0x346   : > { %v1730_v3 = vpop.xlane.xlu0 %1729 }
 0x347   : > { %8409 = vmatmul.msk.bf16.gmra.mxu1 %vm852_vm0, %v14001_v7  ;;  %8527 = vmatmul.msk.bf16.gmra.mxu3 %vm852_vm0, %v10665_v63  ;;  %v1024_v63 = vmul.f32 1.442695, %v995_v41  ;;  %v1026_v41 = vmul.f32 1.442695, %v996_v56 }
 0x349   : > { %9373 = vpow2.f32 %v1024_v63 }
 0x34a   : > { %v10889_v37 = vpop.f32.mrf.mxu3 }
 0x34b   : > { %1757 = vmax.xlane.f32.xlu1 %v10883_v62  ;;  %2609 = vmax.xlane.f32.xlu2 %v10889_v37  ;;  %v1761_v62 = vsub.f32 %v10716_v42, %v1730_v3 }
 0x34c   : > { %1052 = vadd.xlane.f32.xlu0 %v10891_v24  ;;  %v10897_v1 = vpop.f32.mrf.mxu1 }
 0x34d   : > { %14003 = vst [vmem:[#allocation32_spill] sm:$0xff] %v10897_v1  ;;  %v1777_v44 = vmul.f32 1.442695, %v1761_v62 }
 0x34e   : > { %v1732_v38 = vpop.xlane.xlu2 %1731  ;;  %v981_v34 = vpop.xlane.xlu0 %980 }
 0x34f   : > { %v10915_v15 = vpop.eup %9373  ;;  %v997_v62 = vsub.f32 %v10731_v33, %v981_v34 }
 0x350   : > { %14007 = vst [vmem:[#allocation29_spill] sm:$0xff] %v10915_v15 }
 0x352   : > { %v10901_v39 = vpop.f32.mrf.mxu3 }
 0x353   : > { %14005 = vst [vmem:[#allocation28_spill] sm:$0xff] %v10901_v39  ;;  %1054 = vadd.xlane.f32.xlu1 %v10899_v60  ;;  %1755 = vmax.xlane.f32.xlu2 %v10872_v20 }
 0x354   : > { %2611 = vmax.xlane.f32.xlu0 %v10901_v39  ;;  %v10906_v7 = vpop.f32.mrf.mxu1 }
 0x355   : > { %14006 = vst [vmem:[#allocation37_spill] sm:$0xff] %v10906_v7 }
 0x357   : > { %8528 = vmatmul.msk.bf16.gmra.mxu3 %vm852_vm0, %v10646_v26  ;;  %8642 = vmatmul.msk.bf16.vlgmr.msrb.gmra.mxu1 %vm852_vm0, %v10598_v12  ;;  %v1033_v60 = vpop.xlane.xlu2 %1032  ;;  %v1762_v26 = vsub.f32 %v10733_v27, %v1732_v38 }
 0x358   : > { %v10913_v36 = vpop.xlane.xlu1 %1733  ;;  %9375 = vrcp.f32 %v1033_v60  ;;  %v1088_v38 = vand.u32 2147483648, %v1033_v60  ;;  %vm1082_vm2 = vweird.f32 %v1033_v60 }
 0x359   : > { %9377 = vpow2.f32 %v1026_v41  ;;  %v1779_v56 = vmul.f32 1.442695, %v1762_v26 }
 0x35a   : > { %v10917_v63 = vpop.f32.mrf.mxu3 }
 0x35b   : > { %1056 = vadd.xlane.f32.xlu2 %v10915_v15  ;;  %2613 = vmax.xlane.f32.xlu1 %v10917_v63  ;;  %v1086_v15 = vand.u32 2147483647, %v1033_v60 }
 0x35c   : > { %1759 = vmax.xlane.f32.xlu0 %v10897_v1  ;;  %v10924_v12 = vpop.f32.mrf.mxu1 }
 0x35d   : > { %vm1087_vm4 = vcmp.eq.f32.partialorder %v1086_v15, 8.507059e+37 }
 0x35e   : > { %v9376_v61 = vpop.eup %9375 }
 0x35f   : > { %v1078_v20 = vmul.f32 %v9376_v61, %v1033_v60  ;;  %v10930_v3 = vpop.eup %9377  ;;  %vm1083_vm1 = vweird.f32 %v9376_v61 }
 0x360   : > { %v1031_v39 = vpop.xlane.xlu1 %1030  ;;  %v10926_v24 = vpop.xlane.xlu0 %1735  ;;  %14009 = vst [vmem:[#allocation33_spill] sm:$0xff] %v10930_v3  ;;  %vm1084_vm3 = vmor %vm1082_vm2, %vm1083_vm1 }
 0x361   : > { %9379 = vrcp.f32 %v1031_v39  ;;  %v1079_v27 = vsub.f32 1.0, %v1078_v20  ;;  %v1071_v15 = vand.u32 2147483647, %v1031_v39  ;;  %vm1067_vm6 = vweird.f32 %v1031_v39 }
 0x362   : > { %v10928_v42 = vpop.f32.mrf.mxu3  ;;  %9381 = vpow2.f32 %v1777_v44  ;;  %v1028_v44 = vmul.f32 1.442695, %v997_v62 }
 0x363   : > { %14008 = vst [vmem:[#allocation41_spill] sm:$0xff] %v10928_v42  ;;  %3449 = vmax.xlane.f32.xlu1 %v10906_v7  ;;  %2615 = vmax.xlane.f32.xlu2 %v10928_v42  ;;  %9383 = vpow2.f32 %v1779_v56  ;;  %v1080_v26 = vmul.f32 %v9376_v61, %v1079_v27  ;;  %v1089_v56 = vor.u32 1.1754944e-38, %v1088_v38  ;;  %v1073_v42 = vand.u32 2147483648, %v1031_v39 }
 0x364   : > { %1058 = vadd.xlane.f32.xlu0 %v10930_v3  ;;  %v10936_v41 = vpop.f32.mrf.mxu1  ;;  %vm1072_vm8 = vcmp.eq.f32.partialorder %v1071_v15, 8.507059e+37 }
 0x365   : > { %v1081_v20 = vadd.f32 %v9376_v61, %v1080_v26 }
 0x367   : > { %v9380_v1 = vpop.eup %9379  ;;  %8529 = vmatmul.msk.bf16.gmra.mxu3 %vm852_vm0, %v10677_v8  ;;  %8643 = vmatmul.msk.bf16.gmra.mxu1 %vm852_vm0, %v10657_v29  ;;  %v1085_v27 = vsel %vm1084_vm3, %v9376_v61, %v1081_v20  ;;  %v1763_v61 = vsub.f32 %v10740_v32, %v10913_v36 }
 0x368   : > { %v1063_v33 = vmul.f32 %v9380_v1, %v1031_v39  ;;  %v10943_v34 = vpop.xlane.xlu0 %1034  ;;  %v10945_v3 = vpop.eup %9381  ;;  %v1090_v29 = vsel %vm1087_vm4, %v1089_v56, %v1085_v27  ;;  %vm1068_vm5 = vweird.f32 %v9380_v1 }
 0x369   : > { %14010 = vst [vmem:[#allocation36_spill] sm:$0xff] %v10945_v3  ;;  %9385 = vrcp.f32 %v10943_v34  ;;  %v10948_v60 = vpop.eup %9383  ;;  %v1303_v62 = vmul.f32 %v10742_v30, %v1090_v29  ;;  %vm1069_vm7 = vmor %vm1067_vm6, %vm1068_vm5  ;;  %v1781_v29 = vmul.f32 1.442695, %v1763_v61  ;;  %v1101_v15 = vand.u32 2147483647, %v10943_v34 }
 0x36a   : > { %14011 = vst [vmem:[#allocation18_spill] sm:$0xff] %v10948_v60  ;;  %v1064_v8 = vsub.f32 1.0, %v1063_v33  ;;  %v10950_v7 = vpop.f32.mrf.mxu3  ;;  %9387 = vpow2.f32 %v1028_v44  ;;  %v1074_v44 = vor.u32 1.1754944e-38, %v1073_v42  ;;  %vm1097_vm10 = vweird.f32 %v10943_v34 }
 0x36b   : > { %1811 = vadd.xlane.f32.xlu1 %v10948_v60  ;;  %1809 = vadd.xlane.f32.xlu2 %v10945_v3  ;;  %1319 = vst [vmem:[%s10960_s7 + $0x8] sm:$0xff] %v1303_v62  ;;  %vm1102_vm12 = vcmp.eq.f32.partialorder %v1101_v15, 8.507059e+37 }
 0x36c   : > { %v1065_v38 = vmul.f32 %v9380_v1, %v1064_v8  ;;  %2617 = vmax.xlane.f32.xlu0 %v10950_v7  ;;  %v10956_v26 = vpop.f32.mrf.mxu1 }
 0x36e   : > { %v2590_v20 = vpop.xlane.xlu1 %2589  ;;  %v1066_v33 = vadd.f32 %v9380_v1, %v1065_v38  ;;  %v1764_v38 = vsub.f32 %v10754_v13, %v10926_v24 }
 0x36f   : > { %v9386_v56 = vpop.eup %9385  ;;  %v2621_v30 = vsub.f32 %v10772_v22, %v2590_v20  ;;  %v1103_v22 = vand.u32 2147483648, %v10943_v34 }
 0x370   : > { %v1093_v27 = vmul.f32 %v9386_v56, %v10943_v34  ;;  %v1070_v8 = vsel %vm1069_vm7, %v9380_v1, %v1066_v33  ;;  %v10965_v36 = vpop.eup %9387  ;;  %vm1098_vm9 = vweird.f32 %v9386_v56 }
 0x371   : > { %v2637_v60 = vmul.f32 1.442695, %v2621_v30  ;;  %v1075_v32 = vsel %vm1072_vm8, %v1074_v44, %v1070_v8  ;;  %vm1099_vm11 = vmor %vm1097_vm10, %vm1098_vm9 }
 0x372   : > { %v1094_v3 = vsub.f32 1.0, %v1093_v27  ;;  %v1302_v39 = vmul.f32 %v10752_v45, %v1075_v32  ;;  %v10976_v45 = vpop.f32.mrf.mxu3 }
 0x373   : > { %9389 = vpow2.f32 %v2637_v60  ;;  %1060 = vadd.xlane.f32.xlu1 %v10965_v36  ;;  %3453 = vmax.xlane.f32.xlu2 %v10936_v41 }
 0x374   : > { %3451 = vmax.xlane.f32.xlu0 %v10924_v12  ;;  %1318 = vst [vmem:[%s10960_s7] sm:$0xff] %v1302_v39  ;;  %v1334_v1 = vpack.c.bf16 %v1303_v62, %v1302_v39  ;;  %v1095_v42 = vmul.f32 %v9386_v56, %v1094_v3  ;;  %9391 = vpow2.f32 %v1781_v29  ;;  %v10978_v61 = vpop.f32.mrf.mxu1  ;;  %v1104_v3 = vor.u32 1.1754944e-38, %v1103_v22 }
 0x375   : > { %v1783_v62 = vmul.f32 1.442695, %v1764_v38 }
 0x376   : > { %1398 = vmatmul.bf16.vlgmr.msrb.gmra.mxu0 %v1334_v1  ;;  %v10980_v13 = vpop.xlane.xlu1 %1739  ;;  %v2592_v24 = vpop.xlane.xlu2 %2591  ;;  %v1096_v60 = vadd.f32 %v9386_v56, %v1095_v42 }
 0x377   : > { %8644 = vmatmul.msk.bf16.gmra.mxu1 %vm852_vm0, %v10671_v21  ;;  %8762 = vmatmul.msk.bf16.vlgmr.msrb.gmra.mxu3 %vm852_vm0, %v10770_v48  ;;  %9393 = vpow2.f32 %v1783_v62  ;;  %v2622_v21 = vsub.f32 %v10779_v11, %v2592_v24 }
 0x378   : > { %v1100_v20 = vsel %vm1099_vm11, %v9386_v56, %v1096_v60 }
 0x379   : > { %v10987_v33 = vpop.eup %9389  ;;  %v1105_v30 = vsel %vm1102_vm12, %v1104_v3, %v1100_v20  ;;  %v2639_v32 = vmul.f32 1.442695, %v2622_v21 }
 0x37a   : > { %v10990_v44 = vmul.f32 %v10759_v51, %v1105_v30  ;;  %v10992_v27 = vpop.eup %9391  ;;  %v11003_v29 = vpop.f32.mrf.mxu3 }
 0x37b   : > { %2669 = vadd.xlane.f32.xlu2 %v10987_v33  ;;  %2619 = vmax.xlane.f32.xlu1 %v10976_v45  ;;  %14012 = vst [vmem:[#allocation38_spill] sm:$0xff] %v11003_v29 }
 0x37c   : > { %1813 = vadd.xlane.f32.xlu0 %v10992_v27  ;;  %1320 = vst [vmem:[%s10960_s7 + $0x10] sm:$0xff] %v10990_v44  ;;  %v11000_v56 = vpop.f32.mrf.mxu1 }
 0x37d   : > { %v11005_v38 = vpop.eup %9393 }
 0x37e   : > { %v1037_v48 = vpop.xlane.xlu1 %1036  ;;  %v1738_v34 = vpop.xlane.xlu2 %1737 }
 0x37f   : > { %9395 = vrcp.f32 %v1037_v48  ;;  %v1765_v51 = vsub.f32 %v10761_v43, %v1738_v34  ;;  %v2594_v8 = vpop.xlane.xlu0 %2593  ;;  %v1118_v62 = vand.u32 2147483648, %v1037_v48  ;;  %v1116_v21 = vand.u32 2147483647, %v1037_v48 }
 0x380   : > { %v2623_v11 = vsub.f32 %v10793_v19, %v2594_v8  ;;  %vm1112_vm14 = vweird.f32 %v1037_v48 }
 0x381   : > { %v1785_v39 = vmul.f32 1.442695, %v1765_v51  ;;  %vm1117_vm1 = vcmp.eq.f32.partialorder %v1116_v21, 8.507059e+37 }
 0x382   : > { %v2641_v60 = vmul.f32 1.442695, %v2623_v11  ;;  %v11022_v20 = vpop.f32.mrf.mxu3 }
 0x383   : > { %9397 = vpow2.f32 %v1785_v39  ;;  %1815 = vadd.xlane.f32.xlu2 %v11005_v38  ;;  %3455 = vmax.xlane.f32.xlu1 %v10956_v26  ;;  %14014 = vst [vmem:[#allocation22_spill] sm:$0xff] %v11022_v20  ;;  %v1119_v39 = vor.u32 1.1754944e-38, %v1118_v62 }
 0x384   : > { %4309 = vmax.xlane.f32.xlu0 %v11003_v29  ;;  %9399 = vpow2.f32 %v2639_v32  ;;  %v11020_v19 = vpop.f32.mrf.mxu1  ;;  %v1766_v32 = vsub.f32 %v10776_v46, %v10980_v13 }
 0x385   : > { %v9396_v22 = vpop.eup %9395 }
 0x386   : > { %v1108_v1 = vmul.f32 %v9396_v22, %v1037_v48  ;;  %v11011_v43 = vpop.xlane.xlu2 %1038  ;;  %v2596_v42 = vpop.xlane.xlu1 %2595  ;;  %vm1113_vm13 = vweird.f32 %v9396_v22  ;;  %v1787_v46 = vmul.f32 1.442695, %v1766_v32 }
 0x387   : > { %9401 = vrcp.f32 %v11011_v43  ;;  %v11014_v15 = vpop.xlane.xlu0 %1741  ;;  %8645 = vmatmul.msk.bf16.gmra.mxu1 %vm852_vm0, %v10683_v31  ;;  %v2624_v31 = vsub.f32 %v10805_v59, %v2596_v42  ;;  %vm1114_vm15 = vmor %vm1112_vm14, %vm1113_vm13  ;;  %v1133_v13 = vand.u32 2147483648, %v11011_v43  ;;  %vm1127_vm3 = vweird.f32 %v11011_v43 }
 0x388   : > { %v1109_v24 = vsub.f32 1.0, %v1108_v1  ;;  %9403 = vpow2.f32 %v2641_v60 }
 0x389   : > { %v11018_v3 = vpop.eup %9397 }
 0x38a   : > { %14013 = vst [vmem:[#allocation20_spill] sm:$0xff] %v11018_v3  ;;  %v1110_v30 = vmul.f32 %v9396_v22, %v1109_v24  ;;  %v11024_v34 = vpop.eup %9399 }
 0x38b   : > { %1817 = vadd.xlane.f32.xlu1 %v11018_v3  ;;  %4311 = vmax.xlane.f32.xlu2 %v11022_v20 }
 0x38c   : > { %2671 = vadd.xlane.f32.xlu0 %v11024_v34  ;;  %v1111_v51 = vadd.f32 %v9396_v22, %v1110_v30  ;;  %v2643_v30 = vmul.f32 1.442695, %v2624_v31  ;;  %v11045_v21 = vpop.f32.mrf.mxu1  ;;  %v1134_v31 = vor.u32 1.1754944e-38, %v1133_v13 }
 0x38d   : > { %v9402_v8 = vpop.eup %9401 }
 0x38e   : > { %v1123_v11 = vmul.f32 %v9402_v8, %v11011_v43  ;;  %v11033_v1 = vpop.xlane.xlu1 %1745  ;;  %v2598_v24 = vpop.xlane.xlu2 %2597  ;;  %v1115_v29 = vsel %vm1114_vm15, %v9396_v22, %v1111_v51  ;;  %vm1128_vm2 = vweird.f32 %v9402_v8  ;;  %v1131_v22 = vand.u32 2147483647, %v11011_v43 }
 0x38f   : > { %v11035_v60 = vpop.xlane.xlu0 %1040  ;;  %v1120_v59 = vsel %vm1117_vm1, %v1119_v39, %v1115_v29  ;;  %v11040_v62 = vpop.eup %9403  ;;  %vm1129_vm4 = vmor %vm1127_vm3, %vm1128_vm2 }
 0x390   : > { %v1124_v42 = vsub.f32 1.0, %v1123_v11  ;;  %9405 = vrcp.f32 %v11035_v60  ;;  %v1305_v48 = vmul.f32 %v10791_v2, %v1120_v59  ;;  %v1767_v2 = vsub.f32 %v10784_v47, %v11014_v15 }
 0x391   : > { %9407 = vpow2.f32 %v2643_v30  ;;  %vm1132_vm5 = vcmp.eq.f32.partialorder %v1131_v22, 8.507059e+37  ;;  %vm1142_vm7 = vweird.f32 %v11035_v60 }
 0x392   : > { %1321 = vst [vmem:[%s10960_s7 + $0x18] sm:$0xff] %v1305_v48  ;;  %v1335_v20 = vpack.c.bf16 %v1305_v48, %v10990_v44  ;;  %v1125_v3 = vmul.f32 %v9402_v8, %v1124_v42  ;;  %9409 = vpow2.f32 %v1787_v46  ;;  %v2625_v44 = vsub.f32 %v10817_v23, %v2598_v24  ;;  %v11065_v42 = vpop.f32.mrf.mxu3 }
 0x393   : > { %2673 = vadd.xlane.f32.xlu1 %v11040_v62  ;;  %3459 = vmax.xlane.f32.xlu2 %v11000_v56  ;;  %v1789_v23 = vmul.f32 1.442695, %v1767_v2  ;;  %14015 = vst [vmem:[#allocation17_spill] sm:$0xff] %v11065_v42  ;;  %v1146_v48 = vand.u32 2147483647, %v11035_v60 }
 0x394   : > { %3457 = vmax.xlane.f32.xlu0 %v10978_v61  ;;  %1403 = vmatmul.bf16.gmra.mxu0 %v1335_v20  ;;  %v1126_v29 = vadd.f32 %v9402_v8, %v1125_v3  ;;  %v2645_v24 = vmul.f32 1.442695, %v2625_v44  ;;  %v11076_v13 = vpop.f32.mrf.mxu1 }
 0x395   : > { %vm1147_vm9 = vcmp.eq.f32.partialorder %v1146_v48, 8.507059e+37 }
 0x396   : > { %v9406_v51 = vpop.eup %9405  ;;  %v11054_v32 = vpop.xlane.xlu1 %1042  ;;  %v1130_v11 = vsel %vm1129_vm4, %v9402_v8, %v1126_v29  ;;  %v1148_v8 = vand.u32 2147483648, %v11035_v60 }
 0x397   : > { %v1744_v39 = vpop.xlane.xlu2 %1743  ;;  %v1138_v47 = vmul.f32 %v9406_v51, %v11035_v60  ;;  %9411 = vrcp.f32 %v11054_v32  ;;  %v11058_v15 = vpop.xlane.xlu0 %2599  ;;  %8646 = vmatmul.msk.bf16.gmra.mxu1 %vm852_vm0, %v10690_v4  ;;  %v1135_v43 = vsel %vm1132_vm5, %v1134_v31, %v1130_v11  ;;  %vm1143_vm6 = vweird.f32 %v9406_v51 }
 0x398   : > { %v1306_v3 = vmul.f32 %v10803_v16, %v1135_v43  ;;  %v11063_v59 = vpop.eup %9407  ;;  %9413 = vpow2.f32 %v1789_v23  ;;  %v1768_v16 = vsub.f32 %v10798_v49, %v1744_v39  ;;  %vm1144_vm8 = vmor %vm1142_vm7, %vm1143_vm6  ;;  %v1149_v31 = vor.u32 1.1754944e-38, %v1148_v8 }
 0x399   : > { %v1139_v20 = vsub.f32 1.0, %v1138_v47  ;;  %v11069_v30 = vpop.eup %9409  ;;  %9415 = vpow2.f32 %v2645_v24  ;;  %v1163_v60 = vand.u32 2147483648, %v11054_v32  ;;  %v1161_v8 = vand.u32 2147483647, %v11054_v32 }
 0x39a   : > { %1322 = vst [vmem:[%s10960_s7 + $0x20] sm:$0xff] %v1306_v3  ;;  %v1791_v47 = vmul.f32 1.442695, %v1768_v16  ;;  %vm1157_vm11 = vweird.f32 %v11054_v32 }
 0x39b   : > { %2675 = vadd.xlane.f32.xlu2 %v11063_v59  ;;  %4313 = vmax.xlane.f32.xlu1 %v11065_v42  ;;  %v1140_v4 = vmul.f32 %v9406_v51, %v1139_v20  ;;  %v2626_v42 = vsub.f32 %v10829_v25, %v11058_v15  ;;  %v1164_v25 = vor.u32 1.1754944e-38, %v1163_v60  ;;  %vm1162_vm13 = vcmp.eq.f32.partialorder %v1161_v8, 8.507059e+37 }
 0x39c   : > { %1819 = vadd.xlane.f32.xlu0 %v11069_v30 }
 0x39d   : > { %v9412_v46 = vpop.eup %9411  ;;  %v1141_v22 = vadd.f32 %v9406_v51, %v1140_v4 }
 0x39e   : > { %v1153_v2 = vmul.f32 %v9412_v46, %v11054_v32  ;;  %v2602_v44 = vpop.xlane.xlu1 %2601  ;;  %v11087_v20 = vpop.eup %9413  ;;  %vm1158_vm10 = vweird.f32 %v9412_v46 }
 0x39f   : > { %v11080_v29 = vpop.xlane.xlu2 %1044  ;;  %v11083_v11 = vpop.xlane.xlu0 %1747  ;;  %v1145_v49 = vsel %vm1144_vm8, %v9406_v51, %v1141_v22  ;;  %v1769_v22 = vsub.f32 %v10811_v18, %v11033_v1  ;;  %vm1159_vm12 = vmor %vm1157_vm11, %vm1158_vm10 }
 0x3a0   : > { %9417 = vrcp.f32 %v11080_v29  ;;  %v1154_v39 = vsub.f32 1.0, %v1153_v2  ;;  %v1150_v43 = vsel %vm1147_vm9, %v1149_v31, %v1145_v49  ;;  %v11090_v4 = vpop.eup %9415  ;;  %vm1172_vm15 = vweird.f32 %v11080_v29 }
 0x3a1   : > { %v1307_v23 = vmul.f32 %v10819_v50, %v1150_v43  ;;  %9419 = vpow2.f32 %v1791_v47  ;;  %v2627_v50 = vsub.f32 %v10843_v9, %v2602_v44  ;;  %v2647_v9 = vmul.f32 1.442695, %v2626_v42  ;;  %v11106_v44 = vpop.f32.mrf.mxu1 }
 0x3a2   : > { %v1155_v24 = vmul.f32 %v9412_v46, %v1154_v39  ;;  %v1793_v39 = vmul.f32 1.442695, %v1769_v22  ;;  %v1178_v42 = vand.u32 2147483648, %v11080_v29 }
 0x3a3   : > { %1821 = vadd.xlane.f32.xlu2 %v11087_v20  ;;  %3461 = vmax.xlane.f32.xlu1 %v11020_v19  ;;  %1323 = vst [vmem:[%s10960_s7 + $0x28] sm:$0xff] %v1307_v23  ;;  %v1336_v51 = vpack.c.bf16 %v1307_v23, %v1306_v3  ;;  %v2649_v32 = vmul.f32 1.442695, %v2627_v50  ;;  %v1770_v23 = vsub.f32 %v10825_v10, %v11083_v11 }
 0x3a4   : > { %2677 = vadd.xlane.f32.xlu0 %v11090_v4  ;;  %v1156_v48 = vadd.f32 %v9412_v46, %v1155_v24 }
 0x3a5   : > { %1408 = vmatmul.bf16.gmra.mxu0 %v1336_v51  ;;  %v1795_v11 = vmul.f32 1.442695, %v1770_v23 }
 0x3a6   : > { %v9418_v16 = vpop.eup %9417  ;;  %v11104_v2 = vpop.xlane.xlu1 %1751  ;;  %v1160_v31 = vsel %vm1159_vm12, %v9412_v46, %v1156_v48  ;;  %v1179_v48 = vor.u32 1.1754944e-38, %v1178_v42 }
 0x3a7   : > { %v1168_v15 = vmul.f32 %v9418_v16, %v11080_v29  ;;  %v2604_v3 = vpop.xlane.xlu2 %2603  ;;  %v11108_v49 = vpop.xlane.xlu0 %1046  ;;  %8647 = vmatmul.msk.bf16.gmra.mxu1 %vm852_vm0, %v10659_v28  ;;  %v1165_v18 = vsel %vm1162_vm13, %v1164_v25, %v1160_v31  ;;  %vm1173_vm14 = vweird.f32 %v9418_v16  ;;  %v1176_v28 = vand.u32 2147483647, %v11080_v29 }
 0x3a8   : > { %9421 = vrcp.f32 %v11108_v49  ;;  %v1308_v47 = vmul.f32 %v10827_v6, %v1165_v18  ;;  %v11114_v43 = vpop.eup %9419  ;;  %v2628_v60 = vsub.f32 %v10851_v0, %v2604_v3  ;;  %vm1174_vm1 = vmor %vm1172_vm15, %vm1173_vm14  ;;  %vm1187_vm4 = vweird.f32 %v11108_v49 }
 0x3a9   : > { %v1169_v1 = vsub.f32 1.0, %v1168_v15  ;;  %9423 = vpow2.f32 %v2647_v9  ;;  %vm1177_vm2 = vcmp.eq.f32.partialorder %v1176_v28, 8.507059e+37  ;;  %v11134_v0 = vpop.f32.mrf.mxu1 }
 0x3aa   : > { %1324 = vst [vmem:[%s10960_s7 + $0x30] sm:$0xff] %v1308_v47  ;;  %9425 = vpow2.f32 %v2649_v32  ;;  %v2651_v3 = vmul.f32 1.442695, %v2628_v60 }
 0x3ab   : > { %v1170_v46 = vmul.f32 %v9418_v16, %v1169_v1  ;;  %3465 = vmax.xlane.f32.xlu2 %v11076_v13  ;;  %1823 = vadd.xlane.f32.xlu1 %v11114_v43  ;;  %9427 = vpow2.f32 %v1793_v39  ;;  %v1193_v1 = vand.u32 2147483648, %v11108_v49 }
 0x3ac   : > { %3463 = vmax.xlane.f32.xlu0 %v11045_v21 }
 0x3ad   : > { %v1171_v6 = vadd.f32 %v9418_v16, %v1170_v46 }
 0x3ae   : > { %v9422_v24 = vpop.eup %9421  ;;  %v11126_v8 = vpop.xlane.xlu1 %1048 }
 0x3af   : > { %v1750_v51 = vpop.xlane.xlu2 %1749  ;;  %v1175_v50 = vsel %vm1174_vm1, %v9418_v16, %v1171_v6  ;;  %v1183_v22 = vmul.f32 %v9422_v24, %v11108_v49  ;;  %9429 = vrcp.f32 %v11126_v8  ;;  %v11130_v10 = vpop.xlane.xlu0 %2605  ;;  %vm1188_vm3 = vweird.f32 %v9422_v24 }
 0x3b0   : > { %v1180_v29 = vsel %vm1177_vm2, %v1179_v48, %v1175_v50  ;;  %v11132_v25 = vpop.eup %9423  ;;  %9431 = vpow2.f32 %v1795_v11  ;;  %v1771_v39 = vsub.f32 %v10834_v53, %v1750_v51  ;;  %vm1189_vm5 = vmor %vm1187_vm4, %vm1188_vm3  ;;  %v1194_v53 = vor.u32 1.1754944e-38, %v1193_v1 }
 0x3b1   : > { %v1184_v15 = vsub.f32 1.0, %v1183_v22  ;;  %v1309_v31 = vmul.f32 %v10841_v5, %v1180_v29  ;;  %v11137_v16 = vpop.eup %9425  ;;  %v1191_v5 = vand.u32 2147483647, %v11108_v49  ;;  %9433 = vpow2.f32 %v2651_v3 }
 0x3b2   : > { %v11139_v9 = vpop.eup %9427  ;;  %v1797_v51 = vmul.f32 1.442695, %v1771_v39  ;;  %v1208_v49 = vand.u32 2147483648, %v11126_v8  ;;  %v1206_v29 = vand.u32 2147483647, %v11126_v8  ;;  %vm1202_vm8 = vweird.f32 %v11126_v8 }
 0x3b3   : > { %v1185_v18 = vmul.f32 %v9422_v24, %v1184_v15  ;;  %2681 = vadd.xlane.f32.xlu2 %v11137_v16  ;;  %2679 = vadd.xlane.f32.xlu1 %v11132_v25  ;;  %1325 = vst [vmem:[%s10960_s7 + $0x38] sm:$0xff] %v1309_v31  ;;  %v1337_v32 = vpack.c.bf16 %v1309_v31, %v1308_v47  ;;  %vm1192_vm6 = vcmp.eq.f32.partialorder %v1191_v5, 8.507059e+37 }
 0x3b4   : > { %1825 = vadd.xlane.f32.xlu0 %v11139_v9  ;;  %v1772_v1 = vsub.f32 %v10849_v55, %v11104_v2  ;;  %vm1207_vm10 = vcmp.eq.f32.partialorder %v1206_v29, 8.507059e+37 }
 0x3b5   : > { %v9430_v46 = vpop.eup %9429  ;;  %1413 = vmatmul.bf16.gmra.mxu0 %v1337_v32  ;;  %v1186_v42 = vadd.f32 %v9422_v24, %v1185_v18 }
 0x3b6   : > { %v1198_v28 = vmul.f32 %v9430_v46, %v11126_v8  ;;  %v2608_v6 = vpop.xlane.xlu1 %2607  ;;  %v11158_v22 = vpop.eup %9431  ;;  %vm1203_vm7 = vweird.f32 %v9430_v46  ;;  %v1799_v55 = vmul.f32 1.442695, %v1772_v1 }
 0x3b7   : > { %v11150_v23 = vpop.xlane.xlu2 %1050  ;;  %v11153_v47 = vpop.xlane.xlu0 %1753  ;;  %8648 = vmatmul.msk.bf16.gmra.mxu1 %vm852_vm0, %v10725_v57  ;;  %v1190_v50 = vsel %vm1189_vm5, %v9422_v24, %v1186_v42  ;;  %v2629_v24 = vsub.f32 %v10867_v40, %v11130_v10  ;;  %v2630_v31 = vsub.f32 %v10877_v17, %v2608_v6  ;;  %vm1204_vm9 = vmor %vm1202_vm8, %vm1203_vm7  ;;  %v1209_v40 = vor.u32 1.1754944e-38, %v1208_v49 }
 0x3b8   : > { %9435 = vrcp.f32 %v11150_v23  ;;  %v1199_v60 = vsub.f32 1.0, %v1198_v28  ;;  %v1195_v48 = vsel %vm1192_vm6, %v1194_v53, %v1190_v50  ;;  %v11162_v3 = vpop.eup %9433  ;;  %v11164_v57 = vpop.f32.mrf.mxu1  ;;  %v1221_v50 = vand.u32 2147483647, %v11150_v23 }
 0x3b9   : > { %v1310_v15 = vmul.f32 %v10853_v52, %v1195_v48  ;;  %9437 = vpow2.f32 %v1797_v51  ;;  %v2653_v17 = vmul.f32 1.442695, %v2629_v24  ;;  %v2655_v6 = vmul.f32 1.442695, %v2630_v31 }
 0x3ba   : > { %v1200_v11 = vmul.f32 %v9430_v46, %v1199_v60  ;;  %v1223_v51 = vand.u32 2147483648, %v11150_v23  ;;  %vm1217_vm12 = vweird.f32 %v11150_v23  ;;  %vm1222_vm14 = vcmp.eq.f32.partialorder %v1221_v50, 8.507059e+37 }
 0x3bb   : > { %1827 = vadd.xlane.f32.xlu2 %v11158_v22  ;;  %3467 = vmax.xlane.f32.xlu1 %v11106_v44  ;;  %1326 = vst [vmem:[%s10960_s7 + $0x40] sm:$0xff] %v1310_v15 }
 0x3bc   : > { %2683 = vadd.xlane.f32.xlu0 %v11162_v3  ;;  %v1201_v18 = vadd.f32 %v9430_v46, %v1200_v11  ;;  %v1224_v31 = vor.u32 1.1754944e-38, %v1223_v51 }
 0x3be   : > { %v9436_v52 = vpop.eup %9435  ;;  %v11178_v32 = vpop.xlane.xlu1 %1757  ;;  %v1205_v8 = vsel %vm1204_vm9, %v9430_v46, %v1201_v18 }
 0x3bf   : > { %v1213_v10 = vmul.f32 %v9436_v52, %v11150_v23  ;;  %v2610_v39 = vpop.xlane.xlu2 %2609  ;;  %v11180_v5 = vpop.xlane.xlu0 %1052  ;;  %v1210_v42 = vsel %vm1207_vm10, %v1209_v40, %v1205_v8  ;;  %vm1218_vm11 = vweird.f32 %v9436_v52 }
 0x3c0   : > { %9439 = vrcp.f32 %v11180_v5  ;;  %v1311_v2 = vmul.f32 %v10865_v35, %v1210_v42  ;;  %v11184_v53 = vpop.eup %9437  ;;  %v1773_v35 = vsub.f32 %v10859_v54, %v11153_v47  ;;  %v11195_v48 = vpop.f32.mrf.mxu1  ;;  %v2631_v11 = vsub.f32 %v10889_v37, %v2610_v39  ;;  %vm1219_vm13 = vmor %vm1217_vm12, %vm1218_vm11 }
 0x3c1   : > { %v1214_v28 = vsub.f32 1.0, %v1213_v10  ;;  %9441 = vpow2.f32 %v2653_v17  ;;  %14016 = vst [vmem:[#allocation26_spill] sm:$0xff] %v11195_v48  ;;  %v1238_v42 = vand.u32 2147483648, %v11180_v5  ;;  %vm1232_vm1 = vweird.f32 %v11180_v5 }
 0x3c2   : > { %1327 = vst [vmem:[%s10960_s7 + $0x48] sm:$0xff] %v1311_v2  ;;  %v1338_v46 = vpack.c.bf16 %v1311_v2, %v1310_v15  ;;  %9443 = vpow2.f32 %v2655_v6  ;;  %v1801_v37 = vmul.f32 1.442695, %v1773_v35  ;;  %v2657_v10 = vmul.f32 1.442695, %v2631_v11 }
 0x3c3   : > { %v1215_v60 = vmul.f32 %v9436_v52, %v1214_v28  ;;  %3471 = vmax.xlane.f32.xlu2 %v11164_v57  ;;  %1829 = vadd.xlane.f32.xlu1 %v11184_v53  ;;  %9445 = vpow2.f32 %v1799_v55  ;;  %v1239_v50 = vor.u32 1.1754944e-38, %v1238_v42 }
 0x3c4   : > { %3469 = vmax.xlane.f32.xlu0 %v11134_v0 }
 0x3c5   : > { %v1216_v49 = vadd.f32 %v9436_v52, %v1215_v60  ;;  %1418 = vmatmul.bf16.gmra.mxu0 %v1338_v46 }
 0x3c6   : > { %v9440_v29 = vpop.eup %9439  ;;  %v11199_v15 = vpop.xlane.xlu1 %1054 }
 0x3c7   : > { %v1756_v24 = vpop.xlane.xlu2 %1755  ;;  %v1220_v23 = vsel %vm1219_vm13, %v9436_v52, %v1216_v49  ;;  %v1228_v54 = vmul.f32 %v9440_v29, %v11180_v5  ;;  %9447 = vrcp.f32 %v11199_v15  ;;  %v11203_v47 = vpop.xlane.xlu0 %2611  ;;  %8649 = vmatmul.msk.bf16.gmra.mxu1 %vm852_vm0, %v10703_v14  ;;  %v14017_v14 = vld [vmem:[#allocation25_spill] sm:$0xff]  ;;  %vm1233_vm15 = vweird.f32 %v9440_v29 }
 0x3c8   : > { %v1225_v18 = vsel %vm1222_vm14, %v1224_v31, %v1220_v23  ;;  %v11207_v1 = vpop.eup %9441  ;;  %9449 = vpow2.f32 %v1801_v37  ;;  %v1774_v28 = vsub.f32 %v14017_v14, %v1756_v24  ;;  %vm1234_vm2 = vmor %vm1232_vm1, %vm1233_vm15  ;;  %v11228_v35 = vpop.f32.mrf.mxu1  ;;  %v14019_v37 = vld [vmem:[#allocation31_spill] sm:$0xff]  ;;  %vm1247_vm5 = vweird.f32 %v11199_v15 }
 0x3c9   : > { %v1229_v40 = vsub.f32 1.0, %v1228_v54  ;;  %v1312_v52 = vmul.f32 %v10875_v58, %v1225_v18  ;;  %v11210_v39 = vpop.eup %9443  ;;  %v1236_v58 = vand.u32 2147483647, %v11180_v5  ;;  %9451 = vpow2.f32 %v2657_v10  ;;  %14018 = vst [vmem:[#allocation21_spill] sm:$0xff] %v11228_v35 }
 0x3ca   : > { %v11212_v8 = vpop.eup %9445  ;;  %v1803_v11 = vmul.f32 1.442695, %v1774_v28  ;;  %v1253_v5 = vand.u32 2147483648, %v11199_v15 }
 0x3cb   : > { %v1230_v17 = vmul.f32 %v9440_v29, %v1229_v40  ;;  %2687 = vadd.xlane.f32.xlu2 %v11210_v39  ;;  %2685 = vadd.xlane.f32.xlu1 %v11207_v1  ;;  %1328 = vst [vmem:[%s10960_s7 + $0x50] sm:$0xff] %v1312_v52  ;;  %vm1237_vm3 = vcmp.eq.f32.partialorder %v1236_v58, 8.507059e+37  ;;  %v1251_v40 = vand.u32 2147483647, %v11199_v15 }
 0x3cc   : > { %1831 = vadd.xlane.f32.xlu0 %v11212_v8 }
 0x3cd   : > { %v9448_v6 = vpop.eup %9447  ;;  %v1231_v55 = vadd.f32 %v9440_v29, %v1230_v17  ;;  %v14020_v17 = vld [vmem:[#allocation28_spill] sm:$0xff]  ;;  %vm1252_vm7 = vcmp.eq.f32.partialorder %v1251_v40, 8.507059e+37 }
 0x3ce   : > { %v1243_v2 = vmul.f32 %v9448_v6, %v11199_v15  ;;  %v2614_v51 = vpop.xlane.xlu1 %2613  ;;  %v11231_v31 = vpop.eup %9449  ;;  %vm1248_vm4 = vweird.f32 %v9448_v6  ;;  %v1254_v15 = vor.u32 1.1754944e-38, %v1253_v5 }
 0x3cf   : > { %v11223_v60 = vpop.xlane.xlu2 %1056  ;;  %v11226_v46 = vpop.xlane.xlu0 %1759  ;;  %v1235_v24 = vsel %vm1234_vm2, %v9440_v29, %v1231_v55  ;;  %v2632_v29 = vsub.f32 %v14020_v17, %v11203_v47  ;;  %v2633_v42 = vsub.f32 %v10917_v63, %v2614_v51  ;;  %v14021_v55 = vld [vmem:[#allocation35_spill] sm:$0xff]  ;;  %vm1249_vm6 = vmor %vm1247_vm5, %vm1248_vm4 }
 0x3d0   : > { %9453 = vrcp.f32 %v11223_v60  ;;  %v1244_v49 = vsub.f32 1.0, %v1243_v2  ;;  %v1240_v23 = vsel %vm1237_vm3, %v1239_v50, %v1235_v24  ;;  %v11235_v10 = vpop.eup %9451  ;;  %v1775_v2 = vsub.f32 %v14021_v55, %v11178_v32  ;;  %v14022_v24 = vld [vmem:[#allocation19_spill] sm:$0xff]  ;;  %v11257_v17 = vpop.f32.mrf.mxu1  ;;  %v14025_v55 = vld [vmem:[#allocation41_spill] sm:$0xff] }
 0x3d1   : > { %v1313_v18 = vmul.f32 %v14019_v37, %v1240_v23  ;;  %9455 = vpow2.f32 %v1803_v11  ;;  %v2659_v63 = vmul.f32 1.442695, %v2632_v29  ;;  %v2661_v32 = vmul.f32 1.442695, %v2633_v42  ;;  %v14024_v29 = vld [vmem:[#allocation32_spill] sm:$0xff] }
 0x3d2   : > { %v1245_v54 = vmul.f32 %v9448_v6, %v1244_v49  ;;  %v1805_v5 = vmul.f32 1.442695, %v1775_v2  ;;  %vm1262_vm9 = vweird.f32 %v11223_v60  ;;  %v1268_v40 = vand.u32 2147483648, %v11223_v60 }
 0x3d3   : > { %1833 = vadd.xlane.f32.xlu2 %v11231_v31  ;;  %3473 = vmax.xlane.f32.xlu1 %v11195_v48  ;;  %1329 = vst [vmem:[%s10960_s7 + $0x58] sm:$0xff] %v1313_v18  ;;  %v1339_v14 = vpack.c.bf16 %v1313_v18, %v1312_v52  ;;  %v1776_v42 = vsub.f32 %v14024_v29, %v11226_v46 }
 0x3d4   : > { %2689 = vadd.xlane.f32.xlu0 %v11235_v10  ;;  %v1246_v28 = vadd.f32 %v9448_v6, %v1245_v54  ;;  %v14023_v54 = vld [vmem:[#allocation24_spill] sm:$0xff] }
 0x3d5   : > { %1423 = vmatmul.bf16.gmra.mxu0 %v1339_v14 }
 0x3d6   : > { %v9454_v58 = vpop.eup %9453  ;;  %v3450_v50 = vpop.xlane.xlu1 %3449  ;;  %v1250_v11 = vsel %vm1249_vm6, %v9448_v6, %v1246_v28  ;;  %v1266_v28 = vand.u32 2147483647, %v11223_v60 }
 0x3d7   : > { %v1258_v47 = vmul.f32 %v9454_v58, %v11223_v60  ;;  %v2616_v49 = vpop.xlane.xlu2 %2615  ;;  %v11249_v51 = vpop.xlane.xlu0 %1058  ;;  %8882 = vmatmul.msk.bf16.vlgmr.msra.gmra.mxu1 %vm852_vm0, %v14022_v24  ;;  %v1255_v52 = vsel %vm1252_vm7, %v1254_v15, %v1250_v11  ;;  %vm1263_vm8 = vweird.f32 %v9454_v58  ;;  %v14028_v11 = vld [vmem:[#allocation37_spill] sm:$0xff] }
 0x3d8   : > { %9457 = vrcp.f32 %v11249_v51  ;;  %v1314_v37 = vmul.f32 %v14023_v54, %v1255_v52  ;;  %v11255_v18 = vpop.eup %9455  ;;  %v2634_v2 = vsub.f32 %v14025_v55, %v2616_v49  ;;  %vm11269_vm10 = vmor %vm1262_vm9, %vm1263_vm8  ;;  %v1269_v49 = vor.u32 1.1754944e-38, %v1268_v40 }
 0x3d9   : > { %v1259_v23 = vsub.f32 1.0, %v1258_v47  ;;  %9459 = vpow2.f32 %v2659_v63  ;;  %v3481_v63 = vsub.f32 %v14028_v11, %v3450_v50  ;;  %vm1267_vm11 = vcmp.eq.f32.partialorder %v1266_v28, 8.507059e+37 }
 0x3da   : > { %1330 = vst [vmem:[%s10960_s7 + $0x60] sm:$0xff] %v1314_v37  ;;  %9461 = vpow2.f32 %v2661_v32  ;;  %v1807_v32 = vmul.f32 1.442695, %v1776_v42  ;;  %v2663_v54 = vmul.f32 1.442695, %v2634_v2  ;;  %v1283_v40 = vand.u32 2147483648, %v11249_v51 }
 0x3db   : > { %v1260_v6 = vmul.f32 %v9454_v58, %v1259_v23  ;;  %3477 = vmax.xlane.f32.xlu2 %v11257_v17  ;;  %1835 = vadd.xlane.f32.xlu1 %v11255_v18  ;;  %9463 = vpow2.f32 %v1805_v5  ;;  %v3497_v55 = vmul.f32 1.442695, %v3481_v63  ;;  %v1281_v42 = vand.u32 2147483647, %v11249_v51 }
 0x3dc   : > { %3475 = vmax.xlane.f32.xlu0 %v11228_v35  ;;  %vm1277_vm13 = vweird.f32 %v11249_v51  ;;  %vm1455_vm9 = vcmask 125952  }
 0x3dd   : > { %v1261_v14 = vadd.f32 %v9454_v58, %v1260_v6  ;;  %vm11309_vm14 = vcmp.eq.f32.partialorder %v1281_v42, 8.507059e+37 }
 0x3de   : > { %v9458_v47 = vpop.eup %9457  ;;  %v11274_v24 = vpop.xlane.xlu1 %1811 }
 0x3df   : > { %v11276_v52 = vpop.xlane.xlu2 %1809  ;;  %v1265_v46 = vsel %vm11269_vm10, %v9454_v58, %v1261_v14  ;;  %v1273_v23 = vmul.f32 %v9458_v47, %v11249_v51  ;;  %9465 = vrcp.f32 %v11274_v24  ;;  %v2618_v60 = vpop.xlane.xlu0 %2617  ;;  %v14030_v58 = vld [vmem:[#allocation29_spill] sm:$0xff]  ;;  %vm1278_vm12 = vweird.f32 %v9458_v47 }
 0x3e0   : > { %9467 = vrcp.f32 %v11276_v52  ;;  %v11283_v5 = vpop.eup %9459  ;;  %v1270_v6 = vsel %vm1267_vm11, %v1269_v49, %v1265_v46  ;;  %v2635_v28 = vsub.f32 %v10950_v7, %v2618_v60  ;;  %vm1279_vm15 = vmor %vm1277_vm13, %vm1278_vm12  ;;  %v1850_v48 = vand.u32 2147483647, %v11276_v52 }
 0x3e1   : > { %v1274_v50 = vsub.f32 1.0, %v1273_v23  ;;  %v11285_v29 = vpop.eup %9461  ;;  %v1315_v14 = vmul.f32 %v14030_v58, %v1270_v6  ;;  %9469 = vpow2.f32 %v1807_v32  ;;  %vm1861_vm2 = vweird.f32 %v11274_v24 }
 0x3e2   : > { %14029 = vst [vmem:[#allocation30_spill] sm:$0xff] %v11285_v29  ;;  %v11288_v15 = vpop.eup %9463  ;;  %9471 = vpow2.f32 %v2663_v54  ;;  %v1284_v54 = vor.u32 1.1754944e-38, %v1283_v40  ;;  %v2665_v58 = vmul.f32 1.442695, %v2635_v28  ;;  %vm1846_vm4 = vweird.f32 %v11276_v52 }
 0x3e3   : > { %v1275_v11 = vmul.f32 %v9458_v47, %v1274_v50  ;;  %2693 = vadd.xlane.f32.xlu2 %v11285_v29  ;;  %2691 = vadd.xlane.f32.xlu1 %v11283_v5  ;;  %1331 = vst [vmem:[%s10960_s7 + $0x68] sm:$0xff] %v1315_v14  ;;  %v1340_v2 = vpack.c.bf16 %v1315_v14, %v1314_v37  ;;  %9473 = vpow2.f32 %v3497_v55  ;;  %v1867_v55 = vand.u32 2147483648, %v11274_v24  ;;  %v11322_v29 = vpop.f32.mrf.mxu1 }
 0x3e4   : > { %1837 = vadd.xlane.f32.xlu0 %v11288_v15  ;;  %14033 = vst [vmem:[#allocation23_spill] sm:$0xff] %v11322_v29  ;;  %vm1851_vm7 = vcmp.eq.f32.partialorder %v1850_v48, 8.507059e+37 }
 0x3e5   : > { %v11297_v63 = vpop.eup %9465  ;;  %v1276_v46 = vadd.f32 %v9458_v47, %v1275_v11  ;;  %1428 = vmatmul.bf16.gmra.mxu0 %v1340_v2  ;;  %v1852_v2 = vand.u32 2147483648, %v11276_v52 }
 0x3e6   : > { %v11299_v23 = vpop.eup %9467  ;;  %v1857_v49 = vmul.f32 %v11297_v63, %v11274_v24  ;;  %v11304_v32 = vpop.xlane.xlu1 %1060  ;;  %vm1862_vm1 = vweird.f32 %v11297_v63 }
 0x3e7   : > { %v3454_v7 = vpop.xlane.xlu2 %3453  ;;  %v1842_v37 = vmul.f32 %v11299_v23, %v11276_v52  ;;  %9475 = vrcp.f32 %v11304_v32  ;;  %v3452_v60 = vpop.xlane.xlu0 %3451  ;;  %v1280_v42 = vsel %vm1279_vm15, %v9458_v47, %v1276_v46  ;;  %v1865_v47 = vand.u32 2147483647, %v11274_v24  ;;  %v14035_v46 = vld [vmem:[#allocation33_spill] sm:$0xff]  ;;  %vm11350_vm5 = vmor %vm1861_vm2, %vm1862_vm1 }
 0x3e8   : > { %v1858_v6 = vsub.f32 1.0, %v1857_v49  ;;  %v3482_v14 = vsub.f32 %v10924_v12, %v3452_v60  ;;  %v11320_v35 = vpop.eup %9469  ;;  %v1285_v12 = vsel %vm11309_vm14, %v1284_v54, %v1280_v42  ;;  %9477 = vpow2.f32 %v2665_v58 }
 0x3e9   : > { %v1843_v11 = vsub.f32 1.0, %v1842_v37  ;;  %v11328_v51 = vpop.eup %9471  ;;  %v3483_v37 = vsub.f32 %v10936_v41, %v3454_v7  ;;  %v11336_v60 = vmul.f32 %v14035_v46, %v1285_v12  ;;  %vm1847_vm3 = vweird.f32 %v11299_v23 }
 0x3ea   : > { %v1859_v40 = vmul.f32 %v11297_v63, %v1858_v6  ;;  %v3499_v49 = vmul.f32 1.442695, %v3482_v14  ;;  %14034 = vst [vmem:[#allocation34_spill] sm:$0xff] %v11328_v51  ;;  %v11338_v6 = vpop.eup %9473  ;;  %v1868_v42 = vor.u32 1.1754944e-38, %v1867_v55  ;;  %vm1848_vm6 = vmor %vm1846_vm4, %vm1847_vm3  ;;  %vm1866_vm8 = vcmp.eq.f32.partialorder %v1865_v47, 8.507059e+37  ;;  %v14038_v47 = vld [vmem:[#allocation36_spill] sm:$0xff] }
 0x3eb   : > { %v1844_v28 = vmul.f32 %v11299_v23, %v1843_v11  ;;  %1839 = vadd.xlane.f32.xlu2 %v11320_v35  ;;  %3479 = vmax.xlane.f32.xlu1 %v11322_v29  ;;  %1332 = vst [vmem:[%s10960_s7 + $0x70] sm:$0xff] %v11336_v60  ;;  %v1853_v11 = vor.u32 1.1754944e-38, %v1852_v2  ;;  %v1296_v46 = vand.u32 2147483647, %v11304_v32  ;;  %v14039_v29 = vld [vmem:[#allocation18_spill] sm:$0xff]  ;;  %vm1292_vm11 = vweird.f32 %v11304_v32 }
 0x3ec   : > { %2695 = vadd.xlane.f32.xlu0 %v11328_v51  ;;  %v1860_v41 = vadd.f32 %v11297_v63, %v1859_v40  ;;  %9479 = vpow2.f32 %v3499_v49  ;;  %v3501_v40 = vmul.f32 1.442695, %v3483_v37 }
 0x3ed   : > { %v11344_v7 = vpop.eup %9475  ;;  %v1845_v50 = vadd.f32 %v11299_v23, %v1844_v28  ;;  %vm1297_vm13 = vcmp.eq.f32.partialorder %v1296_v46, 8.507059e+37 }
 0x3ee   : > { %v1288_v24 = vmul.f32 %v11344_v7, %v11304_v32  ;;  %v2620_v14 = vpop.xlane.xlu1 %2619  ;;  %v1864_v52 = vsel %vm11350_vm5, %v11297_v63, %v1860_v41  ;;  %v1298_v63 = vand.u32 2147483648, %v11304_v32  ;;  %v11373_v41 = vpop.eup %9477  ;;  %vm1293_vm10 = vweird.f32 %v11344_v7 }
 0x3ef   : > { %v11358_v58 = vpop.xlane.xlu2 %2669  ;;  %v11364_v49 = vpop.xlane.xlu0 %1813  ;;  %v2636_v2 = vsub.f32 %v10976_v45, %v2620_v14  ;;  %v1849_v28 = vsel %vm1848_vm6, %v11299_v23, %v1845_v50  ;;  %v1869_v37 = vsel %vm1866_vm8, %v1868_v42, %v1864_v52  ;;  %vm1294_vm12 = vmor %vm1292_vm11, %vm1293_vm10 }
 0x3f0   : > { %9481 = vrcp.f32 %v11358_v58  ;;  %v1289_v12 = vsub.f32 1.0, %v1288_v24  ;;  %v1854_v55 = vsel %vm1851_vm7, %v1853_v11, %v1849_v28  ;;  %v2082_v51 = vmul.f32 %v14039_v29, %v1869_v37 }
 0x3f1   : > { %9483 = vrcp.f32 %v11364_v49  ;;  %v2667_v48 = vmul.f32 1.442695, %v2636_v2  ;;  %v2081_v24 = vmul.f32 %v14038_v47, %v1854_v55  ;;  %v1299_v2 = vor.u32 1.1754944e-38, %v1298_v63 }
 0x3f2   : > { %v1290_v54 = vmul.f32 %v11344_v7, %v1289_v12  ;;  %v11378_v45 = vpop.eup %9479  ;;  %9485 = vpow2.f32 %v3501_v40  ;;  %8171 = vst [vmem:[%s10960_s7 + $0x88] sm:$0xff] %v2082_v51  ;;  %v2712_v47 = vand.u32 2147483648, %v11358_v58  ;;  %vm2706_vm1 = vweird.f32 %v11358_v58 }
 0x3f3   : > { %v1399_v23 = vpop.f32.mrf.mxu0  ;;  %2697 = vadd.xlane.f32.xlu1 %v11373_v41  ;;  %9487 = vpow2.f32 %v2667_v48  ;;  %3531 = vadd.xlane.f32.xlu2 %v11378_v45  ;;  %8170 = vst [vmem:[%s10960_s7 + $0x80] sm:$0xff] %v2081_v24  ;;  %v2114_v14 = vpack.c.bf16 %v2082_v51, %v2081_v24  ;;  %vm1876_vm3 = vweird.f32 %v11364_v49 }
 0x3f4   : > { %v1439_v50 = vpack.c.bf16 %v1399_v23, %v1399_v23  ;;  %3529 = vadd.xlane.f32.xlu0 %v11338_v6  ;;  %v1291_v29 = vadd.f32 %v11344_v7, %v1290_v54 }
 0x3f5   : > { %2194 = vmatmul.bf16.vlgmr.msrb.gmra.mxu2 %v2114_v14  ;;  %v1882_v14 = vand.u32 2147483648, %v11364_v49 }
 0x3f6   : > { %v9482_v11 = vpop.eup %9481  ;;  %1456 = vst.msk [vmem:[#allocation3] sm:$0xf] %vm1455_vm9, %v1439_v50  ;;  %v3456_v12 = vpop.xlane.xlu1 %3455  ;;  %v1295_v55 = vsel %vm1294_vm12, %v11344_v7, %v1291_v29 }
 0x3f7   : > { %v9484_v52 = vpop.eup %9483  ;;  %v2702_v42 = vmul.f32 %v9482_v11, %v11358_v58  ;;  %v11390_v40 = vpop.xlane.xlu2 %1815  ;;  %v3484_v32 = vsub.f32 %v10956_v26, %v3456_v12  ;;  %v1300_v54 = vsel %vm1297_vm13, %v1299_v2, %v1295_v55  ;;  %vm2707_vm14 = vweird.f32 %v9482_v11 }
 0x3f8   : > { %v1872_v28 = vmul.f32 %v9484_v52, %v11364_v49  ;;  %9489 = vrcp.f32 %v11390_v40  ;;  %v11397_v51 = vpop.xlane.xlu0 %4309  ;;  %v11400_v48 = vpop.eup %9485  ;;  %v1317_v63 = vmul.f32 %v10965_v36, %v1300_v54  ;;  %v2710_v26 = vand.u32 2147483647, %v11358_v58  ;;  %vm2708_vm2 = vmor %vm2706_vm1, %vm2707_vm14 }
 0x3f9   : > { %14040 = vst [vmem:[#allocation27_spill] sm:$0xff] %v11397_v51  ;;  %v2703_v37 = vsub.f32 1.0, %v2702_v42  ;;  %v3503_v46 = vmul.f32 1.442695, %v3484_v32  ;;  %v11404_v23 = vpop.eup %9487  ;;  %vm1877_vm15 = vweird.f32 %v9484_v52  ;;  %v1880_v2 = vand.u32 2147483647, %v11364_v49 }
 0x3fa   : > { %14041 = vst [vmem:[#allocation39_spill] sm:$0xff] %v11400_v48  ;;  %v1873_v24 = vsub.f32 1.0, %v1872_v28  ;;  %v1341_v29 = vpack.c.bf16 %v1317_v63, %v11336_v60  ;;  %v2713_v32 = vor.u32 1.1754944e-38, %v2712_v47  ;;  %vm2711_vm4 = vcmp.eq.f32.partialorder %v2710_v26, 8.507059e+37  ;;  %vm1878_vm5 = vmor %vm1876_vm3, %vm1877_vm15 }
 0x3fb   : > { %v2704_v50 = vmul.f32 %v9482_v11, %v2703_v37  ;;  %9491 = vpow2.f32 %v3503_v46  ;;  %v1401_v7 = vpop.f32.mrf.mxu0  ;;  %3533 = vadd.xlane.f32.xlu1 %v11400_v48  ;;  %1333 = vst [vmem:[%s10960_s7 + $0x78] sm:$0xff] %v1317_v63  ;;  %2699 = vadd.xlane.f32.xlu2 %v11404_v23  ;;  %v1883_v49 = vor.u32 1.1754944e-38, %v1882_v14  ;;  %vm1881_vm6 = vcmp.eq.f32.partialorder %v1880_v2, 8.507059e+37  ;;  %v9189_v48 = vld [vmem:[#allocation2 + $0x38] sm:$0xf0] }
 0x3fc   : > { %v1874_v42 = vmul.f32 %v9484_v52, %v1873_v24  ;;  %v1440_v36 = vpack.c.bf16 %v1401_v7, %v1401_v7  ;;  %1433 = vmatmul.bf16.gmra.mxu0 %v1341_v29  ;;  %vm1891_vm8 = vweird.f32 %v11390_v40 }
 0x3fd   : > { %v2705_v12 = vadd.f32 %v9482_v11, %v2704_v50 }
 0x3fe   : > { %v9490_v28 = vpop.eup %9489  ;;  %v1875_v55 = vadd.f32 %v9484_v52, %v1874_v42  ;;  %1457 = vst.msk [vmem:[#allocation3 + $0x4] sm:$0xf] %vm1455_vm9, %v1440_v36  ;;  %v11418_v58 = vpop.xlane.xlu1 %1817  ;;  %v1895_v42 = vand.u32 2147483647, %v11390_v40 }
 0x3ff   : > { %v2709_v37 = vsel %vm2708_vm2, %v9482_v11, %v2705_v12  ;;  %v1887_v60 = vmul.f32 %v9490_v28, %v11390_v40  ;;  %v11420_v54 = vpop.xlane.xlu2 %4311  ;;  %9493 = vrcp.f32 %v11418_v58  ;;  %vm1892_vm7 = vweird.f32 %v9490_v28 }
 0x400   : > { %14042 = vst [vmem:[#allocation40_spill] sm:$0xff] %v11420_v54  ;;  %v2714_v24 = vsel %vm2711_vm4, %v2713_v32, %v2709_v37  ;;  %v11424_v47 = vpop.xlane.xlu0 %2671  ;;  %v1879_v46 = vsel %vm1878_vm5, %v9484_v52, %v1875_v55  ;;  %v1897_v52 = vand.u32 2147483648, %v11390_v40  ;;  %vm1893_vm10 = vmor %vm1891_vm8, %vm1892_vm7  ;;  %vm1896_vm11 = vcmp.eq.f32.partialorder %v1895_v42, 8.507059e+37  ;;  %v8824_v54 = vld [vmem:[#allocation2 + $0x18] sm:$0xf] }
 0x401   : > { %v1888_v11 = vsub.f32 1.0, %v1887_v60  ;;  %9495 = vrcp.f32 %v11424_v47  ;;  %v11427_v63 = vpop.eup %9491  ;;  %v1884_v50 = vsel %vm1881_vm6, %v1883_v49, %v1879_v46  ;;  %v11430_v26 = vmul.f32 %v10987_v33, %v2714_v24  ;;  %v11449_v24 = vpop.f32.mrf.mxu3 }
 0x402   : > { %14043 = vst [vmem:[#allocation25_spill] sm:$0xff] %v11427_v63  ;;  %3535 = vadd.xlane.f32.xlu0 %v11427_v63  ;;  %v2083_v29 = vmul.f32 %v10992_v27, %v1884_v50  ;;  %v1898_v60 = vor.u32 1.1754944e-38, %v1897_v52  ;;  %v1912_v52 = vand.u32 2147483648, %v11418_v58  ;;  %vm1906_vm14 = vweird.f32 %v11418_v58 }
 0x403   : > { %v1889_v7 = vmul.f32 %v9490_v28, %v1888_v11  ;;  %8290 = vst [vmem:[%s10960_s7 + $0x100] sm:$0xff] %v11430_v26  ;;  %v2727_v11 = vand.u32 2147483648, %v11424_v47  ;;  %vm2721_vm15 = vweird.f32 %v11424_v47 }
 0x404   : > { %8172 = vst [vmem:[%s10960_s7 + $0x90] sm:$0xff] %v2083_v29 }
 0x405   : > { %v1890_v14 = vadd.f32 %v9490_v28, %v1889_v7  ;;  %v9494_v12 = vpop.eup %9493  ;;  %14044 = vst [vmem:[#allocation31_spill] sm:$0xff] %v11449_v24 }
 0x406   : > { %v1902_v36 = vmul.f32 %v9494_v12, %v11418_v58  ;;  %v11441_v2 = vpop.xlane.xlu1 %2673  ;;  %vm1907_vm12 = vweird.f32 %v9494_v12 }
 0x407   : > { %v9496_v33 = vpop.eup %9495  ;;  %v11443_v32 = vpop.xlane.xlu2 %3459  ;;  %v1894_v27 = vsel %vm1893_vm10, %v9490_v28, %v1890_v14  ;;  %9497 = vrcp.f32 %v11441_v2  ;;  %v2725_v14 = vand.u32 2147483647, %v11424_v47  ;;  %vm11462_vm1 = vmor %vm1906_vm14, %vm1907_vm12  ;;  %vm2736_vm6 = vweird.f32 %v11441_v2 }
 0x408   : > { %v2717_v55 = vmul.f32 %v9496_v33, %v11424_v47  ;;  %v11447_v37 = vpop.xlane.xlu0 %3457  ;;  %v1903_v40 = vsub.f32 1.0, %v1902_v36  ;;  %v1899_v49 = vsel %vm1896_vm11, %v1898_v60, %v1894_v27  ;;  %vm2722_vm13 = vweird.f32 %v9496_v33 }
 0x409   : > { %v2084_v28 = vmul.f32 %v11005_v38, %v1899_v49  ;;  %v1910_v27 = vand.u32 2147483647, %v11418_v58  ;;  %vm2723_vm2 = vmor %vm2721_vm15, %vm2722_vm13  ;;  %v9188_v58 = vld [vmem:[#allocation2 + $0x20] sm:$0xf0]  ;;  %vm2726_vm3 = vcmp.eq.f32.partialorder %v2725_v14, 8.507059e+37 }
 0x40a   : > { %v2718_v46 = vsub.f32 1.0, %v2717_v55  ;;  %4315 = vmax.xlane.f32.xlu0 %v11449_v24  ;;  %v1904_v50 = vmul.f32 %v9494_v12, %v1903_v40  ;;  %v2728_v40 = vor.u32 1.1754944e-38, %v2727_v11  ;;  %v1913_v11 = vor.u32 1.1754944e-38, %v1912_v52 }
 0x40b   : > { %8173 = vst [vmem:[%s10960_s7 + $0x98] sm:$0xff] %v2084_v28  ;;  %v2115_v42 = vpack.c.bf16 %v2084_v28, %v2083_v29  ;;  %v9212_v28 = vld [vmem:[#allocation2 + $0x20] sm:$0xf0]  ;;  %vm1911_vm4 = vcmp.eq.f32.partialorder %v1910_v27, 8.507059e+37  ;;  %v2740_v52 = vand.u32 2147483647, %v11441_v2 }
 0x40c   : > { %v2719_v7 = vmul.f32 %v9496_v33, %v2718_v46  ;;  %v1905_v36 = vadd.f32 %v9494_v12, %v1904_v50 }
 0x40d   : > { %v11459_v55 = vpop.eup %9497  ;;  %2199 = vmatmul.bf16.gmra.mxu2 %v2115_v42  ;;  %v8704_v42 = vld [vmem:[#allocation2 + $0x18] sm:$0xf]  ;;  %vm2741_vm8 = vcmp.eq.f32.partialorder %v2740_v52, 8.507059e+37 }
 0x40e   : > { %v2720_v60 = vadd.f32 %v9496_v33, %v2719_v7  ;;  %v2732_v46 = vmul.f32 %v11459_v55, %v11441_v2  ;;  %v11470_v49 = vpop.xlane.xlu1 %4313  ;;  %v1909_v50 = vsel %vm11462_vm1, %v9494_v12, %v1905_v36  ;;  %v8705_v63 = vor.u32 %v9188_v58, %v8704_v42  ;;  %v9213_v58 = vld [vmem:[#allocation2 + $0x38] sm:$0xf0] }
 0x40f   : > { %v11468_v29 = vpop.xlane.xlu2 %2675  ;;  %14047 = vst [vmem:[#allocation28_spill] sm:$0xff] %v11470_v49  ;;  %v8825_v12 = vor.u32 %v9212_v28, %v8824_v54  ;;  %vm2737_vm5 = vweird.f32 %v11459_v55 }
 0x410   : > { %v2724_v47 = vsel %vm2723_vm2, %v9496_v33, %v2720_v60  ;;  %v11474_v7 = vpop.xlane.xlu0 %1819  ;;  %9499 = vrcp.f32 %v11468_v29  ;;  %v2733_v51 = vsub.f32 1.0, %v2732_v46  ;;  %v1914_v33 = vsel %vm1911_vm4, %v1913_v11, %v1909_v50  ;;  %v8708_v60 = vld [vmem:[#allocation2 + $0x30] sm:$0xf]  ;;  %vm11499_vm7 = vmor %vm2736_vm6, %vm2737_vm5 }
 0x411   : > { %v2729_v24 = vsel %vm2726_vm3, %v2728_v40, %v2724_v47  ;;  %9501 = vrcp.f32 %v11474_v7  ;;  %v1404_v49 = vpop.f32.mrf.mxu0  ;;  %v2742_v40 = vand.u32 2147483648, %v11441_v2  ;;  %v8828_v46 = vld [vmem:[#allocation2 + $0x30] sm:$0xf]  ;;  %v1927_v52 = vand.u32 2147483648, %v11474_v7 }
 0x412   : > { %v2942_v38 = vmul.f32 %v11024_v34, %v2729_v24  ;;  %v2734_v14 = vmul.f32 %v11459_v55, %v2733_v51  ;;  %v1441_v36 = vpack.c.bf16 %v1404_v49, %v1404_v49  ;;  %v14048_v34 = vld [vmem:[#allocation20_spill] sm:$0xff]  ;;  %v8709_v49 = vor.u32 %v9189_v48, %v8708_v60 }
 0x413   : > { %v11486_v54 = vmul.f32 %v14048_v34, %v1914_v33  ;;  %5862 = vrot.lane.b32.xlu2 %v8705_v63, %s10064_s13  ;;  %v8829_v47 = vor.u32 %v9213_v58, %v8828_v46  ;;  %vm2751_vm12 = vweird.f32 %v11468_v29  ;;  %vm1921_vm13 = vweird.f32 %v11474_v7 }
 0x414   : > { %8291 = vst [vmem:[%s10960_s7 + $0x108] sm:$0xff] %v2942_v38  ;;  %v2974_v27 = vpack.c.bf16 %v2942_v38, %v11430_v26  ;;  %6722 = vrot.lane.b32.xlu1 %v8825_v12, %s10065_s17  ;;  %v2735_v51 = vadd.f32 %v11459_v55, %v2734_v14  ;;  %v2743_v12 = vor.u32 1.1754944e-38, %v2742_v40  ;;  %v2757_v14 = vand.u32 2147483648, %v11468_v29 }
 0x415   : > { %1458 = vst.msk [vmem:[#allocation3 + $0x8] sm:$0xf] %vm1455_vm9, %v1441_v36  ;;  %v1925_v36 = vand.u32 2147483647, %v11474_v7 }
 0x416   : > { %v11493_v24 = vpop.eup %9499  ;;  %3054 = vmatmul.bf16.vlgmr.msra.gmra.mxu0 %v2974_v27  ;;  %8174 = vst [vmem:[%s10960_s7 + $0xa0] sm:$0xff] %v11486_v54  ;;  %v3462_v50 = vpop.xlane.xlu1 %3461  ;;  %v2739_v48 = vsel %vm11499_vm7, %v11459_v55, %v2735_v51  ;;  %v2755_v51 = vand.u32 2147483647, %v11468_v29 }
 0x417   : > { %v9502_v2 = vpop.eup %9501  ;;  %v2747_v63 = vmul.f32 %v11493_v24, %v11468_v29  ;;  %v11505_v28 = vpop.xlane.xlu2 %1821  ;;  %v3487_v38 = vsub.f32 %v11020_v19, %v3462_v50  ;;  %v2744_v46 = vsel %vm2741_vm8, %v2743_v12, %v2739_v48  ;;  %vm2752_vm10 = vweird.f32 %v11493_v24 }
 0x418   : > { %v1917_v11 = vmul.f32 %v9502_v2, %v11474_v7  ;;  %v11511_v42 = vpop.xlane.xlu0 %2677  ;;  %9503 = vrcp.f32 %v11505_v28  ;;  %v11522_v19 = vmul.f32 %v11040_v62, %v2744_v46  ;;  %vm1922_vm11 = vweird.f32 %v9502_v2  ;;  %vm11539_vm15 = vmor %vm2751_vm12, %vm2752_vm10 }
 0x419   : > { %v2748_v33 = vsub.f32 1.0, %v2747_v63  ;;  %9505 = vrcp.f32 %v11511_v42  ;;  %v3509_v27 = vmul.f32 1.442695, %v3487_v38  ;;  %v1406_v55 = vpop.f32.mrf.mxu0  ;;  %vm11533_vm14 = vcmp.eq.f32.partialorder %v1925_v36, 8.507059e+37  ;;  %vm1923_vm1 = vmor %vm1921_vm13, %vm1922_vm11 }
 0x41a   : > { %v1918_v60 = vsub.f32 1.0, %v1917_v11  ;;  %v1442_v34 = vpack.c.bf16 %v1406_v55, %v1406_v55  ;;  %8292 = vst [vmem:[%s10960_s7 + $0x110] sm:$0xff] %v11522_v19  ;;  %v1928_v7 = vor.u32 1.1754944e-38, %v1927_v52  ;;  %v2758_v12 = vor.u32 1.1754944e-38, %v2757_v14 }
 0x41b   : > { %v2749_v58 = vmul.f32 %v11493_v24, %v2748_v33  ;;  %9507 = vpow2.f32 %v3509_v27  ;;  %5864 = vrot.lane.b32.xlu2 %v8709_v49, %s10064_s13  ;;  %v11555_v33 = vpop.f32.mrf.mxu1  ;;  %vm2756_vm2 = vcmp.eq.f32.partialorder %v2755_v51, 8.507059e+37  ;;  %v3485_v55 = vsub.f32 %v10978_v61, %v11447_v37 }
 0x41c   : > { %v1919_v40 = vmul.f32 %v9502_v2, %v1918_v60  ;;  %1459 = vst.msk [vmem:[#allocation3 + $0xc] sm:$0xf] %vm1455_vm9, %v1442_v34  ;;  %6724 = vrot.lane.b32.xlu1 %v8829_v47, %s10065_s17  ;;  %v2772_v51 = vand.u32 2147483648, %v11511_v42  ;;  %vm1936_vm4 = vweird.f32 %v11505_v28  ;;  %v2770_v29 = vand.u32 2147483647, %v11511_v42 }
 0x41d   : > { %v2750_v26 = vadd.f32 %v11493_v24, %v2749_v58  ;;  %v3486_v58 = vsub.f32 %v11000_v56, %v11443_v32  ;;  %vm2766_vm7 = vweird.f32 %v11511_v42 }
 0x41e   : > { %v11530_v63 = vpop.eup %9503  ;;  %v1920_v50 = vadd.f32 %v9502_v2, %v1919_v40  ;;  %v11549_v11 = vpop.xlane.xlu1 %1823  ;;  %vm11612_vm10 = vcmp.eq.f32.partialorder %v2770_v29, 8.507059e+37 }
 0x41f   : > { %v11545_v49 = vpop.eup %9505  ;;  %v1932_v47 = vmul.f32 %v11530_v63, %v11505_v28  ;;  %v3466_v48 = vpop.xlane.xlu2 %3465  ;;  %v2754_v38 = vsel %vm11539_vm15, %v11493_v24, %v2750_v26  ;;  %9509 = vrcp.f32 %v11549_v11  ;;  %vm1937_vm3 = vweird.f32 %v11530_v63 }
 0x420   : > { %v2762_v36 = vmul.f32 %v11545_v49, %v11511_v42  ;;  %v11559_v60 = vpop.xlane.xlu0 %3463  ;;  %v1924_v27 = vsel %vm1923_vm1, %v9502_v2, %v1920_v50  ;;  %v2759_v14 = vsel %vm2756_vm2, %v2758_v12, %v2754_v38  ;;  %v1940_v26 = vand.u32 2147483647, %v11505_v28  ;;  %vm11592_vm5 = vmor %vm1936_vm4, %vm1937_vm3 }
 0x421   : > { %v1933_v52 = vsub.f32 1.0, %v1932_v47  ;;  %v1929_v24 = vsel %vm11533_vm14, %v1928_v7, %v1924_v27  ;;  %v11566_v46 = vpop.eup %9507  ;;  %v2944_v2 = vmul.f32 %v11063_v59, %v2759_v14  ;;  %v3505_v7 = vmul.f32 1.442695, %v3485_v55 }
 0x422   : > { %v2763_v34 = vsub.f32 1.0, %v2762_v36  ;;  %v2086_v40 = vmul.f32 %v11069_v30, %v1929_v24  ;;  %v1409_v61 = vpop.f32.mrf.mxu0  ;;  %3541 = vadd.xlane.f32.xlu0 %v11566_v46  ;;  %v1942_v30 = vand.u32 2147483648, %v11505_v28  ;;  %v3507_v38 = vmul.f32 1.442695, %v3486_v58 }
 0x423   : > { %v1934_v37 = vmul.f32 %v11530_v63, %v1933_v52  ;;  %v1443_v62 = vpack.c.bf16 %v1409_v61, %v1409_v61  ;;  %8293 = vst [vmem:[%s10960_s7 + $0x118] sm:$0xff] %v2944_v2  ;;  %v2975_v59 = vpack.c.bf16 %v2944_v2, %v11522_v19  ;;  %v3489_v12 = vsub.f32 %v11076_v13, %v3466_v48  ;;  %v11616_v14 = vpop.f32.mrf.mxu1  ;;  %v11632_v61 = vld [vmem:[#allocation2 + $0x50] sm:$0xf0] }
 0x424   : > { %v2764_v50 = vmul.f32 %v11545_v49, %v2763_v34  ;;  %8175 = vst [vmem:[%s10960_s7 + $0xa8] sm:$0xff] %v2086_v40  ;;  %v2116_v56 = vpack.c.bf16 %v2086_v40, %v11486_v54  ;;  %vm2767_vm6 = vweird.f32 %v11545_v49  ;;  %vm1941_vm8 = vcmp.eq.f32.partialorder %v1940_v26, 8.507059e+37 }
 0x425   : > { %v1935_v32 = vadd.f32 %v11530_v63, %v1934_v37  ;;  %v11586_v47 = vpop.eup %9509  ;;  %1460 = vst.msk [vmem:[#allocation3 + $0x10] sm:$0xf] %vm1455_vm9, %v1443_v62  ;;  %v1943_v55 = vor.u32 1.1754944e-38, %v1942_v30  ;;  %v3488_v58 = vsub.f32 %v11045_v21, %v11559_v60  ;;  %v3513_v42 = vmul.f32 1.442695, %v3489_v12  ;;  %vm2768_vm11 = vmor %vm2766_vm7, %vm2767_vm6 }
 0x426   : > { %2204 = vmatmul.bf16.gmra.mxu2 %v2116_v56  ;;  %v1947_v28 = vmul.f32 %v11586_v47, %v11549_v11  ;;  %3059 = vmatmul.bf16.gmra.mxu0 %v2975_v59  ;;  %v11600_v36 = vpop.xlane.xlu1 %2679  ;;  %v2765_v48 = vadd.f32 %v11545_v49, %v2764_v50  ;;  %vm1952_vm12 = vweird.f32 %v11586_v47  ;;  %v11630_v60 = vld [vmem:[#allocation2 + $0x48] sm:$0xf]  ;;  %v1955_v26 = vand.u32 2147483647, %v11549_v11 }
 0x427   : > { %v11598_v19 = vpop.xlane.xlu2 %2681  ;;  %v1939_v13 = vsel %vm11592_vm5, %v11530_v63, %v1935_v32  ;;  %v2773_v63 = vor.u32 1.1754944e-38, %v2772_v51  ;;  %v1957_v50 = vand.u32 2147483648, %v11549_v11  ;;  %vm1951_vm13 = vweird.f32 %v11549_v11 }
 0x428   : > { %v11608_v27 = vpop.xlane.xlu0 %1825  ;;  %9511 = vrcp.f32 %v11598_v19  ;;  %v1948_v52 = vsub.f32 1.0, %v1947_v28  ;;  %v1944_v34 = vsel %vm1941_vm8, %v1943_v55, %v1939_v13  ;;  %v2769_v21 = vsel %vm2768_vm11, %v11545_v49, %v2765_v48  ;;  %vm11650_vm14 = vmor %vm1951_vm13, %vm1952_vm12 }
 0x429   : > { %9513 = vrcp.f32 %v11608_v27  ;;  %v11627_v51 = vmul.f32 %v11087_v20, %v1944_v34  ;;  %v2774_v62 = vsel %vm11612_vm10, %v2773_v63, %v2769_v21  ;;  %v11658_v32 = vmul.f32 1.442695, %v3488_v58 }
 0x42a   : > { %9515 = vrcp.f32 %v11600_v36  ;;  %v1411_v40 = vpop.f32.mrf.mxu0  ;;  %5171 = vmax.xlane.f32.xlu0 %v11616_v14  ;;  %v1949_v2 = vmul.f32 %v11586_v47, %v1948_v52  ;;  %v11643_v20 = vmul.f32 %v11090_v4, %v2774_v62  ;;  %vm1956_vm15 = vcmp.eq.f32.partialorder %v1955_v26, 8.507059e+37 }
 0x42b   : > { %v1444_v37 = vpack.c.bf16 %v1411_v40, %v1411_v40  ;;  %9517 = vpow2.f32 %v3505_v7  ;;  %8176 = vst [vmem:[%s10960_s7 + $0xb0] sm:$0xff] %v11627_v51  ;;  %v1958_v13 = vor.u32 1.1754944e-38, %v1957_v50  ;;  %v2787_v24 = vand.u32 2147483648, %v11600_v36 }
 0x42c   : > { %v1950_v56 = vadd.f32 %v11586_v47, %v1949_v2  ;;  %9519 = vpow2.f32 %v3507_v38  ;;  %8294 = vst [vmem:[%s10960_s7 + $0x120] sm:$0xff] %v11643_v20  ;;  %v2785_v58 = vand.u32 2147483647, %v11600_v36  ;;  %v1972_v34 = vand.u32 2147483648, %v11608_v27 }
 0x42d   : > { %1461 = vst.msk [vmem:[#allocation3 + $0x14] sm:$0xf] %vm1455_vm9, %v1444_v37  ;;  %9521 = vpow2.f32 %v3513_v42  ;;  %vm2796_vm1 = vweird.f32 %v11598_v19  ;;  %v1970_v37 = vand.u32 2147483647, %v11608_v27  ;;  %vm1966_vm2 = vweird.f32 %v11608_v27 }
 0x42e   : > { %v11645_v49 = vpop.eup %9511  ;;  %v11664_v7 = vpop.xlane.xlu1 %3467  ;;  %v1954_v38 = vsel %vm11650_vm14, %v11586_v47, %v1950_v56  ;;  %vm2781_vm3 = vweird.f32 %v11600_v36  ;;  %vm11700_vm5 = vcmp.eq.f32.partialorder %v2785_v58, 8.507059e+37 }
 0x42f   : > { %v11656_v11 = vpop.eup %9513  ;;  %v2792_v4 = vmul.f32 %v11645_v49, %v11598_v19  ;;  %v11662_v29 = vpop.xlane.xlu2 %1827  ;;  %v1959_v63 = vsel %vm1956_vm15, %v1958_v13, %v1954_v38  ;;  %v2788_v13 = vor.u32 1.1754944e-38, %v2787_v24  ;;  %vm11714_vm7 = vcmp.eq.f32.partialorder %v1970_v37, 8.507059e+37 }
 0x430   : > { %v9516_v12 = vpop.eup %9515  ;;  %v1962_v54 = vmul.f32 %v11656_v11, %v11608_v27  ;;  %v11673_v28 = vpop.xlane.xlu0 %2683  ;;  %9523 = vrcp.f32 %v11662_v29  ;;  %v2088_v21 = vmul.f32 %v11114_v43, %v1959_v63  ;;  %vm1967_vm6 = vweird.f32 %v11656_v11 }
 0x431   : > { %v2793_v48 = vsub.f32 1.0, %v2792_v4  ;;  %v2777_v52 = vmul.f32 %v9516_v12, %v11600_v36  ;;  %9525 = vrcp.f32 %v11673_v28  ;;  %v11681_v42 = vpop.eup %9517  ;;  %vm2782_vm4 = vweird.f32 %v9516_v12  ;;  %vm1968_vm12 = vmor %vm1966_vm2, %vm1967_vm6 }
 0x432   : > { %v1963_v47 = vsub.f32 1.0, %v1962_v54  ;;  %v1414_v2 = vpop.f32.mrf.mxu0  ;;  %v11687_v26 = vpop.eup %9519  ;;  %8177 = vst [vmem:[%s10960_s7 + $0xb8] sm:$0xff] %v2088_v21  ;;  %v2117_v38 = vpack.c.bf16 %v2088_v21, %v11627_v51  ;;  %v1973_v24 = vor.u32 1.1754944e-38, %v1972_v34  ;;  %vm2783_vm8 = vmor %vm2781_vm3, %vm2782_vm4  ;;  %vm2797_vm10 = vweird.f32 %v11645_v49 }
 0x433   : > { %v2778_v40 = vsub.f32 1.0, %v2777_v52  ;;  %v1445_v62 = vpack.c.bf16 %v1414_v2, %v1414_v2  ;;  %v11692_v56 = vpop.eup %9521  ;;  %v2794_v30 = vmul.f32 %v11645_v49, %v2793_v48  ;;  %vm1981_vm11 = vweird.f32 %v11662_v29  ;;  %vm11750_vm14 = vmor %vm2796_vm1, %vm2797_vm10 }
 0x434   : > { %v1964_v50 = vmul.f32 %v11656_v11, %v1963_v47  ;;  %v1987_v36 = vand.u32 2147483648, %v11662_v29  ;;  %vm2811_vm15 = vweird.f32 %v11673_v28 }
 0x435   : > { %v2779_v4 = vmul.f32 %v9516_v12, %v2778_v40  ;;  %1462 = vst.msk [vmem:[#allocation3 + $0x18] sm:$0xf] %vm1455_vm9, %v1445_v62  ;;  %v2795_v34 = vadd.f32 %v11645_v49, %v2794_v30 }
 0x436   : > { %v11697_v43 = vpop.eup %9523  ;;  %v1965_v52 = vadd.f32 %v11656_v11, %v1964_v50  ;;  %2209 = vmatmul.bf16.gmra.mxu2 %v2117_v38  ;;  %v11712_v63 = vpop.xlane.xlu1 %1829  ;;  %v2800_v50 = vand.u32 2147483647, %v11598_v19 }
 0x437   : > { %v11706_v47 = vpop.eup %9525  ;;  %v1977_v48 = vmul.f32 %v11697_v43, %v11662_v29  ;;  %v11710_v51 = vpop.xlane.xlu2 %3471  ;;  %v2780_v40 = vadd.f32 %v9516_v12, %v2779_v4  ;;  %9527 = vrcp.f32 %v11712_v63  ;;  %vm1982_vm13 = vweird.f32 %v11697_v43 }
 0x438   : > { %v2807_v2 = vmul.f32 %v11706_v47, %v11673_v28  ;;  %v11720_v21 = vpop.xlane.xlu0 %3469  ;;  %v1969_v59 = vsel %vm1968_vm12, %v11656_v11, %v1965_v52  ;;  %vm11767_vm1 = vmor %vm1981_vm11, %vm1982_vm13  ;;  %vm2812_vm2 = vweird.f32 %v11706_v47  ;;  %vm2801_vm3 = vcmp.eq.f32.partialorder %v2800_v50, 8.507059e+37 }
 0x439   : > { %v1978_v37 = vsub.f32 1.0, %v1977_v48  ;;  %v2784_v62 = vsel %vm2783_vm8, %v9516_v12, %v2780_v40  ;;  %v1974_v27 = vsel %vm11714_vm7, %v1973_v24, %v1969_v59  ;;  %vm11799_vm6 = vmor %vm2811_vm15, %vm2812_vm2  ;;  %v3491_v11 = vsub.f32 %v11134_v0, %v11720_v21 }
 0x43a   : > { %v2808_v4 = vsub.f32 1.0, %v2807_v2  ;;  %v2789_v38 = vsel %vm11700_vm5, %v2788_v13, %v2784_v62  ;;  %v1416_v55 = vpop.f32.mrf.mxu0  ;;  %v1985_v2 = vand.u32 2147483647, %v11662_v29  ;;  %v2089_v54 = vmul.f32 %v11139_v9, %v1974_v27 }
 0x43b   : > { %v1979_v48 = vmul.f32 %v11697_v43, %v1978_v37  ;;  %v2946_v12 = vmul.f32 %v11132_v25, %v2789_v38  ;;  %v1446_v40 = vpack.c.bf16 %v1416_v55, %v1416_v55  ;;  %v2817_v25 = vand.u32 2147483648, %v11673_v28 }
 0x43c   : > { %v2809_v30 = vmul.f32 %v11706_v47, %v2808_v4  ;;  %v2799_v9 = vsel %vm11750_vm14, %v11645_v49, %v2795_v34  ;;  %v14070_v29 = vor.u32 %v11632_v61, %v11630_v60  ;;  %8178 = vst [vmem:[%s10960_s7 + $0xc0] sm:$0xff] %v2089_v54  ;;  %v2815_v34 = vand.u32 2147483647, %v11673_v28 }
 0x43d   : > { %8295 = vst [vmem:[%s10960_s7 + $0x128] sm:$0xff] %v2946_v12  ;;  %v2976_v59 = vpack.c.bf16 %v2946_v12, %v11643_v20  ;;  %v1980_v55 = vadd.f32 %v11697_v43, %v1979_v48  ;;  %v11761_v13 = vpop.eup %9527  ;;  %v14069_v20 = vand.u32 2147483648, %v11598_v19  ;;  %vm1986_vm4 = vcmp.eq.f32.partialorder %v1985_v2, 8.507059e+37  ;;  %v11815_v2 = vld [vmem:[#allocation2 + $0x50] sm:$0xf0] }
 0x43e   : > { %1463 = vst.msk [vmem:[#allocation3 + $0x1c] sm:$0xf] %vm1455_vm9, %v1446_v40  ;;  %v2810_v24 = vadd.f32 %v11706_v47, %v2809_v30  ;;  %v1992_v49 = vmul.f32 %v11761_v13, %v11712_v63  ;;  %v11779_v62 = vpop.xlane.xlu1 %2685  ;;  %5866 = vrot.lane.b32.xlu0 %v14070_v29, %s10064_s13  ;;  %v1988_v38 = vor.u32 1.1754944e-38, %v1987_v36  ;;  %vm1996_vm5 = vweird.f32 %v11712_v63  ;;  %v11813_v40 = vld [vmem:[#allocation2 + $0x48] sm:$0xf] }
 0x43f   : > { %v2803_v58 = vor.u32 1.1754944e-38, %v14069_v20  ;;  %3064 = vmatmul.bf16.gmra.mxu0 %v2976_v59  ;;  %v11777_v37 = vpop.xlane.xlu2 %2687  ;;  %v1984_v19 = vsel %vm11767_vm1, %v11697_v43, %v1980_v55  ;;  %v2818_v61 = vor.u32 1.1754944e-38, %v2817_v25  ;;  %vm1997_vm7 = vweird.f32 %v11761_v13 }
 0x440   : > { %v11790_v4 = vpop.xlane.xlu0 %1831  ;;  %9529 = vrcp.f32 %v11777_v37  ;;  %v1993_v12 = vsub.f32 1.0, %v1992_v49  ;;  %v1989_v43 = vsel %vm1986_vm4, %v1988_v38, %v1984_v19  ;;  %v2814_v50 = vsel %vm11799_vm6, %v11706_v47, %v2810_v24  ;;  %vm11833_vm10 = vmor %vm1996_vm5, %vm1997_vm7 }
 0x441   : > { %v2804_v48 = vsel %vm2801_vm3, %v2803_v58, %v2799_v9  ;;  %9531 = vrcp.f32 %v11790_v4  ;;  %v2090_v28 = vmul.f32 %v11158_v22, %v1989_v43  ;;  %vm2816_vm8 = vcmp.eq.f32.partialorder %v2815_v34, 8.507059e+37 }
 0x442   : > { %9533 = vrcp.f32 %v11779_v62  ;;  %v1994_v36 = vmul.f32 %v11761_v13, %v1993_v12  ;;  %v1419_v27 = vpop.f32.mrf.mxu0  ;;  %v11811_v30 = vmul.f32 %v11137_v16, %v2804_v48  ;;  %v2002_v47 = vand.u32 2147483648, %v11712_v63 }
 0x443   : > { %v1447_v25 = vpack.c.bf16 %v1419_v27, %v1419_v27  ;;  %v2819_v59 = vsel %vm2816_vm8, %v2818_v61, %v2814_v50  ;;  %8179 = vst [vmem:[%s10960_s7 + $0xc8] sm:$0xff] %v2090_v28  ;;  %v2118_v55 = vpack.c.bf16 %v2090_v28, %v2089_v54  ;;  %v2000_v16 = vand.u32 2147483647, %v11712_v63 }
 0x444   : > { %v2948_v9 = vmul.f32 %v11162_v3, %v2819_v59  ;;  %v1995_v22 = vadd.f32 %v11761_v13, %v1994_v36  ;;  %9535 = vpow2.f32 %v11658_v32  ;;  %3537 = vadd.xlane.f32.xlu2 %v11681_v42  ;;  %v8833_v3 = vor.u32 %v11815_v2, %v11813_v40  ;;  %8296 = vst [vmem:[%s10960_s7 + $0x130] sm:$0xff] %v11811_v30 }
 0x445   : > { %1464 = vst.msk [vmem:[#allocation3 + $0x20] sm:$0xf] %vm1455_vm9, %v1447_v25  ;;  %v3490_v32 = vsub.f32 %v11106_v44, %v11664_v7  ;;  %v11857_v49 = vmul.f32 1.442695, %v3491_v11  ;;  %v2003_v34 = vor.u32 1.1754944e-38, %v2002_v47  ;;  %vm2001_vm11 = vcmp.eq.f32.partialorder %v2000_v16, 8.507059e+37 }
 0x446   : > { %v11824_v52 = vpop.eup %9529  ;;  %2214 = vmatmul.bf16.gmra.mxu2 %v2118_v55  ;;  %3539 = vadd.xlane.f32.xlu1 %v11687_v26  ;;  %v11848_v63 = vpop.xlane.xlu1 %3473  ;;  %v1999_v58 = vsel %vm11833_vm10, %v11761_v13, %v1995_v22  ;;  %8297 = vst [vmem:[%s10960_s7 + $0x138] sm:$0xff] %v2948_v9  ;;  %v2017_v12 = vand.u32 2147483648, %v11790_v4  ;;  %v2847_v60 = vand.u32 2147483648, %v11777_v37  ;;  %vm2011_vm12 = vweird.f32 %v11790_v4 }
 0x447   : > { %v11839_v21 = vpop.eup %9531  ;;  %v2837_v54 = vmul.f32 %v11824_v52, %v11777_v37  ;;  %v11845_v20 = vpop.xlane.xlu2 %1833  ;;  %v2004_v61 = vsel %vm2001_vm11, %v2003_v34, %v1999_v58  ;;  %vm2826_vm13 = vweird.f32 %v11779_v62  ;;  %v2832_v11 = vand.u32 2147483648, %v11779_v62 }
 0x448   : > { %v11855_v24 = vpop.eup %9533  ;;  %v2007_v29 = vmul.f32 %v11839_v21, %v11790_v4  ;;  %v11861_v19 = vpop.xlane.xlu0 %2689  ;;  %9537 = vrcp.f32 %v11845_v20  ;;  %v2091_v25 = vmul.f32 %v11184_v53, %v2004_v61  ;;  %v2977_v55 = vpack.c.bf16 %v2948_v9, %v11811_v30 }
 0x449   : > { %v2838_v38 = vsub.f32 1.0, %v2837_v54  ;;  %v2822_v48 = vmul.f32 %v11855_v24, %v11779_v62  ;;  %9539 = vrcp.f32 %v11861_v19  ;;  %vm2012_vm14 = vweird.f32 %v11839_v21 }
 0x44a   : > { %v2008_v13 = vsub.f32 1.0, %v2007_v29  ;;  %v1421_v36 = vpop.f32.mrf.mxu0  ;;  %v11873_v27 = vpop.eup %9535  ;;  %v2015_v22 = vand.u32 2147483647, %v11790_v4  ;;  %v2018_v54 = vor.u32 1.1754944e-38, %v2017_v12  ;;  %vm2827_vm15 = vweird.f32 %v11855_v24  ;;  %8180 = vst [vmem:[%s10960_s7 + $0xd0] sm:$0xff] %v2091_v25  ;;  %vm2013_vm1 = vmor %vm2011_vm12, %vm2012_vm14 }
 0x44b   : > { %v2839_v43 = vmul.f32 %v11824_v52, %v2838_v38  ;;  %v2823_v50 = vsub.f32 1.0, %v2822_v48  ;;  %v1448_v47 = vpack.c.bf16 %v1421_v36, %v1421_v36  ;;  %v2830_v53 = vand.u32 2147483647, %v11779_v62  ;;  %vm2828_vm4 = vmor %vm2826_vm13, %vm2827_vm15 }
 0x44c   : > { %v2009_v28 = vmul.f32 %v11839_v21, %v2008_v13  ;;  %3543 = vadd.xlane.f32.xlu2 %v11873_v27  ;;  %vm2842_vm2 = vweird.f32 %v11824_v52  ;;  %v2845_v12 = vand.u32 2147483647, %v11777_v37  ;;  %vm2016_vm3 = vcmp.eq.f32.partialorder %v2015_v22, 8.507059e+37 }
 0x44d   : > { %v2824_v59 = vmul.f32 %v11855_v24, %v2823_v50  ;;  %1465 = vst.msk [vmem:[#allocation3 + $0x24] sm:$0xf] %vm1455_vm9, %v1448_v47  ;;  %v2840_v38 = vadd.f32 %v11824_v52, %v2839_v43  ;;  %v2833_v43 = vor.u32 1.1754944e-38, %v2832_v11  ;;  %vm2841_vm5 = vweird.f32 %v11777_v37  ;;  %v11924_v37 = vpop.f32.mrf.mxu3 }
 0x44e   : > { %v11882_v16 = vpop.eup %9537  ;;  %v2010_v0 = vadd.f32 %v11839_v21, %v2009_v28  ;;  %5169 = vmax.xlane.f32.xlu1 %v11555_v33  ;;  %v11896_v29 = vpop.xlane.xlu1 %1835  ;;  %vm2831_vm6 = vcmp.eq.f32.partialorder %v2830_v53, 8.507059e+37  ;;  %vm2843_vm7 = vmor %vm2841_vm5, %vm2842_vm2  ;;  %vm2846_vm8 = vcmp.eq.f32.partialorder %v2845_v12, 8.507059e+37  ;;  %vm2026_vm11 = vweird.f32 %v11845_v20 }
 0x44f   : > { %v11889_v58 = vpop.eup %9539  ;;  %v2022_v30 = vmul.f32 %v11882_v16, %v11845_v20  ;;  %3069 = vmatmul.bf16.gmra.mxu0 %v2977_v55  ;;  %v11893_v9 = vpop.xlane.xlu2 %3477  ;;  %v2825_v34 = vadd.f32 %v11855_v24, %v2824_v59  ;;  %9541 = vrcp.f32 %v11896_v29  ;;  %v3492_v55 = vsub.f32 %v11164_v57, %v11710_v51 }
 0x450   : > { %v2852_v48 = vmul.f32 %v11889_v58, %v11861_v19  ;;  %v11903_v13 = vpop.xlane.xlu0 %3475  ;;  %v2014_v50 = vsel %vm2013_vm1, %v11839_v21, %v2010_v0  ;;  %v2848_v21 = vor.u32 1.1754944e-38, %v2847_v60  ;;  %v2844_v11 = vsel %vm2843_vm7, %v11824_v52, %v2840_v38 }
 0x451   : > { %v2023_v61 = vsub.f32 1.0, %v2022_v30  ;;  %v2019_v36 = vsel %vm2016_vm3, %v2018_v54, %v2014_v50  ;;  %v2829_v4 = vsel %vm2828_vm4, %v11855_v24, %v2825_v34  ;;  %v2032_v24 = vand.u32 2147483648, %v11845_v20  ;;  %v11971_v50 = vpop.f32.mrf.mxu1 }
 0x452   : > { %v2092_v47 = vmul.f32 %v11212_v8, %v2019_v36  ;;  %v2834_v59 = vsel %vm2831_vm6, %v2833_v43, %v2829_v4  ;;  %v2853_v62 = vsub.f32 1.0, %v2852_v48  ;;  %v1424_v22 = vpop.f32.mrf.mxu0  ;;  %v2849_v53 = vsel %vm2846_vm8, %v2848_v21, %v2844_v11 }
 0x453   : > { %v2024_v28 = vmul.f32 %v11882_v16, %v2023_v61  ;;  %v1449_v0 = vpack.c.bf16 %v1424_v22, %v1424_v22  ;;  %v2949_v60 = vmul.f32 %v11207_v1, %v2834_v59  ;;  %v2950_v57 = vmul.f32 %v11210_v39, %v2849_v53 }
 0x454   : > { %8181 = vst [vmem:[%s10960_s7 + $0xd8] sm:$0xff] %v2092_v47  ;;  %v2119_v54 = vpack.c.bf16 %v2092_v47, %v2091_v25  ;;  %4317 = vmax.xlane.f32.xlu2 %v11924_v37  ;;  %vm2027_vm10 = vweird.f32 %v11882_v16  ;;  %v3515_v52 = vmul.f32 1.442695, %v3490_v32  ;;  %9543 = vpow2.f32 %v11857_v49 }
 0x455   : > { %v11928_v8 = vpop.eup %9541  ;;  %v2025_v51 = vadd.f32 %v11882_v16, %v2024_v28  ;;  %1466 = vst.msk [vmem:[#allocation3 + $0x28] sm:$0xf] %vm1455_vm9, %v1449_v0  ;;  %v2030_v30 = vand.u32 2147483647, %v11845_v20  ;;  %v3519_v34 = vmul.f32 1.442695, %v3492_v55  ;;  %v2854_v44 = vmul.f32 %v11889_v58, %v2853_v62  ;;  %vm2028_vm12 = vmor %vm2026_vm11, %vm2027_vm10 }
 0x456   : > { %v2037_v25 = vmul.f32 %v11928_v8, %v11896_v29  ;;  %2219 = vmatmul.bf16.gmra.mxu2 %v2119_v54  ;;  %3545 = vadd.xlane.f32.xlu1 %v11692_v56  ;;  %v11945_v39 = vpop.xlane.xlu1 %2691  ;;  %8298 = vst [vmem:[%s10960_s7 + $0x140] sm:$0xff] %v2949_v60  ;;  %v2862_v32 = vand.u32 2147483648, %v11861_v19  ;;  %v3495_v49 = vsub.f32 %v11257_v17, %v11893_v9  ;;  %vm2041_vm13 = vweird.f32 %v11896_v29  ;;  %v11967_v17 = vld [vmem:[#allocation2 + $0x60] sm:$0xf]  ;;  %v11969_v9 = vld [vmem:[#allocation2 + $0x68] sm:$0xf0] }
 0x457   : > { %v11942_v1 = vpop.xlane.xlu2 %2693  ;;  %8299 = vst [vmem:[%s10960_s7 + $0x148] sm:$0xff] %v2950_v57  ;;  %v2029_v20 = vsel %vm2028_vm12, %v11882_v16, %v2025_v51  ;;  %v2033_v48 = vor.u32 1.1754944e-38, %v2032_v24  ;;  %v2047_v61 = vand.u32 2147483648, %v11896_v29  ;;  %vm2031_vm14 = vcmp.eq.f32.partialorder %v2030_v30, 8.507059e+37 }
 0x458   : > { %v11950_v7 = vpop.xlane.xlu0 %1837  ;;  %9545 = vrcp.f32 %v11942_v1  ;;  %v2038_v38 = vsub.f32 1.0, %v2037_v25  ;;  %vm2042_vm15 = vweird.f32 %v11928_v8  ;;  %v2978_v36 = vpack.c.bf16 %v2950_v57, %v2949_v60 }
 0x459   : > { %9547 = vrcp.f32 %v11950_v7  ;;  %v2034_v4 = vsel %vm2031_vm14, %v2033_v48, %v2029_v20  ;;  %v2855_v28 = vadd.f32 %v11889_v58, %v2854_v44  ;;  %vm2857_vm1 = vweird.f32 %v11889_v58  ;;  %vm11988_vm3 = vmor %vm2041_vm13, %vm2042_vm15 }
 0x45a   : > { %9549 = vrcp.f32 %v11945_v39  ;;  %v2039_v12 = vmul.f32 %v11928_v8, %v2038_v38  ;;  %v1426_v43 = vpop.f32.mrf.mxu0  ;;  %v11975_v16 = vpop.eup %9543  ;;  %v2045_v21 = vand.u32 2147483647, %v11896_v29  ;;  %v2093_v55 = vmul.f32 %v11231_v31, %v2034_v4 }
 0x45b   : > { %v1450_v47 = vpack.c.bf16 %v1426_v43, %v1426_v43  ;;  %9551 = vpow2.f32 %v3515_v52  ;;  %vm2856_vm2 = vweird.f32 %v11861_v19  ;;  %v2860_v11 = vand.u32 2147483647, %v11861_v19 }
 0x45c   : > { %v2040_v59 = vadd.f32 %v11928_v8, %v2039_v12  ;;  %3549 = vadd.xlane.f32.xlu2 %v11975_v16  ;;  %9553 = vpow2.f32 %v3519_v34  ;;  %v3525_v0 = vmul.f32 1.442695, %v3495_v49  ;;  %v2877_v54 = vand.u32 2147483648, %v11945_v39  ;;  %vm12011_vm4 = vmor %vm2856_vm2, %vm2857_vm1  ;;  %8182 = vst [vmem:[%s10960_s7 + $0xe0] sm:$0xff] %v2093_v55 }
 0x45d   : > { %1467 = vst.msk [vmem:[#allocation3 + $0x2c] sm:$0xf] %vm1455_vm9, %v1450_v47  ;;  %v2048_v30 = vor.u32 1.1754944e-38, %v2047_v61  ;;  %vm2046_vm5 = vcmp.eq.f32.partialorder %v2045_v21, 8.507059e+37  ;;  %v2863_v34 = vor.u32 1.1754944e-38, %v2862_v32  ;;  %vm2861_vm6 = vcmp.eq.f32.partialorder %v2860_v11, 8.507059e+37  ;;  %v12047_v21 = vpop.f32.mrf.mxu1 }
 0x45e   : > { %v11980_v62 = vpop.eup %9545  ;;  %5173 = vmax.xlane.f32.xlu1 %v11971_v50  ;;  %v12002_v53 = vpop.xlane.xlu1 %3479  ;;  %v2044_v60 = vsel %vm11988_vm3, %v11928_v8, %v2040_v59  ;;  %v2859_v8 = vsel %vm12011_vm4, %v11889_v58, %v2855_v28  ;;  %vm2056_vm7 = vweird.f32 %v11950_v7  ;;  %v2892_v32 = vand.u32 2147483648, %v11942_v1 }
 0x45f   : > { %v11995_v24 = vpop.eup %9547  ;;  %3074 = vmatmul.bf16.gmra.mxu0 %v2978_v36  ;;  %v11999_v29 = vpop.xlane.xlu2 %1839  ;;  %v2882_v49 = vmul.f32 %v11980_v62, %v11942_v1  ;;  %v2049_v38 = vsel %vm2046_vm5, %v2048_v30, %v2044_v60  ;;  %v2864_v12 = vsel %vm2861_vm6, %v2863_v34, %v2859_v8  ;;  %vm2871_vm8 = vweird.f32 %v11945_v39 }
 0x460   : > { %v12015_v51 = vpop.eup %9549  ;;  %v2052_v52 = vmul.f32 %v11995_v24, %v11950_v7  ;;  %v12019_v25 = vpop.xlane.xlu0 %2695  ;;  %9555 = vrcp.f32 %v11999_v29  ;;  %v2094_v48 = vmul.f32 %v11255_v18, %v2049_v38  ;;  %v12043_v18 = vmul.f32 %v11235_v10, %v2864_v12 }
 0x461   : > { %v2867_v19 = vmul.f32 %v12015_v51, %v11945_v39  ;;  %9557 = vrcp.f32 %v12019_v25  ;;  %v12032_v58 = vpop.eup %9551  ;;  %v2062_v22 = vand.u32 2147483648, %v11950_v7  ;;  %v2883_v11 = vsub.f32 1.0, %v2882_v49 }
 0x462   : > { %v2053_v44 = vsub.f32 1.0, %v2052_v52  ;;  %9559 = vpow2.f32 %v3525_v0  ;;  %v1429_v43 = vpop.f32.mrf.mxu0  ;;  %v12038_v36 = vpop.eup %9553  ;;  %8183 = vst [vmem:[%s10960_s7 + $0xe8] sm:$0xff] %v2094_v48  ;;  %v2120_v47 = vpack.c.bf16 %v2094_v48, %v2093_v55  ;;  %v2875_v0 = vand.u32 2147483647, %v11945_v39 }
 0x463   : > { %v2868_v20 = vsub.f32 1.0, %v2867_v19  ;;  %v1451_v28 = vpack.c.bf16 %v1429_v43, %v1429_v43  ;;  %v2878_v60 = vor.u32 1.1754944e-38, %v2877_v54  ;;  %vm2872_vm10 = vweird.f32 %v12015_v51  ;;  %8300 = vst [vmem:[%s10960_s7 + $0x150] sm:$0xff] %v12043_v18 }
 0x464   : > { %v2054_v61 = vmul.f32 %v11995_v24, %v2053_v44  ;;  %v2060_v30 = vand.u32 2147483647, %v11950_v7  ;;  %vm2057_vm11 = vweird.f32 %v11995_v24  ;;  %vm2071_vm12 = vweird.f32 %v11999_v29  ;;  %vm12086_vm13 = vmor %vm2871_vm8, %vm2872_vm10 }
 0x465   : > { %v2869_v4 = vmul.f32 %v12015_v51, %v2868_v20  ;;  %1468 = vst.msk [vmem:[#allocation3 + $0x30] sm:$0xf] %vm1455_vm9, %v1451_v28  ;;  %v2077_v20 = vand.u32 2147483648, %v11999_v29  ;;  %v2884_v48 = vmul.f32 %v11980_v62, %v2883_v11  ;;  %vm2876_vm14 = vcmp.eq.f32.partialorder %v2875_v0, 8.507059e+37  ;;  %vm12093_vm15 = vmor %vm2056_vm7, %vm2057_vm11 }
 0x466   : > { %v12045_v59 = vpop.eup %9555  ;;  %2224 = vmatmul.bf16.gmra.mxu2 %v2120_v47  ;;  %5175 = vmax.xlane.f32.xlu1 %v12047_v21  ;;  %v12057_v10 = vpop.xlane.xlu1 %2697  ;;  %v2055_v55 = vadd.f32 %v11995_v24, %v2054_v61  ;;  %vm12097_vm1 = vcmp.eq.f32.partialorder %v2060_v30, 8.507059e+37  ;;  %v2063_v47 = vor.u32 1.1754944e-38, %v2062_v22  ;;  %vm2886_vm3 = vweird.f32 %v11942_v1 }
 0x467   : > { %v12051_v57 = vpop.eup %9557  ;;  %v2067_v52 = vmul.f32 %v12045_v59, %v11999_v29  ;;  %v12066_v19 = vpop.xlane.xlu2 %3531  ;;  %9561 = vrcp.f32 %v12057_v10  ;;  %v2870_v34 = vadd.f32 %v12015_v51, %v2869_v4  ;;  %vm2072_vm2 = vweird.f32 %v12045_v59 }
 0x468   : > { %v2897_v54 = vmul.f32 %v12051_v57, %v12019_v25  ;;  %v12064_v8 = vpop.xlane.xlu0 %3529  ;;  %v12073_v44 = vpop.eup %9559  ;;  %3547 = vadd.xlane.f32.xlu0 %v12032_v58  ;;  %v2922_v11 = vand.u32 2147483648, %v12057_v10  ;;  %v3585_v22 = vand.u32 2147483647, %v12066_v19  ;;  %v3587_v61 = vand.u32 2147483648, %v12066_v19  ;;  %vm2073_vm10 = vmor %vm2071_vm12, %vm2072_vm2 }
 0x469   : > { %v2068_v38 = vsub.f32 1.0, %v2067_v52  ;;  %9563 = vrcp.f32 %v12064_v8  ;;  %v3570_v39 = vand.u32 2147483647, %v12064_v8  ;;  %v2874_v7 = vsel %vm12086_vm13, %v12015_v51, %v2870_v34 }
 0x46a   : > { %v2898_v12 = vsub.f32 1.0, %v2897_v54  ;;  %9565 = vrcp.f32 %v12066_v19  ;;  %v1431_v0 = vpop.f32.mrf.mxu0  ;;  %v2059_v52 = vsel %vm12093_vm15, %v11995_v24, %v2055_v55  ;;  %v3572_v30 = vand.u32 2147483648, %v12064_v8 }
 0x46b   : > { %v2069_v43 = vmul.f32 %v12045_v59, %v2068_v38  ;;  %v1452_v54 = vpack.c.bf16 %v1431_v0, %v1431_v0  ;;  %v2879_v38 = vsel %vm2876_vm14, %v2878_v60, %v2874_v7  ;;  %vm3566_vm4 = vweird.f32 %v12064_v8 }
 0x46c   : > { %v2899_v49 = vmul.f32 %v12051_v57, %v2898_v12  ;;  %v2952_v51 = vmul.f32 %v11283_v5, %v2879_v38  ;;  %v2064_v24 = vsel %vm12097_vm1, %v2063_v47, %v2059_v52  ;;  %vm3581_vm5 = vweird.f32 %v12066_v19  ;;  %v14092_v38 = vld [vmem:[#allocation30_spill] sm:$0xff] }
 0x46d   : > { %v12113_v31 = vpop.eup %9561  ;;  %1469 = vst.msk [vmem:[#allocation3 + $0x34] sm:$0xf] %vm1455_vm9, %v1452_v54  ;;  %v2070_v12 = vadd.f32 %v12045_v59, %v2069_v43  ;;  %v12132_v5 = vmul.f32 %v11288_v15, %v2064_v24  ;;  %vm12136_vm6 = vcmp.eq.f32.partialorder %v3570_v39, 8.507059e+37  ;;  %v2075_v43 = vand.u32 2147483647, %v11999_v29 }
 0x46e   : > { %v2912_v60 = vmul.f32 %v12113_v31, %v12057_v10  ;;  %3551 = vadd.xlane.f32.xlu1 %v12038_v36  ;;  %v12128_v34 = vpop.xlane.xlu1 %3533  ;;  %8301 = vst [vmem:[%s10960_s7 + $0x158] sm:$0xff] %v2952_v51  ;;  %v2979_v0 = vpack.c.bf16 %v2952_v51, %v12043_v18  ;;  %v3573_v52 = vor.u32 1.1754944e-38, %v3572_v30  ;;  %vm2901_vm7 = vweird.f32 %v12019_v25 }
 0x46f   : > { %v12121_v55 = vpop.eup %9563  ;;  %v12142_v7 = vpop.xlane.xlu2 %2699  ;;  %9567 = vrcp.f32 %v12128_v34  ;;  %8184 = vst [vmem:[%s10960_s7 + $0xf0] sm:$0xff] %v12132_v5  ;;  %vm12151_vm8 = vcmp.eq.f32.partialorder %v3585_v22, 8.507059e+37  ;;  %v3588_v18 = vor.u32 1.1754944e-38, %v3587_v61  ;;  %v2885_v30 = vadd.f32 %v11980_v62, %v2884_v48 }
 0x470   : > { %v9566_v4 = vpop.eup %9565  ;;  %v3562_v28 = vmul.f32 %v12121_v55, %v12064_v8  ;;  %v2913_v54 = vsub.f32 1.0, %v2912_v60  ;;  %9569 = vrcp.f32 %v12142_v7  ;;  %3079 = vmatmul.bf16.gmra.mxu0 %v2979_v0  ;;  %vm3567_vm11 = vweird.f32 %v12121_v55 }
 0x471   : > { %v3577_v15 = vmul.f32 %v9566_v4, %v12066_v19  ;;  %v2074_v24 = vsel %vm2073_vm10, %v12045_v59, %v2070_v12  ;;  %v2078_v60 = vor.u32 1.1754944e-38, %v2077_v20  ;;  %vm2076_vm13 = vcmp.eq.f32.partialorder %v2075_v43, 8.507059e+37  ;;  %vm3568_vm2 = vmor %vm3566_vm4, %vm3567_vm11 }
 0x472   : > { %v3563_v39 = vsub.f32 1.0, %v3562_v28  ;;  %vm2887_vm14 = vweird.f32 %v11980_v62  ;;  %v2890_v61 = vand.u32 2147483647, %v11942_v1  ;;  %vm3582_vm15 = vweird.f32 %v9566_v4 }
 0x473   : > { %v3578_v51 = vsub.f32 1.0, %v3577_v15  ;;  %v2914_v29 = vmul.f32 %v12113_v31, %v2913_v54  ;;  %v2079_v0 = vsel %vm2076_vm13, %v2078_v60, %v2074_v24  ;;  %vm12168_vm12 = vmor %vm2886_vm3, %vm2887_vm14  ;;  %vm2916_vm1 = vweird.f32 %v12057_v10 }
 0x474   : > { %v3564_v22 = vmul.f32 %v12121_v55, %v3563_v39  ;;  %v2096_v12 = vmul.f32 %v11320_v35, %v2079_v0  ;;  %6726 = vrot.lane.b32.xlu2 %v8833_v3, %s10065_s17  ;;  %v2889_v15 = vsel %vm12168_vm12, %v11980_v62, %v2885_v30  ;;  %v2893_v54 = vor.u32 1.1754944e-38, %v2892_v32  ;;  %vm3583_vm3 = vmor %vm3581_vm5, %vm3582_vm15 }
 0x475   : > { %v3579_v28 = vmul.f32 %v9566_v4, %v3578_v51  ;;  %v12172_v59 = vpop.eup %9567  ;;  %v12181_v43 = vpop.xlane.xlu0 %3535  ;;  %v2900_v2 = vadd.f32 %v12051_v57, %v2899_v49  ;;  %vm2891_vm4 = vcmp.eq.f32.partialorder %v2890_v61, 8.507059e+37  ;;  %vm2902_vm5 = vweird.f32 %v12051_v57 }
 0x476   : > { %v3565_v20 = vadd.f32 %v12121_v55, %v3564_v22  ;;  %v12188_v39 = vpop.eup %9569  ;;  %v3592_v40 = vmul.f32 %v12172_v59, %v12128_v34  ;;  %9571 = vrcp.f32 %v12181_v43  ;;  %3557 = vadd.xlane.f32.xlu1 %v12073_v44  ;;  %8185 = vst [vmem:[%s10960_s7 + $0xf8] sm:$0xff] %v2096_v12  ;;  %v2121_v62 = vpack.c.bf16 %v2096_v12, %v12132_v5 }
 0x477   : > { %v3580_v35 = vadd.f32 %v9566_v4, %v3579_v28  ;;  %v2927_v1 = vmul.f32 %v12188_v39, %v12142_v7  ;;  %v5863_v32 = vpop.permute.xlu2 %5862  ;;  %v2894_v49 = vsel %vm2891_vm4, %v2893_v54, %v2889_v15  ;;  %v2905_v5 = vand.u32 2147483647, %v12019_v25  ;;  %v14094_v15 = vld [vmem:[#allocation34_spill] sm:$0xff] }
 0x478   : > { %v3569_v3 = vsel %vm3568_vm2, %v12121_v55, %v3565_v20  ;;  %v3593_v51 = vsub.f32 1.0, %v3592_v40  ;;  %8763 = vmatmul.msk.bf16.gmra.mxu3 %vm852_vm0, %v5863_v32  ;;  %2229 = vmatmul.bf16.gmra.mxu2 %v2121_v62  ;;  %v2937_v24 = vand.u32 2147483648, %v12142_v7  ;;  %v14093_v20 = vor.u32 %v11969_v9, %v11967_v17 }
 0x479   : > { %v3574_v8 = vsel %vm12136_vm6, %v3573_v52, %v3569_v3  ;;  %v3584_v30 = vsel %vm3583_vm3, %v9566_v4, %v3580_v35  ;;  %v2928_v55 = vsub.f32 1.0, %v2927_v1  ;;  %v1434_v52 = vpop.f32.mrf.mxu0  ;;  %vm2903_vm6 = vmor %vm2901_vm7, %vm2902_vm5  ;;  %v14091_v4 = vand.u32 2147483648, %v12019_v25 }
 0x47a   : > { %v3589_v19 = vsel %vm12151_vm8, %v3588_v18, %v3584_v30  ;;  %v3594_v47 = vmul.f32 %v12172_v59, %v3593_v51  ;;  %v2953_v18 = vmul.f32 %v14092_v38, %v2894_v49  ;;  %v1453_v61 = vpack.c.bf16 %v1434_v52, %v1434_v52 }
 0x47b   : > { %v2908_v60 = vor.u32 1.1754944e-38, %v14091_v4  ;;  %v2929_v22 = vmul.f32 %v12188_v39, %v2928_v55  ;;  %v2904_v28 = vsel %vm2903_vm6, %v12051_v57, %v2900_v2  ;;  %vm2906_vm8 = vcmp.eq.f32.partialorder %v2905_v5, 8.507059e+37 }
 0x47c   : > { %v12223_v0 = vpop.eup %9571  ;;  %8302 = vst [vmem:[%s10960_s7 + $0x160] sm:$0xff] %v2953_v18  ;;  %5868 = vrot.lane.b32.xlu0 %v14093_v20, %s10064_s13  ;;  %v12231_v25 = vmul.f32 %v11338_v6, %v3574_v8  ;;  %v12234_v12 = vmul.f32 %v11378_v45, %v3589_v19  ;;  %vm2917_vm7 = vweird.f32 %v12113_v31  ;;  %v2915_v17 = vadd.f32 %v12113_v31, %v2914_v29  ;;  %v12270_v19 = vpop.f32.mrf.mxu2 }
 0x47d   : > { %v2909_v48 = vsel %vm2906_vm8, %v2908_v60, %v2904_v28  ;;  %v3607_v57 = vmul.f32 %v12223_v0, %v12181_v43  ;;  %1470 = vst.msk [vmem:[#allocation3 + $0x38] sm:$0xf] %vm1455_vm9, %v1453_v61  ;;  %v2920_v9 = vand.u32 2147483647, %v12057_v10  ;;  %vm2931_vm10 = vweird.f32 %v12142_v7  ;;  %vm2918_vm13 = vmor %vm2916_vm1, %vm2917_vm7  ;;  %v8836_v61 = vld [vmem:[#allocation2 + $0x60] sm:$0xf] }
 0x47e   : > { %v2954_v54 = vmul.f32 %v14094_v15, %v2909_v48  ;;  %vm3596_vm11 = vweird.f32 %v12128_v34  ;;  %8410 = vst [vmem:[%s10960_s7 + $0x180] sm:$0xff] %v12231_v25  ;;  %v2923_v6 = vor.u32 1.1754944e-38, %v2922_v11  ;;  %v2930_v45 = vadd.f32 %v12188_v39, %v2929_v22  ;;  %v9215_v28 = vld [vmem:[#allocation2 + $0x68] sm:$0xf0]  ;;  %v8720_v15 = vld [vmem:[#allocation2 + $0x78] sm:$0xf] }
 0x47f   : > { %v3608_v35 = vsub.f32 1.0, %v3607_v57  ;;  %v2919_v29 = vsel %vm2918_vm13, %v12113_v31, %v2915_v17  ;;  %vm2921_vm14 = vcmp.eq.f32.partialorder %v2920_v9, 8.507059e+37  ;;  %v3602_v2 = vand.u32 2147483648, %v12128_v34  ;;  %8411 = vst [vmem:[%s10960_s7 + $0x188] sm:$0xff] %v12234_v12  ;;  %v5865_v4 = vpop.permute.xlu2 %5864 }
 0x480   : > { %8303 = vst [vmem:[%s10960_s7 + $0x168] sm:$0xff] %v2954_v54  ;;  %v2980_v40 = vpack.c.bf16 %v2954_v54, %v2953_v18  ;;  %v2924_v3 = vsel %vm2921_vm14, %v2923_v6, %v2919_v29  ;;  %vm2932_vm15 = vweird.f32 %v12188_v39  ;;  %v2935_v1 = vand.u32 2147483647, %v12142_v7  ;;  %v9192_v54 = vld [vmem:[#allocation2 + $0x80] sm:$0xf0]  ;;  %v14098_v29 = vld [vmem:[#allocation26_spill] sm:$0xff] }
 0x481   : > { %v3609_v10 = vmul.f32 %v12223_v0, %v3608_v35  ;;  %vm2933_vm12 = vmor %vm2931_vm10, %vm2932_vm15  ;;  %v2938_v11 = vor.u32 1.1754944e-38, %v2937_v24  ;;  %v2955_v31 = vmul.f32 %v11373_v41, %v2924_v3  ;;  %v3595_v62 = vadd.f32 %v12172_v59, %v3594_v47  ;;  %v1436_v8 = vpop.f32.mrf.mxu0 }
 0x482   : > { %3084 = vmatmul.bf16.gmra.mxu0 %v2980_v40  ;;  %vm3611_vm1 = vweird.f32 %v12181_v43  ;;  %v3617_v32 = vand.u32 2147483648, %v12181_v43  ;;  %v2934_v30 = vsel %vm2933_vm12, %v12188_v39, %v2930_v45  ;;  %vm2936_vm2 = vcmp.eq.f32.partialorder %v2935_v1, 8.507059e+37  ;;  %v9216_v1 = vld [vmem:[#allocation2 + $0x80] sm:$0xf0] }
 0x483   : > { %v1454_v51 = vpack.c.bf16 %v1436_v8, %v1436_v8  ;;  %v2939_v49 = vsel %vm2936_vm2, %v2938_v11, %v2934_v30  ;;  %8304 = vst [vmem:[%s10960_s7 + $0x170] sm:$0xff] %v2955_v31  ;;  %vm3597_vm3 = vweird.f32 %v12172_v59  ;;  %v3600_v7 = vand.u32 2147483647, %v12128_v34 }
 0x484   : > { %v2956_v41 = vmul.f32 %v11404_v23, %v2939_v49  ;;  %vm3598_vm4 = vmor %vm3596_vm11, %vm3597_vm3  ;;  %v3603_v55 = vor.u32 1.1754944e-38, %v3602_v2  ;;  %v3610_v5 = vadd.f32 %v12223_v0, %v3609_v10  ;;  %vm3612_vm5 = vweird.f32 %v12223_v0  ;;  %v12294_v20 = vpop.f32.mrf.mxu2  ;;  %v12305_v10 = vpop.f32.mrf.mxu1 }
 0x485   : > { %1471 = vst.msk [vmem:[#allocation3 + $0x3c] sm:$0xf] %vm1455_vm9, %v1454_v51  ;;  %v3599_v39 = vsel %vm3598_vm4, %v12172_v59, %v3595_v62  ;;  %vm3601_vm6 = vcmp.eq.f32.partialorder %v3600_v7, 8.507059e+37  ;;  %vm3613_vm8 = vmor %vm3611_vm1, %vm3612_vm5  ;;  %v3615_v24 = vand.u32 2147483647, %v12181_v43  ;;  %v3618_v52 = vor.u32 1.1754944e-38, %v3617_v32 }
 0x486   : > { %v6723_v23 = vpop.permute.xlu1 %6722  ;;  %8305 = vst [vmem:[%s10960_s7 + $0x178] sm:$0xff] %v2956_v41  ;;  %v3604_v34 = vsel %vm3601_vm6, %v3603_v55, %v3599_v39  ;;  %v3614_v47 = vsel %vm3613_vm8, %v12223_v0, %v3610_v5  ;;  %v3834_v60 = vpack.c.bf16 %v12234_v12, %v12231_v25  ;;  %v14095_v59 = vld [vmem:[#allocation39_spill] sm:$0xff]  ;;  %v14096_v43 = vld [vmem:[#allocation25_spill] sm:$0xff]  ;;  %v12292_v0 = vpop.xlane.xlu0 %4315  ;;  %v8837_v48 = vor.u32 %v9215_v28, %v8836_v61 }
 0x487   : > { %8883 = vmatmul.msk.bf16.gmra.mxu1 %vm852_vm0, %v6723_v23  ;;  %vm3616_vm9 = vcmp.eq.f32.partialorder %v3615_v24, 8.507059e+37  ;;  %v3803_v38 = vmul.f32 %v14095_v59, %v3604_v34  ;;  %v14097_v25 = vld [vmem:[#allocation21_spill] sm:$0xff]  ;;  %v2981_v57 = vpack.c.bf16 %v2956_v41, %v2955_v31  ;;  %v8721_v45 = vor.u32 %v9192_v54, %v8720_v15 }
 0x488   : > { %8764 = vmatmul.msk.bf16.gmra.mxu3 %vm852_vm0, %v5865_v4  ;;  %v3619_v18 = vsel %vm3616_vm9, %v3618_v52, %v3614_v47  ;;  %3914 = vmatmul.bf16.vlgmr.msra.gmra.mxu2 %v3834_v60  ;;  %v3494_v12 = vsub.f32 %v14097_v25, %v11903_v13  ;;  %v3493_v2 = vsub.f32 %v14098_v29, %v11848_v63  ;;  %v8840_v13 = vld [vmem:[#allocation2 + $0x78] sm:$0xf]  ;;  %v14099_v63 = vld [vmem:[#allocation23_spill] sm:$0xff] }
 0x489   : > { %v3804_v22 = vmul.f32 %v14096_v43, %v3619_v18  ;;  %8412 = vst [vmem:[%s10960_s7 + $0x190] sm:$0xff] %v3803_v38  ;;  %v8841_v8 = vor.u32 %v9216_v1, %v8840_v13  ;;  %v3496_v30 = vsub.f32 %v14099_v63, %v12002_v53  ;;  %v2235_v54 = vpack.c.bf16 %v12270_v19, %v12270_v19 }
 0x48a   : > { %v3523_v17 = vmul.f32 1.442695, %v3494_v12  ;;  %v3521_v11 = vmul.f32 1.442695, %v3493_v2 }
 0x48b   : > { %8413 = vst [vmem:[%s10960_s7 + $0x198] sm:$0xff] %v3804_v22  ;;  %v3835_v3 = vpack.c.bf16 %v3804_v22, %v3803_v38  ;;  %v3527_v39 = vmul.f32 1.442695, %v3496_v30 }
 0x48c   : > { %v12319_v53 = vpop.f32.mrf.mxu1 }
 0x48e   : > { %v6725_v35 = vpop.permute.xlu1 %6724 }
 0x48f   : > { %6728 = vrot.lane.b32.xlu1 %v8837_v48, %s10065_s17 }
 0x490   : > { %v2200_v40 = vpop.f32.mrf.mxu2 }
 0x491   : > { %v2237_v47 = vpack.c.bf16 %v2200_v40, %v2200_v40 }
 0x492   : > { %3089 = vmatmul.bf16.gmra.mxu0 %v2981_v57 }
 0x493   : > { %v12299_v9 = vpop.f32.mrf.mxu0 }
 0x495   : > { %v3542_v6 = vpop.xlane.xlu0 %3541 }
 0x496   : > { %9573 = vrcp.f32 %v3542_v6  ;;  %v3662_v7 = vand.u32 2147483648, %v3542_v6  ;;  %v3660_v5 = vand.u32 2147483647, %v3542_v6  ;;  %vm3656_vm10 = vweird.f32 %v3542_v6 }
 0x497   : > { %9575 = vpow2.f32 %v3523_v17  ;;  %5870 = vrot.lane.b32.xlu1 %v8721_v45, %s10064_s13  ;;  %8884 = vmatmul.msk.bf16.gmra.mxu1 %vm852_vm0, %v6725_v35 }
 0x498   : > { %3919 = vmatmul.bf16.gmra.mxu2 %v3835_v3  ;;  %9577 = vpow2.f32 %v3521_v11  ;;  %v12315_v41 = vpop.f32.mrf.mxu2  ;;  %v3663_v23 = vor.u32 1.1754944e-38, %v3662_v7  ;;  %vm3661_vm13 = vcmp.eq.f32.partialorder %v3660_v5, 8.507059e+37 }
 0x499   : > { %9579 = vpow2.f32 %v3527_v39  ;;  %v2236_v39 = vpack.c.bf16 %v12294_v20, %v12294_v20  ;;  %v2238_v20 = vpack.c.bf16 %v12315_v41, %v12315_v41 }
 0x49b   : > { %v12312_v49 = vpop.f32.mrf.mxu0 }
 0x49c   : > { %v9574_v31 = vpop.eup %9573  ;;  %v3096_v13 = vpack.c.bf16 %v12312_v49, %v12312_v49 }
 0x49d   : > { %v12307_v62 = vpop.eup %9575  ;;  %v3652_v32 = vmul.f32 %v9574_v31, %v3542_v6  ;;  %vm3657_vm7 = vweird.f32 %v9574_v31  ;;  %v12327_v59 = vpop.xlane.xlu0 %5171 }
 0x49e   : > { %3555 = vadd.xlane.f32.xlu2 %v12307_v62  ;;  %vm3658_vm11 = vmor %vm3656_vm10, %vm3657_vm7  ;;  %v12317_v34 = vpop.eup %9577 }
 0x49f   : > { %v3653_v51 = vsub.f32 1.0, %v3652_v32  ;;  %6730 = vrot.lane.b32.xlu1 %v8841_v8, %s10065_s17  ;;  %v12333_v43 = vpop.eup %9579 }
 0x4a1   : > { %v3654_v55 = vmul.f32 %v9574_v31, %v3653_v51 }
 0x4a3   : > { %v3655_v24 = vadd.f32 %v9574_v31, %v3654_v55  ;;  %v3060_v18 = vpop.f32.mrf.mxu0 }
 0x4a4   : > { %v3097_v22 = vpack.c.bf16 %v3060_v18, %v3060_v18 }
 0x4a5   : > { %v3659_v52 = vsel %vm3658_vm11, %v9574_v31, %v3655_v24 }
 0x4a6   : > { %5179 = vmax.xlane.f32.xlu2 %v12319_v53  ;;  %3553 = vadd.xlane.f32.xlu0 %v12317_v34  ;;  %v3664_v4 = vsel %vm3661_vm13, %v3663_v23, %v3659_v52 }
 0x4a7   : > { %2271 = vrot.lane.b32.xlu1 %v2237_v47, %s10065_s17  ;;  %v12325_v60 = vmul.f32 %v11566_v46, %v3664_v4 }
 0x4a9   : > { %v12329_v38 = vpop.f32.mrf.mxu2  ;;  %8416 = vst [vmem:[%s10960_s7 + $0x1b0] sm:$0xff] %v12325_v60 }
 0x4ab   : > { %v12338_v46 = vpop.f32.mrf.mxu0 }
 0x4ae   : > { %3559 = vadd.xlane.f32.xlu0 %v12333_v43 }
 0x4af   : > { %3131 = vrot.lane.b32.xlu1 %v3097_v22, %s10064_s13 }
 0x4b0   : > { %v5867_v28 = vpop.permute.xlu0 %5866 }
 0x4b1   : > { %v2207_v61 = vpop.f32.mrf.mxu2  ;;  %8765 = vmatmul.msk.bf16.gmra.mxu3 %vm852_vm0, %v5867_v28 }
 0x4b2   : > { %v2240_v48 = vpack.c.bf16 %v2207_v61, %v2207_v61 }
 0x4b6   : > { %5177 = vmax.xlane.f32.xlu0 %v12305_v10 }
 0x4b7   : > { %2277 = vrot.lane.b32.xlu1 %v2240_v48, %s10065_s17  ;;  %v3538_v25 = vpop.xlane.xlu2 %3537 }
 0x4b8   : > { %9581 = vrcp.f32 %v3538_v25  ;;  %v3632_v1 = vand.u32 2147483648, %v3538_v25  ;;  %v3630_v8 = vand.u32 2147483647, %v3538_v25  ;;  %vm3626_vm12 = vweird.f32 %v3538_v25 }
 0x4b9   : > { %v12342_v12 = vpop.f32.mrf.mxu2  ;;  %v3540_v57 = vpop.xlane.xlu1 %3539 }
 0x4ba   : > { %9583 = vrcp.f32 %v3540_v57  ;;  %v3647_v30 = vand.u32 2147483648, %v3540_v57  ;;  %v3645_v7 = vand.u32 2147483647, %v3540_v57  ;;  %vm3641_vm1 = vweird.f32 %v3540_v57 }
 0x4bb   : > { %v3633_v49 = vor.u32 1.1754944e-38, %v3632_v1  ;;  %vm3631_vm3 = vcmp.eq.f32.partialorder %v3630_v8, 8.507059e+37 }
 0x4bc   : > { %v12344_v15 = vpop.f32.mrf.mxu0  ;;  %v3648_v61 = vor.u32 1.1754944e-38, %v3647_v30  ;;  %vm3646_vm5 = vcmp.eq.f32.partialorder %v3645_v7, 8.507059e+37 }
 0x4be   : > { %2267 = vrot.lane.b32.xlu2 %v2235_v54, %s10065_s17  ;;  %v9582_v17 = vpop.eup %9581 }
 0x4bf   : > { %v3622_v45 = vmul.f32 %v9582_v17, %v3538_v25  ;;  %v12349_v35 = vpop.xlane.xlu2 %3543  ;;  %vm3627_vm14 = vweird.f32 %v9582_v17 }
 0x4c0   : > { %v9584_v6 = vpop.eup %9583  ;;  %9585 = vrcp.f32 %v12349_v35  ;;  %vm3628_vm2 = vmor %vm3626_vm12, %vm3627_vm14  ;;  %vm3671_vm8 = vweird.f32 %v12349_v35 }
 0x4c1   : > { %v3637_v40 = vmul.f32 %v9584_v6, %v3540_v57  ;;  %v12352_v29 = vpop.f32.mrf.mxu2  ;;  %v12354_v2 = vpop.xlane.xlu1 %5169  ;;  %v3623_v3 = vsub.f32 1.0, %v3622_v45  ;;  %vm3642_vm15 = vweird.f32 %v9584_v6  ;;  %v3675_v45 = vand.u32 2147483647, %v12349_v35 }
 0x4c2   : > { %vm3643_vm4 = vmor %vm3641_vm1, %vm3642_vm15 }
 0x4c3   : > { %v3638_v19 = vsub.f32 1.0, %v3637_v40  ;;  %v3624_v31 = vmul.f32 %v9582_v17, %v3623_v3  ;;  %vm3676_vm7 = vcmp.eq.f32.partialorder %v3675_v45, 8.507059e+37  ;;  %v3098_v45 = vpack.c.bf16 %v12338_v46, %v12338_v46 }
 0x4c4   : > { %v3067_v11 = vpop.f32.mrf.mxu0 }
 0x4c5   : > { %v3100_v32 = vpack.c.bf16 %v3067_v11, %v3067_v11  ;;  %v3639_v63 = vmul.f32 %v9584_v6, %v3638_v19  ;;  %v3625_v51 = vadd.f32 %v9582_v17, %v3624_v31 }
 0x4c6   : > { %3129 = vrot.lane.b32.xlu2 %v3096_v13, %s10064_s13  ;;  %v9586_v55 = vpop.eup %9585 }
 0x4c7   : > { %3137 = vrot.lane.b32.xlu1 %v3100_v32, %s10064_s13  ;;  %v3640_v5 = vadd.f32 %v9584_v6, %v3639_v63  ;;  %v3667_v24 = vmul.f32 %v9586_v55, %v12349_v35  ;;  %v12363_v23 = vpop.xlane.xlu2 %4317  ;;  %v3629_v47 = vsel %vm3628_vm2, %v9582_v17, %v3625_v51  ;;  %v3677_v17 = vand.u32 2147483648, %v12349_v35 }
 0x4c8   : > { %v3634_v18 = vsel %vm3631_vm3, %v3633_v49, %v3629_v47  ;;  %vm3672_vm6 = vweird.f32 %v9586_v55  ;;  %v3099_v63 = vpack.c.bf16 %v12344_v15, %v12344_v15 }
 0x4c9   : > { %v12366_v52 = vpop.f32.mrf.mxu2  ;;  %v3546_v4 = vpop.xlane.xlu1 %3545  ;;  %v3644_v22 = vsel %vm3643_vm4, %v9584_v6, %v3640_v5  ;;  %v3668_v28 = vsub.f32 1.0, %v3667_v24  ;;  %v3805_v57 = vmul.f32 %v11681_v42, %v3634_v18  ;;  %vm3673_vm9 = vmor %vm3671_vm8, %vm3672_vm6  ;;  %v3095_v42 = vpack.c.bf16 %v12299_v9, %v12299_v9 }
 0x4ca   : > { %9587 = vrcp.f32 %v3546_v4  ;;  %2269 = vrot.lane.b32.xlu0 %v2236_v39, %s10065_s17  ;;  %v3649_v25 = vsel %vm3646_vm5, %v3648_v61, %v3644_v22  ;;  %v3678_v1 = vor.u32 1.1754944e-38, %v3677_v17  ;;  %v3692_v30 = vand.u32 2147483648, %v3546_v4 }
 0x4cb   : > { %v3669_v54 = vmul.f32 %v9586_v55, %v3668_v28  ;;  %v3806_v6 = vmul.f32 %v11687_v26, %v3649_v25  ;;  %8414 = vst [vmem:[%s10960_s7 + $0x1a0] sm:$0xff] %v3805_v57  ;;  %v3690_v7 = vand.u32 2147483647, %v3546_v4  ;;  %vm3686_vm11 = vweird.f32 %v3546_v4 }
 0x4cc   : > { %v12371_v48 = vpop.f32.mrf.mxu0  ;;  %v2239_v5 = vpack.c.bf16 %v12329_v38, %v12329_v38  ;;  %v2241_v38 = vpack.c.bf16 %v12342_v12, %v12342_v12 }
 0x4cd   : > { %8415 = vst [vmem:[%s10960_s7 + $0x1a8] sm:$0xff] %v3806_v6  ;;  %v3836_v41 = vpack.c.bf16 %v3806_v6, %v3805_v57  ;;  %v3670_v40 = vadd.f32 %v9586_v55, %v3669_v54  ;;  %vm3691_vm14 = vcmp.eq.f32.partialorder %v3690_v7, 8.507059e+37 }
 0x4ce   : > { %2273 = vrot.lane.b32.xlu2 %v2238_v20, %s10065_s17 }
 0x4cf   : > { %3924 = vmatmul.bf16.gmra.mxu2 %v3836_v41  ;;  %v3550_v13 = vpop.xlane.xlu2 %3549  ;;  %v3674_v26 = vsel %vm3673_vm9, %v9586_v55, %v3670_v40 }
 0x4d0   : > { %v9588_v3 = vpop.eup %9587  ;;  %9589 = vrcp.f32 %v3550_v13  ;;  %v3679_v31 = vsel %vm3676_vm7, %v3678_v1, %v3674_v26  ;;  %v3722_v61 = vand.u32 2147483648, %v3550_v13  ;;  %v3720_v54 = vand.u32 2147483647, %v3550_v13 }
 0x4d1   : > { %v3682_v19 = vmul.f32 %v9588_v3, %v3546_v4  ;;  %v12383_v11 = vpop.f32.mrf.mxu2  ;;  %v12385_v35 = vpop.xlane.xlu1 %5173  ;;  %v3808_v9 = vmul.f32 %v11873_v27, %v3679_v31  ;;  %vm3687_vm10 = vweird.f32 %v9588_v3  ;;  %v3693_v27 = vor.u32 1.1754944e-38, %v3692_v30 }
 0x4d2   : > { %3127 = vrot.lane.b32.xlu0 %v3095_v42, %s10064_s13  ;;  %vm3688_vm13 = vmor %vm3686_vm11, %vm3687_vm10  ;;  %vm3716_vm12 = vweird.f32 %v3550_v13  ;;  %v3723_v12 = vor.u32 1.1754944e-38, %v3722_v61  ;;  %vm3721_vm2 = vcmp.eq.f32.partialorder %v3720_v54, 8.507059e+37  ;;  %v9185_v42 = vld [vmem:[#allocation2 + $0xa0] sm:$0xf0] }
 0x4d3   : > { %v3683_v32 = vsub.f32 1.0, %v3682_v19  ;;  %8417 = vst [vmem:[%s10960_s7 + $0x1b8] sm:$0xff] %v3808_v9  ;;  %v3837_v17 = vpack.c.bf16 %v3808_v9, %v12325_v60  ;;  %v9186_v9 = vld [vmem:[#allocation2 + $0xb8] sm:$0xf0] }
 0x4d4   : > { %v12388_v8 = vpop.f32.mrf.mxu0 }
 0x4d5   : > { %v3684_v51 = vmul.f32 %v9588_v3, %v3683_v32  ;;  %v8696_v32 = vld [vmem:[#allocation2 + $0xb0] sm:$0xf] }
 0x4d6   : > { %3135 = vrot.lane.b32.xlu2 %v3099_v63, %s10064_s13  ;;  %v9590_v55 = vpop.eup %9589 }
 0x4d7   : > { %v3685_v49 = vadd.f32 %v9588_v3, %v3684_v51  ;;  %v3712_v39 = vmul.f32 %v9590_v55, %v3550_v13  ;;  %v6727_v24 = vpop.permute.xlu2 %6726  ;;  %vm3717_vm15 = vweird.f32 %v9590_v55 }
 0x4d8   : > { %8885 = vmatmul.msk.bf16.gmra.mxu1 %vm852_vm0, %v6727_v24  ;;  %vm3718_vm1 = vmor %vm3716_vm12, %vm3717_vm15  ;;  %vm2315_vm12 = vcmask 257152  }
 0x4d9   : > { %v12397_v47 = vpop.f32.mrf.mxu2  ;;  %v12400_v15 = vpop.xlane.xlu1 %5175  ;;  %v3689_v18 = vsel %vm3688_vm13, %v9588_v3, %v3685_v49  ;;  %v3713_v22 = vsub.f32 1.0, %v3712_v39  ;;  %v8692_v3 = vld [vmem:[#allocation2 + $0x98] sm:$0xf] }
 0x4da   : > { %2275 = vrot.lane.b32.xlu0 %v2239_v5, %s10065_s17  ;;  %v3694_v4 = vsel %vm3691_vm14, %v3693_v27, %v3689_v18  ;;  %v8693_v46 = vor.u32 %v9185_v42, %v8692_v3 }
 0x4db   : > { %v3548_v20 = vpop.xlane.xlu0 %3547  ;;  %v12408_v25 = vmul.f32 %v11692_v56, %v3694_v4  ;;  %v3714_v57 = vmul.f32 %v9590_v55, %v3713_v22  ;;  %v3102_v22 = vpack.c.bf16 %v12388_v8, %v12388_v8 }
 0x4dc   : > { %v12405_v28 = vpop.f32.mrf.mxu0  ;;  %9591 = vrcp.f32 %v3548_v20  ;;  %v3707_v63 = vand.u32 2147483648, %v3548_v20  ;;  %v3705_v51 = vand.u32 2147483647, %v3548_v20  ;;  %vm3701_vm4 = vweird.f32 %v3548_v20 }
 0x4dd   : > { %8418 = vst [vmem:[%s10960_s7 + $0x1c0] sm:$0xff] %v12408_v25  ;;  %v3715_v6 = vadd.f32 %v9590_v55, %v3714_v57 }
 0x4de   : > { %2279 = vrot.lane.b32.xlu2 %v2241_v38, %s10065_s17  ;;  %v3708_v24 = vor.u32 1.1754944e-38, %v3707_v63  ;;  %vm3706_vm6 = vcmp.eq.f32.partialorder %v3705_v51, 8.507059e+37  ;;  %v3101_v63 = vpack.c.bf16 %v12371_v48, %v12371_v48 }
 0x4df   : > { %3929 = vmatmul.bf16.gmra.mxu2 %v3837_v17  ;;  %v3719_v56 = vsel %vm3718_vm1, %v9590_v55, %v3715_v6  ;;  %v8697_v55 = vor.u32 %v9186_v9, %v8696_v32  ;;  %v12434_v6 = vpop.f32.mrf.mxu3 }
 0x4e0   : > { %v3724_v13 = vsel %vm3721_vm2, %v3723_v12, %v3719_v56  ;;  %v2242_v56 = vpack.c.bf16 %v12352_v29, %v12352_v29  ;;  %v2244_v29 = vpack.c.bf16 %v12383_v11, %v12383_v11 }
 0x4e1   : > { %v12416_v41 = vpop.f32.mrf.mxu2  ;;  %v3552_v40 = vpop.xlane.xlu1 %3551  ;;  %v12420_v1 = vmul.f32 %v11975_v16, %v3724_v13 }
 0x4e2   : > { %v9592_v26 = vpop.eup %9591  ;;  %9593 = vrcp.f32 %v3552_v40  ;;  %3133 = vrot.lane.b32.xlu0 %v3098_v45, %s10064_s13  ;;  %v3737_v4 = vand.u32 2147483648, %v3552_v40  ;;  %v3735_v57 = vand.u32 2147483647, %v3552_v40  ;;  %vm3731_vm9 = vweird.f32 %v3552_v40 }
 0x4e3   : > { %v3697_v60 = vmul.f32 %v9592_v26, %v3548_v20  ;;  %8420 = vst [vmem:[%s10960_s7 + $0x1d0] sm:$0xff] %v12420_v1  ;;  %vm3702_vm3 = vweird.f32 %v9592_v26 }
 0x4e4   : > { %v12422_v19 = vpop.f32.mrf.mxu0  ;;  %vm3703_vm5 = vmor %vm3701_vm4, %vm3702_vm3  ;;  %vm3736_vm10 = vcmp.eq.f32.partialorder %v3735_v57, 8.507059e+37  ;;  %vm3175_vm3 = vcmask 388352  }
 0x4e5   : > { %v3698_v31 = vsub.f32 1.0, %v3697_v60 }
 0x4e6   : > { %5614 = vrot.lane.b32.xlu2 %v8693_v46, %s10063_s12 }
 0x4e7   : > { %v3699_v30 = vmul.f32 %v9592_v26, %v3698_v31 }
 0x4e8   : > { %v9594_v7 = vpop.eup %9593 }
 0x4e9   : > { %v3727_v49 = vmul.f32 %v9594_v7, %v3552_v40  ;;  %v12427_v16 = vpop.f32.mrf.mxu2  ;;  %v3558_v5 = vpop.xlane.xlu1 %3557  ;;  %v3700_v39 = vadd.f32 %v9592_v26, %v3699_v30  ;;  %vm3732_vm8 = vweird.f32 %v9594_v7 }
 0x4ea   : > { %9595 = vrcp.f32 %v3558_v5  ;;  %5616 = vrot.lane.b32.xlu0 %v8697_v55, %s10063_s12  ;;  %vm3733_vm7 = vmor %vm3731_vm9, %vm3732_vm8  ;;  %v3782_v60 = vand.u32 2147483648, %v3558_v5  ;;  %v3780_v31 = vand.u32 2147483647, %v3558_v5  ;;  %vm3776_vm13 = vweird.f32 %v3558_v5 }
 0x4eb   : > { %v3728_v27 = vsub.f32 1.0, %v3727_v49  ;;  %v3704_v18 = vsel %vm3703_vm5, %v9592_v26, %v3700_v39  ;;  %v8576_v49 = vld [vmem:[#allocation2 + $0xb0] sm:$0xf]  ;;  %v9162_v39 = vld [vmem:[#allocation2 + $0xb8] sm:$0xf0] }
 0x4ec   : > { %v3709_v38 = vsel %vm3706_vm6, %v3708_v24, %v3704_v18  ;;  %vm3781_vm15 = vcmp.eq.f32.partialorder %v3780_v31, 8.507059e+37  ;;  %v8577_v24 = vor.u32 %v9162_v39, %v8576_v49 }
 0x4ed   : > { %v3729_v61 = vmul.f32 %v9594_v7, %v3728_v27  ;;  %v3810_v20 = vmul.f32 %v12032_v58, %v3709_v38  ;;  %v3080_v54 = vpop.f32.mrf.mxu0  ;;  %v3738_v58 = vor.u32 1.1754944e-38, %v3737_v4  ;;  %v2245_v4 = vpack.c.bf16 %v12397_v47, %v12397_v47 }
 0x4ee   : > { %3141 = vrot.lane.b32.xlu2 %v3102_v22, %s10064_s13  ;;  %v5869_v17 = vpop.permute.xlu0 %5868  ;;  %v2243_v22 = vpack.c.bf16 %v12366_v52, %v12366_v52  ;;  %v3104_v52 = vpack.c.bf16 %v12422_v19, %v12422_v19 }
 0x4ef   : > { %8766 = vmatmul.msk.bf16.gmra.mxu3 %vm852_vm0, %v5869_v17  ;;  %8419 = vst [vmem:[%s10960_s7 + $0x1c8] sm:$0xff] %v3810_v20  ;;  %v3838_v12 = vpack.c.bf16 %v3810_v20, %v12408_v25  ;;  %v3730_v8 = vadd.f32 %v9594_v7, %v3729_v61  ;;  %v2246_v17 = vpack.c.bf16 %v12416_v41, %v12416_v41 }
 0x4f0   : > { %v9596_v45 = vpop.eup %9595 }
 0x4f1   : > { %4319 = vmax.xlane.f32.xlu1 %v12434_v6  ;;  %v3772_v3 = vmul.f32 %v9596_v45, %v3558_v5  ;;  %3934 = vmatmul.bf16.gmra.mxu2 %v3838_v12  ;;  %v3734_v42 = vsel %vm3733_vm7, %v9594_v7, %v3730_v8  ;;  %v12442_v40 = vpop.f32.mrf.mxu2  ;;  %vm3777_vm11 = vweird.f32 %v9596_v45  ;;  %v3105_v7 = vpack.c.bf16 %v3080_v54, %v3080_v54 }
 0x4f2   : > { %2281 = vrot.lane.b32.xlu0 %v2242_v56, %s10065_s17  ;;  %v3739_v13 = vsel %vm3736_vm10, %v3738_v58, %v3734_v42  ;;  %vm3778_vm14 = vmor %vm3776_vm13, %vm3777_vm11  ;;  %v2248_v19 = vpack.c.bf16 %v12442_v40, %v12442_v40 }
 0x4f3   : > { %v3773_v25 = vsub.f32 1.0, %v3772_v3  ;;  %v3812_v26 = vmul.f32 %v12038_v36, %v3739_v13  ;;  %v3783_v36 = vor.u32 1.1754944e-38, %v3782_v60 }
 0x4f5   : > { %v3774_v46 = vmul.f32 %v9596_v45, %v3773_v25  ;;  %8421 = vst [vmem:[%s10960_s7 + $0x1d8] sm:$0xff] %v3812_v26  ;;  %v12449_v32 = vpop.f32.mrf.mxu0  ;;  %v3839_v5 = vpack.c.bf16 %v3812_v26, %v12420_v1 }
 0x4f6   : > { %2285 = vrot.lane.b32.xlu2 %v2244_v29, %s10065_s17  ;;  %v3106_v26 = vpack.c.bf16 %v12449_v32, %v12449_v32 }
 0x4f7   : > { %v3775_v9 = vadd.f32 %v9596_v45, %v3774_v46 }
 0x4f9   : > { %v3779_v30 = vsel %vm3778_vm14, %v9596_v45, %v3775_v9 }
 0x4fa   : > { %3139 = vrot.lane.b32.xlu0 %v3101_v63, %s10064_s13  ;;  %v3784_v11 = vsel %vm3781_vm15, %v3783_v36, %v3779_v30  ;;  %vm4035_vm15 = vcmask 519552  }
 0x4fb   : > { %v12456_v51 = vmul.f32 %v12073_v44, %v3784_v11  ;;  %v12458_v55 = vpop.f32.mrf.mxu2  ;;  %v2247_v44 = vpack.c.bf16 %v12427_v16, %v12427_v16  ;;  %v3103_v16 = vpack.c.bf16 %v12405_v28, %v12405_v28 }
 0x4fd   : > { %8424 = vst [vmem:[%s10960_s7 + $0x1f0] sm:$0xff] %v12456_v51 }
 0x4fe   : > { %3147 = vrot.lane.b32.xlu2 %v3105_v7, %s10064_s13 }
 0x4ff   : > { %v12463_v48 = vpop.f32.mrf.mxu0 }
 0x500   : > { %v3107_v60 = vpack.c.bf16 %v12463_v48, %v12463_v48 }
 0x501   : > { %v6729_v27 = vpop.permute.xlu1 %6728  ;;  %3939 = vmatmul.bf16.gmra.mxu2 %v3839_v5 }
 0x502   : > { %4756 = vrot.lane.b32.xlu0 %v8577_v24, %s10059_s24  ;;  %8886 = vmatmul.msk.bf16.gmra.mxu1 %vm852_vm0, %v6729_v27  ;;  %v2249_v27 = vpack.c.bf16 %v12458_v55, %v12458_v55 }
 0x503   : > { %v2232_v18 = vpop.f32.mrf.mxu2 }
 0x504   : > { %v2250_v54 = vpack.c.bf16 %v2232_v18, %v2232_v18 }
 0x506   : > { %2291 = vrot.lane.b32.xlu2 %v2247_v44, %s10065_s17 }
 0x507   : > { %v3087_v1 = vpop.f32.mrf.mxu0 }
 0x508   : > { %v3108_v61 = vpack.c.bf16 %v3087_v1, %v3087_v1 }
 0x509   : > { %v5871_v38 = vpop.permute.xlu1 %5870 }
 0x50a   : > { %2283 = vrot.lane.b32.xlu1 %v2243_v22, %s10065_s17  ;;  %2287 = vrot.lane.b32.xlu0 %v2245_v4, %s10065_s17 }
 0x50b   : > { %8767 = vmatmul.msk.bf16.gmra.mxu3 %vm852_vm0, %v5871_v38  ;;  %v12478_v20 = vpop.f32.mrf.mxu2 }
 0x50e   : > { %3153 = vrot.lane.b32.xlu2 %v3108_v61, %s10064_s13 }
 0x50f   : > { %v12498_v3 = vpop.f32.mrf.mxu0 }
 0x511   : > { %v3556_v47 = vpop.xlane.xlu2 %3555  ;;  %v6731_v57 = vpop.permute.xlu1 %6730 }
 0x512   : > { %3143 = vrot.lane.b32.xlu1 %v3103_v16, %s10064_s13  ;;  %9597 = vrcp.f32 %v3556_v47  ;;  %3145 = vrot.lane.b32.xlu0 %v3104_v52, %s10064_s13  ;;  %v3767_v13 = vand.u32 2147483648, %v3556_v47  ;;  %v3765_v40 = vand.u32 2147483647, %v3556_v47  ;;  %vm3761_vm2 = vweird.f32 %v3556_v47 }
 0x513   : > { %8887 = vmatmul.msk.bf16.gmra.mxu1 %vm852_vm0, %v6731_v57  ;;  %v3917_v12 = vpop.f32.mrf.mxu2 }
 0x514   : > { %v3956_v42 = vpack.c.bf16 %v3917_v12, %v3917_v12  ;;  %v3768_v46 = vor.u32 1.1754944e-38, %v3767_v13  ;;  %vm3766_vm5 = vcmp.eq.f32.partialorder %v3765_v40, 8.507059e+37  ;;  %v3955_v13 = vpack.c.bf16 %v12478_v20, %v12478_v20 }
 0x516   : > { %2297 = vrot.lane.b32.xlu2 %v2250_v54, %s10065_s17 }
 0x517   : > { %v3092_v39 = vpop.f32.mrf.mxu0 }
 0x518   : > { %v9598_v28 = vpop.eup %9597  ;;  %v3110_v44 = vpack.c.bf16 %v3092_v39, %v3092_v39 }
 0x519   : > { %v3757_v8 = vmul.f32 %v9598_v28, %v3556_v47  ;;  %v12494_v45 = vpop.xlane.xlu2 %5179  ;;  %v2272_v56 = vpop.permute.xlu1 %2271  ;;  %vm3762_vm1 = vweird.f32 %v9598_v28 }
 0x51a   : > { %2289 = vrot.lane.b32.xlu1 %v2246_v17, %s10065_s17  ;;  %2318 = vst.msk [vmem:[#allocation3 + $0x8] sm:$0xf] %vm2315_vm12, %v2272_v56  ;;  %v3554_v58 = vpop.xlane.xlu0 %3553  ;;  %2293 = vrot.lane.b32.xlu0 %v2248_v19, %s10065_s17  ;;  %vm3763_vm4 = vmor %vm3761_vm2, %vm3762_vm1  ;;  %v3109_v19 = vpack.c.bf16 %v12498_v3, %v12498_v3 }
 0x51b   : > { %v3758_v41 = vsub.f32 1.0, %v3757_v8  ;;  %9599 = vrcp.f32 %v3554_v58  ;;  %v3752_v48 = vand.u32 2147483648, %v3554_v58  ;;  %v3750_v24 = vand.u32 2147483647, %v3554_v58  ;;  %v3920_v47 = vpop.f32.mrf.mxu2 }
 0x51c   : > { %vm3746_vm8 = vweird.f32 %v3554_v58  ;;  %v3957_v12 = vpack.c.bf16 %v3920_v47, %v3920_v47 }
 0x51d   : > { %v3759_v25 = vmul.f32 %v9598_v28, %v3758_v41  ;;  %vm3751_vm7 = vcmp.eq.f32.partialorder %v3750_v24, 8.507059e+37 }
 0x51e   : > { %3989 = vrot.lane.b32.xlu2 %v3956_v42, %s10063_s12 }
 0x51f   : > { %v3760_v29 = vadd.f32 %v9598_v28, %v3759_v25 }
 0x521   : > { %v9600_v31 = vpop.eup %9599  ;;  %v2268_v9 = vpop.permute.xlu2 %2267  ;;  %v3764_v36 = vsel %vm3763_vm4, %v9598_v28, %v3760_v29  ;;  %v8688_v29 = vld [vmem:[#allocation2 + $0x80] sm:$0xf] }
 0x522   : > { %3149 = vrot.lane.b32.xlu1 %v3106_v26, %s10064_s13  ;;  %v3132_v63 = vpop.permute.xlu1 %3131  ;;  %v3742_v30 = vmul.f32 %v9600_v31, %v3554_v58  ;;  %2316 = vst.msk [vmem:[#allocation3] sm:$0xf] %vm2315_vm12, %v2268_v9  ;;  %v3560_v32 = vpop.xlane.xlu0 %3559  ;;  %3151 = vrot.lane.b32.xlu0 %v3107_v60, %s10064_s13  ;;  %v3769_v11 = vsel %vm3766_vm5, %v3768_v46, %v3764_v36  ;;  %vm3747_vm6 = vweird.f32 %v9600_v31  ;;  %v9184_v60 = vld [vmem:[#allocation2 + $0x88] sm:$0xf0] }
 0x523   : > { %3178 = vst.msk [vmem:[#allocation3 + $0x8] sm:$0xf] %vm3175_vm3, %v3132_v63  ;;  %9601 = vrcp.f32 %v3560_v32  ;;  %v3814_v7 = vmul.f32 %v12307_v62, %v3769_v11  ;;  %vm3748_vm9 = vmor %vm3746_vm8, %vm3747_vm6  ;;  %v3753_v62 = vor.u32 1.1754944e-38, %v3752_v48  ;;  %v3797_v57 = vand.u32 2147483648, %v3560_v32  ;;  %v12537_v63 = vpop.f32.mrf.mxu1  ;;  %v9193_v11 = vld [vmem:[#allocation2 + $0x98] sm:$0xf0] }
 0x524   : > { %v3743_v49 = vsub.f32 1.0, %v3742_v30  ;;  %v3795_v28 = vand.u32 2147483647, %v3560_v32  ;;  %vm3791_vm11 = vweird.f32 %v3560_v32 }
 0x525   : > { %8423 = vst [vmem:[%s10960_s7 + $0x1e8] sm:$0xff] %v3814_v7 }
 0x526   : > { %v3744_v5 = vmul.f32 %v9600_v31, %v3743_v49  ;;  %vm3796_vm14 = vcmp.eq.f32.partialorder %v3795_v28, 8.507059e+37 }
 0x528   : > { %v3745_v18 = vadd.f32 %v9600_v31, %v3744_v5 }
 0x529   : > { %v9602_v22 = vpop.eup %9601  ;;  %v3130_v4 = vpop.permute.xlu2 %3129 }
 0x52a   : > { %2295 = vrot.lane.b32.xlu1 %v2249_v27, %s10065_s17  ;;  %v2278_v1 = vpop.permute.xlu1 %2277  ;;  %v3787_v38 = vmul.f32 %v9602_v22, %v3560_v32  ;;  %3157 = vrot.lane.b32.xlu0 %v3110_v44, %s10064_s13  ;;  %v3749_v61 = vsel %vm3748_vm9, %v9600_v31, %v3745_v18  ;;  %vm3792_vm10 = vweird.f32 %v9602_v22  ;;  %v12523_v42 = vpop.xlane.xlu0 %5177  ;;  %v8724_v32 = vld [vmem:[#allocation2 + $0x90] sm:$0xf] }
 0x52b   : > { %2321 = vst.msk [vmem:[#allocation3 + $0x14] sm:$0xf] %vm2315_vm12, %v2278_v1  ;;  %v3754_v16 = vsel %vm3751_vm7, %v3753_v62, %v3749_v61  ;;  %vm3793_vm13 = vmor %vm3791_vm11, %vm3792_vm10  ;;  %v3922_v31 = vpop.f32.mrf.mxu2  ;;  %v12546_v24 = vpop.f32.mrf.mxu1 }
 0x52c   : > { %v3788_v55 = vsub.f32 1.0, %v3787_v38  ;;  %v3813_v52 = vmul.f32 %v12317_v34, %v3754_v16  ;;  %v3798_v34 = vor.u32 1.1754944e-38, %v3797_v57  ;;  %v3958_v36 = vpack.c.bf16 %v3922_v31, %v3922_v31  ;;  %v8572_v57 = vld [vmem:[#allocation2 + $0x98] sm:$0xf] }
 0x52e   : > { %v3789_v54 = vmul.f32 %v9602_v22, %v3788_v55  ;;  %8422 = vst [vmem:[%s10960_s7 + $0x1e0] sm:$0xff] %v3813_v52  ;;  %v3840_v17 = vpack.c.bf16 %v3814_v7, %v3813_v52  ;;  %v8725_v7 = vor.u32 %v9193_v11, %v8724_v32 }
 0x530   : > { %3944 = vmatmul.bf16.gmra.mxu2 %v3840_v17  ;;  %v3790_v8 = vadd.f32 %v9602_v22, %v3789_v54  ;;  %v9161_v54 = vld [vmem:[#allocation2 + $0xa0] sm:$0xf0] }
 0x531   : > { %v2274_v56 = vpop.permute.xlu2 %2273 }
 0x532   : > { %3155 = vrot.lane.b32.xlu1 %v3109_v19, %s10064_s13  ;;  %2319 = vst.msk [vmem:[#allocation3 + $0xc] sm:$0xf] %vm2315_vm12, %v2274_v56  ;;  %3991 = vrot.lane.b32.xlu0 %v3957_v12, %s10063_s12  ;;  %v3794_v58 = vsel %vm3793_vm13, %v9602_v22, %v3790_v8  ;;  %v8573_v12 = vor.u32 %v9161_v54, %v8572_v57  ;;  %v8684_v54 = vld [vmem:[#allocation2 + $0x68] sm:$0xf] }
 0x533   : > { %v3799_v41 = vsel %vm3796_vm14, %v3798_v34, %v3794_v58 }
 0x534   : > { %v3816_v3 = vmul.f32 %v12333_v43, %v3799_v41  ;;  %v8689_v43 = vor.u32 %v9184_v60, %v8688_v29  ;;  %v5201_v29 = vsub.f32 %v11555_v33, %v12354_v2  ;;  %v5202_v33 = vsub.f32 %v11616_v14, %v12327_v59 }
 0x536   : > { %8425 = vst [vmem:[%s10960_s7 + $0x1f8] sm:$0xff] %v3816_v3  ;;  %v3841_v46 = vpack.c.bf16 %v3816_v3, %v12456_v51 }
 0x539   : > { %v3138_v25 = vpop.permute.xlu1 %3137  ;;  %v3136_v40 = vpop.permute.xlu2 %3135 }
 0x53a   : > { %3181 = vst.msk [vmem:[#allocation3 + $0x14] sm:$0xf] %vm3175_vm3, %v3138_v25  ;;  %3987 = vrot.lane.b32.xlu1 %v3955_v13, %s10063_s12 }
 0x53c   : > { %v2270_v26 = vpop.permute.xlu0 %2269 }
 0x53d   : > { %2317 = vst.msk [vmem:[#allocation3 + $0x4] sm:$0xf] %vm2315_vm12, %v2270_v26 }
 0x53e   : > { %3177 = vst.msk [vmem:[#allocation3 + $0x4] sm:$0xf] %vm3175_vm3, %v3130_v4 }
 0x540   : > { %3949 = vmatmul.bf16.gmra.mxu2 %v3841_v46 }
 0x541   : > { %v2280_v20 = vpop.permute.xlu2 %2279 }
 0x542   : > { %5612 = vrot.lane.b32.xlu1 %v8689_v43, %s10063_s12  ;;  %2322 = vst.msk [vmem:[#allocation3 + $0x18] sm:$0xf] %vm2315_vm12, %v2280_v20  ;;  %v5217_v43 = vmul.f32 1.442695, %v5201_v29  ;;  %v14102_v29 = vld [vmem:[#allocation27_spill] sm:$0xff] }
 0x544   : > { %v3128_v9 = vpop.permute.xlu0 %3127  ;;  %9603 = vpow2.f32 %v5217_v43 }
 0x545   : > { %3176 = vst.msk [vmem:[#allocation3] sm:$0xf] %vm3175_vm3, %v3128_v9 }
 0x547   : > { %5181 = vmax.xlane.f32.xlu2 %v12537_v63 }
 0x549   : > { %v5615_v30 = vpop.permute.xlu2 %5614 }
 0x54a   : > { %3993 = vrot.lane.b32.xlu1 %v3958_v36, %s10063_s12  ;;  %v12576_v9 = vpop.eup %9603 }
 0x54c   : > { %v2276_v51 = vpop.permute.xlu0 %2275 }
 0x54d   : > { %2320 = vst.msk [vmem:[#allocation3 + $0x10] sm:$0xf] %vm2315_vm12, %v2276_v51 }
 0x54e   : > { %3180 = vst.msk [vmem:[#allocation3 + $0x10] sm:$0xf] %vm3175_vm3, %v3136_v40 }
 0x551   : > { %v3142_v49 = vpop.permute.xlu2 %3141 }
 0x552   : > { %5872 = vrot.lane.b32.xlu1 %v8725_v7, %s10064_s13  ;;  %v3925_v39 = vpop.f32.mrf.mxu2 }
 0x553   : > { %v3959_v18 = vpack.c.bf16 %v3925_v39, %v3925_v39  ;;  %v9217_v39 = vld [vmem:[#allocation2 + $0x98] sm:$0xf0] }
 0x554   : > { %v3134_v48 = vpop.permute.xlu0 %3133 }
 0x555   : > { %3179 = vst.msk [vmem:[#allocation3 + $0xc] sm:$0xf] %vm3175_vm3, %v3134_v48 }
 0x559   : > { %v2286_v5 = vpop.permute.xlu2 %2285 }
 0x55a   : > { %2325 = vst.msk [vmem:[#allocation3 + $0x24] sm:$0xf] %vm2315_vm12, %v2286_v5  ;;  %v3927_v27 = vpop.f32.mrf.mxu2 }
 0x55b   : > { %v3960_v52 = vpack.c.bf16 %v3927_v27, %v3927_v27 }
 0x55c   : > { %5183 = vmax.xlane.f32.xlu0 %v12546_v24  ;;  %v5617_v44 = vpop.permute.xlu0 %5616 }
 0x55d   : > { %5626 = vmatpush.bf16.msrb.mxu2 %v5617_v44 }
 0x55f   : > { %3995 = vrot.lane.b32.xlu2 %v3959_v18, %s10063_s12 }
 0x561   : > { %v3148_v22 = vpop.permute.xlu2 %3147  ;;  %5627 = vmatpush.bf16.msrb.mxu2 %v5615_v30  ;;  %v5219_v30 = vmul.f32 1.442695, %v5202_v33  ;;  %v8568_v33 = vld [vmem:[#allocation2 + $0x80] sm:$0xf] }
 0x562   : > { %v3930_v4 = vpop.f32.mrf.mxu2 }
 0x563   : > { %v3961_v1 = vpack.c.bf16 %v3930_v4, %v3930_v4  ;;  %9605 = vpow2.f32 %v5219_v30 }
 0x564   : > { %v2282_v62 = vpop.permute.xlu0 %2281  ;;  %v12557_v17 = vpop.xlane.xlu1 %4319 }
 0x565   : > { %2323 = vst.msk [vmem:[#allocation3 + $0x1c] sm:$0xf] %vm2315_vm12, %v2282_v62  ;;  %3999 = vrot.lane.b32.xlu1 %v3961_v1, %s10063_s12 }
 0x566   : > { %3183 = vst.msk [vmem:[#allocation3 + $0x1c] sm:$0xf] %vm3175_vm3, %v3142_v49  ;;  %v8844_v49 = vld [vmem:[#allocation2 + $0x90] sm:$0xf] }
 0x567   : > { %v8845_v27 = vor.u32 %v9217_v39, %v8844_v49  ;;  %v8676_v39 = vld [vmem:[#allocation2 + $0x38] sm:$0xf] }
 0x569   : > { %v2292_v38 = vpop.permute.xlu2 %2291  ;;  %v12585_v11 = vpop.eup %9605 }
 0x56a   : > { %2328 = vst.msk [vmem:[#allocation3 + $0x30] sm:$0xf] %vm2315_vm12, %v2292_v38  ;;  %v3932_v61 = vpop.f32.mrf.mxu2 }
 0x56b   : > { %v3962_v16 = vpack.c.bf16 %v3932_v61, %v3932_v61 }
 0x56c   : > { %v3140_v55 = vpop.permute.xlu0 %3139 }
 0x56d   : > { %3182 = vst.msk [vmem:[#allocation3 + $0x18] sm:$0xf] %vm3175_vm3, %v3140_v55  ;;  %4001 = vrot.lane.b32.xlu2 %v3962_v16, %s10063_s12 }
 0x570   : > { %3997 = vrot.lane.b32.xlu0 %v3960_v52, %s10063_s12 }
 0x571   : > { %v3154_v47 = vpop.permute.xlu2 %3153 }
 0x574   : > { %v3935_v28 = vpop.f32.mrf.mxu2  ;;  %v4757_v19 = vpop.permute.xlu0 %4756 }
 0x575   : > { %4766 = vmatpush.bf16.msrb.mxu0 %v4757_v19  ;;  %4754 = vrot.lane.b32.xlu2 %v8573_v12, %s10059_s24  ;;  %v3963_v7 = vpack.c.bf16 %v3935_v28, %v3935_v28  ;;  %v9183_v28 = vld [vmem:[#allocation2 + $0x70] sm:$0xf0] }
 0x576   : > { %v8685_v12 = vor.u32 %v9183_v28, %v8684_v54 }
 0x579   : > { %v2298_v8 = vpop.permute.xlu2 %2297 }
 0x57a   : > { %2331 = vst.msk [vmem:[#allocation3 + $0x3c] sm:$0xf] %vm2315_vm12, %v2298_v8 }
 0x57c   : > { %v2284_v56 = vpop.permute.xlu1 %2283  ;;  %v3937_v34 = vpop.f32.mrf.mxu2 }
 0x57d   : > { %2324 = vst.msk [vmem:[#allocation3 + $0x20] sm:$0xf] %vm2315_vm12, %v2284_v56  ;;  %v2288_v58 = vpop.permute.xlu0 %2287  ;;  %v3964_v41 = vpack.c.bf16 %v3937_v34, %v3937_v34 }
 0x57e   : > { %2326 = vst.msk [vmem:[#allocation3 + $0x28] sm:$0xf] %vm2315_vm12, %v2288_v58 }
 0x57f   : > { %3186 = vst.msk [vmem:[#allocation3 + $0x28] sm:$0xf] %vm3175_vm3, %v3148_v22  ;;  %4005 = vrot.lane.b32.xlu1 %v3964_v41, %s10063_s12  ;;  %v12608_v41 = vpop.f32.mrf.mxu3 }
 0x581   : > { %v3990_v3 = vpop.permute.xlu2 %3989 }
 0x582   : > { %4037 = vst.msk [vmem:[#allocation3 + $0x4] sm:$0xf] %vm4035_vm15, %v3990_v3  ;;  %v14100_v3 = vld [vmem:[#allocation40_spill] sm:$0xff] }
 0x584   : > { %v3144_v13 = vpop.permute.xlu1 %3143  ;;  %v3940_v40 = vpop.f32.mrf.mxu2 }
 0x585   : > { %3184 = vst.msk [vmem:[#allocation3 + $0x20] sm:$0xf] %vm3175_vm3, %v3144_v13  ;;  %v3146_v25 = vpop.permute.xlu0 %3145  ;;  %v3965_v26 = vpack.c.bf16 %v3940_v40, %v3940_v40  ;;  %v14101_v13 = vld [vmem:[#allocation22_spill] sm:$0xff] }
 0x586   : > { %3185 = vst.msk [vmem:[#allocation3 + $0x24] sm:$0xf] %vm3175_vm3, %v3146_v25  ;;  %v4342_v25 = vsub.f32 %v14101_v13, %v14100_v3 }
 0x587   : > { %4007 = vrot.lane.b32.xlu2 %v3965_v26, %s10063_s12  ;;  %v12613_v26 = vpop.f32.mrf.mxu3 }
 0x588   : > { %v4359_v40 = vmul.f32 1.442695, %v4342_v25 }
 0x58a   : > { %9607 = vpow2.f32 %v4359_v40 }
 0x58c   : > { %v2290_v60 = vpop.permute.xlu1 %2289  ;;  %v3942_v14 = vpop.f32.mrf.mxu2 }
 0x58d   : > { %2327 = vst.msk [vmem:[#allocation3 + $0x2c] sm:$0xf] %vm2315_vm12, %v2290_v60  ;;  %v2294_v46 = vpop.permute.xlu0 %2293  ;;  %v3966_v4 = vpack.c.bf16 %v3942_v14, %v3942_v14  ;;  %v14103_v60 = vld [vmem:[#allocation38_spill] sm:$0xff] }
 0x58e   : > { %2329 = vst.msk [vmem:[#allocation3 + $0x34] sm:$0xf] %vm2315_vm12, %v2294_v46  ;;  %v4341_v46 = vsub.f32 %v14103_v60, %v14102_v29 }
 0x58f   : > { %3189 = vst.msk [vmem:[#allocation3 + $0x34] sm:$0xf] %vm3175_vm3, %v3154_v47 }
 0x594   : > { %v3150_v20 = vpop.permute.xlu1 %3149 }
 0x595   : > { %3187 = vst.msk [vmem:[#allocation3 + $0x2c] sm:$0xf] %vm3175_vm3, %v3150_v20  ;;  %v3152_v31 = vpop.permute.xlu0 %3151  ;;  %v4357_v20 = vmul.f32 1.442695, %v4341_v46  ;;  %v8556_v46 = vld [vmem:[#allocation2 + $0x38] sm:$0xf] }
 0x596   : > { %3188 = vst.msk [vmem:[#allocation3 + $0x30] sm:$0xf] %vm3175_vm3, %v3152_v31  ;;  %v12619_v31 = vpop.eup %9607 }
 0x597   : > { %9609 = vpow2.f32 %v4357_v20 }
 0x59a   : > { %5249 = vadd.xlane.f32.xlu0 %v12576_v9 }
 0x59c   : > { %v2296_v2 = vpop.permute.xlu1 %2295 }
 0x59d   : > { %2330 = vst.msk [vmem:[#allocation3 + $0x38] sm:$0xf] %vm2315_vm12, %v2296_v2  ;;  %v3158_v36 = vpop.permute.xlu0 %3157  ;;  %v9160_v2 = vld [vmem:[#allocation2 + $0x88] sm:$0xf0]  ;;  %v12622_v30 = vpop.eup %9609 }
 0x59e   : > { %3191 = vst.msk [vmem:[#allocation3 + $0x3c] sm:$0xf] %vm3175_vm3, %v3158_v36  ;;  %v8569_v36 = vor.u32 %v9160_v2, %v8568_v33 }
 0x5a4   : > { %v3156_v51 = vpop.permute.xlu1 %3155 }
 0x5a5   : > { %3190 = vst.msk [vmem:[#allocation3 + $0x38] sm:$0xf] %vm3175_vm3, %v3156_v51  ;;  %v3992_v32 = vpop.permute.xlu0 %3991  ;;  %v8564_v51 = vld [vmem:[#allocation2 + $0x68] sm:$0xf] }
 0x5a6   : > { %4038 = vst.msk [vmem:[#allocation3 + $0x8] sm:$0xf] %vm4035_vm15, %v3992_v32  ;;  %v9159_v32 = vld [vmem:[#allocation2 + $0x70] sm:$0xf0] }
 0x5a7   : > { %v8565_v14 = vor.u32 %v9159_v32, %v8564_v51 }
 0x5a9   : > { %5251 = vadd.xlane.f32.xlu1 %v12585_v11 }
 0x5ac   : > { %v3988_v59 = vpop.permute.xlu1 %3987 }
 0x5ad   : > { %4036 = vst.msk [vmem:[#allocation3] sm:$0xf] %vm4035_vm15, %v3988_v59  ;;  %v8680_v59 = vld [vmem:[#allocation2 + $0x50] sm:$0xf] }
 0x5ae   : > { %4003 = vrot.lane.b32.xlu0 %v3963_v7, %s10063_s12  ;;  %v9182_v7 = vld [vmem:[#allocation2 + $0x58] sm:$0xf0] }
 0x5af   : > { %v8681_v49 = vor.u32 %v9182_v7, %v8680_v59  ;;  %v8848_v7 = vld [vmem:[#allocation2 + $0xa8] sm:$0xf] }
 0x5b3   : > { %v3945_v5 = vpop.f32.mrf.mxu2 }
 0x5b4   : > { %v5613_v48 = vpop.permute.xlu1 %5612  ;;  %v3967_v62 = vpack.c.bf16 %v3945_v5, %v3945_v5 }
 0x5b5   : > { %5628 = vmatpush.bf16.msrb.mxu2 %v5613_v48  ;;  %v9181_v48 = vld [vmem:[#allocation2 + $0x40] sm:$0xf0] }
 0x5b6   : > { %6732 = vrot.lane.b32.xlu0 %v8845_v27, %s10065_s17  ;;  %v8677_v27 = vor.u32 %v9181_v48, %v8676_v39 }
 0x5ba   : > { %v12591_v44 = vpop.xlane.xlu2 %5181 }
 0x5bb   : > { %v3947_v22 = vpop.f32.mrf.mxu2 }
 0x5bc   : > { %v3994_v18 = vpop.permute.xlu1 %3993  ;;  %v3968_v1 = vpack.c.bf16 %v3947_v22, %v3947_v22  ;;  %v9158_v22 = vld [vmem:[#allocation2 + $0x58] sm:$0xf0] }
 0x5bd   : > { %4039 = vst.msk [vmem:[#allocation3 + $0xc] sm:$0xf] %vm4035_vm15, %v3994_v18  ;;  %v8560_v18 = vld [vmem:[#allocation2 + $0x50] sm:$0xf] }
 0x5be   : > { %4013 = vrot.lane.b32.xlu2 %v3968_v1, %s10063_s12  ;;  %4009 = vrot.lane.b32.xlu0 %v3966_v4, %s10063_s12  ;;  %v8561_v4 = vor.u32 %v9158_v22, %v8560_v18  ;;  %v5203_v22 = vsub.f32 %v11971_v50, %v12385_v35 }
 0x5c2   : > { %v3996_v38 = vpop.permute.xlu2 %3995  ;;  %4011 = vrot.lane.b32.xlu1 %v3967_v62, %s10063_s12  ;;  %v8672_v62 = vld [vmem:[#allocation2 + $0x20] sm:$0xf] }
 0x5c3   : > { %4040 = vst.msk [vmem:[#allocation3 + $0x10] sm:$0xf] %vm4035_vm15, %v3996_v38  ;;  %v3950_v16 = vpop.f32.mrf.mxu2  ;;  %v9180_v38 = vld [vmem:[#allocation2 + $0x28] sm:$0xf0] }
 0x5c4   : > { %v5873_v61 = vpop.permute.xlu1 %5872  ;;  %v3969_v55 = vpack.c.bf16 %v3950_v16, %v3950_v16 }
 0x5c5   : > { %8768 = vmatmul.msk.bf16.gmra.mxu3 %vm852_vm0, %v5873_v61 }
 0x5c6   : > { %4015 = vrot.lane.b32.xlu0 %v3969_v55, %s10063_s12  ;;  %v8673_v55 = vor.u32 %v9180_v38, %v8672_v62  ;;  %v8668_v62 = vld [vmem:[#allocation2 + $0x8] sm:$0xf]  ;;  %v5221_v38 = vmul.f32 1.442695, %v5203_v22 }
 0x5ca   : > { %v4002_v52 = vpop.permute.xlu2 %4001 }
 0x5cb   : > { %4043 = vst.msk [vmem:[#allocation3 + $0x1c] sm:$0xf] %vm4035_vm15, %v4002_v52  ;;  %v3952_v47 = vpop.f32.mrf.mxu2 }
 0x5cc   : > { %v3970_v57 = vpack.c.bf16 %v3952_v47, %v3952_v47 }
 0x5ce   : > { %4017 = vrot.lane.b32.xlu1 %v3970_v57, %s10063_s12 }
 0x5cf   : > { %v12604_v56 = vpop.xlane.xlu0 %5183 }
 0x5d2   : > { %v4755_v19 = vpop.permute.xlu2 %4754 }
 0x5d3   : > { %4767 = vmatpush.bf16.msrb.mxu0 %v4755_v19 }
 0x5d6   : > { %5610 = vrot.lane.b32.xlu1 %v8685_v12, %s10063_s12 }
 0x5d7   : > { %v4000_v8 = vpop.permute.xlu1 %3999 }
 0x5d8   : > { %4042 = vst.msk [vmem:[#allocation3 + $0x18] sm:$0xf] %vm4035_vm15, %v4000_v8  ;;  %v8728_v8 = vld [vmem:[#allocation2 + $0xa8] sm:$0xf] }
 0x5e1   : > { %v4008_v34 = vpop.permute.xlu2 %4007 }
 0x5e2   : > { %4046 = vst.msk [vmem:[#allocation3 + $0x28] sm:$0xf] %vm4035_vm15, %v4008_v34  ;;  %v3998_v58 = vpop.permute.xlu0 %3997  ;;  %v9194_v34 = vld [vmem:[#allocation2 + $0xb0] sm:$0xf0] }
 0x5e3   : > { %4041 = vst.msk [vmem:[#allocation3 + $0x14] sm:$0xf] %vm4035_vm15, %v3998_v58  ;;  %v8729_v13 = vor.u32 %v9194_v34, %v8728_v8  ;;  %v14106_v34 = vld [vmem:[#allocation31_spill] sm:$0xff] }
 0x5e7   : > { %4321 = vmax.xlane.f32.xlu2 %v12608_v41 }
 0x5f0   : > { %4323 = vmax.xlane.f32.xlu0 %v12613_v26 }
 0x5f1   : > { %v4006_v43 = vpop.permute.xlu1 %4005 }
 0x5f2   : > { %4045 = vst.msk [vmem:[#allocation3 + $0x24] sm:$0xf] %vm4035_vm15, %v4006_v43  ;;  %v9157_v43 = vld [vmem:[#allocation2 + $0x40] sm:$0xf0] }
 0x5f3   : > { %v8557_v2 = vor.u32 %v9157_v43, %v8556_v46  ;;  %v5205_v46 = vsub.f32 %v12305_v10, %v12523_v42 }
 0x5f8   : > { %4391 = vadd.xlane.f32.xlu0 %v12619_v31 }
 0x5ff   : > { %4752 = vrot.lane.b32.xlu2 %v8569_v36, %s10059_s24 }
 0x600   : > { %4389 = vadd.xlane.f32.xlu1 %v12622_v30 }
 0x607   : > { %4750 = vrot.lane.b32.xlu2 %v8565_v14, %s10059_s24 }
 0x60c   : > { %5608 = vrot.lane.b32.xlu0 %v8681_v49, %s10063_s12  ;;  %v9218_v49 = vld [vmem:[#allocation2 + $0xb0] sm:$0xf0] }
 0x60d   : > { %v5250_v5 = vpop.xlane.xlu0 %5249 }
 0x60e   : > { %9611 = vrcp.f32 %v5250_v5  ;;  %v5292_v52 = vand.u32 2147483648, %v5250_v5  ;;  %v5290_v54 = vand.u32 2147483647, %v5250_v5  ;;  %vm5286_vm1 = vweird.f32 %v5250_v5 }
 0x60f   : > { %5606 = vrot.lane.b32.xlu2 %v8677_v27, %s10063_s12 }
 0x610   : > { %v5293_v19 = vor.u32 1.1754944e-38, %v5292_v52  ;;  %vm5291_vm3 = vcmp.eq.f32.partialorder %v5290_v54, 8.507059e+37  ;;  %v14105_v54 = vld [vmem:[#allocation17_spill] sm:$0xff] }
 0x614   : > { %v9612_v1 = vpop.eup %9611  ;;  %4748 = vrot.lane.b32.xlu0 %v8561_v4, %s10059_s24  ;;  %v12652_v4 = vpop.f32.mrf.mxu1 }
 0x615   : > { %v5282_v61 = vmul.f32 %v9612_v1, %v5250_v5  ;;  %vm5287_vm12 = vweird.f32 %v9612_v1  ;;  %v8849_v5 = vor.u32 %v9218_v49, %v8848_v7 }
 0x616   : > { %vm5288_vm2 = vmor %vm5286_vm1, %vm5287_vm12 }
 0x617   : > { %v5283_v16 = vsub.f32 1.0, %v5282_v61  ;;  %v5204_v61 = vsub.f32 %v12047_v21, %v12400_v15  ;;  %v12667_v21 = vpop.f32.mrf.mxu3 }
 0x618   : > { %v4014_v47 = vpop.permute.xlu2 %4013 }
 0x619   : > { %v5284_v57 = vmul.f32 %v9612_v1, %v5283_v16  ;;  %4049 = vst.msk [vmem:[#allocation3 + $0x34] sm:$0xf] %vm4035_vm15, %v4014_v47  ;;  %5604 = vrot.lane.b32.xlu1 %v8673_v55, %s10063_s12  ;;  %v5223_v50 = vmul.f32 1.442695, %v5204_v61 }
 0x61b   : > { %v5285_v28 = vadd.f32 %v9612_v1, %v5284_v57  ;;  %v14104_v57 = vld [vmem:[#allocation28_spill] sm:$0xff] }
 0x61c   : > { %v5252_v12 = vpop.xlane.xlu1 %5251  ;;  %v12660_v35 = vpop.f32.mrf.mxu1 }
 0x61d   : > { %v5289_v58 = vsel %vm5288_vm2, %v9612_v1, %v5285_v28  ;;  %9613 = vrcp.f32 %v5252_v12  ;;  %v5307_v33 = vand.u32 2147483648, %v5252_v12  ;;  %v5305_v51 = vand.u32 2147483647, %v5252_v12 }
 0x61e   : > { %v5294_v3 = vsel %vm5291_vm3, %v5293_v19, %v5289_v58  ;;  %vm5301_vm5 = vweird.f32 %v5252_v12  ;;  %9615 = vpow2.f32 %v5221_v38  ;;  %v4343_v28 = vsub.f32 %v14105_v54, %v14104_v57 }
 0x61f   : > { %v12633_v25 = vmul.f32 %v12576_v9, %v5294_v3  ;;  %v5308_v14 = vor.u32 1.1754944e-38, %v5307_v33  ;;  %vm5306_vm8 = vcmp.eq.f32.partialorder %v5305_v51, 8.507059e+37  ;;  %9617 = vpow2.f32 %v5223_v50  ;;  %v12675_v8 = vpop.f32.mrf.mxu3  ;;  %v8548_v51 = vld [vmem:[#allocation2 + $0x8] sm:$0xf] }
 0x620   : > { %v4004_v40 = vpop.permute.xlu0 %4003  ;;  %v4344_v58 = vsub.f32 %v14106_v34, %v12292_v0 }
 0x621   : > { %4044 = vst.msk [vmem:[#allocation3 + $0x20] sm:$0xf] %vm4035_vm15, %v4004_v40  ;;  %5874 = vrot.lane.b32.xlu1 %v8729_v13, %s10064_s13 }
 0x622   : > { %8650 = vst [vmem:[%s10960_s7 + $0x280] sm:$0xff] %v12633_v25  ;;  %v4363_v13 = vmul.f32 1.442695, %v4344_v58 }
 0x623   : > { %v9614_v29 = vpop.eup %9613 }
 0x624   : > { %v5297_v60 = vmul.f32 %v9614_v29, %v5252_v12  ;;  %vm5302_vm4 = vweird.f32 %v9614_v29  ;;  %v12663_v52 = vpop.eup %9615  ;;  %v4361_v12 = vmul.f32 1.442695, %v4343_v28  ;;  %v12703_v49 = vpop.f32.mrf.mxu1 }
 0x625   : > { %vm5303_vm6 = vmor %vm5301_vm5, %vm5302_vm4  ;;  %v12669_v15 = vpop.eup %9617 }
 0x626   : > { %v5298_v20 = vsub.f32 1.0, %v5297_v60  ;;  %9619 = vpow2.f32 %v4361_v12  ;;  %v9156_v60 = vld [vmem:[#allocation2 + $0x28] sm:$0xf0] }
 0x627   : > { %9621 = vpow2.f32 %v4363_v13 }
 0x628   : > { %v5299_v36 = vmul.f32 %v9614_v29, %v5298_v20  ;;  %v6733_v9 = vpop.permute.xlu0 %6732  ;;  %v5225_v20 = vmul.f32 1.442695, %v5205_v46 }
 0x629   : > { %4746 = vrot.lane.b32.xlu1 %v8557_v2, %s10059_s24  ;;  %8888 = vmatmul.msk.bf16.gmra.mxu1 %vm852_vm0, %v6733_v9  ;;  %v5206_v2 = vsub.f32 %v12319_v53, %v12494_v45  ;;  %v9155_v9 = vld [vmem:[#allocation2 + $0x10] sm:$0xf0]  ;;  %v12699_v45 = vpop.f32.mrf.mxu3 }
 0x62a   : > { %v5300_v32 = vadd.f32 %v9614_v29, %v5299_v36  ;;  %9623 = vpow2.f32 %v5225_v20  ;;  %v8549_v10 = vor.u32 %v9155_v9, %v8548_v51 }
 0x62c   : > { %v5304_v59 = vsel %vm5303_vm6, %v9614_v29, %v5300_v32  ;;  %v12680_v3 = vpop.eup %9619  ;;  %v8552_v29 = vld [vmem:[#allocation2 + $0x20] sm:$0xf]  ;;  %v5227_v32 = vmul.f32 1.442695, %v5206_v2 }
 0x62d   : > { %v5309_v39 = vsel %vm5306_vm8, %v5308_v14, %v5304_v59  ;;  %v8553_v43 = vor.u32 %v9156_v60, %v8552_v29  ;;  %v12688_v33 = vpop.eup %9621 }
 0x62e   : > { %v12642_v48 = vmul.f32 %v12585_v11, %v5309_v39  ;;  %v9179_v11 = vld [vmem:[#allocation2 + $0x10] sm:$0xf0]  ;;  %9625 = vpow2.f32 %v5227_v32 }
 0x62f   : > { %v8669_v16 = vor.u32 %v9179_v11, %v8668_v62 }
 0x630   : > { %v4010_v27 = vpop.permute.xlu0 %4009  ;;  %8651 = vst [vmem:[%s10960_s7 + $0x288] sm:$0xff] %v12642_v48  ;;  %v5554_v18 = vpack.c.bf16 %v12642_v48, %v12633_v25  ;;  %v12695_v42 = vpop.eup %9623 }
 0x631   : > { %4047 = vst.msk [vmem:[#allocation3 + $0x2c] sm:$0xf] %vm4035_vm15, %v4010_v27  ;;  %6734 = vrot.lane.b32.xlu1 %v8849_v5, %s10065_s17  ;;  %v4346_v27 = vsub.f32 %v12434_v6, %v12557_v17  ;;  %v12711_v6 = vpop.f32.mrf.mxu1  ;;  %v5207_v17 = vsub.f32 %v12537_v63, %v12591_v44 }
 0x633   : > { %v4367_v38 = vmul.f32 1.442695, %v4346_v27  ;;  %v5229_v29 = vmul.f32 1.442695, %v5207_v17 }
 0x634   : > { %v4012_v1 = vpop.permute.xlu1 %4011  ;;  %v12701_v59 = vpop.eup %9625 }
 0x635   : > { %4048 = vst.msk [vmem:[#allocation3 + $0x30] sm:$0xf] %vm4035_vm15, %v4012_v1 }
 0x638   : > { %5185 = vmax.xlane.f32.xlu2 %v12652_v4  ;;  %v4016_v55 = vpop.permute.xlu0 %4015 }
 0x639   : > { %4050 = vst.msk [vmem:[#allocation3 + $0x38] sm:$0xf] %vm4035_vm15, %v4016_v55  ;;  %5602 = vrot.lane.b32.xlu1 %v8669_v16, %s10063_s12  ;;  %v12708_v55 = vpop.f32.mrf.mxu3  ;;  %s7695_s12 = scalar_lea.sflag [#allocation12], %s10200_s10 }
 0x63e   : > { %5187 = vmax.xlane.f32.xlu0 %v12660_v35 }
 0x640   : > { %v4018_v47 = vpop.permute.xlu1 %4017  ;;  %5253 = vadd.xlane.f32.xlu2 %v12663_v52 }
 0x641   : > { %4051 = vst.msk [vmem:[#allocation3 + $0x3c] sm:$0xf] %vm4035_vm15, %v4018_v47  ;;  %v12732_v9 = vpop.f32.mrf.mxu3 }
 0x646   : > { %5255 = vadd.xlane.f32.xlu0 %v12669_v15 }
 0x648   : > { %v5611_v19 = vpop.permute.xlu1 %5610  ;;  %4325 = vmax.xlane.f32.xlu2 %v12667_v21 }
 0x649   : > { %5629 = vmatpush.bf16.msrb.mxu2 %v5611_v19 }
 0x64e   : > { %4327 = vmax.xlane.f32.xlu0 %v12675_v8 }
 0x656   : > { %4393 = vadd.xlane.f32.xlu0 %v12680_v3 }
 0x65a   : > { %v12683_v40 = vpop.xlane.xlu2 %4321 }
 0x660   : > { %4744 = vrot.lane.b32.xlu2 %v8553_v43, %s10059_s24 }
 0x662   : > { %v4753_v0 = vpop.permute.xlu2 %4752 }
 0x663   : > { %4395 = vadd.xlane.f32.xlu1 %v12688_v33  ;;  %4768 = vmatpush.bf16.msrb.mxu0 %v4753_v0  ;;  %v12693_v36 = vpop.xlane.xlu0 %4323  ;;  %v12726_v0 = vpop.f32.mrf.mxu1 }
 0x66a   : > { %v4751_v14 = vpop.permute.xlu2 %4750  ;;  %4742 = vrot.lane.b32.xlu0 %v8549_v10, %s10059_s24  ;;  %v4345_v10 = vsub.f32 %v11924_v37, %v12363_v23  ;;  %v5208_v37 = vsub.f32 %v12546_v24, %v12604_v56  ;;  %v4348_v24 = vsub.f32 %v12613_v26, %v12693_v36 }
 0x66b   : > { %5257 = vadd.xlane.f32.xlu1 %v12695_v42  ;;  %4769 = vmatpush.bf16.msrb.mxu0 %v4751_v14  ;;  %v4392_v53 = vpop.xlane.xlu0 %4391 }
 0x66c   : > { %9627 = vrcp.f32 %v4392_v53  ;;  %v4447_v1 = vand.u32 2147483648, %v4392_v53  ;;  %v4445_v11 = vand.u32 2147483647, %v4392_v53  ;;  %vm4441_vm7 = vweird.f32 %v4392_v53 }
 0x66d   : > { %v4365_v14 = vmul.f32 1.442695, %v4345_v10 }
 0x66e   : > { %v4448_v50 = vor.u32 1.1754944e-38, %v4447_v1  ;;  %vm4446_vm11 = vcmp.eq.f32.partialorder %v4445_v11, 8.507059e+37  ;;  %v4347_v1 = vsub.f32 %v12608_v41, %v12683_v40 }
 0x672   : > { %v9628_v7 = vpop.eup %9627  ;;  %v5607_v63 = vpop.permute.xlu2 %5606 }
 0x673   : > { %v4437_v39 = vmul.f32 %v9628_v7, %v4392_v53  ;;  %5259 = vadd.xlane.f32.xlu1 %v12701_v59  ;;  %v4390_v5 = vpop.xlane.xlu1 %4389  ;;  %vm4442_vm9 = vweird.f32 %v9628_v7  ;;  %v12740_v53 = vpop.f32.mrf.mxu1 }
 0x674   : > { %9629 = vrcp.f32 %v4390_v5  ;;  %vm4443_vm10 = vmor %vm4441_vm7, %vm4442_vm9  ;;  %v4432_v12 = vand.u32 2147483648, %v4390_v5  ;;  %v4430_v13 = vand.u32 2147483647, %v4390_v5  ;;  %vm4426_vm14 = vweird.f32 %v4390_v5 }
 0x675   : > { %v4438_v22 = vsub.f32 1.0, %v4437_v39  ;;  %9631 = vpow2.f32 %v4367_v38  ;;  %v4371_v38 = vmul.f32 1.442695, %v4348_v24 }
 0x676   : > { %v4433_v44 = vor.u32 1.1754944e-38, %v4432_v12  ;;  %vm4431_vm12 = vcmp.eq.f32.partialorder %v4430_v13, 8.507059e+37  ;;  %9633 = vpow2.f32 %v5229_v29 }
 0x677   : > { %v4439_v62 = vmul.f32 %v9628_v7, %v4438_v22  ;;  %9635 = vpow2.f32 %v4365_v14 }
 0x679   : > { %v4440_v61 = vadd.f32 %v9628_v7, %v4439_v62  ;;  %v4369_v62 = vmul.f32 1.442695, %v4347_v1 }
 0x67a   : > { %v9630_v16 = vpop.eup %9629 }
 0x67b   : > { %v4444_v47 = vsel %vm4443_vm10, %v9628_v7, %v4440_v61  ;;  %v4422_v57 = vmul.f32 %v9630_v16, %v4390_v5  ;;  %4331 = vmax.xlane.f32.xlu1 %v12708_v55  ;;  %vm4427_vm13 = vweird.f32 %v9630_v16  ;;  %v12720_v46 = vpop.eup %9631  ;;  %v12743_v7 = vpop.f32.mrf.mxu3  ;;  %v5231_v5 = vmul.f32 1.442695, %v5208_v37 }
 0x67c   : > { %v4449_v54 = vsel %vm4446_vm11, %v4448_v50, %v4444_v47  ;;  %vm4428_vm15 = vmor %vm4426_vm14, %vm4427_vm13  ;;  %v12735_v32 = vpop.eup %9633  ;;  %v12753_v27 = vpop.f32.mrf.mxu1 }
 0x67d   : > { %v4423_v28 = vsub.f32 1.0, %v4422_v57  ;;  %v12716_v19 = vmul.f32 %v12619_v31, %v4449_v54  ;;  %v12750_v23 = vpop.eup %9635  ;;  %9637 = vpow2.f32 %v5231_v5 }
 0x67e   : > { %v5609_v34 = vpop.permute.xlu0 %5608  ;;  %9639 = vpow2.f32 %v4369_v62 }
 0x67f   : > { %v4424_v58 = vmul.f32 %v9630_v16, %v4423_v28  ;;  %5630 = vmatpush.bf16.msrb.mxu2 %v5609_v34  ;;  %8531 = vst [vmem:[%s10960_s7 + $0x208] sm:$0xff] %v12716_v19  ;;  %9641 = vpow2.f32 %v4371_v38 }
 0x681   : > { %v4425_v60 = vadd.f32 %v9630_v16, %v4424_v58 }
 0x683   : > { %v4429_v43 = vsel %vm4428_vm15, %v9630_v16, %v4425_v60  ;;  %4399 = vadd.xlane.f32.xlu1 %v12720_v46  ;;  %5631 = vmatpush.bf16.msrb.mxu2 %v5607_v63  ;;  %v12762_v56 = vpop.eup %9637  ;;  %v12781_v54 = vpop.f32.mrf.mxu3 }
 0x684   : > { %v4434_v31 = vsel %vm4431_vm12, %v4433_v44, %v4429_v43  ;;  %v12767_v61 = vpop.eup %9639  ;;  %v12778_v57 = vpop.f32.mrf.mxu1 }
 0x685   : > { %v12724_v20 = vmul.f32 %v12622_v30, %v4434_v31  ;;  %v12774_v36 = vpop.eup %9641 }
 0x686   : > { %v4749_v2 = vpop.permute.xlu0 %4748 }
 0x687   : > { %4770 = vmatpush.bf16.msrb.mxu0 %v4749_v2  ;;  %8530 = vst [vmem:[%s10960_s7 + $0x200] sm:$0xff] %v12724_v20  ;;  %v4694_v51 = vpack.c.bf16 %v12716_v19, %v12724_v20 }
 0x689   : > { %5189 = vmax.xlane.f32.xlu2 %v12703_v49 }
 0x68b   : > { %v5605_v30 = vpop.permute.xlu1 %5604  ;;  %5261 = vadd.xlane.f32.xlu1 %v12735_v32  ;;  %v12791_v43 = vpop.f32.mrf.mxu3 }
 0x68c   : > { %5632 = vmatpush.bf16.msrb.mxu2 %v5605_v30  ;;  %v12795_v5 = vpop.f32.mrf.mxu1 }
 0x691   : > { %4329 = vmax.xlane.f32.xlu2 %v12699_v45 }
 0x693   : > { %v5875_v39 = vpop.permute.xlu1 %5874  ;;  %4335 = vmax.xlane.f32.xlu1 %v12743_v7 }
 0x694   : > { %8769 = vmatmul.msk.bf16.gmra.mxu3 %vm852_vm0, %v5875_v39  ;;  %5191 = vmax.xlane.f32.xlu0 %v12711_v6 }
 0x699   : > { %4397 = vadd.xlane.f32.xlu2 %v12750_v23 }
 0x69b   : > { %v4747_v22 = vpop.permute.xlu1 %4746  ;;  %5197 = vmax.xlane.f32.xlu1 %v12753_v27 }
 0x69c   : > { %4771 = vmatpush.bf16.msrb.mxu0 %v4747_v22  ;;  %5193 = vmax.xlane.f32.xlu0 %v12726_v0 }
 0x6a1   : > { %5195 = vmax.xlane.f32.xlu2 %v12740_v53 }
 0x6a3   : > { %v6735_v11 = vpop.permute.xlu1 %6734 }
 0x6a4   : > { %8889 = vmatmul.msk.bf16.gmra.mxu1 %vm852_vm0, %v6735_v11  ;;  %5263 = vadd.xlane.f32.xlu0 %v12762_v56 }
 0x6a9   : > { %4333 = vmax.xlane.f32.xlu2 %v12732_v9 }
 0x6ab   : > { %v5603_v41 = vpop.permute.xlu1 %5602  ;;  %v5186_v40 = vpop.xlane.xlu2 %5185 }
 0x6ac   : > { %v5209_v16 = vsub.f32 %v12652_v4, %v5186_v40  ;;  %5633 = vmatpush.bf16.msrb.mxu2 %v5603_v41  ;;  %4401 = vadd.xlane.f32.xlu0 %v12767_v61 }
 0x6ae   : > { %v5233_v26 = vmul.f32 1.442695, %v5209_v16 }
 0x6af   : > { %5634 = vmatmul.bf16.vlgmr.msrb.gmra.mxu2 %v5554_v18 }
 0x6b0   : > { %9643 = vpow2.f32 %v5233_v26 }
 0x6b1   : > { %4403 = vadd.xlane.f32.xlu2 %v12774_v36  ;;  %v5188_v50 = vpop.xlane.xlu0 %5187 }
 0x6b2   : > { %v5210_v47 = vsub.f32 %v12660_v35, %v5188_v50 }
 0x6b3   : > { %v5254_v17 = vpop.xlane.xlu2 %5253 }
 0x6b4   : > { %v5235_v4 = vmul.f32 1.442695, %v5210_v47  ;;  %9645 = vrcp.f32 %v5254_v17  ;;  %5199 = vmax.xlane.f32.xlu0 %v12778_v57  ;;  %v5322_v13 = vand.u32 2147483648, %v5254_v17  ;;  %v5320_v63 = vand.u32 2147483647, %v5254_v17 }
 0x6b5   : > { %vm5316_vm1 = vweird.f32 %v5254_v17 }
 0x6b6   : > { %9647 = vpow2.f32 %v5235_v4  ;;  %v12783_v25 = vpop.eup %9643  ;;  %v5323_v30 = vor.u32 1.1754944e-38, %v5322_v13  ;;  %vm5321_vm3 = vcmp.eq.f32.partialorder %v5320_v63, 8.507059e+37  ;;  %v12808_v4 = vpop.f32.mrf.mxu1 }
 0x6b9   : > { %5265 = vadd.xlane.f32.xlu2 %v12783_v25  ;;  %v5256_v48 = vpop.xlane.xlu0 %5255 }
 0x6ba   : > { %v9646_v18 = vpop.eup %9645  ;;  %9649 = vrcp.f32 %v5256_v48  ;;  %v5337_v22 = vand.u32 2147483648, %v5256_v48  ;;  %v5335_v11 = vand.u32 2147483647, %v5256_v48  ;;  %vm5331_vm5 = vweird.f32 %v5256_v48 }
 0x6bb   : > { %v5312_v28 = vmul.f32 %v9646_v18, %v5254_v17  ;;  %v4326_v12 = vpop.xlane.xlu2 %4325  ;;  %vm5317_vm0 = vweird.f32 %v9646_v18 }
 0x6bc   : > { %v12786_v35 = vpop.eup %9647  ;;  %v4349_v34 = vsub.f32 %v12667_v21, %v4326_v12  ;;  %4337 = vmax.xlane.f32.xlu0 %v12781_v54  ;;  %vm5318_vm2 = vmor %vm5316_vm1, %vm5317_vm0  ;;  %v5338_v40 = vor.u32 1.1754944e-38, %v5337_v22  ;;  %vm5336_vm8 = vcmp.eq.f32.partialorder %v5335_v11, 8.507059e+37 }
 0x6bd   : > { %v5313_v58 = vsub.f32 1.0, %v5312_v28  ;;  %5267 = vadd.xlane.f32.xlu1 %v12786_v35 }
 0x6be   : > { %v4373_v29 = vmul.f32 1.442695, %v4349_v34 }
 0x6bf   : > { %v5314_v60 = vmul.f32 %v9646_v18, %v5313_v58 }
 0x6c0   : > { %v9650_v44 = vpop.eup %9649  ;;  %9651 = vpow2.f32 %v4373_v29 }
 0x6c1   : > { %v5327_v31 = vmul.f32 %v9650_v44, %v5256_v48  ;;  %4339 = vmax.xlane.f32.xlu2 %v12791_v43  ;;  %v4328_v2 = vpop.xlane.xlu0 %4327  ;;  %v5315_v21 = vadd.f32 %v9646_v18, %v5314_v60  ;;  %vm5332_vm4 = vweird.f32 %v9650_v44 }
 0x6c2   : > { %v4350_v10 = vsub.f32 %v12675_v8, %v4328_v2  ;;  %vm5333_vm6 = vmor %vm5331_vm5, %vm5332_vm4 }
 0x6c3   : > { %v5328_v14 = vsub.f32 1.0, %v5327_v31  ;;  %v4745_v39 = vpop.permute.xlu2 %4744  ;;  %v5319_v37 = vsel %vm5318_vm2, %v9646_v18, %v5315_v21 }
 0x6c4   : > { %v4375_v1 = vmul.f32 1.442695, %v4350_v10  ;;  %4772 = vmatpush.bf16.msrb.mxu0 %v4745_v39  ;;  %v5324_v62 = vsel %vm5321_vm3, %v5323_v30, %v5319_v37 }
 0x6c5   : > { %v5329_v24 = vmul.f32 %v9650_v44, %v5328_v14  ;;  %v5523_v38 = vmul.f32 %v12663_v52, %v5324_v62 }
 0x6c6   : > { %v12798_v41 = vpop.eup %9651  ;;  %9653 = vpow2.f32 %v4375_v1 }
 0x6c7   : > { %4405 = vadd.xlane.f32.xlu1 %v12798_v41  ;;  %v5330_v8 = vadd.f32 %v9650_v44, %v5329_v24  ;;  %8652 = vst [vmem:[%s10960_s7 + $0x290] sm:$0xff] %v5523_v38 }
 0x6c9   : > { %6889 = vmax.xlane.f32.xlu2 %v12795_v5  ;;  %v4394_v16 = vpop.xlane.xlu0 %4393  ;;  %v5334_v26 = vsel %vm5333_vm6, %v9650_v44, %v5330_v8 }
 0x6ca   : > { %9655 = vrcp.f32 %v4394_v16  ;;  %v5339_v50 = vsel %vm5336_vm8, %v5338_v40, %v5334_v26  ;;  %v4462_v12 = vand.u32 2147483648, %v4394_v16  ;;  %v4460_v58 = vand.u32 2147483647, %v4394_v16 }
 0x6cb   : > { %v5524_v52 = vmul.f32 %v12669_v15, %v5339_v50  ;;  %v12811_v15 = vpop.f32.mrf.mxu3  ;;  %vm4456_vm7 = vweird.f32 %v4394_v16 }
 0x6cc   : > { %v12804_v47 = vpop.eup %9653  ;;  %v4463_v60 = vor.u32 1.1754944e-38, %v4462_v12  ;;  %vm4461_vm11 = vcmp.eq.f32.partialorder %v4460_v58, 8.507059e+37 }
 0x6cd   : > { %4407 = vadd.xlane.f32.xlu0 %v12804_v47  ;;  %8653 = vst [vmem:[%s10960_s7 + $0x298] sm:$0xff] %v5524_v52  ;;  %v5555_v17 = vpack.c.bf16 %v5524_v52, %v5523_v38 }
 0x6cf   : > { %6891 = vmax.xlane.f32.xlu1 %v12808_v4  ;;  %5639 = vmatmul.bf16.gmra.mxu2 %v5555_v17 }
 0x6d0   : > { %v9656_v48 = vpop.eup %9655 }
 0x6d1   : > { %v4452_v18 = vmul.f32 %v9656_v48, %v4394_v16  ;;  %vm4457_vm9 = vweird.f32 %v9656_v48 }
 0x6d2   : > { %vm4458_vm10 = vmor %vm4456_vm7, %vm4457_vm9 }
 0x6d3   : > { %v4453_v28 = vsub.f32 1.0, %v4452_v18 }
 0x6d5   : > { %v4454_v34 = vmul.f32 %v9656_v48, %v4453_v28 }
 0x6d6   : > { %v4396_v13 = vpop.xlane.xlu1 %4395 }
 0x6d7   : > { %9657 = vrcp.f32 %v4396_v13  ;;  %6029 = vmax.xlane.f32.xlu1 %v12811_v15  ;;  %v4455_v29 = vadd.f32 %v9656_v48, %v4454_v34  ;;  %v4477_v39 = vand.u32 2147483648, %v4396_v13  ;;  %v4475_v22 = vand.u32 2147483647, %v4396_v13 }
 0x6d8   : > { %vm4471_vm14 = vweird.f32 %v4396_v13 }
 0x6d9   : > { %v4459_v63 = vsel %vm4458_vm10, %v9656_v48, %v4455_v29  ;;  %v4478_v62 = vor.u32 1.1754944e-38, %v4477_v39  ;;  %vm4476_vm12 = vcmp.eq.f32.partialorder %v4475_v22, 8.507059e+37 }
 0x6da   : > { %v4464_v44 = vsel %vm4461_vm11, %v4463_v60, %v4459_v63 }
 0x6db   : > { %v4663_v31 = vmul.f32 %v12680_v3, %v4464_v44 }
 0x6dc   : > { %v4743_v2 = vpop.permute.xlu0 %4742 }
 0x6dd   : > { %v9658_v21 = vpop.eup %9657  ;;  %4773 = vmatpush.bf16.msrb.mxu0 %v4743_v2  ;;  %8532 = vst [vmem:[%s10960_s7 + $0x210] sm:$0xff] %v4663_v31 }
 0x6de   : > { %v4467_v10 = vmul.f32 %v9658_v21, %v4396_v13  ;;  %v5258_v30 = vpop.xlane.xlu1 %5257  ;;  %vm4472_vm13 = vweird.f32 %v9658_v21 }
 0x6df   : > { %9659 = vrcp.f32 %v5258_v30  ;;  %vm4473_vm15 = vmor %vm4471_vm14, %vm4472_vm13  ;;  %v5352_v20 = vand.u32 2147483648, %v5258_v30  ;;  %v5350_v16 = vand.u32 2147483647, %v5258_v30  ;;  %vm5346_vm1 = vweird.f32 %v5258_v30 }
 0x6e0   : > { %v4468_v14 = vsub.f32 1.0, %v4467_v10  ;;  %4774 = vmatmul.bf16.vlgmr.msrb.gmra.mxu0 %v4694_v51 }
 0x6e1   : > { %v5353_v52 = vor.u32 1.1754944e-38, %v5352_v20  ;;  %vm5351_vm3 = vcmp.eq.f32.partialorder %v5350_v16, 8.507059e+37 }
 0x6e2   : > { %v4469_v37 = vmul.f32 %v9658_v21, %v4468_v14 }
 0x6e4   : > { %v4470_v1 = vadd.f32 %v9658_v21, %v4469_v37 }
 0x6e5   : > { %v9660_v3 = vpop.eup %9659 }
 0x6e6   : > { %v5342_v24 = vmul.f32 %v9660_v3, %v5258_v30  ;;  %v5260_v11 = vpop.xlane.xlu1 %5259  ;;  %v4474_v38 = vsel %vm4473_vm15, %v9658_v21, %v4470_v1  ;;  %vm5347_vm0 = vweird.f32 %v9660_v3 }
 0x6e7   : > { %9661 = vrcp.f32 %v5260_v11  ;;  %v4479_v8 = vsel %vm4476_vm12, %v4478_v62, %v4474_v38  ;;  %vm5348_vm2 = vmor %vm5346_vm1, %vm5347_vm0  ;;  %v5367_v13 = vand.u32 2147483648, %v5260_v11  ;;  %v5365_v63 = vand.u32 2147483647, %v5260_v11 }
 0x6e8   : > { %v5343_v40 = vsub.f32 1.0, %v5342_v24  ;;  %v4664_v19 = vmul.f32 %v12688_v33, %v4479_v8  ;;  %vm5361_vm5 = vweird.f32 %v5260_v11 }
 0x6e9   : > { %vm5366_vm8 = vcmp.eq.f32.partialorder %v5365_v63, 8.507059e+37 }
 0x6ea   : > { %v5344_v51 = vmul.f32 %v9660_v3, %v5343_v40  ;;  %8533 = vst [vmem:[%s10960_s7 + $0x218] sm:$0xff] %v4664_v19  ;;  %v4695_v18 = vpack.c.bf16 %v4664_v19, %v4663_v31  ;;  %v5368_v31 = vor.u32 1.1754944e-38, %v5367_v13 }
 0x6ec   : > { %v5345_v26 = vadd.f32 %v9660_v3, %v5344_v51 }
 0x6ed   : > { %v9662_v50 = vpop.eup %9661 }
 0x6ee   : > { %v5357_v17 = vmul.f32 %v9662_v50, %v5260_v11  ;;  %v4332_v48 = vpop.xlane.xlu1 %4331  ;;  %v5349_v28 = vsel %vm5348_vm2, %v9660_v3, %v5345_v26  ;;  %vm5362_vm4 = vweird.f32 %v9662_v50 }
 0x6ef   : > { %v4352_v12 = vsub.f32 %v12708_v55, %v4332_v48  ;;  %v5354_v34 = vsel %vm5351_vm3, %v5353_v52, %v5349_v28  ;;  %vm5363_vm6 = vmor %vm5361_vm5, %vm5362_vm4 }
 0x6f0   : > { %v5358_v33 = vsub.f32 1.0, %v5357_v17  ;;  %4779 = vmatmul.bf16.gmra.mxu0 %v4695_v18  ;;  %v5525_v58 = vmul.f32 %v12695_v42, %v5354_v34 }
 0x6f1   : > { %v4379_v29 = vmul.f32 1.442695, %v4352_v12 }
 0x6f2   : > { %v5359_v60 = vmul.f32 %v9662_v50, %v5358_v33  ;;  %8654 = vst [vmem:[%s10960_s7 + $0x2a0] sm:$0xff] %v5525_v58 }
 0x6f3   : > { %9663 = vpow2.f32 %v4379_v29 }
 0x6f4   : > { %v5360_v44 = vadd.f32 %v9662_v50, %v5359_v60 }
 0x6f6   : > { %v4400_v2 = vpop.xlane.xlu1 %4399  ;;  %v5364_v21 = vsel %vm5363_vm6, %v9662_v50, %v5360_v44 }
 0x6f7   : > { %9665 = vrcp.f32 %v4400_v2  ;;  %v5369_v55 = vsel %vm5366_vm8, %v5368_v31, %v5364_v21  ;;  %v4507_v24 = vand.u32 2147483648, %v4400_v2  ;;  %vm4501_vm7 = vweird.f32 %v4400_v2  ;;  %v12847_v31 = vpop.f32.mrf.mxu1 }
 0x6f8   : > { %v5526_v10 = vmul.f32 %v12701_v59, %v5369_v55  ;;  %v4505_v59 = vand.u32 2147483647, %v4400_v2 }
 0x6f9   : > { %v12825_v42 = vpop.eup %9663  ;;  %v4508_v19 = vor.u32 1.1754944e-38, %v4507_v24 }
 0x6fa   : > { %4411 = vadd.xlane.f32.xlu1 %v12825_v42  ;;  %8655 = vst [vmem:[%s10960_s7 + $0x2a8] sm:$0xff] %v5526_v10  ;;  %v5556_v30 = vpack.c.bf16 %v5526_v10, %v5525_v58  ;;  %vm4506_vm11 = vcmp.eq.f32.partialorder %v4505_v59, 8.507059e+37 }
 0x6fc   : > { %5644 = vmatmul.bf16.gmra.mxu2 %v5556_v30  ;;  %v5190_v14 = vpop.xlane.xlu2 %5189 }
 0x6fd   : > { %v9666_v39 = vpop.eup %9665  ;;  %v5211_v37 = vsub.f32 %v12703_v49, %v5190_v14 }
 0x6fe   : > { %v4497_v22 = vmul.f32 %v9666_v39, %v4400_v2  ;;  %v5262_v1 = vpop.xlane.xlu1 %5261  ;;  %vm4502_vm9 = vweird.f32 %v9666_v39 }
 0x6ff   : > { %v5237_v3 = vmul.f32 1.442695, %v5211_v37  ;;  %9667 = vrcp.f32 %v5262_v1  ;;  %vm4503_vm10 = vmor %vm4501_vm7, %vm4502_vm9  ;;  %v5382_v48 = vand.u32 2147483648, %v5262_v1  ;;  %v5380_v12 = vand.u32 2147483647, %v5262_v1 }
 0x700   : > { %v4498_v62 = vsub.f32 1.0, %v4497_v22  ;;  %vm5376_vm14 = vweird.f32 %v5262_v1 }
 0x701   : > { %9669 = vpow2.f32 %v5237_v3  ;;  %vm5381_vm12 = vcmp.eq.f32.partialorder %v5380_v12, 8.507059e+37 }
 0x702   : > { %v4499_v11 = vmul.f32 %v9666_v39, %v4498_v62 }
 0x704   : > { %v4330_v38 = vpop.xlane.xlu2 %4329  ;;  %v4500_v8 = vadd.f32 %v9666_v39, %v4499_v11 }
 0x705   : > { %v9668_v40 = vpop.eup %9667  ;;  %v4351_v34 = vsub.f32 %v12699_v45, %v4330_v38 }
 0x706   : > { %v5372_v20 = vmul.f32 %v9668_v40, %v5262_v1  ;;  %v4504_v51 = vsel %vm4503_vm10, %v9666_v39, %v4500_v8  ;;  %vm5377_vm13 = vweird.f32 %v9668_v40 }
 0x707   : > { %v12830_v49 = vpop.eup %9669  ;;  %v5192_v16 = vpop.xlane.xlu0 %5191  ;;  %v4509_v26 = vsel %vm4506_vm11, %v4508_v19, %v4504_v51  ;;  %vm5378_vm15 = vmor %vm5376_vm14, %vm5377_vm13  ;;  %v4377_v29 = vmul.f32 1.442695, %v4351_v34 }
 0x708   : > { %v5373_v50 = vsub.f32 1.0, %v5372_v20  ;;  %v5212_v52 = vsub.f32 %v12711_v6, %v5192_v16  ;;  %5269 = vadd.xlane.f32.xlu0 %v12830_v49  ;;  %v12835_v17 = vmul.f32 %v12720_v46, %v4509_v26  ;;  %v5383_v6 = vor.u32 1.1754944e-38, %v5382_v48  ;;  %v12840_v46 = vpop.f32.mrf.mxu3 }
 0x70a   : > { %v5374_v18 = vmul.f32 %v9668_v40, %v5373_v50  ;;  %v5239_v28 = vmul.f32 1.442695, %v5212_v52  ;;  %8535 = vst [vmem:[%s10960_s7 + $0x228] sm:$0xff] %v12835_v17 }
 0x70c   : > { %9671 = vpow2.f32 %v5239_v28  ;;  %v4398_v33 = vpop.xlane.xlu2 %4397  ;;  %v5375_v58 = vadd.f32 %v9668_v40, %v5374_v18 }
 0x70d   : > { %9673 = vrcp.f32 %v4398_v33  ;;  %v4492_v39 = vand.u32 2147483648, %v4398_v33  ;;  %v4490_v3 = vand.u32 2147483647, %v4398_v33  ;;  %vm4486_vm1 = vweird.f32 %v4398_v33 }
 0x70e   : > { %v5379_v13 = vsel %vm5378_vm15, %v9668_v40, %v5375_v58  ;;  %9675 = vpow2.f32 %v4377_v29  ;;  %v4336_v40 = vpop.xlane.xlu1 %4335 }
 0x70f   : > { %v5194_v60 = vpop.xlane.xlu0 %5193  ;;  %v5384_v63 = vsel %vm5381_vm12, %v5383_v6, %v5379_v13  ;;  %v4493_v59 = vor.u32 1.1754944e-38, %v4492_v39  ;;  %vm4491_vm3 = vcmp.eq.f32.partialorder %v4490_v3, 8.507059e+37  ;;  %v4354_v12 = vsub.f32 %v12743_v7, %v4336_v40 }
 0x710   : > { %v5213_v44 = vsub.f32 %v12726_v0, %v5194_v60  ;;  %6031 = vmax.xlane.f32.xlu0 %v12840_v46  ;;  %v12845_v45 = vmul.f32 %v12735_v32, %v5384_v63  ;;  %v12855_v22 = vpop.f32.mrf.mxu3 }
 0x711   : > { %v4383_v29 = vmul.f32 1.442695, %v4354_v12 }
 0x712   : > { %v12849_v2 = vpop.eup %9671  ;;  %v5241_v21 = vmul.f32 1.442695, %v5213_v44  ;;  %8656 = vst [vmem:[%s10960_s7 + $0x2b0] sm:$0xff] %v12845_v45 }
 0x713   : > { %v9674_v55 = vpop.eup %9673  ;;  %5271 = vadd.xlane.f32.xlu2 %v12849_v2 }
 0x714   : > { %v4482_v10 = vmul.f32 %v9674_v55, %v4398_v33  ;;  %9677 = vpow2.f32 %v5241_v21  ;;  %v5196_v30 = vpop.xlane.xlu2 %5195  ;;  %vm4487_vm0 = vweird.f32 %v9674_v55  ;;  %v12858_v62 = vpop.eup %9675 }
 0x715   : > { %v5214_v0 = vsub.f32 %v12740_v53, %v5196_v30  ;;  %v12862_v53 = vpop.f32.mrf.mxu1  ;;  %vm4488_vm2 = vmor %vm4486_vm1, %vm4487_vm0 }
 0x716   : > { %v4483_v14 = vsub.f32 1.0, %v4482_v10  ;;  %v5198_v63 = vpop.xlane.xlu1 %5197 }
 0x717   : > { %v5243_v32 = vmul.f32 1.442695, %v5214_v0  ;;  %v5264_v37 = vpop.xlane.xlu0 %5263  ;;  %v5215_v39 = vsub.f32 %v12753_v27, %v5198_v63 }
 0x718   : > { %v4484_v1 = vmul.f32 %v9674_v55, %v4483_v14  ;;  %9679 = vrcp.f32 %v5264_v37  ;;  %6893 = vmax.xlane.f32.xlu0 %v12847_v31  ;;  %v5395_v33 = vand.u32 2147483647, %v5264_v37  ;;  %vm5391_vm5 = vweird.f32 %v5264_v37 }
 0x719   : > { %9681 = vpow2.f32 %v5243_v32 }
 0x71a   : > { %v12860_v24 = vpop.eup %9677  ;;  %v4485_v11 = vadd.f32 %v9674_v55, %v4484_v1  ;;  %vm5396_vm8 = vcmp.eq.f32.partialorder %v5395_v33, 8.507059e+37 }
 0x71b   : > { %4409 = vadd.xlane.f32.xlu2 %v12858_v62  ;;  %5273 = vadd.xlane.f32.xlu1 %v12860_v24 }
 0x71c   : > { %v4334_v38 = vpop.xlane.xlu2 %4333  ;;  %v4489_v8 = vsel %vm4488_vm2, %v9674_v55, %v4485_v11 }
 0x71d   : > { %v4353_v19 = vsub.f32 %v12732_v9, %v4334_v38  ;;  %v4494_v20 = vsel %vm4491_vm3, %v4493_v59, %v4489_v8  ;;  %v12876_v9 = vpop.f32.mrf.mxu3  ;;  %v12883_v6 = vpop.f32.mrf.mxu1  ;;  %v5245_v38 = vmul.f32 1.442695, %v5215_v39 }
 0x71e   : > { %v9680_v51 = vpop.eup %9679  ;;  %v4665_v16 = vmul.f32 %v12750_v23, %v4494_v20  ;;  %v5397_v23 = vand.u32 2147483648, %v5264_v37 }
 0x71f   : > { %v12868_v26 = vpop.eup %9681  ;;  %v5387_v50 = vmul.f32 %v9680_v51, %v5264_v37  ;;  %v4381_v52 = vmul.f32 1.442695, %v4353_v19  ;;  %v12870_v48 = vpop.xlane.xlu0 %4401  ;;  %vm5392_vm4 = vweird.f32 %v9680_v51 }
 0x720   : > { %9683 = vrcp.f32 %v12870_v48  ;;  %5275 = vadd.xlane.f32.xlu0 %v12868_v26  ;;  %8534 = vst [vmem:[%s10960_s7 + $0x220] sm:$0xff] %v4665_v16  ;;  %v4696_v18 = vpack.c.bf16 %v12835_v17, %v4665_v16  ;;  %vm5393_vm6 = vmor %vm5391_vm5, %vm5392_vm4  ;;  %v5398_v7 = vor.u32 1.1754944e-38, %v5397_v23  ;;  %v4522_v32 = vand.u32 2147483648, %v12870_v48 }
 0x721   : > { %v5388_v28 = vsub.f32 1.0, %v5387_v50  ;;  %9685 = vpow2.f32 %v4381_v52  ;;  %v4520_v11 = vand.u32 2147483647, %v12870_v48  ;;  %vm4516_vm7 = vweird.f32 %v12870_v48 }
 0x722   : > { %4784 = vmatmul.bf16.gmra.mxu0 %v4696_v18  ;;  %v4523_v40 = vor.u32 1.1754944e-38, %v4522_v32 }
 0x723   : > { %v5389_v34 = vmul.f32 %v9680_v51, %v5388_v28  ;;  %6895 = vmax.xlane.f32.xlu2 %v12862_v53  ;;  %6035 = vmax.xlane.f32.xlu1 %v12876_v9  ;;  %vm4521_vm11 = vcmp.eq.f32.partialorder %v4520_v11, 8.507059e+37 }
 0x724   : > { %v12881_v58 = vpop.xlane.xlu2 %4403 }
 0x725   : > { %9687 = vrcp.f32 %v12881_v58  ;;  %v5390_v17 = vadd.f32 %v9680_v51, %v5389_v34  ;;  %v12904_v19 = vpop.f32.mrf.mxu1  ;;  %v4535_v16 = vand.u32 2147483647, %v12881_v58  ;;  %vm4531_vm14 = vweird.f32 %v12881_v58 }
 0x726   : > { %v9684_v13 = vpop.eup %9683  ;;  %9689 = vpow2.f32 %v4383_v29 }
 0x727   : > { %v12886_v60 = vpop.eup %9685  ;;  %v4512_v44 = vmul.f32 %v9684_v13, %v12870_v48  ;;  %v5200_v21 = vpop.xlane.xlu0 %5199  ;;  %v5394_v55 = vsel %vm5393_vm6, %v9680_v51, %v5390_v17  ;;  %vm4517_vm9 = vweird.f32 %v9684_v13  ;;  %vm4536_vm12 = vcmp.eq.f32.partialorder %v4535_v16, 8.507059e+37 }
 0x728   : > { %v5216_v10 = vsub.f32 %v12778_v57, %v5200_v21  ;;  %4413 = vadd.xlane.f32.xlu0 %v12886_v60  ;;  %v5399_v30 = vsel %vm5396_vm8, %v5398_v7, %v5394_v55  ;;  %vm4518_vm10 = vmor %vm4516_vm7, %vm4517_vm9  ;;  %v12925_v55 = vpop.f32.mrf.mxu3 }
 0x729   : > { %v4513_v0 = vsub.f32 1.0, %v4512_v44  ;;  %v5528_v14 = vmul.f32 %v12762_v56, %v5399_v30 }
 0x72a   : > { %v5247_v37 = vmul.f32 1.442695, %v5216_v10 }
 0x72b   : > { %v9688_v1 = vpop.eup %9687  ;;  %v4514_v3 = vmul.f32 %v9684_v13, %v4513_v0  ;;  %6033 = vmax.xlane.f32.xlu2 %v12855_v22  ;;  %6897 = vmax.xlane.f32.xlu1 %v12883_v6  ;;  %8657 = vst [vmem:[%s10960_s7 + $0x2b8] sm:$0xff] %v5528_v14  ;;  %v5557_v57 = vpack.c.bf16 %v5528_v14, %v12845_v45  ;;  %v4537_v45 = vand.u32 2147483648, %v12881_v58 }
 0x72c   : > { %v4527_v56 = vmul.f32 %v9688_v1, %v12881_v58  ;;  %9691 = vpow2.f32 %v5247_v37  ;;  %v12900_v59 = vpop.xlane.xlu2 %5265  ;;  %v12908_v50 = vpop.eup %9689  ;;  %vm4532_vm13 = vweird.f32 %v9688_v1 }
 0x72d   : > { %9693 = vrcp.f32 %v12900_v59  ;;  %5649 = vmatmul.bf16.gmra.mxu2 %v5557_v57  ;;  %v4515_v27 = vadd.f32 %v9684_v13, %v4514_v3  ;;  %vm4533_vm15 = vmor %vm4531_vm14, %vm4532_vm13  ;;  %v5412_v10 = vand.u32 2147483648, %v12900_v59  ;;  %v5410_v0 = vand.u32 2147483647, %v12900_v59 }
 0x72e   : > { %v4528_v8 = vsub.f32 1.0, %v4527_v56  ;;  %vm5406_vm1 = vweird.f32 %v12900_v59 }
 0x72f   : > { %v4338_v20 = vpop.xlane.xlu0 %4337  ;;  %v4519_v51 = vsel %vm4518_vm10, %v9684_v13, %v4515_v27  ;;  %vm5411_vm3 = vcmp.eq.f32.partialorder %v5410_v0, 8.507059e+37  ;;  %v5413_v11 = vor.u32 1.1754944e-38, %v5412_v10  ;;  %v8932_v0 = vld [vmem:[#allocation2 + $0x98] sm:$0xf] }
 0x730   : > { %v4529_v52 = vmul.f32 %v9688_v1, %v4528_v8  ;;  %v4355_v48 = vsub.f32 %v12781_v54, %v4338_v20  ;;  %6899 = vmax.xlane.f32.xlu0 %v12904_v19  ;;  %v12912_v18 = vpop.xlane.xlu1 %5267  ;;  %v4524_v28 = vsel %vm4521_vm11, %v4523_v40, %v4519_v51  ;;  %v4538_v54 = vor.u32 1.1754944e-38, %v4537_v45 }
 0x731   : > { %9695 = vrcp.f32 %v12912_v18  ;;  %v4667_v12 = vmul.f32 %v12767_v61, %v4524_v28  ;;  %v5427_v57 = vand.u32 2147483648, %v12912_v18  ;;  %vm5421_vm5 = vweird.f32 %v12912_v18  ;;  %v12947_v28 = vpop.f32.mrf.mxu3 }
 0x732   : > { %v12916_v23 = vpop.eup %9691  ;;  %v4385_v34 = vmul.f32 1.442695, %v4355_v48  ;;  %v4530_v33 = vadd.f32 %v9688_v1, %v4529_v52  ;;  %9697 = vpow2.f32 %v5245_v38 }
 0x733   : > { %v9694_v17 = vpop.eup %9693  ;;  %4415 = vadd.xlane.f32.xlu2 %v12908_v50  ;;  %5279 = vadd.xlane.f32.xlu1 %v12916_v23  ;;  %8536 = vst [vmem:[%s10960_s7 + $0x230] sm:$0xff] %v4667_v12  ;;  %v5428_v20 = vor.u32 1.1754944e-38, %v5427_v57 }
 0x734   : > { %v5402_v13 = vmul.f32 %v9694_v17, %v12900_v59  ;;  %9699 = vpow2.f32 %v4385_v34  ;;  %v4340_v61 = vpop.xlane.xlu2 %4339  ;;  %v4534_v29 = vsel %vm4533_vm15, %v9688_v1, %v4530_v33  ;;  %vm5407_vm0 = vweird.f32 %v9694_v17 }
 0x735   : > { %v4356_v58 = vsub.f32 %v12791_v43, %v4340_v61  ;;  %v4539_v7 = vsel %vm4536_vm12, %v4538_v54, %v4534_v29  ;;  %vm5408_vm2 = vmor %vm5406_vm1, %vm5407_vm0  ;;  %v5425_v59 = vand.u32 2147483647, %v12912_v18 }
 0x736   : > { %v5403_v63 = vsub.f32 1.0, %v5402_v13  ;;  %v4668_v44 = vmul.f32 %v12774_v36, %v4539_v7 }
 0x737   : > { %v9696_v21 = vpop.eup %9695  ;;  %v4387_v30 = vmul.f32 1.442695, %v4356_v58  ;;  %vm5426_vm8 = vcmp.eq.f32.partialorder %v5425_v59, 8.507059e+37  ;;  %v8936_v59 = vld [vmem:[#allocation2 + $0xb0] sm:$0xf] }
 0x738   : > { %v5404_v14 = vmul.f32 %v9694_v17, %v5403_v63  ;;  %v5417_v39 = vmul.f32 %v9696_v21, %v12912_v18  ;;  %6037 = vmax.xlane.f32.xlu0 %v12925_v55  ;;  %8537 = vst [vmem:[%s10960_s7 + $0x238] sm:$0xff] %v4668_v44  ;;  %v4697_v32 = vpack.c.bf16 %v4668_v44, %v4667_v12  ;;  %v12932_v43 = vpop.eup %9697  ;;  %vm5422_vm4 = vweird.f32 %v9696_v21 }
 0x739   : > { %9701 = vpow2.f32 %v4387_v30  ;;  %vm5423_vm6 = vmor %vm5421_vm5, %vm5422_vm4 }
 0x73a   : > { %v12934_v36 = vpop.eup %9699  ;;  %v5418_v37 = vsub.f32 1.0, %v5417_v39  ;;  %4789 = vmatmul.bf16.gmra.mxu0 %v4697_v32  ;;  %v4406_v1 = vpop.xlane.xlu1 %4405  ;;  %v5405_v3 = vadd.f32 %v9694_v17, %v5404_v14  ;;  %v8816_v14 = vld [vmem:[#allocation2 + $0xb0] sm:$0xf]  ;;  %v9210_v39 = vld [vmem:[#allocation2 + $0xb8] sm:$0xf0] }
 0x73b   : > { %9703 = vrcp.f32 %v4406_v1  ;;  %5277 = vadd.xlane.f32.xlu2 %v12932_v43  ;;  %4417 = vadd.xlane.f32.xlu1 %v12934_v36  ;;  %v4552_v33 = vand.u32 2147483648, %v4406_v1  ;;  %v4550_v54 = vand.u32 2147483647, %v4406_v1  ;;  %vm4546_vm7 = vweird.f32 %v4406_v1  ;;  %v9233_v32 = vld [vmem:[#allocation2 + $0xa0] sm:$0xf0] }
 0x73c   : > { %v5419_v56 = vmul.f32 %v9696_v21, %v5418_v37  ;;  %v5409_v27 = vsel %vm5408_vm2, %v9694_v17, %v5405_v3  ;;  %v8817_v57 = vor.u32 %v9210_v39, %v8816_v14  ;;  %v12971_v14 = vpop.f32.mrf.mxu3 }
 0x73d   : > { %v5414_v38 = vsel %vm5411_vm3, %v5413_v11, %v5409_v27  ;;  %v4553_v58 = vor.u32 1.1754944e-38, %v4552_v33  ;;  %vm4551_vm11 = vcmp.eq.f32.partialorder %v4550_v54, 8.507059e+37  ;;  %v8933_v11 = vor.u32 %v9233_v32, %v8932_v0 }
 0x73e   : > { %v5420_v8 = vadd.f32 %v9696_v21, %v5419_v56  ;;  %v5529_v40 = vmul.f32 %v12783_v25, %v5414_v38  ;;  %v9234_v38 = vld [vmem:[#allocation2 + $0xb8] sm:$0xf0] }
 0x73f   : > { %v12943_v45 = vpop.eup %9701 }
 0x740   : > { %4419 = vadd.xlane.f32.xlu0 %v12943_v45  ;;  %v4408_v51 = vpop.xlane.xlu0 %4407  ;;  %v5424_v16 = vsel %vm5423_vm6, %v9696_v21, %v5420_v8  ;;  %8658 = vst [vmem:[%s10960_s7 + $0x2c0] sm:$0xff] %v5529_v40  ;;  %v8928_v8 = vld [vmem:[#allocation2 + $0x80] sm:$0xf] }
 0x741   : > { %v9704_v52 = vpop.eup %9703  ;;  %v5429_v48 = vsel %vm5426_vm8, %v5428_v20, %v5424_v16  ;;  %9705 = vrcp.f32 %v4408_v51  ;;  %v4567_v44 = vand.u32 2147483648, %v4408_v51  ;;  %v4565_v30 = vand.u32 2147483647, %v4408_v51 }
 0x742   : > { %v4542_v12 = vmul.f32 %v9704_v52, %v4406_v1  ;;  %v5530_v18 = vmul.f32 %v12786_v35, %v5429_v48  ;;  %vm4547_vm9 = vweird.f32 %v9704_v52  ;;  %vm4561_vm14 = vweird.f32 %v4408_v51  ;;  %v6892_v16 = vpop.xlane.xlu1 %6891 }
 0x743   : > { %6039 = vmax.xlane.f32.xlu2 %v12947_v28  ;;  %vm4548_vm10 = vmor %vm4546_vm7, %vm4547_vm9  ;;  %v4568_v1 = vor.u32 1.1754944e-38, %v4567_v44  ;;  %vm4566_vm12 = vcmp.eq.f32.partialorder %v4565_v30, 8.507059e+37  ;;  %v8937_v20 = vor.u32 %v9234_v38, %v8936_v59  ;;  %v6922_v33 = vsub.f32 %v12808_v4, %v6892_v16 }
 0x744   : > { %v4543_v25 = vsub.f32 1.0, %v4542_v12  ;;  %8659 = vst [vmem:[%s10960_s7 + $0x2c8] sm:$0xff] %v5530_v18  ;;  %v5558_v34 = vpack.c.bf16 %v5530_v18, %v5529_v40  ;;  %v9232_v40 = vld [vmem:[#allocation2 + $0x88] sm:$0xf0]  ;;  %v12985_v16 = vpop.f32.mrf.mxu3 }
 0x746   : > { %v4544_v17 = vmul.f32 %v9704_v52, %v4543_v25  ;;  %5654 = vmatmul.bf16.gmra.mxu2 %v5558_v34 }
 0x747   : > { %v9706_v13 = vpop.eup %9705 }
 0x748   : > { %v4545_v61 = vadd.f32 %v9704_v52, %v4544_v17  ;;  %v4557_v29 = vmul.f32 %v9706_v13, %v4408_v51  ;;  %vm4562_vm13 = vweird.f32 %v9706_v13  ;;  %v8929_v51 = vor.u32 %v9232_v40, %v8928_v8 }
 0x749   : > { %vm4563_vm15 = vmor %vm4561_vm14, %vm4562_vm13 }
 0x74a   : > { %v4549_v7 = vsel %vm4548_vm10, %v9704_v52, %v4545_v61  ;;  %v4558_v35 = vsub.f32 1.0, %v4557_v29  ;;  %v8812_v52 = vld [vmem:[#allocation2 + $0x98] sm:$0xf]  ;;  %v6030_v12 = vpop.xlane.xlu1 %6029 }
 0x74b   : > { %v4554_v63 = vsel %vm4551_vm11, %v4553_v58, %v4549_v7  ;;  %v6890_v58 = vpop.xlane.xlu2 %6889  ;;  %v6939_v7 = vmul.f32 1.442695, %v6922_v33 }
 0x74c   : > { %v4669_v21 = vmul.f32 %v12798_v41, %v4554_v63  ;;  %v4559_v10 = vmul.f32 %v9706_v13, %v4558_v35  ;;  %v6921_v4 = vsub.f32 %v12795_v5, %v6890_v58 }
 0x74e   : > { %8538 = vst [vmem:[%s10960_s7 + $0x240] sm:$0xff] %v4669_v21  ;;  %v4560_v37 = vadd.f32 %v9706_v13, %v4559_v10  ;;  %v6937_v39 = vmul.f32 1.442695, %v6921_v4 }
 0x750   : > { %v4564_v3 = vsel %vm4563_vm15, %v9706_v13, %v4560_v37  ;;  %v12962_v13 = vpop.f32.mrf.mxu1 }
 0x751   : > { %v4569_v56 = vsel %vm4566_vm12, %v4568_v1, %v4564_v3 }
 0x752   : > { %v4670_v41 = vmul.f32 %v12804_v47, %v4569_v56  ;;  %v9209_v47 = vld [vmem:[#allocation2 + $0xa0] sm:$0xf0] }
 0x753   : > { %v8813_v48 = vor.u32 %v9209_v47, %v8812_v52 }
 0x754   : > { %6476 = vrot.lane.b32.xlu0 %v8817_v57, %s10064_s13  ;;  %7334 = vrot.lane.b32.xlu1 %v8933_v11, %s10065_s17  ;;  %8539 = vst [vmem:[%s10960_s7 + $0x248] sm:$0xff] %v4670_v41  ;;  %v4698_v27 = vpack.c.bf16 %v4670_v41, %v4669_v21  ;;  %v6061_v57 = vsub.f32 %v12811_v15, %v6030_v12 }
 0x756   : > { %4794 = vmatmul.bf16.gmra.mxu0 %v4698_v27  ;;  %v6077_v59 = vmul.f32 1.442695, %v6061_v57 }
 0x758   : > { %v12973_v32 = vpop.f32.mrf.mxu1 }
 0x75b   : > { %7336 = vrot.lane.b32.xlu2 %v8937_v20, %s10065_s17 }
 0x75c   : > { %7332 = vrot.lane.b32.xlu1 %v8929_v51, %s10065_s17 }
 0x764   : > { %6474 = vrot.lane.b32.xlu1 %v8813_v48, %s10064_s13 }
 0x76d   : > { %v4412_v18 = vpop.xlane.xlu1 %4411 }
 0x76e   : > { %9707 = vrcp.f32 %v4412_v18  ;;  %v4597_v54 = vand.u32 2147483648, %v4412_v18  ;;  %v4595_v29 = vand.u32 2147483647, %v4412_v18  ;;  %vm4591_vm1 = vweird.f32 %v4412_v18 }
 0x770   : > { %v4598_v44 = vor.u32 1.1754944e-38, %v4597_v54  ;;  %vm4596_vm3 = vcmp.eq.f32.partialorder %v4595_v29, 8.507059e+37 }
 0x774   : > { %v9708_v25 = vpop.eup %9707 }
 0x775   : > { %v4587_v34 = vmul.f32 %v9708_v25, %v4412_v18  ;;  %vm4592_vm0 = vweird.f32 %v9708_v25 }
 0x776   : > { %vm4593_vm2 = vmor %vm4591_vm1, %vm4592_vm0 }
 0x777   : > { %v4588_v17 = vsub.f32 1.0, %v4587_v34 }
 0x779   : > { %v4589_v61 = vmul.f32 %v9708_v25, %v4588_v17 }
 0x77b   : > { %v5270_v35 = vpop.xlane.xlu0 %5269  ;;  %v4590_v63 = vadd.f32 %v9708_v25, %v4589_v61 }
 0x77c   : > { %9709 = vrcp.f32 %v5270_v35  ;;  %v5440_v41 = vand.u32 2147483647, %v5270_v35  ;;  %vm5436_vm5 = vweird.f32 %v5270_v35 }
 0x77d   : > { %v4594_v21 = vsel %vm4593_vm2, %v9708_v25, %v4590_v63  ;;  %9711 = vpow2.f32 %v6939_v7 }
 0x77e   : > { %6901 = vmax.xlane.f32.xlu0 %v12962_v13  ;;  %v4599_v10 = vsel %vm4596_vm3, %v4598_v44, %v4594_v21  ;;  %9713 = vpow2.f32 %v6937_v39  ;;  %vm5441_vm8 = vcmp.eq.f32.partialorder %v5440_v41, 8.507059e+37  ;;  %v9208_v41 = vld [vmem:[#allocation2 + $0x88] sm:$0xf0] }
 0x77f   : > { %v12967_v30 = vmul.f32 %v12825_v42, %v4599_v10  ;;  %v5442_v42 = vand.u32 2147483648, %v5270_v35 }
 0x781   : > { %8541 = vst [vmem:[%s10960_s7 + $0x258] sm:$0xff] %v12967_v30  ;;  %v5443_v38 = vor.u32 1.1754944e-38, %v5442_v42 }
 0x782   : > { %v9710_v0 = vpop.eup %9709 }
 0x783   : > { %v5432_v37 = vmul.f32 %v9710_v0, %v5270_v35  ;;  %v6032_v1 = vpop.xlane.xlu0 %6031  ;;  %v12976_v5 = vpop.eup %9711  ;;  %vm5437_vm4 = vweird.f32 %v9710_v0 }
 0x784   : > { %6903 = vmax.xlane.f32.xlu2 %v12973_v32  ;;  %vm5438_vm6 = vmor %vm5436_vm5, %vm5437_vm4  ;;  %v12982_v20 = vpop.eup %9713  ;;  %v6062_v18 = vsub.f32 %v12840_v46, %v6032_v1 }
 0x785   : > { %v5433_v3 = vsub.f32 1.0, %v5432_v37 }
 0x786   : > { %6971 = vadd.xlane.f32.xlu0 %v12976_v5  ;;  %v5272_v11 = vpop.xlane.xlu2 %5271  ;;  %v6079_v17 = vmul.f32 1.442695, %v6062_v18 }
 0x787   : > { %v5434_v56 = vmul.f32 %v9710_v0, %v5433_v3  ;;  %9715 = vrcp.f32 %v5272_v11  ;;  %v5457_v34 = vand.u32 2147483648, %v5272_v11  ;;  %vm5451_vm7 = vweird.f32 %v5272_v11 }
 0x788   : > { %9717 = vpow2.f32 %v6077_v59 }
 0x789   : > { %v5435_v27 = vadd.f32 %v9710_v0, %v5434_v56  ;;  %v5458_v46 = vor.u32 1.1754944e-38, %v5457_v34  ;;  %v8808_v56 = vld [vmem:[#allocation2 + $0x80] sm:$0xf] }
 0x78b   : > { %v12980_v8 = vpop.xlane.xlu0 %6893  ;;  %v5439_v40 = vsel %vm5438_vm6, %v9710_v0, %v5435_v27 }
 0x78c   : > { %6041 = vmax.xlane.f32.xlu2 %v12971_v14  ;;  %v5444_v15 = vsel %vm5441_vm8, %v5443_v38, %v5439_v40 }
 0x78d   : > { %v9716_v51 = vpop.eup %9715  ;;  %v5531_v52 = vmul.f32 %v12830_v49, %v5444_v15  ;;  %v5455_v49 = vand.u32 2147483647, %v5272_v11 }
 0x78e   : > { %v5447_v47 = vmul.f32 %v9716_v51, %v5272_v11  ;;  %6043 = vmax.xlane.f32.xlu0 %v12985_v16  ;;  %v4410_v48 = vpop.xlane.xlu2 %4409  ;;  %v12989_v12 = vpop.xlane.xlu1 %5273  ;;  %6969 = vadd.xlane.f32.xlu1 %v12982_v20  ;;  %vm5452_vm9 = vweird.f32 %v9716_v51 }
 0x78f   : > { %9719 = vrcp.f32 %v4410_v48  ;;  %8660 = vst [vmem:[%s10960_s7 + $0x2d0] sm:$0xff] %v5531_v52  ;;  %v12997_v61 = vpop.eup %9717  ;;  %vm5453_vm10 = vmor %vm5451_vm7, %vm5452_vm9  ;;  %vm5456_vm11 = vcmp.eq.f32.partialorder %v5455_v49, 8.507059e+37  ;;  %v4580_v37 = vand.u32 2147483647, %v4410_v48  ;;  %v4582_v1 = vand.u32 2147483648, %v4410_v48 }
 0x790   : > { %v5448_v25 = vsub.f32 1.0, %v5447_v47  ;;  %9721 = vrcp.f32 %v12989_v12  ;;  %vm4576_vm14 = vweird.f32 %v4410_v48  ;;  %v5472_v27 = vand.u32 2147483648, %v12989_v12 }
 0x791   : > { %v5470_v15 = vand.u32 2147483647, %v12989_v12  ;;  %vm5466_vm0 = vweird.f32 %v12989_v12  ;;  %vm4581_vm1 = vcmp.eq.f32.partialorder %v4580_v37, 8.507059e+37  ;;  %v4583_v18 = vor.u32 1.1754944e-38, %v4582_v1 }
 0x792   : > { %v5449_v33 = vmul.f32 %v9716_v51, %v5448_v25 }
 0x793   : > { %v12995_v54 = vpop.xlane.xlu0 %5275  ;;  %vm5471_vm4 = vcmp.eq.f32.partialorder %v5470_v15, 8.507059e+37 }
 0x794   : > { %v5450_v29 = vadd.f32 %v9716_v51, %v5449_v33  ;;  %9723 = vrcp.f32 %v12995_v54  ;;  %vm5481_vm5 = vweird.f32 %v12995_v54 }
 0x795   : > { %v9720_v58 = vpop.eup %9719  ;;  %9725 = vpow2.f32 %v6079_v17 }
 0x796   : > { %v4572_v7 = vmul.f32 %v9720_v58, %v4410_v48  ;;  %v13000_v35 = vpop.xlane.xlu2 %6895  ;;  %6109 = vadd.xlane.f32.xlu1 %v12997_v61  ;;  %v13003_v63 = vpop.xlane.xlu1 %6035  ;;  %v5454_v44 = vsel %vm5453_vm10, %v9716_v51, %v5450_v29  ;;  %vm4577_vm13 = vweird.f32 %v9720_v58  ;;  %v8809_v48 = vor.u32 %v9208_v41, %v8808_v56  ;;  %v9207_v41 = vld [vmem:[#allocation2 + $0x70] sm:$0xf0] }
 0x797   : > { %v9722_v21 = vpop.eup %9721  ;;  %v5459_v4 = vsel %vm5456_vm11, %v5458_v46, %v5454_v44  ;;  %vm13019_vm12 = vmor %vm4576_vm14, %vm4577_vm13  ;;  %v5487_v29 = vand.u32 2147483648, %v12995_v54  ;;  %v8924_v46 = vld [vmem:[#allocation2 + $0x68] sm:$0xf]  ;;  %v5473_v44 = vor.u32 1.1754944e-38, %v5472_v27 }
 0x798   : > { %v4573_v10 = vsub.f32 1.0, %v4572_v7  ;;  %v5462_v0 = vmul.f32 %v9722_v21, %v12989_v12  ;;  %v5532_v39 = vmul.f32 %v12849_v2, %v5459_v4  ;;  %vm5467_vm15 = vweird.f32 %v9722_v21  ;;  %v9231_v7 = vld [vmem:[#allocation2 + $0x70] sm:$0xf0] }
 0x799   : > { %vm5468_vm3 = vmor %vm5466_vm0, %vm5467_vm15  ;;  %v5485_v4 = vand.u32 2147483647, %v12995_v54  ;;  %v8925_v12 = vor.u32 %v9231_v7, %v8924_v46 }
 0x79a   : > { %v13007_v3 = vpop.eup %9723  ;;  %v4574_v57 = vmul.f32 %v9720_v58, %v4573_v10  ;;  %v5463_v42 = vsub.f32 1.0, %v5462_v0  ;;  %8661 = vst [vmem:[%s10960_s7 + $0x2d8] sm:$0xff] %v5532_v39  ;;  %v5559_v11 = vpack.c.bf16 %v5532_v39, %v5531_v52  ;;  %v9230_v52 = vld [vmem:[#allocation2 + $0x58] sm:$0xf0] }
 0x79b   : > { %v5477_v59 = vmul.f32 %v13007_v3, %v12995_v54  ;;  %v13013_v38 = vpop.xlane.xlu0 %4413  ;;  %v13016_v51 = vpop.eup %9725  ;;  %vm5482_vm2 = vweird.f32 %v13007_v3  ;;  %vm5486_vm8 = vcmp.eq.f32.partialorder %v5485_v4, 8.507059e+37 }
 0x79c   : > { %v4575_v2 = vadd.f32 %v9720_v58, %v4574_v57  ;;  %v5464_v40 = vmul.f32 %v9722_v21, %v5463_v42  ;;  %5659 = vmatmul.bf16.gmra.mxu2 %v5559_v11  ;;  %9727 = vrcp.f32 %v13013_v38  ;;  %vm13042_vm6 = vmor %vm5481_vm5, %vm5482_vm2  ;;  %v4612_v15 = vand.u32 2147483648, %v13013_v38 }
 0x79d   : > { %v5478_v47 = vsub.f32 1.0, %v5477_v59  ;;  %vm4606_vm7 = vweird.f32 %v13013_v38 }
 0x79e   : > { %v13025_v25 = vpop.xlane.xlu2 %6033  ;;  %6111 = vadd.xlane.f32.xlu1 %v13016_v51  ;;  %v13028_v34 = vpop.xlane.xlu1 %6897  ;;  %v4579_v33 = vsel %vm13019_vm12, %v9720_v58, %v4575_v2  ;;  %v5465_v49 = vadd.f32 %v9722_v21, %v5464_v40 }
 0x79f   : > { %v5479_v17 = vmul.f32 %v13007_v3, %v5478_v47  ;;  %v4584_v10 = vsel %vm4581_vm1, %v4583_v18, %v4579_v33 }
 0x7a0   : > { %v5469_v0 = vsel %vm5468_vm3, %v9722_v21, %v5465_v49  ;;  %v4671_v39 = vmul.f32 %v12858_v62, %v4584_v10  ;;  %v5488_v21 = vor.u32 1.1754944e-38, %v5487_v29 }
 0x7a1   : > { %v5480_v58 = vadd.f32 %v13007_v3, %v5479_v17  ;;  %v5474_v37 = vsel %vm5471_vm4, %v5473_v44, %v5469_v0  ;;  %v4613_v17 = vor.u32 1.1754944e-38, %v4612_v15  ;;  %v8800_v0 = vld [vmem:[#allocation2 + $0x50] sm:$0xf] }
 0x7a2   : > { %6472 = vrot.lane.b32.xlu0 %v8809_v48, %s10064_s13  ;;  %v5533_v57 = vmul.f32 %v12860_v24, %v5474_v37  ;;  %v9728_v42 = vpop.eup %9727  ;;  %8540 = vst [vmem:[%s10960_s7 + $0x250] sm:$0xff] %v4671_v39  ;;  %v4699_v54 = vpack.c.bf16 %v12967_v30, %v4671_v39  ;;  %v8804_v24 = vld [vmem:[#allocation2 + $0x68] sm:$0xf]  ;;  %v4610_v48 = vand.u32 2147483647, %v13013_v38 }
 0x7a3   : > { %v13048_v11 = vpop.xlane.xlu0 %6899  ;;  %v5484_v62 = vsel %vm13042_vm6, %v13007_v3, %v5480_v58  ;;  %v4602_v56 = vmul.f32 %v9728_v42, %v13013_v38  ;;  %v8920_v3 = vld [vmem:[#allocation2 + $0x50] sm:$0xf]  ;;  %vm4607_vm9 = vweird.f32 %v9728_v42  ;;  %v8805_v18 = vor.u32 %v9207_v41, %v8804_v24  ;;  %v9206_v58 = vld [vmem:[#allocation2 + $0x58] sm:$0xf0]  ;;  %v9229_v24 = vld [vmem:[#allocation2 + $0x40] sm:$0xf0] }
 0x7a4   : > { %7330 = vrot.lane.b32.xlu2 %v8925_v12, %s10065_s17  ;;  %8662 = vst [vmem:[%s10960_s7 + $0x2e0] sm:$0xff] %v5533_v57  ;;  %4799 = vmatmul.bf16.gmra.mxu0 %v4699_v54  ;;  %v5489_v27 = vsel %vm5486_vm8, %v5488_v21, %v5484_v62  ;;  %vm4608_vm10 = vmor %vm4606_vm7, %vm4607_vm9  ;;  %vm4611_vm11 = vcmp.eq.f32.partialorder %v4610_v48, 8.507059e+37  ;;  %v8916_v21 = vld [vmem:[#allocation2 + $0x38] sm:$0xf] }
 0x7a5   : > { %v4603_v59 = vsub.f32 1.0, %v4602_v56  ;;  %v5534_v30 = vmul.f32 %v12868_v26, %v5489_v27  ;;  %v8921_v26 = vor.u32 %v9230_v52, %v8920_v3  ;;  %v8917_v52 = vor.u32 %v9229_v24, %v8916_v21 }
 0x7a6   : > { %v4416_v2 = vpop.xlane.xlu2 %4415  ;;  %v13058_v40 = vpop.xlane.xlu1 %5279 }
 0x7a7   : > { %9729 = vrcp.f32 %v4416_v2  ;;  %v4604_v47 = vmul.f32 %v9728_v42, %v4603_v59  ;;  %8663 = vst [vmem:[%s10960_s7 + $0x2e8] sm:$0xff] %v5534_v30  ;;  %v5560_v49 = vpack.c.bf16 %v5534_v30, %v5533_v57  ;;  %v4627_v57 = vand.u32 2147483648, %v4416_v2 }
 0x7a8   : > { %9731 = vrcp.f32 %v13058_v40  ;;  %v4625_v62 = vand.u32 2147483647, %v4416_v2  ;;  %vm4621_vm14 = vweird.f32 %v4416_v2  ;;  %v5517_v30 = vand.u32 2147483648, %v13058_v40 }
 0x7a9   : > { %v4605_v33 = vadd.f32 %v9728_v42, %v4604_v47  ;;  %v4628_v3 = vor.u32 1.1754944e-38, %v4627_v57  ;;  %vm5511_vm1 = vweird.f32 %v13058_v40  ;;  %v8912_v57 = vld [vmem:[#allocation2 + $0x20] sm:$0xf] }
 0x7aa   : > { %6470 = vrot.lane.b32.xlu0 %v8805_v18, %s10064_s13  ;;  %vm4626_vm0 = vcmp.eq.f32.partialorder %v4625_v62, 8.507059e+37 }
 0x7ab   : > { %v13067_v29 = vpop.xlane.xlu0 %6037  ;;  %v4609_v46 = vsel %vm4608_vm10, %v9728_v42, %v4605_v33  ;;  %v8801_v42 = vor.u32 %v9206_v58, %v8800_v0 }
 0x7ac   : > { %5664 = vmatmul.bf16.gmra.mxu2 %v5560_v49  ;;  %7328 = vrot.lane.b32.xlu2 %v8921_v26, %s10065_s17  ;;  %v4614_v44 = vsel %vm4611_vm11, %v4613_v17, %v4609_v46  ;;  %v5518_v17 = vor.u32 1.1754944e-38, %v5517_v30 }
 0x7ad   : > { %v9730_v7 = vpop.eup %9729  ;;  %v13075_v39 = vmul.f32 %v12886_v60, %v4614_v44  ;;  %v5515_v60 = vand.u32 2147483647, %v13058_v40 }
 0x7ae   : > { %v4617_v4 = vmul.f32 %v9730_v7, %v4416_v2  ;;  %v13070_v10 = vpop.xlane.xlu2 %5277  ;;  %v13072_v38 = vpop.xlane.xlu1 %4417  ;;  %vm4622_vm13 = vweird.f32 %v9730_v7 }
 0x7af   : > { %v9732_v37 = vpop.eup %9731  ;;  %9733 = vrcp.f32 %v13070_v10  ;;  %8542 = vst [vmem:[%s10960_s7 + $0x260] sm:$0xff] %v13075_v39  ;;  %vm4623_vm15 = vmor %vm4621_vm14, %vm4622_vm13  ;;  %vm13092_vm2 = vcmp.eq.f32.partialorder %v5515_v60, 8.507059e+37  ;;  %v5500_v44 = vand.u32 2147483647, %v13070_v10  ;;  %v4640_v0 = vand.u32 2147483647, %v13072_v38 }
 0x7b0   : > { %v4618_v1 = vsub.f32 1.0, %v4617_v4  ;;  %v5507_v12 = vmul.f32 %v9732_v37, %v13058_v40  ;;  %9735 = vrcp.f32 %v13072_v38  ;;  %vm5512_vm12 = vweird.f32 %v9732_v37 }
 0x7b1   : > { %vm5513_vm3 = vmor %vm5511_vm1, %vm5512_vm12  ;;  %vm5496_vm5 = vweird.f32 %v13070_v10  ;;  %v4642_v62 = vand.u32 2147483648, %v13072_v38  ;;  %vm13115_vm9 = vcmp.eq.f32.partialorder %v5500_v44, 8.507059e+37  ;;  %vm4636_vm7 = vweird.f32 %v13072_v38 }
 0x7b2   : > { %v4619_v54 = vmul.f32 %v9730_v7, %v4618_v1  ;;  %v5508_v56 = vsub.f32 1.0, %v5507_v12  ;;  %vm4641_vm10 = vcmp.eq.f32.partialorder %v4640_v0, 8.507059e+37 }
 0x7b3   : > { %v13083_v41 = vpop.xlane.xlu0 %4419 }
 0x7b4   : > { %v4620_v27 = vadd.f32 %v9730_v7, %v4619_v54  ;;  %v5509_v59 = vmul.f32 %v9732_v37, %v5508_v56  ;;  %6468 = vrot.lane.b32.xlu2 %v8801_v42, %s10064_s13  ;;  %9737 = vrcp.f32 %v13083_v41  ;;  %v9228_v42 = vld [vmem:[#allocation2 + $0x28] sm:$0xf0]  ;;  %vm4651_vm14 = vweird.f32 %v13083_v41 }
 0x7b5   : > { %v9734_v15 = vpop.eup %9733 }
 0x7b6   : > { %v5510_v47 = vadd.f32 %v9732_v37, %v5509_v59  ;;  %v5492_v48 = vmul.f32 %v9734_v15, %v13070_v10  ;;  %v13089_v18 = vpop.xlane.xlu2 %6039  ;;  %v4624_v33 = vsel %vm4623_vm15, %v9730_v7, %v4620_v27  ;;  %v9736_v2 = vpop.eup %9735  ;;  %v5502_v7 = vand.u32 2147483648, %v13070_v10 }
 0x7b7   : > { %7326 = vrot.lane.b32.xlu1 %v8917_v52, %s10065_s17  ;;  %v4629_v26 = vsel %vm4626_vm0, %v4628_v3, %v4624_v33  ;;  %v4632_v4 = vmul.f32 %v9736_v2, %v13072_v38  ;;  %vm5497_vm4 = vweird.f32 %v9734_v15  ;;  %vm4637_vm6 = vweird.f32 %v9736_v2 }
 0x7b8   : > { %v5493_v46 = vsub.f32 1.0, %v5492_v48  ;;  %v4674_v40 = vmul.f32 %v12908_v50, %v4629_v26  ;;  %v5514_v58 = vsel %vm5513_vm3, %v9732_v37, %v5510_v47  ;;  %vm13111_vm8 = vmor %vm5496_vm5, %vm5497_vm4  ;;  %v5503_v10 = vor.u32 1.1754944e-38, %v5502_v7  ;;  %v9205_v7 = vld [vmem:[#allocation2 + $0x40] sm:$0xf0] }
 0x7b9   : > { %v4633_v12 = vsub.f32 1.0, %v4632_v4  ;;  %v5519_v21 = vsel %vm13092_vm2, %v5518_v17, %v5514_v58  ;;  %vm4638_vm11 = vmor %vm4636_vm7, %vm4637_vm6  ;;  %v4643_v47 = vor.u32 1.1754944e-38, %v4642_v62  ;;  %v4655_v48 = vand.u32 2147483647, %v13083_v41  ;;  %v8796_v4 = vld [vmem:[#allocation2 + $0x38] sm:$0xf] }
 0x7ba   : > { %v5494_v1 = vmul.f32 %v9734_v15, %v5493_v46  ;;  %v9738_v54 = vpop.eup %9737  ;;  %8543 = vst [vmem:[%s10960_s7 + $0x268] sm:$0xff] %v4674_v40  ;;  %v4700_v56 = vpack.c.bf16 %v4674_v40, %v13075_v39  ;;  %v5536_v50 = vmul.f32 %v12916_v23, %v5519_v21  ;;  %v8913_v39 = vor.u32 %v9228_v42, %v8912_v57 }
 0x7bb   : > { %v4634_v24 = vmul.f32 %v9736_v2, %v4633_v12  ;;  %v4647_v60 = vmul.f32 %v9738_v54, %v13083_v41  ;;  %v4657_v33 = vand.u32 2147483648, %v13083_v41  ;;  %vm4652_vm13 = vweird.f32 %v9738_v54 }
 0x7bc   : > { %v5495_v37 = vadd.f32 %v9734_v15, %v5494_v1  ;;  %4804 = vmatmul.bf16.gmra.mxu0 %v4700_v56  ;;  %8665 = vst [vmem:[%s10960_s7 + $0x2f8] sm:$0xff] %v5536_v50  ;;  %vm4653_vm15 = vmor %vm4651_vm14, %vm4652_vm13  ;;  %vm4656_vm12 = vcmp.eq.f32.partialorder %v4655_v48, 8.507059e+37  ;;  %v8797_v1 = vor.u32 %v9205_v7, %v8796_v4 }
 0x7bd   : > { %v4635_v23 = vadd.f32 %v9736_v2, %v4634_v24  ;;  %v4648_v30 = vsub.f32 1.0, %v4647_v60  ;;  %v4658_v40 = vor.u32 1.1754944e-38, %v4657_v33  ;;  %v6063_v24 = vsub.f32 %v12855_v22, %v13025_v25 }
 0x7be   : > { %v7337_v3 = vpop.permute.xlu2 %7336  ;;  %v5499_v52 = vsel %vm13111_vm8, %v9734_v15, %v5495_v37  ;;  %v6925_v22 = vsub.f32 %v12883_v6, %v13028_v34 }
 0x7bf   : > { %7324 = vrot.lane.b32.xlu1 %v8913_v39, %s10065_s17  ;;  %7346 = vmatpush.bf16.msra.mxu2 %v7337_v3  ;;  %v5504_v38 = vsel %vm13115_vm9, %v5503_v10, %v5499_v52  ;;  %v4649_v49 = vmul.f32 %v9738_v54, %v4648_v30  ;;  %v4639_v17 = vsel %vm4638_vm11, %v9736_v2, %v4635_v23  ;;  %v6081_v60 = vmul.f32 1.442695, %v6063_v24  ;;  %v8908_v30 = vld [vmem:[#allocation2 + $0x8] sm:$0xf]  ;;  %v9227_v3 = vld [vmem:[#allocation2 + $0x10] sm:$0xf0] }
 0x7c0   : > { %v5535_v26 = vmul.f32 %v12932_v43, %v5504_v38  ;;  %v4644_v46 = vsel %vm4641_vm10, %v4643_v47, %v4639_v17  ;;  %v8909_v52 = vor.u32 %v9227_v3, %v8908_v30  ;;  %v6945_v47 = vmul.f32 1.442695, %v6925_v22 }
 0x7c1   : > { %v4650_v15 = vadd.f32 %v9738_v54, %v4649_v49  ;;  %v4675_v0 = vmul.f32 %v12934_v36, %v4644_v46  ;;  %v6924_v36 = vsub.f32 %v12862_v53, %v13000_v35  ;;  %v6923_v53 = vsub.f32 %v12847_v31, %v12980_v8  ;;  %v8792_v31 = vld [vmem:[#allocation2 + $0x20] sm:$0xf]  ;;  %v9204_v8 = vld [vmem:[#allocation2 + $0x28] sm:$0xf0]  ;;  %v8788_v49 = vld [vmem:[#allocation2 + $0x8] sm:$0xf] }
 0x7c2   : > { %8664 = vst [vmem:[%s10960_s7 + $0x2f0] sm:$0xff] %v5535_v26  ;;  %v5561_v44 = vpack.c.bf16 %v5536_v50, %v5535_v26  ;;  %v8793_v10 = vor.u32 %v9204_v8, %v8792_v31  ;;  %v9203_v26 = vld [vmem:[#allocation2 + $0x10] sm:$0xf0]  ;;  %v6926_v17 = vsub.f32 %v12904_v19, %v13048_v11  ;;  %v6064_v22 = vsub.f32 %v12876_v9, %v13003_v63 }
 0x7c3   : > { %v4654_v58 = vsel %vm4653_vm15, %v9738_v54, %v4650_v15  ;;  %8544 = vst [vmem:[%s10960_s7 + $0x270] sm:$0xff] %v4675_v0  ;;  %v6943_v21 = vmul.f32 1.442695, %v6924_v36  ;;  %v13138_v54 = vpop.f32.mrf.mxu1  ;;  %v6941_v37 = vmul.f32 1.442695, %v6923_v53  ;;  %v8789_v15 = vor.u32 %v9203_v26, %v8788_v49 }
 0x7c4   : > { %5669 = vmatmul.bf16.gmra.mxu2 %v5561_v44  ;;  %v4659_v43 = vsel %vm4656_vm12, %v4658_v40, %v4654_v58  ;;  %v6947_v4 = vmul.f32 1.442695, %v6926_v17 }
 0x7c5   : > { %v4676_v57 = vmul.f32 %v12943_v45, %v4659_v43  ;;  %9739 = vpow2.f32 %v6943_v21  ;;  %v13141_v45 = vpop.f32.mrf.mxu3 }
 0x7c6   : > { %v6477_v2 = vpop.permute.xlu0 %6476  ;;  %v7335_v12 = vpop.permute.xlu1 %7334  ;;  %9741 = vpow2.f32 %v6941_v37 }
 0x7c7   : > { %6486 = vmatpush.bf16.msra.mxu0 %v6477_v2  ;;  %6466 = vrot.lane.b32.xlu1 %v8797_v1, %s10064_s13  ;;  %8545 = vst [vmem:[%s10960_s7 + $0x278] sm:$0xff] %v4676_v57  ;;  %v4701_v41 = vpack.c.bf16 %v4676_v57, %v4675_v0  ;;  %9743 = vpow2.f32 %v6081_v60 }
 0x7c8   : > { %7347 = vmatpush.bf16.msra.mxu2 %v7335_v12 }
 0x7cb   : > { %v13143_v56 = vpop.eup %9739  ;;  %v13145_v50 = vpop.f32.mrf.mxu1 }
 0x7cc   : > { %4809 = vmatmul.bf16.gmra.mxu0 %v4701_v41  ;;  %v13157_v27 = vpop.eup %9741 }
 0x7cd   : > { %v13151_v35 = vpop.f32.mrf.mxu3  ;;  %v13164_v23 = vpop.eup %9743 }
 0x7ce   : > { %v7333_v42 = vpop.permute.xlu1 %7332 }
 0x7cf   : > { %7348 = vmatpush.bf16.msra.mxu2 %v7333_v42 }
 0x7d3   : > { %v13173_v38 = vpop.f32.mrf.mxu1 }
 0x7d4   : > { %6905 = vmax.xlane.f32.xlu0 %v13138_v54 }
 0x7d5   : > { %v13199_v17 = vpop.f32.mrf.mxu3 }
 0x7d6   : > { %v6475_v62 = vpop.permute.xlu1 %6474 }
 0x7d7   : > { %6487 = vmatpush.bf16.msra.mxu0 %v6475_v62 }
 0x7dc   : > { %6975 = vadd.xlane.f32.xlu0 %v13143_v56 }
 0x7dd   : > { %6907 = vmax.xlane.f32.xlu2 %v13145_v50 }
 0x7e4   : > { %6047 = vmax.xlane.f32.xlu0 %v13151_v35 }
 0x7e5   : > { %6045 = vmax.xlane.f32.xlu2 %v13141_v45 }
 0x7f1   : > { %v13159_v59 = vpop.xlane.xlu0 %6901  ;;  %6973 = vadd.xlane.f32.xlu1 %v13157_v27 }
 0x7f7   : > { %v13162_v39 = vpop.xlane.xlu2 %6903 }
 0x7f8   : > { %6464 = vrot.lane.b32.xlu0 %v8793_v10, %s10064_s13 }
 0x7f9   : > { %v6972_v25 = vpop.xlane.xlu0 %6971  ;;  %6113 = vadd.xlane.f32.xlu1 %v13164_v23 }
 0x7fa   : > { %9745 = vrcp.f32 %v6972_v25  ;;  %v7027_v44 = vand.u32 2147483648, %v6972_v25  ;;  %v7025_v0 = vand.u32 2147483647, %v6972_v25  ;;  %vm7021_vm1 = vweird.f32 %v6972_v25 }
 0x7fb   : > { %9747 = vpow2.f32 %v6945_v47 }
 0x7fc   : > { %v7028_v11 = vor.u32 1.1754944e-38, %v7027_v44  ;;  %vm7026_vm3 = vcmp.eq.f32.partialorder %v7025_v0, 8.507059e+37 }
 0x7fd   : > { %7322 = vrot.lane.b32.xlu2 %v8909_v52, %s10065_s17 }
 0x7ff   : > { %v13171_v48 = vpop.xlane.xlu2 %6041 }
 0x800   : > { %v9746_v33 = vpop.eup %9745 }
 0x801   : > { %v7017_v6 = vmul.f32 %v9746_v33, %v6972_v25  ;;  %6909 = vmax.xlane.f32.xlu1 %v13173_v38  ;;  %v6970_v34 = vpop.xlane.xlu1 %6969  ;;  %vm7022_vm0 = vweird.f32 %v9746_v33  ;;  %v13179_v40 = vpop.eup %9747 }
 0x802   : > { %9749 = vrcp.f32 %v6970_v34  ;;  %vm7023_vm2 = vmor %vm7021_vm1, %vm7022_vm0  ;;  %v13185_v42 = vpop.xlane.xlu0 %6043  ;;  %v7012_v21 = vand.u32 2147483648, %v6970_v34  ;;  %v7010_v53 = vand.u32 2147483647, %v6970_v34  ;;  %vm7006_vm5 = vweird.f32 %v6970_v34 }
 0x803   : > { %v7018_v46 = vsub.f32 1.0, %v7017_v6  ;;  %9751 = vpow2.f32 %v6947_v4  ;;  %v6083_v6 = vmul.f32 1.442695, %v6064_v22  ;;  %v6065_v4 = vsub.f32 %v12925_v55, %v13067_v29 }
 0x804   : > { %v7013_v8 = vor.u32 1.1754944e-38, %v7012_v21  ;;  %vm7011_vm8 = vcmp.eq.f32.partialorder %v7010_v53, 8.507059e+37  ;;  %v6068_v22 = vsub.f32 %v12985_v16, %v13185_v42 }
 0x805   : > { %v7019_v7 = vmul.f32 %v9746_v33, %v7018_v46  ;;  %6462 = vrot.lane.b32.xlu2 %v8789_v15, %s10064_s13  ;;  %v6066_v15 = vsub.f32 %v12947_v28, %v13089_v18  ;;  %v6085_v28 = vmul.f32 1.442695, %v6065_v4 }
 0x807   : > { %v7020_v58 = vadd.f32 %v9746_v33, %v7019_v7  ;;  %v7331_v1 = vpop.permute.xlu2 %7330 }
 0x808   : > { %v9750_v19 = vpop.eup %9749  ;;  %7349 = vmatpush.bf16.msra.mxu2 %v7331_v1 }
 0x809   : > { %v7024_v43 = vsel %vm7023_vm2, %v9746_v33, %v7020_v58  ;;  %v7002_v2 = vmul.f32 %v9750_v19, %v6970_v34  ;;  %6977 = vadd.xlane.f32.xlu1 %v13179_v40  ;;  %v6110_v12 = vpop.xlane.xlu1 %6109  ;;  %vm7007_vm4 = vweird.f32 %v9750_v19  ;;  %v13189_v37 = vpop.eup %9751 }
 0x80a   : > { %v7029_v57 = vsel %vm7026_vm3, %v7028_v11, %v7024_v43  ;;  %9753 = vrcp.f32 %v6110_v12  ;;  %vm7008_vm6 = vmor %vm7006_vm5, %vm7007_vm4  ;;  %v6152_v47 = vand.u32 2147483648, %v6110_v12  ;;  %v6150_v26 = vand.u32 2147483647, %v6110_v12 }
 0x80b   : > { %v13183_v41 = vmul.f32 %v12976_v5, %v7029_v57  ;;  %v7003_v36 = vsub.f32 1.0, %v7002_v2  ;;  %vm6146_vm7 = vweird.f32 %v6110_v12  ;;  %v6087_v43 = vmul.f32 1.442695, %v6066_v15  ;;  %v13211_v2 = vpop.f32.mrf.mxu1 }
 0x80c   : > { %v6153_v9 = vor.u32 1.1754944e-38, %v6152_v47  ;;  %vm6151_vm11 = vcmp.eq.f32.partialorder %v6150_v26, 8.507059e+37 }
 0x80d   : > { %8891 = vst [vmem:[%s10960_s7 + $0x388] sm:$0xff] %v13183_v41  ;;  %v7004_v62 = vmul.f32 %v9750_v19, %v7003_v36  ;;  %v6927_v36 = vsub.f32 %v12962_v13, %v13159_v59  ;;  %v6928_v59 = vsub.f32 %v12973_v32, %v13162_v39  ;;  %v6067_v32 = vsub.f32 %v12971_v14, %v13171_v48 }
 0x80e   : > { %v6091_v39 = vmul.f32 1.442695, %v6068_v22 }
 0x80f   : > { %v7005_v24 = vadd.f32 %v9750_v19, %v7004_v62  ;;  %v7329_v60 = vpop.permute.xlu2 %7328 }
 0x810   : > { %v9754_v31 = vpop.eup %9753  ;;  %7350 = vmatpush.bf16.msra.mxu2 %v7329_v60 }
 0x811   : > { %v7009_v5 = vsel %vm7008_vm6, %v9750_v19, %v7005_v24  ;;  %v6142_v10 = vmul.f32 %v9754_v31, %v6110_v12  ;;  %6979 = vadd.xlane.f32.xlu1 %v13189_v37  ;;  %v6112_v30 = vpop.xlane.xlu1 %6111  ;;  %vm6147_vm9 = vweird.f32 %v9754_v31  ;;  %v13213_v12 = vpop.f32.mrf.mxu3  ;;  %v6949_v24 = vmul.f32 1.442695, %v6927_v36 }
 0x812   : > { %v7014_v3 = vsel %vm7011_vm8, %v7013_v8, %v7009_v5  ;;  %9755 = vrcp.f32 %v6112_v30  ;;  %vm6148_vm10 = vmor %vm6146_vm7, %vm6147_vm9  ;;  %v6167_v58 = vand.u32 2147483648, %v6112_v30  ;;  %v6165_v11 = vand.u32 2147483647, %v6112_v30 }
 0x813   : > { %v13195_v25 = vmul.f32 %v12982_v20, %v7014_v3  ;;  %v6143_v52 = vsub.f32 1.0, %v6142_v10  ;;  %9757 = vpow2.f32 %v6083_v6  ;;  %vm6161_vm14 = vweird.f32 %v6112_v30  ;;  %v13228_v60 = vpop.f32.mrf.mxu1 }
 0x814   : > { %v6473_v33 = vpop.permute.xlu0 %6472  ;;  %v6168_v55 = vor.u32 1.1754944e-38, %v6167_v58  ;;  %vm6166_vm12 = vcmp.eq.f32.partialorder %v6165_v11, 8.507059e+37  ;;  %9759 = vpow2.f32 %v6087_v43  ;;  %v6951_v3 = vmul.f32 1.442695, %v6928_v59  ;;  %v13282_v11 = vpop.f32.mrf.mxu2 }
 0x815   : > { %8890 = vst [vmem:[%s10960_s7 + $0x380] sm:$0xff] %v13195_v25  ;;  %v6144_v49 = vmul.f32 %v9754_v31, %v6143_v52  ;;  %6488 = vmatpush.bf16.msra.mxu0 %v6473_v33  ;;  %9761 = vpow2.f32 %v6085_v28  ;;  %v7274_v53 = vpack.c.bf16 %v13183_v41, %v13195_v25 }
 0x816   : > { %9763 = vpow2.f32 %v6949_v24 }
 0x817   : > { %v6145_v34 = vadd.f32 %v9754_v31, %v6144_v49  ;;  %9765 = vpow2.f32 %v6951_v3  ;;  %v6089_v49 = vmul.f32 1.442695, %v6067_v32 }
 0x818   : > { %v9756_v46 = vpop.eup %9755  ;;  %9767 = vpow2.f32 %v6091_v39 }
 0x819   : > { %v6149_v20 = vsel %vm6148_vm10, %v9754_v31, %v6145_v34  ;;  %v6157_v63 = vmul.f32 %v9756_v46, %v6112_v30  ;;  %6049 = vmax.xlane.f32.xlu1 %v13199_v17  ;;  %vm6162_vm13 = vweird.f32 %v9756_v46  ;;  %v13215_v29 = vpop.eup %9757  ;;  %9769 = vpow2.f32 %v6089_v49 }
 0x81a   : > { %v6154_v44 = vsel %vm6151_vm11, %v6153_v9, %v6149_v20  ;;  %vm6163_vm15 = vmor %vm6161_vm14, %vm6162_vm13  ;;  %v13230_v31 = vpop.eup %9759 }
 0x81b   : > { %v13207_v7 = vmul.f32 %v12997_v61, %v6154_v44  ;;  %v6158_v0 = vsub.f32 1.0, %v6157_v63  ;;  %v6469_v61 = vpop.permute.xlu2 %6468  ;;  %v13232_v8 = vpop.eup %9761 }
 0x81c   : > { %v6471_v1 = vpop.permute.xlu0 %6470  ;;  %v13241_v5 = vpop.eup %9763 }
 0x81d   : > { %8770 = vst [vmem:[%s10960_s7 + $0x300] sm:$0xff] %v13207_v7  ;;  %v6159_v19 = vmul.f32 %v9756_v46, %v6158_v0  ;;  %6489 = vmatpush.bf16.msra.mxu0 %v6471_v1  ;;  %v13243_v10 = vpop.f32.mrf.mxu1  ;;  %v13258_v16 = vpop.eup %9765 }
 0x81e   : > { %v13263_v26 = vpop.eup %9767  ;;  %v13296_v32 = vpop.f32.mrf.mxu2 }
 0x81f   : > { %v6160_v18 = vadd.f32 %v9756_v46, %v6159_v19  ;;  %v13267_v14 = vpop.eup %9769 }
 0x821   : > { %v6164_v57 = vsel %vm6163_vm15, %v9756_v46, %v6160_v18  ;;  %6490 = vmatpush.bf16.msra.mxu0 %v6469_v61  ;;  %6051 = vmax.xlane.f32.xlu1 %v13213_v12 }
 0x822   : > { %v6169_v21 = vsel %vm6166_vm12, %v6168_v55, %v6164_v57  ;;  %6115 = vadd.xlane.f32.xlu0 %v13215_v29 }
 0x823   : > { %v13222_v62 = vmul.f32 %v13016_v51, %v6169_v21  ;;  %v13236_v51 = vpop.f32.mrf.mxu3 }
 0x825   : > { %8771 = vst [vmem:[%s10960_s7 + $0x308] sm:$0xff] %v13222_v62  ;;  %v6414_v52 = vpack.c.bf16 %v13222_v62, %v13207_v7  ;;  %v13261_v42 = vpop.f32.mrf.mxu1 }
 0x829   : > { %v7327_v13 = vpop.permute.xlu1 %7326  ;;  %6119 = vadd.xlane.f32.xlu1 %v13230_v31 }
 0x82a   : > { %6117 = vadd.xlane.f32.xlu0 %v13232_v8  ;;  %7351 = vmatpush.bf16.msra.mxu2 %v7327_v13 }
 0x82b   : > { %v13254_v47 = vpop.f32.mrf.mxu3 }
 0x82d   : > { %v13271_v46 = vpop.f32.mrf.mxu1 }
 0x82e   : > { %6911 = vmax.xlane.f32.xlu2 %v13211_v2 }
 0x831   : > { %v7325_v30 = vpop.permute.xlu1 %7324  ;;  %6981 = vadd.xlane.f32.xlu1 %v13241_v5 }
 0x832   : > { %6915 = vmax.xlane.f32.xlu0 %v13243_v10  ;;  %7352 = vmatpush.bf16.msra.mxu2 %v7325_v30 }
 0x833   : > { %v13274_v20 = vpop.f32.mrf.mxu3 }
 0x836   : > { %6913 = vmax.xlane.f32.xlu2 %v13228_v60 }
 0x839   : > { %v6467_v33 = vpop.permute.xlu1 %6466  ;;  %6055 = vmax.xlane.f32.xlu1 %v13254_v47 }
 0x83a   : > { %6053 = vmax.xlane.f32.xlu0 %v13236_v51  ;;  %6491 = vmatpush.bf16.msra.mxu0 %v6467_v33 }
 0x83e   : > { %6983 = vadd.xlane.f32.xlu2 %v13258_v16 }
 0x841   : > { %6917 = vmax.xlane.f32.xlu1 %v13261_v42 }
 0x842   : > { %6123 = vadd.xlane.f32.xlu0 %v13263_v26 }
 0x846   : > { %6121 = vadd.xlane.f32.xlu2 %v13267_v14 }
 0x847   : > { %v6906_v48 = vpop.xlane.xlu0 %6905 }
 0x848   : > { %v6929_v6 = vsub.f32 %v13138_v54, %v6906_v48 }
 0x84a   : > { %v6953_v34 = vmul.f32 1.442695, %v6929_v6 }
 0x84c   : > { %9771 = vpow2.f32 %v6953_v34 }
 0x84e   : > { %6919 = vmax.xlane.f32.xlu2 %v13271_v46 }
 0x84f   : > { %v6976_v9 = vpop.xlane.xlu0 %6975 }
 0x850   : > { %9773 = vrcp.f32 %v6976_v9  ;;  %v6908_v63 = vpop.xlane.xlu2 %6907  ;;  %v7057_v18 = vand.u32 2147483648, %v6976_v9  ;;  %v7055_v36 = vand.u32 2147483647, %v6976_v9  ;;  %vm7051_vm1 = vweird.f32 %v6976_v9 }
 0x851   : > { %v6930_v15 = vsub.f32 %v13145_v50, %v6908_v63  ;;  %v13285_v50 = vpop.f32.mrf.mxu3 }
 0x852   : > { %v13277_v44 = vpop.eup %9771  ;;  %vm7056_vm3 = vcmp.eq.f32.partialorder %v7055_v36, 8.507059e+37 }
 0x853   : > { %v6955_v4 = vmul.f32 1.442695, %v6930_v15  ;;  %6985 = vadd.xlane.f32.xlu0 %v13277_v44 }
 0x855   : > { %9775 = vpow2.f32 %v6955_v4 }
 0x856   : > { %v9774_v54 = vpop.eup %9773  ;;  %6057 = vmax.xlane.f32.xlu2 %v13274_v20 }
 0x857   : > { %v7047_v0 = vmul.f32 %v9774_v54, %v6976_v9  ;;  %v6048_v58 = vpop.xlane.xlu0 %6047  ;;  %vm7052_vm0 = vweird.f32 %v9774_v54 }
 0x858   : > { %v6070_v1 = vsub.f32 %v13151_v35, %v6048_v58  ;;  %v6046_v19 = vpop.xlane.xlu2 %6045  ;;  %vm7053_vm2 = vmor %vm7051_vm1, %vm7052_vm0 }
 0x859   : > { %v7048_v43 = vsub.f32 1.0, %v7047_v0  ;;  %v6069_v28 = vsub.f32 %v13141_v45, %v6046_v19  ;;  %v7058_v45 = vor.u32 1.1754944e-38, %v7057_v18 }
 0x85a   : > { %v6095_v55 = vmul.f32 1.442695, %v6070_v1 }
 0x85b   : > { %v13287_v61 = vpop.eup %9775  ;;  %v7049_v57 = vmul.f32 %v9774_v54, %v7048_v43  ;;  %v6093_v21 = vmul.f32 1.442695, %v6069_v28  ;;  %6059 = vmax.xlane.f32.xlu0 %v13285_v50 }
 0x85c   : > { %9777 = vpow2.f32 %v6095_v55  ;;  %6987 = vadd.xlane.f32.xlu1 %v13287_v61 }
 0x85d   : > { %v7050_v35 = vadd.f32 %v9774_v54, %v7049_v57  ;;  %9779 = vpow2.f32 %v6093_v21  ;;  %v13319_v21 = vpop.f32.mrf.mxu0 }
 0x85f   : > { %v7054_v24 = vsel %vm7053_vm2, %v9774_v54, %v7050_v35 }
 0x860   : > { %v7323_v13 = vpop.permute.xlu2 %7322  ;;  %v7059_v59 = vsel %vm7056_vm3, %v7058_v45, %v7054_v24 }
 0x861   : > { %7353 = vmatpush.bf16.msra.mxu2 %v7323_v13  ;;  %v7244_v30 = vmul.f32 %v13143_v56, %v7059_v59  ;;  %v13304_v56 = vpop.f32.mrf.mxu2 }
 0x862   : > { %v13292_v3 = vpop.eup %9777 }
 0x863   : > { %v13294_v22 = vpop.eup %9779  ;;  %6127 = vadd.xlane.f32.xlu2 %v13292_v3  ;;  %8893 = vst [vmem:[%s10960_s7 + $0x398] sm:$0xff] %v7244_v30 }
 0x864   : > { %v6974_v39 = vpop.xlane.xlu1 %6973  ;;  %7354 = vmatmul.bf16.vlgmr.msra.gmra.mxu2 %v7274_v53  ;;  %6125 = vadd.xlane.f32.xlu1 %v13294_v22 }
 0x865   : > { %9781 = vrcp.f32 %v6974_v39  ;;  %v7042_v63 = vand.u32 2147483648, %v6974_v39  ;;  %v7040_v4 = vand.u32 2147483647, %v6974_v39  ;;  %vm7036_vm5 = vweird.f32 %v6974_v39 }
 0x867   : > { %v7043_v25 = vor.u32 1.1754944e-38, %v7042_v63  ;;  %vm7041_vm8 = vcmp.eq.f32.partialorder %v7040_v4, 8.507059e+37 }
 0x868   : > { %v6463_v9 = vpop.permute.xlu2 %6462 }
 0x869   : > { %v13309_v0 = vpop.f32.mrf.mxu2 }
 0x86a   : > { %v6465_v33 = vpop.permute.xlu0 %6464 }
 0x86b   : > { %v9782_v49 = vpop.eup %9781  ;;  %6492 = vmatpush.bf16.msra.mxu0 %v6465_v33 }
 0x86c   : > { %v7032_v48 = vmul.f32 %v9782_v49, %v6974_v39  ;;  %v6114_v6 = vpop.xlane.xlu1 %6113  ;;  %vm7037_vm4 = vweird.f32 %v9782_v49 }
 0x86d   : > { %9783 = vrcp.f32 %v6114_v6  ;;  %vm7038_vm6 = vmor %vm7036_vm5, %vm7037_vm4  ;;  %v6182_v45 = vand.u32 2147483648, %v6114_v6  ;;  %vm6176_vm10 = vweird.f32 %v6114_v6 }
 0x86e   : > { %v7033_v34 = vsub.f32 1.0, %v7032_v48 }
 0x86f   : > { %6493 = vmatpush.bf16.msra.mxu0 %v6463_v9  ;;  %v6183_v48 = vor.u32 1.1754944e-38, %v6182_v45 }
 0x870   : > { %v7034_v15 = vmul.f32 %v9782_v49, %v7033_v34 }
 0x872   : > { %v7035_v41 = vadd.f32 %v9782_v49, %v7034_v15  ;;  %6494 = vmatmul.bf16.vlgmr.msra.gmra.mxu0 %v6414_v52  ;;  %v13314_v52 = vpop.f32.mrf.mxu2 }
 0x873   : > { %v9784_v28 = vpop.eup %9783 }
 0x874   : > { %v6910_v53 = vpop.xlane.xlu1 %6909  ;;  %v7039_v54 = vsel %vm7038_vm6, %v9782_v49, %v7035_v41  ;;  %v6172_v7 = vmul.f32 %v9784_v28, %v6114_v6  ;;  %vm6177_vm9 = vweird.f32 %v9784_v28 }
 0x875   : > { %v6931_v58 = vsub.f32 %v13173_v38, %v6910_v53  ;;  %v7044_v1 = vsel %vm7041_vm8, %v7043_v25, %v7039_v54  ;;  %vm6178_vm11 = vmor %vm6176_vm10, %vm6177_vm9 }
 0x876   : > { %v7243_v19 = vmul.f32 %v13157_v27, %v7044_v1  ;;  %v6173_v57 = vsub.f32 1.0, %v6172_v7  ;;  %v13327_v1 = vpop.f32.mrf.mxu0 }
 0x877   : > { %v6957_v43 = vmul.f32 1.442695, %v6931_v58 }
 0x878   : > { %8892 = vst [vmem:[%s10960_s7 + $0x390] sm:$0xff] %v7243_v19  ;;  %v7275_v18 = vpack.c.bf16 %v7244_v30, %v7243_v19  ;;  %v6174_v36 = vmul.f32 %v9784_v28, %v6173_v57  ;;  %v6180_v30 = vand.u32 2147483647, %v6114_v6 }
 0x879   : > { %9785 = vpow2.f32 %v6957_v43 }
 0x87a   : > { %7359 = vmatmul.bf16.gmra.mxu2 %v7275_v18  ;;  %v13321_v13 = vpop.f32.mrf.mxu2  ;;  %v6175_v59 = vadd.f32 %v9784_v28, %v6174_v36  ;;  %vm6181_vm14 = vcmp.eq.f32.partialorder %v6180_v30, 8.507059e+37 }
 0x87c   : > { %v6978_v62 = vpop.xlane.xlu1 %6977  ;;  %v6179_v15 = vsel %vm6178_vm11, %v9784_v28, %v6175_v59 }
 0x87d   : > { %9787 = vrcp.f32 %v6978_v62  ;;  %v7072_v39 = vand.u32 2147483648, %v6978_v62  ;;  %v7070_v49 = vand.u32 2147483647, %v6978_v62  ;;  %vm7066_vm13 = vweird.f32 %v6978_v62 }
 0x87e   : > { %v6184_v53 = vsel %vm6181_vm14, %v6183_v48, %v6179_v15 }
 0x87f   : > { %v13316_v55 = vpop.eup %9785  ;;  %v7073_v63 = vor.u32 1.1754944e-38, %v7072_v39  ;;  %vm7071_vm12 = vcmp.eq.f32.partialorder %v7070_v49, 8.507059e+37  ;;  %v13325_v6 = vmul.f32 %v13164_v23, %v6184_v53  ;;  %v13339_v39 = vpop.f32.mrf.mxu0 }
 0x880   : > { %6989 = vadd.xlane.f32.xlu0 %v13316_v55 }
 0x881   : > { %8772 = vst [vmem:[%s10960_s7 + $0x310] sm:$0xff] %v13325_v6 }
 0x882   : > { %v13330_v18 = vpop.f32.mrf.mxu2 }
 0x883   : > { %v9788_v38 = vpop.eup %9787 }
 0x884   : > { %v7062_v27 = vmul.f32 %v9788_v38, %v6978_v62  ;;  %v6980_v35 = vpop.xlane.xlu1 %6979  ;;  %vm7067_vm7 = vweird.f32 %v9788_v38 }
 0x885   : > { %9789 = vrcp.f32 %v6980_v35  ;;  %vm7068_vm15 = vmor %vm7066_vm13, %vm7067_vm7  ;;  %v7087_v28 = vand.u32 2147483648, %v6980_v35  ;;  %v7085_v57 = vand.u32 2147483647, %v6980_v35  ;;  %vm7081_vm1 = vweird.f32 %v6980_v35 }
 0x886   : > { %v7063_v24 = vsub.f32 1.0, %v7062_v27 }
 0x887   : > { %v7088_v23 = vor.u32 1.1754944e-38, %v7087_v28  ;;  %vm7086_vm3 = vcmp.eq.f32.partialorder %v7085_v57, 8.507059e+37  ;;  %v13353_v53 = vpop.f32.mrf.mxu0 }
 0x888   : > { %v7064_v33 = vmul.f32 %v9788_v38, %v7063_v24 }
 0x88a   : > { %v7065_v34 = vadd.f32 %v9788_v38, %v7064_v33 }
 0x88b   : > { %v9790_v9 = vpop.eup %9789 }
 0x88c   : > { %v7077_v4 = vmul.f32 %v9790_v9, %v6980_v35  ;;  %v6050_v41 = vpop.xlane.xlu1 %6049  ;;  %v7069_v25 = vsel %vm7068_vm15, %v9788_v38, %v7065_v34  ;;  %vm7082_vm0 = vweird.f32 %v9790_v9  ;;  %v13342_v35 = vpop.f32.mrf.mxu2 }
 0x88d   : > { %v6071_v54 = vsub.f32 %v13199_v17, %v6050_v41  ;;  %v7074_v58 = vsel %vm7071_vm12, %v7073_v63, %v7069_v25  ;;  %vm7083_vm2 = vmor %vm7081_vm1, %vm7082_vm0 }
 0x88e   : > { %v7078_v19 = vsub.f32 1.0, %v7077_v4  ;;  %v7245_v43 = vmul.f32 %v13179_v40, %v7074_v58 }
 0x88f   : > { %v6097_v7 = vmul.f32 1.442695, %v6071_v54 }
 0x890   : > { %v7079_v62 = vmul.f32 %v9790_v9, %v7078_v19  ;;  %8894 = vst [vmem:[%s10960_s7 + $0x3a0] sm:$0xff] %v7245_v43 }
 0x891   : > { %9791 = vpow2.f32 %v6097_v7 }
 0x892   : > { %v7080_v17 = vadd.f32 %v9790_v9, %v7079_v62 }
 0x894   : > { %v6052_v38 = vpop.xlane.xlu1 %6051  ;;  %v7084_v36 = vsel %vm7083_vm2, %v9790_v9, %v7080_v17  ;;  %v13351_v15 = vpop.f32.mrf.mxu2 }
 0x895   : > { %v6116_v40 = vpop.xlane.xlu0 %6115  ;;  %v6072_v27 = vsub.f32 %v13213_v12, %v6052_v38  ;;  %v7089_v45 = vsel %vm7086_vm3, %v7088_v23, %v7084_v36 }
 0x896   : > { %9793 = vrcp.f32 %v6116_v40  ;;  %v7246_v30 = vmul.f32 %v13189_v37, %v7089_v45  ;;  %v6195_v63 = vand.u32 2147483647, %v6116_v40  ;;  %v6197_v41 = vand.u32 2147483648, %v6116_v40 }
 0x897   : > { %v13336_v24 = vpop.eup %9791  ;;  %v6099_v59 = vmul.f32 1.442695, %v6072_v27  ;;  %vm6191_vm5 = vweird.f32 %v6116_v40 }
 0x898   : > { %6129 = vadd.xlane.f32.xlu2 %v13336_v24  ;;  %8895 = vst [vmem:[%s10960_s7 + $0x3a8] sm:$0xff] %v7246_v30  ;;  %v7276_v33 = vpack.c.bf16 %v7246_v30, %v7245_v43  ;;  %vm13356_vm6 = vcmp.eq.f32.partialorder %v6195_v63, 8.507059e+37  ;;  %v6198_v17 = vor.u32 1.1754944e-38, %v6197_v41 }
 0x899   : > { %9795 = vpow2.f32 %v6099_v59 }
 0x89a   : > { %7364 = vmatmul.bf16.gmra.mxu2 %v7276_v33 }
 0x89c   : > { %v9794_v49 = vpop.eup %9793  ;;  %v6120_v48 = vpop.xlane.xlu1 %6119 }
 0x89d   : > { %v6187_v12 = vmul.f32 %v9794_v49, %v6116_v40  ;;  %v13345_v34 = vpop.xlane.xlu0 %6117  ;;  %9797 = vrcp.f32 %v6120_v48  ;;  %vm6192_vm4 = vweird.f32 %v9794_v49  ;;  %vm6221_vm8 = vweird.f32 %v6120_v48 }
 0x89e   : > { %9799 = vrcp.f32 %v13345_v34  ;;  %vm6193_vm9 = vmor %vm6191_vm5, %vm6192_vm4  ;;  %v6225_v45 = vand.u32 2147483647, %v6120_v48  ;;  %v6227_v59 = vand.u32 2147483648, %v6120_v48  ;;  %vm6206_vm11 = vweird.f32 %v13345_v34 }
 0x89f   : > { %v13348_v9 = vpop.eup %9795  ;;  %v6188_v37 = vsub.f32 1.0, %v6187_v12 }
 0x8a0   : > { %6131 = vadd.xlane.f32.xlu0 %v13348_v9  ;;  %vm6226_vm15 = vcmp.eq.f32.partialorder %v6225_v45, 8.507059e+37 }
 0x8a1   : > { %v6189_v4 = vmul.f32 %v9794_v49, %v6188_v37  ;;  %v6912_v25 = vpop.xlane.xlu2 %6911 }
 0x8a2   : > { %v6932_v54 = vsub.f32 %v13211_v2, %v6912_v25  ;;  %v6212_v2 = vand.u32 2147483648, %v13345_v34 }
 0x8a3   : > { %v9798_v58 = vpop.eup %9797  ;;  %v6190_v19 = vadd.f32 %v9794_v49, %v6189_v4  ;;  %v6210_v4 = vand.u32 2147483647, %v13345_v34 }
 0x8a4   : > { %v9800_v43 = vpop.eup %9799  ;;  %v6217_v7 = vmul.f32 %v9798_v58, %v6120_v48  ;;  %v6959_v62 = vmul.f32 1.442695, %v6932_v54  ;;  %v13360_v57 = vpop.xlane.xlu1 %6981  ;;  %vm6222_vm7 = vweird.f32 %v9798_v58 }
 0x8a5   : > { %v6202_v23 = vmul.f32 %v9800_v43, %v13345_v34  ;;  %v6916_v38 = vpop.xlane.xlu0 %6915  ;;  %9801 = vrcp.f32 %v13360_v57  ;;  %v6194_v30 = vsel %vm6193_vm9, %v9794_v49, %v6190_v19  ;;  %vm6207_vm10 = vweird.f32 %v9800_v43  ;;  %v13370_v54 = vpop.f32.mrf.mxu0  ;;  %vm13378_vm13 = vmor %vm6221_vm8, %vm6222_vm7 }
 0x8a6   : > { %v6218_v36 = vsub.f32 1.0, %v6217_v7  ;;  %9803 = vpow2.f32 %v6959_v62  ;;  %v6934_v40 = vsub.f32 %v13243_v10, %v6916_v38  ;;  %v6199_v37 = vsel %vm13356_vm6, %v6198_v17, %v6194_v30  ;;  %v13374_v7 = vpop.f32.mrf.mxu2  ;;  %vm13387_vm14 = vmor %vm6206_vm11, %vm6207_vm10 }
 0x8a7   : > { %v6203_v27 = vsub.f32 1.0, %v6202_v23  ;;  %v6384_v25 = vmul.f32 %v13215_v29, %v6199_v37  ;;  %v6213_v62 = vor.u32 1.1754944e-38, %v6212_v2  ;;  %v6228_v29 = vor.u32 1.1754944e-38, %v6227_v59 }
 0x8a8   : > { %v6219_v33 = vmul.f32 %v9798_v58, %v6218_v36  ;;  %v6963_v12 = vmul.f32 1.442695, %v6934_v40  ;;  %vm6211_vm12 = vcmp.eq.f32.partialorder %v6210_v4, 8.507059e+37  ;;  %vm7096_vm1 = vweird.f32 %v13360_v57 }
 0x8a9   : > { %v6204_v63 = vmul.f32 %v9800_v43, %v6203_v27  ;;  %v6914_v41 = vpop.xlane.xlu2 %6913  ;;  %8773 = vst [vmem:[%s10960_s7 + $0x318] sm:$0xff] %v6384_v25  ;;  %v6415_v23 = vpack.c.bf16 %v6384_v25, %v13325_v6 }
 0x8aa   : > { %v6220_v10 = vadd.f32 %v9798_v58, %v6219_v33  ;;  %9805 = vpow2.f32 %v6963_v12  ;;  %v6933_v49 = vsub.f32 %v13228_v60, %v6914_v41 }
 0x8ab   : > { %v9802_v19 = vpop.eup %9801  ;;  %v6205_v28 = vadd.f32 %v9800_v43, %v6204_v63  ;;  %6499 = vmatmul.bf16.gmra.mxu0 %v6415_v23 }
 0x8ac   : > { %v13384_v34 = vpop.eup %9803  ;;  %v7092_v38 = vmul.f32 %v9802_v19, %v13360_v57  ;;  %v6961_v2 = vmul.f32 1.442695, %v6933_v49  ;;  %v6056_v48 = vpop.xlane.xlu1 %6055  ;;  %v6224_v36 = vsel %vm13378_vm13, %v9798_v58, %v6220_v10  ;;  %v7102_v58 = vand.u32 2147483648, %v13360_v57 }
 0x8ad   : > { %v6054_v40 = vpop.xlane.xlu0 %6053  ;;  %v6074_v6 = vsub.f32 %v13254_v47, %v6056_v48  ;;  %6991 = vadd.xlane.f32.xlu1 %v13384_v34  ;;  %v6209_v27 = vsel %vm13387_vm14, %v9800_v43, %v6205_v28  ;;  %v6229_v59 = vsel %vm6226_vm15, %v6228_v29, %v6224_v36  ;;  %vm7097_vm0 = vweird.f32 %v9802_v19  ;;  %v13413_v49 = vpop.f32.mrf.mxu0 }
 0x8ae   : > { %v7093_v45 = vsub.f32 1.0, %v7092_v38  ;;  %9807 = vpow2.f32 %v6961_v2  ;;  %v6073_v30 = vsub.f32 %v13236_v51, %v6054_v40  ;;  %v6214_v33 = vsel %vm6211_vm12, %v6213_v62, %v6209_v27  ;;  %vm7098_vm2 = vmor %vm7096_vm1, %vm7097_vm0 }
 0x8af   : > { %v6385_v12 = vmul.f32 %v13232_v8, %v6214_v33  ;;  %v6386_v37 = vmul.f32 %v13230_v31, %v6229_v59  ;;  %v7100_v43 = vand.u32 2147483647, %v13360_v57  ;;  %v6103_v41 = vmul.f32 1.442695, %v6074_v6  ;;  %v13409_v8 = vpop.f32.mrf.mxu2 }
 0x8b0   : > { %v13402_v47 = vpop.eup %9805  ;;  %v7094_v63 = vmul.f32 %v9802_v19, %v7093_v45  ;;  %v6101_v4 = vmul.f32 1.442695, %v6073_v30  ;;  %v7103_v31 = vor.u32 1.1754944e-38, %v7102_v58 }
 0x8b1   : > { %6995 = vadd.xlane.f32.xlu2 %v13402_v47  ;;  %v6984_v25 = vpop.xlane.xlu2 %6983  ;;  %8774 = vst [vmem:[%s10960_s7 + $0x320] sm:$0xff] %v6385_v12  ;;  %vm7101_vm3 = vcmp.eq.f32.partialorder %v7100_v43, 8.507059e+37  ;;  %v6416_v36 = vpack.c.bf16 %v6386_v37, %v6385_v12 }
 0x8b2   : > { %v7095_v51 = vadd.f32 %v9802_v19, %v7094_v63  ;;  %9809 = vpow2.f32 %v6101_v4  ;;  %8775 = vst [vmem:[%s10960_s7 + $0x328] sm:$0xff] %v6386_v37  ;;  %v7117_v59 = vand.u32 2147483648, %v6984_v25  ;;  %v7115_v33 = vand.u32 2147483647, %v6984_v25 }
 0x8b3   : > { %9811 = vrcp.f32 %v6984_v25  ;;  %vm7111_vm5 = vweird.f32 %v6984_v25 }
 0x8b4   : > { %v13411_v10 = vpop.eup %9807  ;;  %v6918_v28 = vpop.xlane.xlu1 %6917  ;;  %v7099_v62 = vsel %vm7098_vm2, %v9802_v19, %v7095_v51  ;;  %9813 = vpow2.f32 %v6103_v41  ;;  %v7118_v41 = vor.u32 1.1754944e-38, %v7117_v59  ;;  %vm7116_vm9 = vcmp.eq.f32.partialorder %v7115_v33, 8.507059e+37 }
 0x8b5   : > { %v6124_v17 = vpop.xlane.xlu0 %6123  ;;  %v6935_v29 = vsub.f32 %v13261_v42, %v6918_v28  ;;  %6993 = vadd.xlane.f32.xlu1 %v13411_v10  ;;  %v7104_v57 = vsel %vm7101_vm3, %v7103_v31, %v7099_v62  ;;  %v13427_v6 = vpop.f32.mrf.mxu0 }
 0x8b6   : > { %9815 = vrcp.f32 %v6124_v17  ;;  %v13418_v60 = vmul.f32 %v13241_v5, %v7104_v57  ;;  %v6255_v43 = vand.u32 2147483647, %v6124_v17  ;;  %v6257_v37 = vand.u32 2147483648, %v6124_v17 }
 0x8b7   : > { %v6965_v23 = vmul.f32 1.442695, %v6935_v29  ;;  %v13429_v5 = vpop.f32.mrf.mxu2  ;;  %vm6251_vm7 = vweird.f32 %v6124_v17 }
 0x8b8   : > { %v13420_v38 = vpop.eup %9809  ;;  %8896 = vst [vmem:[%s10960_s7 + $0x3b0] sm:$0xff] %v13418_v60  ;;  %vm13436_vm10 = vcmp.eq.f32.partialorder %v6255_v43, 8.507059e+37 }
 0x8b9   : > { %v9812_v2 = vpop.eup %9811  ;;  %9817 = vpow2.f32 %v6965_v23  ;;  %6133 = vadd.xlane.f32.xlu0 %v13420_v38  ;;  %v6122_v48 = vpop.xlane.xlu2 %6121 }
 0x8ba   : > { %v7107_v19 = vmul.f32 %v9812_v2, %v6984_v25  ;;  %9819 = vrcp.f32 %v6122_v48  ;;  %v13425_v42 = vpop.eup %9813  ;;  %vm7112_vm4 = vweird.f32 %v9812_v2  ;;  %vm6236_vm14 = vweird.f32 %v6122_v48 }
 0x8bb   : > { %6504 = vmatmul.bf16.gmra.mxu0 %v6416_v36  ;;  %vm7113_vm6 = vmor %vm7111_vm5, %vm7112_vm4  ;;  %v6258_v36 = vor.u32 1.1754944e-38, %v6257_v37 }
 0x8bc   : > { %v9816_v40 = vpop.eup %9815  ;;  %v7108_v27 = vsub.f32 1.0, %v7107_v19 }
 0x8bd   : > { %v6247_v45 = vmul.f32 %v9816_v40, %v6124_v17  ;;  %6135 = vadd.xlane.f32.xlu1 %v13425_v42  ;;  %vm6252_vm8 = vweird.f32 %v9816_v40  ;;  %v6240_v17 = vand.u32 2147483647, %v6122_v48 }
 0x8be   : > { %v7109_v30 = vmul.f32 %v9812_v2, %v7108_v27  ;;  %vm6253_vm11 = vmor %vm6251_vm7, %vm6252_vm8  ;;  %v6242_v27 = vand.u32 2147483648, %v6122_v48 }
 0x8bf   : > { %v13432_v58 = vpop.eup %9817  ;;  %v6248_v63 = vsub.f32 1.0, %v6247_v45  ;;  %vm6241_vm12 = vcmp.eq.f32.partialorder %v6240_v17, 8.507059e+37 }
 0x8c0   : > { %v9820_v4 = vpop.eup %9819  ;;  %v7110_v12 = vadd.f32 %v9812_v2, %v7109_v30  ;;  %6997 = vadd.xlane.f32.xlu2 %v13432_v58 }
 0x8c1   : > { %v6249_v51 = vmul.f32 %v9816_v40, %v6248_v63  ;;  %v6232_v31 = vmul.f32 %v9820_v4, %v6122_v48  ;;  %v6920_v28 = vpop.xlane.xlu2 %6919  ;;  %vm6237_vm13 = vweird.f32 %v9820_v4 }
 0x8c2   : > { %v6936_v62 = vsub.f32 %v13271_v46, %v6920_v28  ;;  %v7114_v29 = vsel %vm7113_vm6, %v9812_v2, %v7110_v12  ;;  %v13441_v46 = vpop.f32.mrf.mxu0  ;;  %v13447_v12 = vpop.f32.mrf.mxu2  ;;  %vm6238_vm15 = vmor %vm6236_vm14, %vm6237_vm13 }
 0x8c3   : > { %v6250_v57 = vadd.f32 %v9816_v40, %v6249_v51  ;;  %v6233_v25 = vsub.f32 1.0, %v6232_v31  ;;  %v7119_v19 = vsel %vm7116_vm9, %v7118_v41, %v7114_v29 }
 0x8c4   : > { %v6967_v59 = vmul.f32 1.442695, %v6936_v62  ;;  %v7248_v45 = vmul.f32 %v13258_v16, %v7119_v19  ;;  %v6243_v16 = vor.u32 1.1754944e-38, %v6242_v27 }
 0x8c5   : > { %v6234_v30 = vmul.f32 %v9820_v4, %v6233_v25  ;;  %v6254_v33 = vsel %vm6253_vm11, %v9816_v40, %v6250_v57 }
 0x8c6   : > { %9821 = vpow2.f32 %v6967_v59  ;;  %v6986_v2 = vpop.xlane.xlu0 %6985  ;;  %8897 = vst [vmem:[%s10960_s7 + $0x3b8] sm:$0xff] %v7248_v45  ;;  %v7277_v63 = vpack.c.bf16 %v7248_v45, %v13418_v60  ;;  %v6259_v43 = vsel %vm13436_vm10, %v6258_v36, %v6254_v33 }
 0x8c7   : > { %v6235_v37 = vadd.f32 %v9820_v4, %v6234_v30  ;;  %9823 = vrcp.f32 %v6986_v2  ;;  %v6388_v40 = vmul.f32 %v13263_v26, %v6259_v43  ;;  %v7132_v59 = vand.u32 2147483648, %v6986_v2 }
 0x8c8   : > { %7369 = vmatmul.bf16.gmra.mxu2 %v7277_v63  ;;  %vm7126_vm1 = vweird.f32 %v6986_v2  ;;  %v7130_v17 = vand.u32 2147483647, %v6986_v2 }
 0x8c9   : > { %v6058_v41 = vpop.xlane.xlu2 %6057  ;;  %v6239_v51 = vsel %vm6238_vm15, %v9820_v4, %v6235_v37  ;;  %8777 = vst [vmem:[%s10960_s7 + $0x338] sm:$0xff] %v6388_v40  ;;  %v7133_v37 = vor.u32 1.1754944e-38, %v7132_v59 }
 0x8ca   : > { %v6075_v31 = vsub.f32 %v13274_v20, %v6058_v41  ;;  %v6244_v60 = vsel %vm6241_vm12, %v6243_v16, %v6239_v51  ;;  %v13457_v23 = vpop.f32.mrf.mxu0  ;;  %vm7131_vm3 = vcmp.eq.f32.partialorder %v7130_v17, 8.507059e+37 }
 0x8cb   : > { %v6387_v28 = vmul.f32 %v13267_v14, %v6244_v60  ;;  %v13460_v14 = vpop.f32.mrf.mxu2 }
 0x8cc   : > { %v13453_v62 = vpop.eup %9821  ;;  %v6105_v29 = vmul.f32 1.442695, %v6075_v31 }
 0x8cd   : > { %v9824_v48 = vpop.eup %9823  ;;  %6999 = vadd.xlane.f32.xlu0 %v13453_v62  ;;  %8776 = vst [vmem:[%s10960_s7 + $0x330] sm:$0xff] %v6387_v28  ;;  %v6417_v57 = vpack.c.bf16 %v6388_v40, %v6387_v28 }
 0x8ce   : > { %v7122_v26 = vmul.f32 %v9824_v48, %v6986_v2  ;;  %9825 = vpow2.f32 %v6105_v29  ;;  %v6060_v25 = vpop.xlane.xlu0 %6059  ;;  %vm7127_vm0 = vweird.f32 %v9824_v48 }
 0x8cf   : > { %v6076_v4 = vsub.f32 %v13285_v50, %v6060_v25  ;;  %6509 = vmatmul.bf16.gmra.mxu0 %v6417_v57  ;;  %v6988_v20 = vpop.xlane.xlu1 %6987  ;;  %vm13464_vm2 = vmor %vm7126_vm1, %vm7127_vm0 }
 0x8d0   : > { %v7123_v19 = vsub.f32 1.0, %v7122_v26  ;;  %9827 = vrcp.f32 %v6988_v20  ;;  %v7147_v28 = vand.u32 2147483648, %v6988_v20  ;;  %v7145_v57 = vand.u32 2147483647, %v6988_v20 }
 0x8d1   : > { %v6107_v36 = vmul.f32 1.442695, %v6076_v4  ;;  %vm7141_vm5 = vweird.f32 %v6988_v20 }
 0x8d2   : > { %v7124_v27 = vmul.f32 %v9824_v48, %v7123_v19  ;;  %v13471_v41 = vpop.f32.mrf.mxu0  ;;  %v7148_v19 = vor.u32 1.1754944e-38, %v7147_v28  ;;  %vm7146_vm8 = vcmp.eq.f32.partialorder %v7145_v57, 8.507059e+37 }
 0x8d3   : > { %9829 = vpow2.f32 %v6107_v36  ;;  %v13475_v51 = vpop.f32.mrf.mxu2 }
 0x8d4   : > { %v13462_v45 = vpop.eup %9825  ;;  %v7125_v30 = vadd.f32 %v9824_v48, %v7124_v27  ;;  %v4817_v27 = vpack.c.bf16 %v13339_v39, %v13339_v39 }
 0x8d5   : > { %6137 = vadd.xlane.f32.xlu1 %v13462_v45 }
 0x8d6   : > { %v9828_v50 = vpop.eup %9827  ;;  %v6128_v63 = vpop.xlane.xlu2 %6127  ;;  %v7129_v43 = vsel %vm13464_vm2, %v9824_v48, %v7125_v30 }
 0x8d7   : > { %v7137_v16 = vmul.f32 %v9828_v50, %v6988_v20  ;;  %9831 = vrcp.f32 %v6128_v63  ;;  %v6126_v40 = vpop.xlane.xlu1 %6125  ;;  %v7134_v60 = vsel %vm7131_vm3, %v7133_v37, %v7129_v43  ;;  %vm7142_vm4 = vweird.f32 %v9828_v50 }
 0x8d8   : > { %9833 = vrcp.f32 %v6126_v40  ;;  %v7249_v29 = vmul.f32 %v13277_v44, %v7134_v60  ;;  %vm7143_vm6 = vmor %vm7141_vm5, %vm7142_vm4  ;;  %v6287_v43 = vand.u32 2147483648, %v6128_v63  ;;  %v6272_v60 = vand.u32 2147483648, %v6126_v40 }
 0x8d9   : > { %v13473_v2 = vpop.eup %9829  ;;  %v7138_v31 = vsub.f32 1.0, %v7137_v16  ;;  %vm6281_vm10 = vweird.f32 %v6128_v63  ;;  %vm6266_vm13 = vweird.f32 %v6126_v40 }
 0x8da   : > { %6139 = vadd.xlane.f32.xlu2 %v13473_v2  ;;  %8898 = vst [vmem:[%s10960_s7 + $0x3c0] sm:$0xff] %v7249_v29  ;;  %v13482_v17 = vpop.f32.mrf.mxu0 }
 0x8db   : > { %v7139_v48 = vmul.f32 %v9828_v50, %v7138_v31  ;;  %v6285_v31 = vand.u32 2147483647, %v6128_v63  ;;  %v13486_v28 = vpop.f32.mrf.mxu2 }
 0x8dd   : > { %v9832_v26 = vpop.eup %9831  ;;  %v7140_v25 = vadd.f32 %v9828_v50, %v7139_v48  ;;  %vm6286_vm14 = vcmp.eq.f32.partialorder %v6285_v31, 8.507059e+37 }
 0x8de   : > { %v9834_v4 = vpop.eup %9833  ;;  %v6277_v36 = vmul.f32 %v9832_v26, %v6128_v63  ;;  %vm6282_vm9 = vweird.f32 %v9832_v26 }
 0x8df   : > { %v6262_v59 = vmul.f32 %v9834_v4, %v6126_v40  ;;  %v7144_v30 = vsel %vm7143_vm6, %v9828_v50, %v7140_v25  ;;  %vm6267_vm7 = vweird.f32 %v9834_v4  ;;  %v6270_v50 = vand.u32 2147483647, %v6126_v40  ;;  %vm6283_vm11 = vmor %vm6281_vm10, %vm6282_vm9 }
 0x8e0   : > { %v6278_v44 = vsub.f32 1.0, %v6277_v36  ;;  %v7149_v33 = vsel %vm7146_vm8, %v7148_v19, %v7144_v30  ;;  %v6288_v25 = vor.u32 1.1754944e-38, %v6287_v43  ;;  %vm6268_vm15 = vmor %vm6266_vm13, %vm6267_vm7 }
 0x8e1   : > { %v6263_v37 = vsub.f32 1.0, %v6262_v59  ;;  %4851 = vrot.lane.b32.xlu0 %v4817_v27, %s10059_s24  ;;  %v7250_v20 = vmul.f32 %v13287_v61, %v7149_v33  ;;  %v6273_v61 = vor.u32 1.1754944e-38, %v6272_v60  ;;  %v5678_v27 = vpack.c.bf16 %v13309_v0, %v13309_v0 }
 0x8e2   : > { %v6279_v16 = vmul.f32 %v9832_v26, %v6278_v44  ;;  %vm6271_vm12 = vcmp.eq.f32.partialorder %v6270_v50, 8.507059e+37  ;;  %v13494_v40 = vpop.f32.mrf.mxu0  ;;  %v4818_v0 = vpack.c.bf16 %v13353_v53, %v13353_v53  ;;  %v4820_v60 = vpack.c.bf16 %v13413_v49, %v13413_v49 }
 0x8e3   : > { %v6264_v39 = vmul.f32 %v9834_v4, %v6263_v37  ;;  %8899 = vst [vmem:[%s10960_s7 + $0x3c8] sm:$0xff] %v7250_v20  ;;  %v7278_v48 = vpack.c.bf16 %v7250_v20, %v7249_v29 }
 0x8e4   : > { %v6280_v57 = vadd.f32 %v9832_v26, %v6279_v16 }
 0x8e5   : > { %v6265_v19 = vadd.f32 %v9834_v4, %v6264_v39  ;;  %7374 = vmatmul.bf16.gmra.mxu2 %v7278_v48 }
 0x8e6   : > { %v6284_v36 = vsel %vm6283_vm11, %v9832_v26, %v6280_v57 }
 0x8e7   : > { %v6269_v59 = vsel %vm6268_vm15, %v9834_v4, %v6265_v19  ;;  %v6289_v30 = vsel %vm6286_vm14, %v6288_v25, %v6284_v36  ;;  %v13497_v33 = vpop.f32.mrf.mxu2 }
 0x8e8   : > { %v6274_v29 = vsel %vm6271_vm12, %v6273_v61, %v6269_v59  ;;  %v6390_v63 = vmul.f32 %v13292_v3, %v6289_v30  ;;  %14127 = vst [vmem:[#allocation35_spill] sm:$0xff] %v13497_v33  ;;  %v5677_v3 = vpack.c.bf16 %v13304_v56, %v13304_v56 }
 0x8e9   : > { %5713 = vrot.lane.b32.xlu0 %v5678_v27, %s10062_s11  ;;  %v6389_v44 = vmul.f32 %v13294_v22, %v6274_v29 }
 0x8ea   : > { %8779 = vst [vmem:[%s10960_s7 + $0x348] sm:$0xff] %v6390_v63  ;;  %v13505_v4 = vpop.f32.mrf.mxu0 }
 0x8eb   : > { %8778 = vst [vmem:[%s10960_s7 + $0x340] sm:$0xff] %v6389_v44  ;;  %v6418_v26 = vpack.c.bf16 %v6390_v63, %v6389_v44 }
 0x8ed   : > { %6514 = vmatmul.bf16.gmra.mxu0 %v6418_v26 }
 0x8ee   : > { %4853 = vrot.lane.b32.xlu1 %v4818_v0, %s10059_s24 }
 0x8ef   : > { %v13508_v22 = vpop.f32.mrf.mxu2 }
 0x8f0   : > { %14128 = vst [vmem:[#allocation19_spill] sm:$0xff] %v13508_v22 }
 0x8f2   : > { %5711 = vrot.lane.b32.xlu2 %v5677_v3, %s10062_s11  ;;  %v13510_v37 = vpop.f32.mrf.mxu0 }
 0x8f3   : > { %v6990_v43 = vpop.xlane.xlu0 %6989 }
 0x8f4   : > { %9835 = vrcp.f32 %v6990_v43  ;;  %v7162_v57 = vand.u32 2147483648, %v6990_v43  ;;  %v7160_v19 = vand.u32 2147483647, %v6990_v43  ;;  %vm7156_vm1 = vweird.f32 %v6990_v43 }
 0x8f6   : > { %v7163_v36 = vor.u32 1.1754944e-38, %v7162_v57  ;;  %vm7161_vm3 = vcmp.eq.f32.partialorder %v7160_v19, 8.507059e+37 }
 0x8fa   : > { %v9836_v31 = vpop.eup %9835  ;;  %v13515_v56 = vpop.f32.mrf.mxu0 }
 0x8fb   : > { %v7152_v53 = vmul.f32 %v9836_v31, %v6990_v43  ;;  %vm7157_vm0 = vweird.f32 %v9836_v31 }
 0x8fc   : > { %vm7158_vm2 = vmor %vm7156_vm1, %vm7157_vm0 }
 0x8fd   : > { %v7360_v20 = vpop.f32.mrf.mxu2  ;;  %v7153_v39 = vsub.f32 1.0, %v7152_v53 }
 0x8fe   : > { %v7397_v16 = vpack.c.bf16 %v7360_v20, %v7360_v20 }
 0x8ff   : > { %v7154_v50 = vmul.f32 %v9836_v31, %v7153_v39 }
 0x900   : > { %7431 = vrot.lane.b32.xlu2 %v7397_v16, %s10061_s15 }
 0x901   : > { %v7155_v25 = vadd.f32 %v9836_v31, %v7154_v50 }
 0x902   : > { %v13518_v61 = vpop.f32.mrf.mxu0 }
 0x903   : > { %v7159_v49 = vsel %vm7158_vm2, %v9836_v31, %v7155_v25 }
 0x904   : > { %v7164_v29 = vsel %vm7161_vm3, %v7163_v36, %v7159_v49 }
 0x905   : > { %v13521_v44 = vmul.f32 %v13316_v55, %v7164_v29 }
 0x907   : > { %8900 = vst [vmem:[%s10960_s7 + $0x3d0] sm:$0xff] %v13521_v44 }
 0x908   : > { %4857 = vrot.lane.b32.xlu2 %v4820_v60, %s10059_s24 }
 0x90a   : > { %v13525_v43 = vpop.f32.mrf.mxu0 }
 0x90b   : > { %v6130_v48 = vpop.xlane.xlu2 %6129 }
 0x90c   : > { %9837 = vrcp.f32 %v6130_v48  ;;  %v6302_v26 = vand.u32 2147483648, %v6130_v48  ;;  %v6300_v3 = vand.u32 2147483647, %v6130_v48  ;;  %vm6296_vm5 = vweird.f32 %v6130_v48 }
 0x90e   : > { %v6303_v31 = vor.u32 1.1754944e-38, %v6302_v26  ;;  %vm6301_vm8 = vcmp.eq.f32.partialorder %v6300_v3, 8.507059e+37 }
 0x912   : > { %v9838_v27 = vpop.eup %9837 }
 0x913   : > { %v6292_v59 = vmul.f32 %v9838_v27, %v6130_v48  ;;  %v6132_v30 = vpop.xlane.xlu0 %6131  ;;  %vm6297_vm4 = vweird.f32 %v9838_v27  ;;  %v13529_v48 = vpop.f32.mrf.mxu0 }
 0x914   : > { %9839 = vrcp.f32 %v6132_v30  ;;  %vm6298_vm6 = vmor %vm6296_vm5, %vm6297_vm4  ;;  %v6317_v57 = vand.u32 2147483648, %v6132_v30  ;;  %v6315_v19 = vand.u32 2147483647, %v6132_v30  ;;  %vm6311_vm7 = vweird.f32 %v6132_v30 }
 0x915   : > { %v6293_v63 = vsub.f32 1.0, %v6292_v59 }
 0x916   : > { %v6318_v59 = vor.u32 1.1754944e-38, %v6317_v57  ;;  %vm6316_vm11 = vcmp.eq.f32.partialorder %v6315_v19, 8.507059e+37 }
 0x917   : > { %v6294_v0 = vmul.f32 %v9838_v27, %v6293_v63 }
 0x919   : > { %v6295_v20 = vadd.f32 %v9838_v27, %v6294_v0 }
 0x91a   : > { %v9840_v16 = vpop.eup %9839 }
 0x91b   : > { %v6307_v53 = vmul.f32 %v9840_v16, %v6132_v30  ;;  %v6299_v60 = vsel %vm6298_vm6, %v9838_v27, %v6295_v20  ;;  %vm6312_vm9 = vweird.f32 %v9840_v16 }
 0x91c   : > { %v6304_v39 = vsel %vm6301_vm8, %v6303_v31, %v6299_v60  ;;  %vm6313_vm10 = vmor %vm6311_vm7, %vm6312_vm9 }
 0x91d   : > { %v6308_v55 = vsub.f32 1.0, %v6307_v53  ;;  %v6391_v50 = vmul.f32 %v13336_v24, %v6304_v39  ;;  %v7362_v39 = vpop.f32.mrf.mxu2 }
 0x91f   : > { %v6309_v25 = vmul.f32 %v9840_v16, %v6308_v55  ;;  %8780 = vst [vmem:[%s10960_s7 + $0x350] sm:$0xff] %v6391_v50 }
 0x920   : > { %v6992_v36 = vpop.xlane.xlu1 %6991 }
 0x921   : > { %v6310_v49 = vadd.f32 %v9840_v16, %v6309_v25  ;;  %9841 = vrcp.f32 %v6992_v36  ;;  %v7175_v60 = vand.u32 2147483647, %v6992_v36  ;;  %v7177_v57 = vand.u32 2147483648, %v6992_v36 }
 0x922   : > { %vm7171_vm14 = vweird.f32 %v6992_v36 }
 0x923   : > { %v6314_v27 = vsel %vm6313_vm10, %v9840_v16, %v6310_v49  ;;  %vm7176_vm12 = vcmp.eq.f32.partialorder %v7175_v60, 8.507059e+37 }
 0x924   : > { %v6996_v29 = vpop.xlane.xlu2 %6995  ;;  %v6319_v63 = vsel %vm6316_vm11, %v6318_v59, %v6314_v27  ;;  %v7398_v59 = vpack.c.bf16 %v7362_v39, %v7362_v39 }
 0x925   : > { %9843 = vrcp.f32 %v6996_v29  ;;  %v6392_v24 = vmul.f32 %v13348_v9, %v6319_v63  ;;  %v7178_v63 = vor.u32 1.1754944e-38, %v7177_v57  ;;  %vm7201_vm1 = vweird.f32 %v6996_v29 }
 0x927   : > { %v9842_v26 = vpop.eup %9841  ;;  %8781 = vst [vmem:[%s10960_s7 + $0x358] sm:$0xff] %v6392_v24  ;;  %v6419_v20 = vpack.c.bf16 %v6392_v24, %v6391_v50 }
 0x928   : > { %v7167_v0 = vmul.f32 %v9842_v26, %v6992_v36  ;;  %v13532_v3 = vpop.xlane.xlu1 %6993  ;;  %v6500_v31 = vpop.f32.mrf.mxu0  ;;  %vm7172_vm13 = vweird.f32 %v9842_v26  ;;  %v7207_v36 = vand.u32 2147483648, %v6996_v29 }
 0x929   : > { %9845 = vrcp.f32 %v13532_v3  ;;  %6519 = vmatmul.bf16.gmra.mxu0 %v6419_v20  ;;  %v6537_v16 = vpack.c.bf16 %v6500_v31, %v6500_v31  ;;  %vm13543_vm15 = vmor %vm7171_vm14, %vm7172_vm13  ;;  %v7205_v31 = vand.u32 2147483647, %v6996_v29  ;;  %vm7186_vm5 = vweird.f32 %v13532_v3 }
 0x92a   : > { %v7168_v30 = vsub.f32 1.0, %v7167_v0 }
 0x92b   : > { %v13536_v53 = vpop.eup %9843  ;;  %6571 = vrot.lane.b32.xlu0 %v6537_v16, %s10060_s29  ;;  %v7190_v16 = vand.u32 2147483647, %v13532_v3  ;;  %vm13567_vm4 = vcmp.eq.f32.partialorder %v7205_v31, 8.507059e+37 }
 0x92c   : > { %v7169_v55 = vmul.f32 %v9842_v26, %v7168_v30  ;;  %v7197_v9 = vmul.f32 %v13536_v53, %v6996_v29  ;;  %v13539_v25 = vpop.xlane.xlu0 %6133  ;;  %vm7202_vm0 = vweird.f32 %v13536_v53  ;;  %v7208_v29 = vor.u32 1.1754944e-38, %v7207_v36 }
 0x92d   : > { %9847 = vrcp.f32 %v13539_v25  ;;  %vm13563_vm3 = vmor %vm7201_vm1, %vm7202_vm0  ;;  %vm13576_vm6 = vcmp.eq.f32.partialorder %v7190_v16, 8.507059e+37  ;;  %vm6326_vm7 = vweird.f32 %v13539_v25 }
 0x92e   : > { %v7170_v50 = vadd.f32 %v9842_v26, %v7169_v55  ;;  %v7198_v19 = vsub.f32 1.0, %v7197_v9 }
 0x92f   : > { %v9846_v49 = vpop.eup %9845 }
 0x930   : > { %v7199_v24 = vmul.f32 %v13536_v53, %v7198_v19  ;;  %v7182_v0 = vmul.f32 %v9846_v49, %v13532_v3  ;;  %v13549_v20 = vpop.xlane.xlu1 %6135  ;;  %v7174_v30 = vsel %vm13543_vm15, %v9842_v26, %v7170_v50  ;;  %v6502_v55 = vpop.f32.mrf.mxu0  ;;  %v7192_v19 = vand.u32 2147483648, %v13532_v3 }
 0x931   : > { %9849 = vrcp.f32 %v13549_v20  ;;  %v7179_v57 = vsel %vm7176_vm12, %v7178_v63, %v7174_v30  ;;  %v6538_v27 = vpack.c.bf16 %v6502_v55, %v6502_v55  ;;  %vm7187_vm2 = vweird.f32 %v9846_v49  ;;  %v13583_v55 = vpop.f32.mrf.mxu2 }
 0x932   : > { %v7200_v39 = vadd.f32 %v13536_v53, %v7199_v24  ;;  %v7183_v60 = vsub.f32 1.0, %v7182_v0  ;;  %v7252_v50 = vmul.f32 %v13384_v34, %v7179_v57  ;;  %vm7188_vm8 = vmor %vm7186_vm5, %vm7187_vm2  ;;  %v7193_v3 = vor.u32 1.1754944e-38, %v7192_v19 }
 0x933   : > { %v9848_v9 = vpop.eup %9847  ;;  %v13558_v26 = vpop.xlane.xlu2 %6997  ;;  %6573 = vrot.lane.b32.xlu1 %v6538_v27, %s10060_s29  ;;  %7433 = vrot.lane.b32.xlu0 %v7398_v59, %s10061_s15  ;;  %v6330_v59 = vand.u32 2147483647, %v13539_v25  ;;  %v6347_v30 = vand.u32 2147483648, %v13549_v20  ;;  %vm6341_vm14 = vweird.f32 %v13549_v20 }
 0x934   : > { %v7184_v22 = vmul.f32 %v9846_v49, %v7183_v60  ;;  %v6322_v33 = vmul.f32 %v9848_v9, %v13539_v25  ;;  %9851 = vrcp.f32 %v13558_v26  ;;  %8901 = vst [vmem:[%s10960_s7 + $0x3d8] sm:$0xff] %v7252_v50  ;;  %v7279_v34 = vpack.c.bf16 %v7252_v50, %v13521_v44 }
 0x935   : > { %v7204_v31 = vsel %vm13563_vm3, %v13536_v53, %v7200_v39  ;;  %v6332_v44 = vand.u32 2147483648, %v13539_v25  ;;  %vm6327_vm9 = vweird.f32 %v9848_v9  ;;  %v5679_v53 = vpack.c.bf16 %v13314_v52, %v13314_v52 }
 0x936   : > { %v7185_v0 = vadd.f32 %v9846_v49, %v7184_v22  ;;  %v6323_v60 = vsub.f32 1.0, %v6322_v33  ;;  %7379 = vmatmul.bf16.gmra.mxu2 %v7279_v34  ;;  %v7209_v22 = vsel %vm13567_vm4, %v7208_v29, %v7204_v31  ;;  %v4819_v39 = vpack.c.bf16 %v13370_v54, %v13370_v54  ;;  %vm13600_vm10 = vmor %vm6326_vm7, %vm6327_vm9 }
 0x937   : > { %v9850_v36 = vpop.eup %9849  ;;  %v7254_v27 = vmul.f32 %v13402_v47, %v7209_v22  ;;  %vm6331_vm11 = vcmp.eq.f32.partialorder %v6330_v59, 8.507059e+37  ;;  %v6333_v52 = vor.u32 1.1754944e-38, %v6332_v44  ;;  %v7222_v59 = vand.u32 2147483648, %v13558_v26 }
 0x938   : > { %v6324_v16 = vmul.f32 %v9848_v9, %v6323_v60  ;;  %v6337_v33 = vmul.f32 %v9850_v36, %v13549_v20  ;;  %v7189_v57 = vsel %vm7188_vm8, %v9846_v49, %v7185_v0  ;;  %v6505_v29 = vpop.f32.mrf.mxu0  ;;  %vm6342_vm13 = vweird.f32 %v9850_v36 }
 0x939   : > { %v7194_v19 = vsel %vm13576_vm6, %v7193_v3, %v7189_v57  ;;  %v6539_v0 = vpack.c.bf16 %v6505_v29, %v6505_v29  ;;  %8903 = vst [vmem:[%s10960_s7 + $0x3e8] sm:$0xff] %v7254_v27  ;;  %vm13617_vm15 = vmor %vm6341_vm14, %vm6342_vm13  ;;  %vm7216_vm1 = vweird.f32 %v13558_v26  ;;  %vm4895_vm9 = vcmask 650752  }
 0x93a   : > { %v9852_v50 = vpop.eup %9851  ;;  %v6325_v24 = vadd.f32 %v9848_v9, %v6324_v16  ;;  %v6338_v63 = vsub.f32 1.0, %v6337_v33  ;;  %v7253_v49 = vmul.f32 %v13411_v10, %v7194_v19  ;;  %v6345_v10 = vand.u32 2147483647, %v13549_v20  ;;  %v7367_v20 = vpop.f32.mrf.mxu2 }
 0x93b   : > { %v7212_v54 = vmul.f32 %v9852_v50, %v13558_v26  ;;  %4855 = vrot.lane.b32.xlu1 %v4819_v39, %s10059_s24  ;;  %5715 = vrot.lane.b32.xlu0 %v5679_v53, %s10062_s11  ;;  %vm7217_vm12 = vweird.f32 %v9852_v50  ;;  %v7220_v16 = vand.u32 2147483647, %v13558_v26  ;;  %v6348_v33 = vor.u32 1.1754944e-38, %v6347_v30 }
 0x93c   : > { %v6339_v47 = vmul.f32 %v9850_v36, %v6338_v63  ;;  %v6329_v25 = vsel %vm13600_vm10, %v9848_v9, %v6325_v24  ;;  %8902 = vst [vmem:[%s10960_s7 + $0x3e0] sm:$0xff] %v7253_v49  ;;  %6575 = vrot.lane.b32.xlu2 %v6539_v0, %s10060_s29  ;;  %vm6346_vm0 = vcmp.eq.f32.partialorder %v6345_v10, 8.507059e+37  ;;  %vm7218_vm2 = vmor %vm7216_vm1, %vm7217_vm12  ;;  %v7223_v19 = vor.u32 1.1754944e-38, %v7222_v59 }
 0x93d   : > { %v7213_v60 = vsub.f32 1.0, %v7212_v54  ;;  %v6334_v31 = vsel %vm6331_vm11, %v6333_v52, %v6329_v25  ;;  %vm7221_vm3 = vcmp.eq.f32.partialorder %v7220_v16, 8.507059e+37  ;;  %v7400_v52 = vpack.c.bf16 %v7367_v20, %v7367_v20 }
 0x93e   : > { %v6340_v3 = vadd.f32 %v9850_v36, %v6339_v47  ;;  %v6393_v44 = vmul.f32 %v13420_v38, %v6334_v31  ;;  %v5680_v38 = vpack.c.bf16 %v13321_v13, %v13321_v13  ;;  %v7280_v0 = vpack.c.bf16 %v7254_v27, %v7253_v49 }
 0x93f   : > { %v7214_v22 = vmul.f32 %v9852_v50, %v7213_v60  ;;  %v4821_v25 = vpack.c.bf16 %v13427_v6, %v13427_v6  ;;  %v7399_v10 = vpack.c.bf16 %v13583_v55, %v13583_v55  ;;  %vm5755_vm7 = vcmask 781952  }
 0x940   : > { %v7000_v57 = vpop.xlane.xlu0 %6999  ;;  %v6344_v53 = vsel %vm13617_vm15, %v9850_v36, %v6340_v3  ;;  %8782 = vst [vmem:[%s10960_s7 + $0x360] sm:$0xff] %v6393_v44  ;;  %v6507_v24 = vpop.f32.mrf.mxu0 }
 0x941   : > { %v7215_v39 = vadd.f32 %v9852_v50, %v7214_v22  ;;  %9853 = vrcp.f32 %v7000_v57  ;;  %v6349_v63 = vsel %vm6346_vm0, %v6348_v33, %v6344_v53  ;;  %v6540_v29 = vpack.c.bf16 %v6507_v24, %v6507_v24 }
 0x942   : > { %v6394_v36 = vmul.f32 %v13425_v42, %v6349_v63  ;;  %v7237_v60 = vand.u32 2147483648, %v7000_v57  ;;  %v7235_v49 = vand.u32 2147483647, %v7000_v57  ;;  %vm7231_vm5 = vweird.f32 %v7000_v57 }
 0x943   : > { %v7219_v34 = vsel %vm7218_vm2, %v9852_v50, %v7215_v39  ;;  %5717 = vrot.lane.b32.xlu1 %v5680_v38, %s10062_s11  ;;  %6577 = vrot.lane.b32.xlu0 %v6540_v29, %s10060_s29  ;;  %v5682_v33 = vpack.c.bf16 %v13342_v35, %v13342_v35  ;;  %vm6615_vm2 = vcmask 913152  }
 0x944   : > { %v7224_v54 = vsel %vm7221_vm3, %v7223_v19, %v7219_v34  ;;  %8783 = vst [vmem:[%s10960_s7 + $0x368] sm:$0xff] %v6394_v36  ;;  %v6420_v26 = vpack.c.bf16 %v6394_v36, %v6393_v44  ;;  %7437 = vrot.lane.b32.xlu2 %v7400_v52, %s10061_s15  ;;  %v7238_v55 = vor.u32 1.1754944e-38, %v7237_v60  ;;  %vm7236_vm8 = vcmp.eq.f32.partialorder %v7235_v49, 8.507059e+37 }
 0x945   : > { %v7255_v13 = vmul.f32 %v13432_v58, %v7224_v54  ;;  %v5681_v58 = vpack.c.bf16 %v13330_v18, %v13330_v18  ;;  %v4823_v60 = vpack.c.bf16 %v13457_v23, %v13457_v23  ;;  %vm7475_vm3 = vcmask 1044352  }
 0x946   : > { %6524 = vmatmul.bf16.gmra.mxu0 %v6420_v26  ;;  %7384 = vmatmul.bf16.gmra.mxu2 %v7280_v0 }
 0x947   : > { %v9854_v47 = vpop.eup %9853  ;;  %8904 = vst [vmem:[%s10960_s7 + $0x3f0] sm:$0xff] %v7255_v13 }
 0x948   : > { %v7227_v30 = vmul.f32 %v9854_v47, %v7000_v57  ;;  %v6138_v42 = vpop.xlane.xlu1 %6137  ;;  %vm7232_vm4 = vweird.f32 %v9854_v47  ;;  %v4822_v57 = vpack.c.bf16 %v13441_v46, %v13441_v46 }
 0x949   : > { %9855 = vrcp.f32 %v6138_v42  ;;  %vm7233_vm6 = vmor %vm7231_vm5, %vm7232_vm4  ;;  %v6362_v53 = vand.u32 2147483648, %v6138_v42  ;;  %v6360_v19 = vand.u32 2147483647, %v6138_v42  ;;  %vm6356_vm11 = vweird.f32 %v6138_v42 }
 0x94a   : > { %v7228_v50 = vsub.f32 1.0, %v7227_v30 }
 0x94b   : > { %7435 = vrot.lane.b32.xlu1 %v7399_v10, %s10061_s15  ;;  %4859 = vrot.lane.b32.xlu0 %v4821_v25, %s10059_s24  ;;  %v7370_v36 = vpop.f32.mrf.mxu2  ;;  %v6363_v34 = vor.u32 1.1754944e-38, %v6362_v53  ;;  %vm6361_vm14 = vcmp.eq.f32.partialorder %v6360_v19, 8.507059e+37  ;;  %v5685_v19 = vpack.c.bf16 %v13409_v8, %v13409_v8  ;;  %v9245_v8 = vld [vmem:[#allocation9 + $0x10] sm:$0xff] }
 0x94c   : > { %v7229_v27 = vmul.f32 %v9854_v47, %v7228_v50  ;;  %v6510_v31 = vpop.f32.mrf.mxu0  ;;  %5719 = vrot.lane.b32.xlu2 %v5681_v58, %s10062_s11 }
 0x94d   : > { %v6140_v3 = vpop.xlane.xlu2 %6139  ;;  %v6541_v50 = vpack.c.bf16 %v6510_v31, %v6510_v31 }
 0x94e   : > { %v7230_v59 = vadd.f32 %v9854_v47, %v7229_v27  ;;  %9857 = vrcp.f32 %v6140_v3  ;;  %v6377_v54 = vand.u32 2147483648, %v6140_v3  ;;  %vm6371_vm12 = vweird.f32 %v6140_v3 }
 0x94f   : > { %v9856_v6 = vpop.eup %9855 }
 0x950   : > { %v6352_v44 = vmul.f32 %v9856_v6, %v6138_v42  ;;  %v7234_v18 = vsel %vm7233_vm6, %v9854_v47, %v7230_v59  ;;  %vm6357_vm10 = vweird.f32 %v9856_v6  ;;  %v7401_v42 = vpack.c.bf16 %v7370_v36, %v7370_v36 }
 0x951   : > { %v7239_v9 = vsel %vm7236_vm8, %v7238_v55, %v7234_v18  ;;  %vm6358_vm13 = vmor %vm6356_vm11, %vm6357_vm10  ;;  %v6378_v10 = vor.u32 1.1754944e-38, %v6377_v54  ;;  %v9250_v18 = vld [vmem:[#allocation9 + $0x38] sm:$0xff] }
 0x952   : > { %v6353_v22 = vsub.f32 1.0, %v6352_v44  ;;  %v7256_v16 = vmul.f32 %v13453_v62, %v7239_v9  ;;  %v5684_v44 = vpack.c.bf16 %v13374_v7, %v13374_v7  ;;  %9253 = vmatpush.bf16.msra.mxu3 %v9250_v18  ;;  %7624 = vmatpush.bf16.msrb.mxu0 %v9250_v18 }
 0x953   : > { %v4852_v20 = vpop.permute.xlu0 %4851  ;;  %4861 = vrot.lane.b32.xlu1 %v4822_v57, %s10059_s24  ;;  %5721 = vrot.lane.b32.xlu0 %v5682_v33, %s10062_s11  ;;  %v7372_v31 = vpop.f32.mrf.mxu2 }
 0x954   : > { %v9858_v39 = vpop.eup %9857  ;;  %v6354_v38 = vmul.f32 %v9856_v6, %v6353_v22  ;;  %4898 = vst.msk [vmem:[#allocation3 + $0x8] sm:$0xf] %vm4895_vm9, %v4852_v20  ;;  %v6512_v24 = vpop.f32.mrf.mxu0  ;;  %v7281_v63 = vpack.c.bf16 %v7256_v16, %v7255_v13  ;;  %v6375_v13 = vand.u32 2147483647, %v6140_v3  ;;  %v7402_v55 = vpack.c.bf16 %v7372_v31, %v7372_v31 }
 0x955   : > { %v6367_v29 = vmul.f32 %v9858_v39, %v6140_v3  ;;  %v6542_v35 = vpack.c.bf16 %v6512_v24, %v6512_v24  ;;  %v5712_v62 = vpop.permute.xlu2 %5711  ;;  %8905 = vst [vmem:[%s10960_s7 + $0x3f8] sm:$0xff] %v7256_v16  ;;  %vm6372_vm15 = vweird.f32 %v9858_v39  ;;  %v5683_v22 = vpack.c.bf16 %v13351_v15, %v13351_v15  ;;  %v9249_v15 = vld [vmem:[#allocation9 + $0x30] sm:$0xff] }
 0x956   : > { %v6355_v46 = vadd.f32 %v9856_v6, %v6354_v38  ;;  %5758 = vst.msk [vmem:[#allocation3 + $0x8] sm:$0xf] %vm5755_vm7, %v5712_v62  ;;  %7389 = vmatmul.bf16.gmra.mxu2 %v7281_v63  ;;  %vm6373_vm0 = vmor %vm6371_vm12, %vm6372_vm15  ;;  %vm6376_vm1 = vcmp.eq.f32.partialorder %v6375_v13, 8.507059e+37  ;;  %9254 = vmatpush.bf16.msra.mxu3 %v9249_v15  ;;  %v9248_v38 = vld [vmem:[#allocation9 + $0x28] sm:$0xff]  ;;  %v4825_v24 = vpack.c.bf16 %v13482_v17, %v13482_v17 }
 0x957   : > { %v6368_v52 = vsub.f32 1.0, %v6367_v29  ;;  %6581 = vrot.lane.b32.xlu2 %v6542_v35, %s10060_s29  ;;  %7625 = vmatpush.bf16.msrb.mxu0 %v9249_v15  ;;  %v5686_v63 = vpack.c.bf16 %v13429_v5, %v13429_v5  ;;  %v9246_v29 = vld [vmem:[#allocation9 + $0x18] sm:$0xff]  ;;  %v9244_v17 = vld [vmem:[#allocation9 + $0x8] sm:$0xff]  ;;  %v9243_v35 = vld [vmem:[#allocation9] sm:$0xff] }
 0x958   : > { %v6359_v26 = vsel %vm6358_vm13, %v9856_v6, %v6355_v46  ;;  %v4824_v6 = vpack.c.bf16 %v13471_v41, %v13471_v41 }
 0x959   : > { %v6369_v0 = vmul.f32 %v9858_v39, %v6368_v52  ;;  %v6364_v47 = vsel %vm6361_vm14, %v6363_v34, %v6359_v26 }
 0x95a   : > { %v6395_v30 = vmul.f32 %v13462_v45, %v6364_v47  ;;  %9255 = vmatpush.bf16.msra.mxu3 %v9248_v38 }
 0x95b   : > { %v6370_v25 = vadd.f32 %v9858_v39, %v6369_v0  ;;  %6579 = vrot.lane.b32.xlu1 %v6541_v50, %s10060_s29  ;;  %7439 = vrot.lane.b32.xlu0 %v7401_v42, %s10061_s15  ;;  %v5714_v59 = vpop.permute.xlu0 %5713 }
 0x95c   : > { %8784 = vst [vmem:[%s10960_s7 + $0x370] sm:$0xff] %v6395_v30  ;;  %7626 = vmatpush.bf16.msrb.mxu0 %v9248_v38 }
 0x95d   : > { %v13662_v58 = vpop.permute.xlu2 %7431  ;;  %v6374_v27 = vsel %vm6373_vm0, %v9858_v39, %v6370_v25  ;;  %v4826_v39 = vpack.c.bf16 %v13494_v40, %v13494_v40  ;;  %v9247_v40 = vld [vmem:[#allocation9 + $0x20] sm:$0xff] }
 0x95e   : > { %v6379_v45 = vsel %vm6376_vm1, %v6378_v10, %v6374_v27  ;;  %9256 = vmatpush.bf16.msra.mxu3 %v9247_v40 }
 0x95f   : > { %4863 = vrot.lane.b32.xlu2 %v4823_v60, %s10059_s24  ;;  %v6396_v49 = vmul.f32 %v13473_v2, %v6379_v45  ;;  %v4827_v60 = vpack.c.bf16 %v13505_v4, %v13505_v4  ;;  %v5688_v4 = vpack.c.bf16 %v13460_v14, %v13460_v14 }
 0x960   : > { %v4854_v3 = vpop.permute.xlu1 %4853  ;;  %7627 = vmatpush.bf16.msrb.mxu0 %v9247_v40 }
 0x961   : > { %4899 = vst.msk [vmem:[#allocation3 + $0xc] sm:$0xf] %vm4895_vm9, %v4854_v3  ;;  %v6421_v23 = vpack.c.bf16 %v6396_v49, %v6395_v30 }
 0x962   : > { %5759 = vst.msk [vmem:[#allocation3 + $0xc] sm:$0xf] %vm5755_vm7, %v5714_v59  ;;  %9257 = vmatpush.bf16.msra.mxu3 %v9246_v29 }
 0x963   : > { %8785 = vst [vmem:[%s10960_s7 + $0x378] sm:$0xff] %v6396_v49  ;;  %6529 = vmatmul.bf16.gmra.mxu0 %v6421_v23  ;;  %7441 = vrot.lane.b32.xlu1 %v7402_v55, %s10061_s15  ;;  %v4828_v23 = vpack.c.bf16 %v13510_v37, %v13510_v37 }
 0x964   : > { %4865 = vrot.lane.b32.xlu0 %v4824_v6, %s10059_s24  ;;  %7628 = vmatpush.bf16.msrb.mxu0 %v9246_v29 }
 0x965   : > { %v4858_v2 = vpop.permute.xlu2 %4857 }
 0x966   : > { %4901 = vst.msk [vmem:[#allocation3 + $0x14] sm:$0xf] %vm4895_vm9, %v4858_v2  ;;  %9258 = vmatpush.bf16.msra.mxu3 %v9245_v8 }
 0x967   : > { %5725 = vrot.lane.b32.xlu2 %v5684_v44, %s10062_s11 }
 0x968   : > { %v7375_v9 = vpop.f32.mrf.mxu2  ;;  %7629 = vmatpush.bf16.msrb.mxu0 %v9245_v8 }
 0x969   : > { %v7403_v33 = vpack.c.bf16 %v7375_v9, %v7375_v9  ;;  %v5687_v9 = vpack.c.bf16 %v13447_v12, %v13447_v12  ;;  %v4830_v12 = vpack.c.bf16 %v13518_v61, %v13518_v61  ;;  %v5689_v61 = vpack.c.bf16 %v13475_v51, %v13475_v51 }
 0x96a   : > { %v6515_v41 = vpop.f32.mrf.mxu0  ;;  %9259 = vmatpush.bf16.msra.mxu3 %v9244_v17  ;;  %v5690_v51 = vpack.c.bf16 %v13486_v28, %v13486_v28 }
 0x96b   : > { %v6543_v16 = vpack.c.bf16 %v6515_v41, %v6515_v41  ;;  %5723 = vrot.lane.b32.xlu1 %v5683_v22, %s10062_s11 }
 0x96c   : > { %7630 = vmatpush.bf16.msrb.mxu0 %v9244_v17 }
 0x96d   : > { %6583 = vrot.lane.b32.xlu0 %v6543_v16, %s10060_s29 }
 0x96e   : > { %9260 = vmatpush.bf16.msra.mxu3 %v9243_v35 }
 0x96f   : > { %7443 = vrot.lane.b32.xlu2 %v7403_v33, %s10061_s15 }
 0x970   : > { %v7377_v7 = vpop.f32.mrf.mxu2  ;;  %7631 = vmatpush.bf16.msrb.mxu0 %v9243_v35 }
 0x971   : > { %v7404_v53 = vpack.c.bf16 %v7377_v7, %v7377_v7 }
 0x972   : > { %v6517_v57 = vpop.f32.mrf.mxu0 }
 0x973   : > { %v6544_v20 = vpack.c.bf16 %v6517_v57, %v6517_v57 }
 0x975   : > { %6585 = vrot.lane.b32.xlu1 %v6544_v20, %s10060_s29  ;;  %7445 = vrot.lane.b32.xlu0 %v7404_v53, %s10061_s15 }
 0x977   : > { %4869 = vrot.lane.b32.xlu2 %v4826_v39, %s10059_s24 }
 0x97d   : > { %4867 = vrot.lane.b32.xlu1 %v4825_v24, %s10059_s24  ;;  %5727 = vrot.lane.b32.xlu0 %v5685_v19, %s10062_s11  ;;  %v4829_v19 = vpack.c.bf16 %v13515_v56, %v13515_v56 }
 0x985   : > { %5729 = vrot.lane.b32.xlu1 %v5686_v63, %s10062_s11 }
 0x996   : > { %v6576_v62 = vpop.permute.xlu2 %6575 }
 0x99d   : > { %v6572_v5 = vpop.permute.xlu0 %6571 }
 0x99e   : > { %v7438_v46 = vpop.permute.xlu2 %7437  ;;  %6618 = vst.msk [vmem:[#allocation3 + $0x8] sm:$0xf] %vm6615_vm2, %v6572_v5 }
 0x99f   : > { %7478 = vst.msk [vmem:[#allocation3 + $0x8] sm:$0xf] %vm7475_vm3, %v13662_v58 }
 0x9a5   : > { %v6574_v36 = vpop.permute.xlu1 %6573  ;;  %v7434_v34 = vpop.permute.xlu0 %7433 }
 0x9a6   : > { %6619 = vst.msk [vmem:[#allocation3 + $0xc] sm:$0xf] %vm6615_vm2, %v6574_v36  ;;  %v6520_v52 = vpop.f32.mrf.mxu0  ;;  %v5720_v54 = vpop.permute.xlu2 %5719 }
 0x9a7   : > { %7479 = vst.msk [vmem:[#allocation3 + $0xc] sm:$0xf] %vm7475_vm3, %v7434_v34  ;;  %v6545_v26 = vpack.c.bf16 %v6520_v52, %v6520_v52 }
 0x9a9   : > { %6587 = vrot.lane.b32.xlu2 %v6545_v26, %s10060_s29  ;;  %v5675_v26 = vpack.c.bf16 %v13282_v11, %v13282_v11  ;;  %v5676_v11 = vpack.c.bf16 %v13296_v32, %v13296_v32 }
 0x9ad   : > { %v4856_v0 = vpop.permute.xlu1 %4855  ;;  %v5716_v13 = vpop.permute.xlu0 %5715 }
 0x9ae   : > { %4900 = vst.msk [vmem:[#allocation3 + $0x10] sm:$0xf] %vm4895_vm9, %v4856_v0  ;;  %v6522_v47 = vpop.f32.mrf.mxu0  ;;  %v9236_v30 = vld [vmem:[#allocation3 + $0x8] sm:$0xff]  ;;  %v4815_v0 = vpack.c.bf16 %v13319_v21, %v13319_v21  ;;  %v6536_v21 = vpack.c.bf16 %v13529_v48, %v13529_v48 }
 0x9af   : > { %5760 = vst.msk [vmem:[#allocation3 + $0x10] sm:$0xf] %vm5755_vm7, %v5716_v13  ;;  %v6546_v42 = vpack.c.bf16 %v6522_v47, %v6522_v47  ;;  %7637 = vmatmul.bf16.vlgmr.msra.gmra.mxu3 %v9236_v30  ;;  %v4816_v13 = vpack.c.bf16 %v13327_v1, %v13327_v1  ;;  %v6535_v30 = vpack.c.bf16 %v13525_v43, %v13525_v43  ;;  %v14141_v1 = vld [vmem:[#allocation35_spill] sm:$0xff] }
 0x9b0   : > { %6620 = vst.msk [vmem:[#allocation3 + $0x10] sm:$0xf] %vm6615_vm2, %v6576_v62 }
 0x9b1   : > { %v6582_v50 = vpop.permute.xlu2 %6581  ;;  %6589 = vrot.lane.b32.xlu0 %v6546_v42, %s10060_s29  ;;  %v7395_v42 = vpack.c.bf16 %v14141_v1, %v14141_v1 }
 0x9b5   : > { %v5718_v25 = vpop.permute.xlu1 %5717  ;;  %v6578_v10 = vpop.permute.xlu0 %6577 }
 0x9b6   : > { %5761 = vst.msk [vmem:[#allocation3 + $0x14] sm:$0xf] %vm5755_vm7, %v5718_v25 }
 0x9b7   : > { %6621 = vst.msk [vmem:[#allocation3 + $0x14] sm:$0xf] %vm6615_vm2, %v6578_v10 }
 0x9b8   : > { %7481 = vst.msk [vmem:[#allocation3 + $0x14] sm:$0xf] %vm7475_vm3, %v7438_v46 }
 0x9b9   : > { %v4864_v58 = vpop.permute.xlu2 %4863  ;;  %v7380_v27 = vpop.f32.mrf.mxu2  ;;  %4871 = vrot.lane.b32.xlu0 %v4827_v60, %s10059_s24 }
 0x9ba   : > { %4904 = vst.msk [vmem:[#allocation3 + $0x20] sm:$0xf] %vm4895_vm9, %v4864_v58  ;;  %v7405_v45 = vpack.c.bf16 %v7380_v27, %v7380_v27 }
 0x9bc   : > { %7447 = vrot.lane.b32.xlu1 %v7405_v45, %s10061_s15  ;;  %v13798_v45 = vld [vmem:[%s13915_s3] ss:$0 sm:$0xff] }
 0x9bd   : > { %v7436_v49 = vpop.permute.xlu1 %7435  ;;  %v4860_v31 = vpop.permute.xlu0 %4859 }
 0x9be   : > { %7480 = vst.msk [vmem:[#allocation3 + $0x10] sm:$0xf] %vm7475_vm3, %v7436_v49 }
 0x9bf   : > { %4902 = vst.msk [vmem:[#allocation3 + $0x18] sm:$0xf] %vm4895_vm9, %v4860_v31 }
 0x9c0   : > { %5762 = vst.msk [vmem:[#allocation3 + $0x18] sm:$0xf] %vm5755_vm7, %v5720_v54 }
 0x9c1   : > { %v5726_v3 = vpop.permute.xlu2 %5725  ;;  %v7382_v59 = vpop.f32.mrf.mxu2  ;;  %5733 = vrot.lane.b32.xlu0 %v5688_v4, %s10062_s11 }
 0x9c2   : > { %v7406_v6 = vpack.c.bf16 %v7382_v59, %v7382_v59 }
 0x9c3   : > { %v6525_v55 = vpop.f32.mrf.mxu0 }
 0x9c4   : > { %4873 = vrot.lane.b32.xlu1 %v4828_v23, %s10059_s24  ;;  %7449 = vrot.lane.b32.xlu2 %v7406_v6, %s10061_s15  ;;  %v6547_v22 = vpack.c.bf16 %v6525_v55, %v6525_v55 }
 0x9c5   : > { %v4862_v44 = vpop.permute.xlu1 %4861  ;;  %v5722_v2 = vpop.permute.xlu0 %5721  ;;  %v9237_v14 = vld [vmem:[#allocation3 + $0x10] sm:$0xff] }
 0x9c6   : > { %4903 = vst.msk [vmem:[#allocation3 + $0x1c] sm:$0xf] %vm4895_vm9, %v4862_v44  ;;  %7642 = vmatmul.bf16.gmra.mxu3 %v9237_v14 }
 0x9c7   : > { %5763 = vst.msk [vmem:[#allocation3 + $0x1c] sm:$0xf] %vm5755_vm7, %v5722_v2 }
 0x9c8   : > { %6623 = vst.msk [vmem:[#allocation3 + $0x1c] sm:$0xf] %vm6615_vm2, %v6582_v50  ;;  %v14142_v50 = vld [vmem:[#allocation19_spill] sm:$0xff] }
 0x9c9   : > { %v7444_v18 = vpop.permute.xlu2 %7443  ;;  %v7385_v37 = vpop.f32.mrf.mxu2  ;;  %v7396_v25 = vpack.c.bf16 %v14142_v50, %v14142_v50 }
 0x9ca   : > { %v7407_v41 = vpack.c.bf16 %v7385_v37, %v7385_v37 }
 0x9cb   : > { %v6527_v7 = vpop.f32.mrf.mxu0 }
 0x9cc   : > { %5731 = vrot.lane.b32.xlu2 %v5687_v9, %s10062_s11  ;;  %7451 = vrot.lane.b32.xlu0 %v7407_v41, %s10061_s15  ;;  %v6548_v20 = vpack.c.bf16 %v6527_v7, %v6527_v7 }
 0x9cd   : > { %6591 = vrot.lane.b32.xlu1 %v6547_v22, %s10060_s29  ;;  %v6580_v16 = vpop.permute.xlu1 %6579  ;;  %v7440_v33 = vpop.permute.xlu0 %7439 }
 0x9ce   : > { %6622 = vst.msk [vmem:[#allocation3 + $0x18] sm:$0xf] %vm6615_vm2, %v6580_v16 }
 0x9cf   : > { %7482 = vst.msk [vmem:[#allocation3 + $0x18] sm:$0xf] %vm7475_vm3, %v7440_v33 }
 0x9d1   : > { %v4870_v57 = vpop.permute.xlu2 %4869  ;;  %v7387_v53 = vpop.f32.mrf.mxu2 }
 0x9d2   : > { %4907 = vst.msk [vmem:[#allocation3 + $0x2c] sm:$0xf] %vm4895_vm9, %v4870_v57  ;;  %v7408_v39 = vpack.c.bf16 %v7387_v53, %v7387_v53 }
 0x9d4   : > { %4877 = vrot.lane.b32.xlu0 %v4830_v12, %s10059_s24  ;;  %6593 = vrot.lane.b32.xlu2 %v6548_v20, %s10060_s29 }
 0x9d5   : > { %7453 = vrot.lane.b32.xlu1 %v7408_v39, %s10061_s15  ;;  %v7442_v15 = vpop.permute.xlu1 %7441 }
 0x9d6   : > { %v4866_v38 = vpop.permute.xlu0 %4865  ;;  %7483 = vst.msk [vmem:[#allocation3 + $0x1c] sm:$0xf] %vm7475_vm3, %v7442_v15 }
 0x9d7   : > { %4905 = vst.msk [vmem:[#allocation3 + $0x24] sm:$0xf] %vm4895_vm9, %v4866_v38 }
 0x9d8   : > { %5765 = vst.msk [vmem:[#allocation3 + $0x24] sm:$0xf] %vm5755_vm7, %v5726_v3 }
 0x9d9   : > { %v7390_v24 = vpop.f32.mrf.mxu2 }
 0x9da   : > { %v7409_v34 = vpack.c.bf16 %v7390_v24, %v7390_v24 }
 0x9dc   : > { %4875 = vrot.lane.b32.xlu2 %v4829_v19, %s10059_s24 }
 0x9dd   : > { %5735 = vrot.lane.b32.xlu1 %v5689_v61, %s10062_s11  ;;  %v5724_v40 = vpop.permute.xlu1 %5723  ;;  %v9238_v63 = vld [vmem:[#allocation3 + $0x18] sm:$0xff] }
 0x9de   : > { %5764 = vst.msk [vmem:[#allocation3 + $0x20] sm:$0xf] %vm5755_vm7, %v5724_v40  ;;  %7647 = vmatmul.bf16.gmra.mxu3 %v9238_v63 }
 0x9df   : > { %v6584_v29 = vpop.permute.xlu0 %6583 }
 0x9e0   : > { %v6530_v8 = vpop.f32.mrf.mxu0  ;;  %6624 = vst.msk [vmem:[#allocation3 + $0x20] sm:$0xf] %vm6615_vm2, %v6584_v29 }
 0x9e1   : > { %v6549_v17 = vpack.c.bf16 %v6530_v8, %v6530_v8  ;;  %7484 = vst.msk [vmem:[#allocation3 + $0x20] sm:$0xf] %vm7475_vm3, %v7444_v18  ;;  %v7392_v56 = vpop.f32.mrf.mxu2 }
 0x9e2   : > { %v7410_v46 = vpack.c.bf16 %v7392_v56, %v7392_v56 }
 0x9e3   : > { %6595 = vrot.lane.b32.xlu0 %v6549_v17, %s10060_s29 }
 0x9e4   : > { %5737 = vrot.lane.b32.xlu2 %v5690_v51, %s10062_s11 }
 0x9e7   : > { %v6586_v35 = vpop.permute.xlu1 %6585  ;;  %v7446_v62 = vpop.permute.xlu0 %7445 }
 0x9e8   : > { %6625 = vst.msk [vmem:[#allocation3 + $0x24] sm:$0xf] %vm6615_vm2, %v6586_v35  ;;  %v6532_v5 = vpop.f32.mrf.mxu0 }
 0x9e9   : > { %v6550_v36 = vpack.c.bf16 %v6532_v5, %v6532_v5  ;;  %7485 = vst.msk [vmem:[#allocation3 + $0x24] sm:$0xf] %vm7475_vm3, %v7446_v62 }
 0x9eb   : > { %6597 = vrot.lane.b32.xlu1 %v6550_v36, %s10060_s29  ;;  %7457 = vrot.lane.b32.xlu0 %v7410_v46, %s10061_s15 }
 0x9ec   : > { %7455 = vrot.lane.b32.xlu2 %v7409_v34, %s10061_s15 }
 0x9ef   : > { %v4868_v28 = vpop.permute.xlu1 %4867  ;;  %v5728_v52 = vpop.permute.xlu0 %5727 }
 0x9f0   : > { %4906 = vst.msk [vmem:[#allocation3 + $0x28] sm:$0xf] %vm4895_vm9, %v4868_v28  ;;  %v9239_v54 = vld [vmem:[#allocation3 + $0x20] sm:$0xff] }
 0x9f1   : > { %5766 = vst.msk [vmem:[#allocation3 + $0x28] sm:$0xf] %vm5755_vm7, %v5728_v52  ;;  %7652 = vmatmul.bf16.gmra.mxu3 %v9239_v54 }
 0x9f3   : > { %4847 = vrot.lane.b32.xlu1 %v4815_v0, %s10059_s24  ;;  %5707 = vrot.lane.b32.xlu0 %v5675_v26, %s10062_s11 }
 0x9f4   : > { %4849 = vrot.lane.b32.xlu2 %v4816_v13, %s10059_s24 }
 0x9f7   : > { %v5730_v47 = vpop.permute.xlu1 %5729 }
 0x9f8   : > { %5767 = vst.msk [vmem:[#allocation3 + $0x2c] sm:$0xf] %vm5755_vm7, %v5730_v47 }
 0x9fb   : > { %5709 = vrot.lane.b32.xlu1 %v5676_v11, %s10062_s11  ;;  %6569 = vrot.lane.b32.xlu0 %v6536_v21, %s10060_s29 }
 0x9fc   : > { %6567 = vrot.lane.b32.xlu2 %v6535_v30, %s10060_s29 }
 0xa03   : > { %7427 = vrot.lane.b32.xlu1 %v7395_v42, %s10061_s15  ;;  %v6588_v32 = vpop.permute.xlu2 %6587 }
 0xa04   : > { %7429 = vrot.lane.b32.xlu2 %v7396_v25, %s10061_s15  ;;  %6626 = vst.msk [vmem:[#allocation3 + $0x28] sm:$0xf] %vm6615_vm2, %v6588_v32  ;;  %s7723_s15 = scalar_lea.hbm %s13917_s5, %s9252_s14 }
 0xa05   : > { %s7726_s11 = sshll.u32 %s7723_s15, 4  ;;  %s7727_s11 = int_to_ptr.hbm [resolvable:$true] %s7726_s11 }
 0xa06   : > { %s9963_s13 = sshra.s32 %s7727_s11, 4  ;;  %s9964_s13 = int_to_ptr.hbm [resolvable:$true] %s9963_s13 }
 0xa07   : > { %s9965_s17 = scalar_lea.hbm %s9964_s13, 1024  ;;  %p9970_p11 = scmp.lt.s32.totalorder %s9964_s13, %s13917_s5 }
 0xa08   : > { %p9966_p1 = scmp.ne.s32.totalorder %s9964_s13, %s9965_s17  ;;  %p9971_p9 = scmp.lt.s32.totalorder %s9969_s9, %s9965_s17 }
 0xa0a   : > { %p9967_p4 = pnand %p9966_p1, %p10170_p5  ;;  %p9972_p2 = por %p9971_p9, %p9970_p11 }
 0xa0c   : > { %p9968_p8 = pneg %p9967_p4 }
 0xa0e   : > { %p9973_p10 = pnand %p9972_p2, %p9968_p8 }
 0xa1e   : > { %v7450_v43 = vpop.permute.xlu2 %7449 }
 0xa23   : > { %v6590_v48 = vpop.permute.xlu0 %6589 }
 0xa24   : > { %6627 = vst.msk [vmem:[#allocation3 + $0x2c] sm:$0xf] %vm6615_vm2, %v6590_v48 }
 0xa25   : > { %7487 = vst.msk [vmem:[#allocation3 + $0x2c] sm:$0xf] %vm7475_vm3, %v7450_v43 }
 0xa26   : > { %v5732_v10 = vpop.permute.xlu2 %5731 }
 0xa2b   : > { %v4872_v60 = vpop.permute.xlu0 %4871 }
 0xa2c   : > { %4908 = vst.msk [vmem:[#allocation3 + $0x30] sm:$0xf] %vm4895_vm9, %v4872_v60 }
 0xa2d   : > { %5768 = vst.msk [vmem:[#allocation3 + $0x30] sm:$0xf] %vm5755_vm7, %v5732_v10 }
 0xa2e   : > { %v7448_v58 = vpop.permute.xlu1 %7447  ;;  %v6594_v27 = vpop.permute.xlu2 %6593 }
 0xa2f   : > { %7486 = vst.msk [vmem:[#allocation3 + $0x28] sm:$0xf] %vm7475_vm3, %v7448_v58 }
 0xa32   : > { %v7638_v49 = vpop.f32.mrf.mxu3 }
 0xa33   : > { %v7639_v31 = vadd.f32 %v13798_v45, %v7638_v49  ;;  %v5734_v4 = vpop.permute.xlu0 %5733 }
 0xa35   : > { %7675 = vst [vmem:[%s13801_s23 + $0x10] sm:$0xff] %v7639_v31 }
 0xa36   : > { %v4874_v3 = vpop.permute.xlu1 %4873  ;;  %v4876_v59 = vpop.permute.xlu2 %4875  ;;  %v9240_v23 = vld [vmem:[#allocation3 + $0x28] sm:$0xff] }
 0xa37   : > { %4909 = vst.msk [vmem:[#allocation3 + $0x34] sm:$0xf] %vm4895_vm9, %v4874_v3  ;;  %7657 = vmatmul.bf16.gmra.mxu3 %v9240_v23 }
 0xa38   : > { %5769 = vst.msk [vmem:[#allocation3 + $0x34] sm:$0xf] %vm5755_vm7, %v5734_v4 }
 0xa39   : > { %6629 = vst.msk [vmem:[#allocation3 + $0x34] sm:$0xf] %vm6615_vm2, %v6594_v27 }
 0xa3a   : > { %4910 = vst.msk [vmem:[#allocation3 + $0x38] sm:$0xf] %vm4895_vm9, %v4876_v59  ;;  %v7640_v6 = vpop.f32.mrf.mxu3 }
 0xa3b   : > { %v7641_v55 = vadd.f32 %v13798_v45, %v7640_v6 }
 0xa3d   : > { %7676 = vst [vmem:[%s13801_s23 + $0x18] sm:$0xff] %v7641_v55 }
 0xa3e   : > { %v5738_v44 = vpop.permute.xlu2 %5737  ;;  %v7452_v2 = vpop.permute.xlu0 %7451 }
 0xa3f   : > { %v6592_v14 = vpop.permute.xlu1 %6591 }
 0xa40   : > { %6628 = vst.msk [vmem:[#allocation3 + $0x30] sm:$0xf] %vm6615_vm2, %v6592_v14 }
 0xa41   : > { %7488 = vst.msk [vmem:[#allocation3 + $0x30] sm:$0xf] %vm7475_vm3, %v7452_v2 }
 0xa46   : > { %v7456_v18 = vpop.permute.xlu2 %7455  ;;  %v4878_v37 = vpop.permute.xlu0 %4877 }
 0xa47   : > { %v7454_v9 = vpop.permute.xlu1 %7453  ;;  %4911 = vst.msk [vmem:[#allocation3 + $0x3c] sm:$0xf] %vm4895_vm9, %v4878_v37 }
 0xa48   : > { %7489 = vst.msk [vmem:[#allocation3 + $0x34] sm:$0xf] %vm7475_vm3, %v7454_v9 }
 0xa49   : > { %5771 = vst.msk [vmem:[#allocation3 + $0x3c] sm:$0xf] %vm5755_vm7, %v5738_v44  ;;  %v7643_v41 = vpop.f32.mrf.mxu3 }
 0xa4a   : > { %v7644_v22 = vadd.f32 %v13798_v45, %v7643_v41 }
 0xa4c   : > { %7677 = vst [vmem:[%s13801_s23 + $0x20] sm:$0xff] %v7644_v22 }
 0xa4e   : > { %v4850_v16 = vpop.permute.xlu2 %4849 }
 0xa4f   : > { %v5736_v33 = vpop.permute.xlu1 %5735  ;;  %4897 = vst.msk [vmem:[#allocation3 + $0x4] sm:$0xf] %vm4895_vm9, %v4850_v16  ;;  %v9241_v7 = vld [vmem:[#allocation3 + $0x30] sm:$0xff] }
 0xa50   : > { %5770 = vst.msk [vmem:[#allocation3 + $0x38] sm:$0xf] %vm5755_vm7, %v5736_v33  ;;  %7662 = vmatmul.bf16.gmra.mxu3 %v9241_v7 }
 0xa51   : > { %v7645_v57 = vpop.f32.mrf.mxu3 }
 0xa52   : > { %v7646_v53 = vadd.f32 %v13798_v45, %v7645_v57 }
 0xa54   : > { %7678 = vst [vmem:[%s13801_s23 + $0x28] sm:$0xff] %v7646_v53 }
 0xa55   : > { %v6596_v12 = vpop.permute.xlu0 %6595 }
 0xa56   : > { %6630 = vst.msk [vmem:[#allocation3 + $0x38] sm:$0xf] %vm6615_vm2, %v6596_v12  ;;  %v6568_v24 = vpop.permute.xlu2 %6567 }
 0xa57   : > { %7490 = vst.msk [vmem:[#allocation3 + $0x38] sm:$0xf] %vm7475_vm3, %v7456_v18 }
 0xa5d   : > { %v6598_v20 = vpop.permute.xlu1 %6597  ;;  %v7458_v39 = vpop.permute.xlu0 %7457 }
 0xa5e   : > { %6631 = vst.msk [vmem:[#allocation3 + $0x3c] sm:$0xf] %vm6615_vm2, %v6598_v20  ;;  %v7430_v51 = vpop.permute.xlu2 %7429 }
 0xa5f   : > { %7491 = vst.msk [vmem:[#allocation3 + $0x3c] sm:$0xf] %vm7475_vm3, %v7458_v39 }
 0xa61   : > { %v7648_v15 = vpop.f32.mrf.mxu3 }
 0xa62   : > { %v7649_v38 = vadd.f32 %v13798_v45, %v7648_v15 }
 0xa64   : > { %7679 = vst [vmem:[%s13801_s23 + $0x30] sm:$0xff] %v7649_v38 }
 0xa65   : > { %v4848_v19 = vpop.permute.xlu1 %4847  ;;  %v5708_v61 = vpop.permute.xlu0 %5707 }
 0xa66   : > { %4896 = vst.msk [vmem:[#allocation3] sm:$0xf] %vm4895_vm9, %v4848_v19  ;;  %v9242_v40 = vld [vmem:[#allocation3 + $0x38] sm:$0xff] }
 0xa67   : > { %5756 = vst.msk [vmem:[#allocation3] sm:$0xf] %vm5755_vm7, %v5708_v61  ;;  %7667 = vmatmul.bf16.gmra.mxu3 %v9242_v40 }
 0xa68   : > { %6616 = vst.msk [vmem:[#allocation3] sm:$0xf] %vm6615_vm2, %v6568_v24 }
 0xa69   : > { %v7650_v63 = vpop.f32.mrf.mxu3 }
 0xa6a   : > { %v7651_v29 = vadd.f32 %v13798_v45, %v7650_v63 }
 0xa6c   : > { %7680 = vst [vmem:[%s13801_s23 + $0x38] sm:$0xff] %v7651_v29 }
 0xa6d   : > { %v5710_v8 = vpop.permute.xlu1 %5709  ;;  %v6570_v17 = vpop.permute.xlu0 %6569 }
 0xa6e   : > { %5757 = vst.msk [vmem:[#allocation3 + $0x4] sm:$0xf] %vm5755_vm7, %v5710_v8 }
 0xa6f   : > { %6617 = vst.msk [vmem:[#allocation3 + $0x4] sm:$0xf] %vm6615_vm2, %v6570_v17 }
 0xa70   : > { %7477 = vst.msk [vmem:[#allocation3 + $0x4] sm:$0xf] %vm7475_vm3, %v7430_v51 }
 0xa74   : > { %v7653_v35 = vpop.f32.mrf.mxu3 }
 0xa75   : > { %v7428_v56 = vpop.permute.xlu1 %7427  ;;  %v7654_v62 = vadd.f32 %v13798_v45, %v7653_v35 }
 0xa76   : > { %7476 = vst.msk [vmem:[#allocation3] sm:$0xf] %vm7475_vm3, %v7428_v56 }
 0xa77   : > { %7681 = vst [vmem:[%s13801_s23 + $0x40] sm:$0xff] %v7654_v62 }
 0xa7c   : > { %v7655_v5 = vpop.f32.mrf.mxu3 }
 0xa7d   : > { %v9235_v46 = vld [vmem:[#allocation3] sm:$0xff]  ;;  %v7656_v36 = vadd.f32 %v13798_v45, %v7655_v5 }
 0xa7e   : > { %7632 = vmatmul.bf16.vlgmr.msrb.gmra.mxu0 %v9235_v46 }
 0xa7f   : > { %7682 = vst [vmem:[%s13801_s23 + $0x48] sm:$0xff] %v7656_v36 }
 0xa80   : > { %9976 = shalt.err (!%p9973_p10)
}
 0xa81   : > { %s10066_s14 = smov 128   ;;  %s10067_s24 = smov 8  }
 0xa82   : > { %9272 = dma.vmem_to_hbm [thread:$0]  (%p10170_p5), %s7725_s6, 16384, %s7727_s11, %s7695_s12, %s10066_s14, %s10066_s14, %s10067_s24  }
 0xa83   : > { %s9251_s6 = sshll.u32 %s10119_s22, 7  ;;  %s7707_s12 = sshll.u32 %s13801_s23, 4  ;;  %s7708_s12 = int_to_ptr.vmem [resolvable:$true] %s7707_s12 }
 0xa84   : > { %s7706_s11 = scalar_lea.hbm %s13916_s4, %s9251_s6  ;;  %s7690_s17 = scalar_lea.sflag [#allocation6], %s10200_s10 }
 0xa85   : > { %s7709_s13 = sshll.u32 %s7706_s11, 4  ;;  %s9997_s7 = scalar_lea.hbm %s13916_s4, 256  ;;  %s7710_s13 = int_to_ptr.hbm [resolvable:$true] %s7709_s13 }
 0xa86   : > { %s9991_s30 = sshra.s32 %s7710_s13, 4  ;;  %s9992_s30 = int_to_ptr.hbm [resolvable:$true] %s9991_s30 }
 0xa87   : > { %s9993_s22 = scalar_lea.hbm %s9992_s30, 128  ;;  %p9998_p3 = scmp.lt.s32.totalorder %s9992_s30, %s13916_s4 }
 0xa88   : > { %p9994_p12 = scmp.ne.s32.totalorder %s9992_s30, %s9993_s22  ;;  %p9999_p7 = scmp.lt.s32.totalorder %s9997_s7, %s9993_s22 }
 0xa8a   : > { %p9995_p13 = pnand %p9994_p12, %p10170_p5  ;;  %p10000_p1 = por %p9999_p7, %p9998_p3 }
 0xa8c   : > { %p9996_p0 = pneg %p9995_p13 }
 0xa8e   : > { %p10001_p4 = pnand %p10000_p1, %p9996_p0 }
 0xaba   : > { %v7658_v34 = vpop.f32.mrf.mxu3 }
 0xabb   : > { %v7659_v28 = vadd.f32 %v13798_v45, %v7658_v34 }
 0xabd   : > { %7683 = vst [vmem:[%s13801_s23 + $0x50] sm:$0xff] %v7659_v28 }
 0xac2   : > { %v7660_v52 = vpop.f32.mrf.mxu3 }
 0xac3   : > { %v7661_v54 = vadd.f32 %v13798_v45, %v7660_v52 }
 0xac5   : > { %7684 = vst [vmem:[%s13801_s23 + $0x58] sm:$0xff] %v7661_v54 }
 0xad3   : > { %v7663_v26 = vpop.f32.mrf.mxu3 }
 0xad4   : > { %v7664_v0 = vadd.f32 %v13798_v45, %v7663_v26 }
 0xad6   : > { %7685 = vst [vmem:[%s13801_s23 + $0x60] sm:$0xff] %v7664_v0 }
 0xadb   : > { %v7665_v13 = vpop.f32.mrf.mxu3 }
 0xadc   : > { %v7666_v47 = vadd.f32 %v13798_v45, %v7665_v13 }
 0xade   : > { %7686 = vst [vmem:[%s13801_s23 + $0x68] sm:$0xff] %v7666_v47 }
 0xaea   : > { %v7668_v11 = vpop.f32.mrf.mxu3 }
 0xaeb   : > { %v7669_v21 = vadd.f32 %v13798_v45, %v7668_v11 }
 0xaed   : > { %7687 = vst [vmem:[%s13801_s23 + $0x70] sm:$0xff] %v7669_v21 }
 0xaf2   : > { %v7670_v30 = vpop.f32.mrf.mxu3 }
 0xaf3   : > { %v7671_v1 = vadd.f32 %v13798_v45, %v7670_v30 }
 0xaf5   : > { %7688 = vst [vmem:[%s13801_s23 + $0x78] sm:$0xff] %v7671_v1 }
 0xafb   : > { %v7633_v42 = vpop.f32.mrf.mxu0 }
 0xafc   : > { %v7634_v50 = vadd.f32 %v13798_v45, %v7633_v42 }
 0xafe   : > { %7673 = vst [vmem:[%s13801_s23] sm:$0xff] %v7634_v50 }
 0xb03   : > { %v7635_v25 = vpop.f32.mrf.mxu0 }
 0xb04   : > { %v7636_v32 = vadd.f32 %v13798_v45, %v7635_v25 }
 0xb06   : > { %7674 = vst [vmem:[%s13801_s23 + $0x8] sm:$0xff] %v7636_v32 }
 0xb07   : > { %10004 = shalt.err (!%p10001_p4)
}
 0xb08   : > { %9271 = dma.vmem_to_hbm [thread:$0]  (%p10170_p5), %s7708_s12, 2048, %s7710_s13, %s7690_s17, %s10066_s14, %s10066_s14, %s10067_s24  }
 0xb09 PF: > { %s7741_s10 = sand.u32 1, %s10039_s18   ;;  %p14143_p8 = scmp.ge.s32.totalorder %s10051_s21, 2 }
 0xb0a   : > { %s7742_s23 = scalar_lea.sflag [#allocation6], %s7741_s10 }
 0xb0b   : > { %p9287_p11 = pnand %p14143_p8, %p10133_p6 }
 0xb0d   : > { %p9288_p9 = pneg %p9287_p11 }
 0xb0f   : > { %10030 = dma.done.wait (%p9288_p9), %s7742_s23, 2048  }
 0xb10   : > { %10032 = vsyncadd (%p9288_p9), %s7742_s23, 4294965248  ;;  %s7752_s29 = scalar_lea.sflag [#allocation12], %s7741_s10 }
 0xb11   : > { %10034 = dma.done.wait (%p9288_p9), %s7752_s29, 16384  }
 0xb12   : > { %10036 = vsyncadd (%p9288_p9), %s7752_s29, 4294950912  ;;  %p23_p5 = scmp.ge.s32.totalorder %s10157_s16, 4   ;;  %s14144_s18 = smov %s10043_s19 }
 0xb13   : > { %s14145_s19 = smov %s10047_s20  ;;  %s14146_s20 = smov %s10166_s26 }
 0xb14   : > { %s14147_s21 = smov %s10157_s16  ;;  %25 = sbr.rel (!%p23_p5) target bundleno = 8 (0x8), region = 113 }
 0xb19   :  { %7758 = vsyncpa [#allocation5], 1 }
 0xb1a   :  { %7760 = vsyncpa [#allocation5 + $0x1], 1 }
 0xb1b   :  { %7761 = vsyncpa [#allocation8], 1 }
 0xb1c   :  { %7762 = vsyncpa [#allocation6], 1 }
 0xb1d   :  { %7764 = vsyncpa [#allocation6 + $0x1], 1 }
 0xb1e   :  { %7765 = vsyncpa [#allocation12], 1 }
 0xb1f   :  { %7767 = vsyncpa [#allocation12 + $0x1], 1 }

</bundles_post_ra>
